<compile_context>
chip_gen: v7x
topology: tpu7x:2x2x1
jax: 0.10.0
libtpu: 0.0.40
codegen_flags: <defaults>
</compile_context>

<pallas_src>
import functools

import numpy as np
import jax
import jax.numpy as jnp
from jax import lax
from jax.experimental import pallas as pl
from jax.experimental.pallas import tpu as pltpu

_VMEM_LIMIT = 32 * 1024 * 1024


# ------------------------------ Pallas kernels ------------------------------

def _pool_2x2(z, half):
    """MaxPool2d(2) on a conv output laid out as (Ho, Wo*C) with column order
    (wo%2, wo//2, c).  Width pooling = max of the two contiguous parity
    halves; height pooling = max of two 0/1 even/odd row-selection matmuls."""
    ho = z.shape[0]
    zw = jnp.maximum(z[:, :half], z[:, half:]).astype(jnp.bfloat16)  # (ho, half)
    i = lax.broadcasted_iota(jnp.int32, (ho // 2, ho), 0)
    j = lax.broadcasted_iota(jnp.int32, (ho // 2, ho), 1)
    s_even = (j == 2 * i).astype(jnp.bfloat16)
    s_odd = (j == 2 * i + 1).astype(jnp.bfloat16)
    return jnp.maximum(
        jnp.dot(s_even, zw, preferred_element_type=jnp.float32),
        jnp.dot(s_odd, zw, preferred_element_type=jnp.float32),
    ).astype(jnp.bfloat16)


def _conv_stack_kernel(x_ref, t1_ref, t2_ref, t3_ref, b1_ref, b2_ref, b3_ref,
                       y3_ref):
    """Per-image conv1..conv3 (+ReLU, +2x MaxPool2d), all VMEM resident."""
    # Conv2d(3,8,3) + ReLU + MaxPool2d(2): 9 banded taps over (cin, kh) so the
    # raw NCHW image planes are consumed directly (no NHWC transpose).
    z1 = jnp.zeros((68, 544), jnp.float32)
    for ci in range(3):
        xc = x_ref[0, ci].astype(jnp.bfloat16)                 # (70, 70)
        for kh in range(3):
            z1 = z1 + jnp.dot(xc[kh:kh + 68, :], t1_ref[ci * 3 + kh],
                              preferred_element_type=jnp.float32)
    z1 = jnp.maximum(z1 + b1_ref[...], 0.0)
    a1 = _pool_2x2(z1, 272)                                    # (34, 272) bf16

    # Conv2d(8,16,3) + ReLU + MaxPool2d(2): 3 banded taps over kh.
    z2 = jnp.zeros((32, 512), jnp.float32)
    for kh in range(3):
        z2 = z2 + jnp.dot(a1[kh:kh + 32, :], t2_ref[kh],
                          preferred_element_type=jnp.float32)
    z2 = jnp.maximum(z2 + b2_ref[...], 0.0)
    a2 = _pool_2x2(z2, 256)                                    # (16, 256) bf16

    # Conv2d(16,32,3) + ReLU.  BatchNorm needs batch statistics across images,
    # so it (and the last pool) live in the head kernel.
    z3 = jnp.zeros((14, 448), jnp.float32)
    for kh in range(3):
        z3 = z3 + jnp.dot(a2[kh:kh + 14, :], t3_ref[kh],
                          preferred_element_type=jnp.float32)
    z3 = jnp.maximum(z3 + b3_ref[...], 0.0)
    y3_ref[0] = z3.astype(jnp.bfloat16)                        # (14, 448)


def _head_kernel(y3_ref, g_ref, be_ref, fw1_ref, fb1_ref, fw2_ref, fb2_ref,
                 fw3_ref, fb3_ref, out_ref, pool_scr, acc_scr, *, batch):
    """BatchNorm2d (batch stats) + MaxPool2d + flatten + 3x Linear.

    Grid axis (7 steps) streams the (7, 224, 512) fc1 weight chunk by chunk;
    the BN/pool prologue runs at step 0 and the FC2/FC3 epilogue at the last
    step, with an f32 accumulator in VMEM scratch in between."""
    k = pl.program_id(0)
    n_chan = 32
    cnt = float(batch * 14 * 14)

    @pl.when(k == 0)
    def _prologue():
        yf = y3_ref[...].astype(jnp.float32)                   # (B, 14, 448)
        # channel <-> column maps: conv3 output column j holds channel j % 32.
        rj = lax.broadcasted_iota(jnp.int32, (448, n_chan), 0) % n_chan
        cj = lax.broadcasted_iota(jnp.int32, (448, n_chan), 1)
        col2ch = (rj == cj).astype(jnp.float32)                # (448, 32)
        rr = lax.broadcasted_iota(jnp.int32, (n_chan, 448), 0)
        cc = lax.broadcasted_iota(jnp.int32, (n_chan, 448), 1) % n_chan
        ch2col = (rr == cc).astype(jnp.float32)                # (32, 448)

        # Training-mode BatchNorm2d statistics over (batch, h, w).
        col_sum = jnp.sum(jnp.sum(yf, axis=0), axis=0, keepdims=True)      # (1,448)
        mean_c = jnp.dot(col_sum, col2ch,
                         preferred_element_type=jnp.float32) / cnt         # (1,32)
        mean_col = jnp.dot(mean_c, ch2col, preferred_element_type=jnp.float32)
        diff = yf - mean_col[None]
        ssq_col = jnp.sum(jnp.sum(diff * diff, axis=0), axis=0, keepdims=True)
        var_c = jnp.dot(ssq_col, col2ch,
                        preferred_element_type=jnp.float32) / cnt          # (1,32)
        scale_c = g_ref[...] * lax.rsqrt(var_c + 1e-5)
        scale_col = jnp.dot(scale_c, ch2col, preferred_element_type=jnp.float32)
        beta_col = jnp.dot(be_ref[...], ch2col, preferred_element_type=jnp.float32)

        # Per image: normalize, MaxPool2d(2), stash (7, 224) rows for the FCs.
        i7 = lax.broadcasted_iota(jnp.int32, (7, 14), 0)
        j7 = lax.broadcasted_iota(jnp.int32, (7, 14), 1)
        s_even = (j7 == 2 * i7).astype(jnp.float32)
        s_odd = (j7 == 2 * i7 + 1).astype(jnp.float32)
        for b in range(batch):
            ybn = diff[b] * scale_col + beta_col               # (14, 448)
            zw = jnp.maximum(ybn[:, :224], ybn[:, 224:])       # (14, 224)
            pooled = jnp.maximum(
                jnp.dot(s_even, zw, preferred_element_type=jnp.float32),
                jnp.dot(s_odd, zw, preferred_element_type=jnp.float32))
            pool_scr[b] = pooled.astype(jnp.bfloat16)          # (7, 224)
        acc_scr[...] = jnp.zeros_like(acc_scr)

    # Every step: accumulate one 224-row chunk of Linear(1568, 512).
    w1 = fw1_ref[0]                                            # (224, 512) bf16
    onehot = (lax.broadcasted_iota(jnp.int32, (1, 7), 1) == k).astype(jnp.bfloat16)
    upd = jnp.zeros(acc_scr.shape, jnp.float32)
    for b in range(batch):
        xb = jnp.dot(onehot, pool_scr[b],
                     preferred_element_type=jnp.float32).astype(jnp.bfloat16)
        row = jnp.dot(xb, w1, preferred_element_type=jnp.float32)          # (1,512)
        sel = (lax.broadcasted_iota(jnp.int32, (batch, 1), 0) == b)
        upd = upd + sel.astype(jnp.float32) * row
    acc_scr[...] += upd

    @pl.when(k == pl.num_programs(0) - 1)
    def _epilogue():
        h = jnp.maximum(acc_scr[...] + fb1_ref[...], 0.0)                  # (B,512)
        h = jnp.dot(h.astype(jnp.bfloat16), fw2_ref[...],
                    preferred_element_type=jnp.float32) + fb2_ref[...]
        h = jnp.maximum(h, 0.0)
        h = jnp.dot(h.astype(jnp.bfloat16), fw3_ref[...],
                    preferred_element_type=jnp.float32) + fb3_ref[...]
        out_ref[...] = h                                                   # (B,128)


# ------------------------------ Pallas wrappers ------------------------------

def conv_stack(x, p):
    bsz = x.shape[0]
    return pl.pallas_call(
        _conv_stack_kernel,
        out_shape=jax.ShapeDtypeStruct((bsz, 14, 448), jnp.bfloat16),
        grid=(bsz,),
        in_specs=[
            pl.BlockSpec((1, 3, 70, 70), lambda b: (b, 0, 0, 0)),
            pl.BlockSpec((9, 70, 544), lambda b: (0, 0, 0)),
            pl.BlockSpec((3, 272, 512), lambda b: (0, 0, 0)),
            pl.BlockSpec((3, 256, 448), lambda b: (0, 0, 0)),
            pl.BlockSpec((1, 544), lambda b: (0, 0)),
            pl.BlockSpec((1, 512), lambda b: (0, 0)),
            pl.BlockSpec((1, 448), lambda b: (0, 0)),
        ],
        out_specs=pl.BlockSpec((1, 14, 448), lambda b: (b, 0, 0)),
        compiler_params=pltpu.CompilerParams(
            dimension_semantics=("parallel",),
            vmem_limit_bytes=_VMEM_LIMIT),
    )(x, p["t1"], p["t2"], p["t3"], p["b1r"], p["b2r"], p["b3r"])


def head(y3, p, bsz):
    return pl.pallas_call(
        functools.partial(_head_kernel, batch=bsz),
        out_shape=jax.ShapeDtypeStruct((bsz, 128), jnp.float32),
        grid=(7,),
        in_specs=[
            pl.BlockSpec((bsz, 14, 448), lambda k: (0, 0, 0)),
            pl.BlockSpec((1, 32), lambda k: (0, 0)),
            pl.BlockSpec((1, 32), lambda k: (0, 0)),
            pl.BlockSpec((1, 224, 512), lambda k: (k, 0, 0)),
            pl.BlockSpec((1, 512), lambda k: (0, 0)),
            pl.BlockSpec((512, 128), lambda k: (0, 0)),
            pl.BlockSpec((1, 128), lambda k: (0, 0)),
            pl.BlockSpec((128, 128), lambda k: (0, 0)),
            pl.BlockSpec((1, 128), lambda k: (0, 0)),
        ],
        out_specs=pl.BlockSpec((bsz, 128), lambda k: (0, 0)),
        scratch_shapes=[pltpu.VMEM((bsz, 7, 224), jnp.bfloat16),
                        pltpu.VMEM((bsz, 512), jnp.float32)],
        compiler_params=pltpu.CompilerParams(
            dimension_semantics=("arbitrary",),
            vmem_limit_bytes=_VMEM_LIMIT),
    )(y3, p["gamma"], p["beta"], p["fw1"], p["fb1"],
      p["fw2"], p["fb2"], p["fw3"], p["fb3"])


def net_forward(params, x_nchw):
    """Forward pass of `Net`. Input: NCHW (B, 3, 70, 70) f32. Output: (B, 3)."""
    y3 = conv_stack(x_nchw, params)            # (B, 14, 448) bf16 (pre-BN conv3)
    out = head(y3, params, x_nchw.shape[0])    # (B, 128) f32 (3 valid columns)
    return out[:, :3]


# --------------------- host-side parameter construction ---------------------

def _toeplitz_taps(wt, w_in):
    """wt (3,3,cin,cout) -> (3, w_in*cin, wo*cout) banded tap matrices.
    Input columns are (w, cin)-interleaved; output columns are ordered
    (wo%2, wo//2, cout) so MaxPool's width step is a max of two halves."""
    _, _, cin, cout = wt.shape
    wo_n = w_in - 2
    half = (wo_n // 2) * cout
    t = np.zeros((3, w_in * cin, wo_n * cout), np.float32)
    for kh in range(3):
        for kw in range(3):
            for wo in range(wo_n):
                w = wo + kw
                col = (wo % 2) * half + (wo // 2) * cout
                t[kh, w * cin:(w + 1) * cin, col:col + cout] = wt[kh, kw]
    return t


def _toeplitz_taps_nchw(wt, w_in):
    """Like _toeplitz_taps but 9 taps over (cin, kh) so raw NCHW planes can be
    used directly (first conv).  Returns (3*cin, w_in, wo*cout)."""
    _, _, cin, cout = wt.shape
    wo_n = w_in - 2
    half = (wo_n // 2) * cout
    t = np.zeros((cin * 3, w_in, wo_n * cout), np.float32)
    for ci in range(cin):
        for kh in range(3):
            for kw in range(3):
                for wo in range(wo_n):
                    col = (wo % 2) * half + (wo // 2) * cout
                    t[ci * 3 + kh, wo + kw, col:col + cout] = wt[kh, kw, ci]
    return t


def init_params(key):
    """Deterministic synthetic parameters with the module's shapes.

    Conv weights are generated in (kh, kw, cin, cout) order (PyTorch
    (cout,cin,kh,kw) permuted) and expanded into banded tap matrices.
    fw1 is stored as (7, 224, 512): fw1[h, w*32 + c, n] corresponds to the
    PyTorch Linear(1568,512) weight [n, c*49 + h*7 + w] (the NHWC-vs-NCHW
    flatten permutation is folded into the weight layout).  fw3/fb3 are
    zero-padded from 3 to 128 output lanes."""
    ks = jax.random.split(key, 12)

    def rnd(k, shape, fan_in):
        return np.asarray(jax.random.normal(k, shape, jnp.float32)) / np.sqrt(fan_in)

    w1 = rnd(ks[0], (3, 3, 3, 8), 27)
    b1 = rnd(ks[1], (8,), 27)
    w2 = rnd(ks[2], (3, 3, 8, 16), 72)
    b2 = rnd(ks[3], (16,), 72)
    w3 = rnd(ks[4], (3, 3, 16, 32), 144)
    b3 = rnd(ks[5], (32,), 144)

    fw3 = np.zeros((128, 128), np.float32)
    fb3 = np.zeros((1, 128), np.float32)
    fw3[:, :3] = rnd(ks[10], (128, 3), 128)
    fb3[:, :3] = rnd(ks[11], (1, 3), 128)

    return {
        "t1": jnp.asarray(_toeplitz_taps_nchw(w1, 70), jnp.bfloat16),  # (9,70,544)
        "t2": jnp.asarray(_toeplitz_taps(w2, 34), jnp.bfloat16),       # (3,272,512)
        "t3": jnp.asarray(_toeplitz_taps(w3, 16), jnp.bfloat16),       # (3,256,448)
        "b1r": jnp.asarray(np.tile(b1, 68)[None, :]),                  # (1,544)
        "b2r": jnp.asarray(np.tile(b2, 32)[None, :]),                  # (1,512)
        "b3r": jnp.asarray(np.tile(b3, 14)[None, :]),                  # (1,448)
        "gamma": jnp.ones((1, 32), jnp.float32),
        "beta": jnp.zeros((1, 32), jnp.float32),
        "fw1": jnp.asarray(rnd(ks[6], (7, 224, 512), 1568), jnp.bfloat16),
        "fb1": jnp.asarray(rnd(ks[7], (1, 512), 1568)),
        "fw2": jnp.asarray(rnd(ks[8], (512, 128), 512), jnp.bfloat16),
        "fb2": jnp.asarray(rnd(ks[9], (1, 128), 512)),
        "fw3": jnp.asarray(fw3, jnp.bfloat16),
        "fb3": jnp.asarray(fb3),
    }


if __name__ == "__main__":
    key = jax.random.PRNGKey(0)
    pkey, xkey = jax.random.split(key)
    params = init_params(pkey)

    # NCHW input like PyTorch; 70x70 is the spatial size implied by
    # Linear(1568 = 32*7*7, 512) after three conv3+pool2 stages.
    x = jax.random.normal(xkey, (2, 3, 70, 70), jnp.float32)

    out = jax.jit(net_forward)(params, x)
    out = jax.block_until_ready(out)
    assert out.shape == (2, 3) and out.dtype == jnp.float32
    print("KERNEL_OK")
</pallas_src>

<mosaic_0001>
module attributes {stable_mosaic.version = 11 : i64} {
  func.func @_conv_stack_kernel(%arg0: i32, %arg1: memref<1x3x70x70xf32, #tpu.memory_space<vmem>>, %arg2: memref<9x70x544xbf16, #tpu.memory_space<vmem>>, %arg3: memref<3x272x512xbf16, #tpu.memory_space<vmem>>, %arg4: memref<3x256x448xbf16, #tpu.memory_space<vmem>>, %arg5: memref<1x544xf32, #tpu.memory_space<vmem>>, %arg6: memref<1x512xf32, #tpu.memory_space<vmem>>, %arg7: memref<1x448xf32, #tpu.memory_space<vmem>>, %arg8: memref<1x14x448xbf16, #tpu.memory_space<vmem>>) attributes {dimension_semantics = [#tpu.dimension_semantics<parallel>], iteration_bounds = array<i64: 2>, scalar_prefetch = 0 : i64, scratch_operands = 0 : i64, tpu.core_type = #tpu.core_type<tc>, window_params = [{transform_indices = @transform_0, window_bounds = array<i64: 1, 3, 70, 70>}, {pipeline_mode = #tpu.pipeline_mode<synchronous>, transform_indices = @transform_1, window_bounds = array<i64: 9, 70, 544>}, {pipeline_mode = #tpu.pipeline_mode<synchronous>, transform_indices = @transform_2, window_bounds = array<i64: 3, 272, 512>}, {pipeline_mode = #tpu.pipeline_mode<synchronous>, transform_indices = @transform_3, window_bounds = array<i64: 3, 256, 448>}, {pipeline_mode = #tpu.pipeline_mode<synchronous>, transform_indices = @transform_4, window_bounds = array<i64: 1, 544>}, {pipeline_mode = #tpu.pipeline_mode<synchronous>, transform_indices = @transform_5, window_bounds = array<i64: 1, 512>}, {pipeline_mode = #tpu.pipeline_mode<synchronous>, transform_indices = @transform_6, window_bounds = array<i64: 1, 448>}, {transform_indices = @transform_7, window_bounds = array<i64: 1, 14, 448>}]} {
    %cst = arith.constant 0.000000e+00 : f32
    %0 = vector.broadcast %cst : f32 to vector<68x544xf32>
    %c0 = arith.constant 0 : index
    %c0_0 = arith.constant 0 : index
    %c0_1 = arith.constant 0 : index
    %c0_2 = arith.constant 0 : index
    %1 = vector.load %arg1[%c0, %c0_0, %c0_1, %c0_2] : memref<1x3x70x70xf32, #tpu.memory_space<vmem>>, vector<1x1x70x70xf32>
    %2 = vector.shape_cast %1 : vector<1x1x70x70xf32> to vector<70x70xf32>
    %3 = arith.truncf %2 : vector<70x70xf32> to vector<70x70xbf16>
    %4 = vector.extract_strided_slice %3 {offsets = [0, 0], sizes = [68, 70], strides = [1, 1]} : vector<70x70xbf16> to vector<68x70xbf16>
    %c0_3 = arith.constant 0 : index
    %c0_4 = arith.constant 0 : index
    %c0_5 = arith.constant 0 : index
    %5 = vector.load %arg2[%c0_3, %c0_4, %c0_5] : memref<9x70x544xbf16, #tpu.memory_space<vmem>>, vector<1x70x544xbf16>
    %6 = vector.shape_cast %5 : vector<1x70x544xbf16> to vector<70x544xbf16>
    %cst_6 = arith.constant dense<0.000000e+00> : vector<68x544xf32>
    %7 = tpu.matmul %4, %6, %cst_6 {dimension_numbers = #tpu.dot_dimension_numbers<[1], [0], [0], [1], [0, 0, 1, 1], [], []>} : vector<68x70xbf16>, vector<70x544xbf16>, vector<68x544xf32> -> vector<68x544xf32>
    %8 = arith.addf %0, %7 : vector<68x544xf32>
    %9 = vector.extract_strided_slice %3 {offsets = [1, 0], sizes = [68, 70], strides = [1, 1]} : vector<70x70xbf16> to vector<68x70xbf16>
    %c1 = arith.constant 1 : index
    %c0_7 = arith.constant 0 : index
    %c0_8 = arith.constant 0 : index
    %10 = vector.load %arg2[%c1, %c0_7, %c0_8] : memref<9x70x544xbf16, #tpu.memory_space<vmem>>, vector<1x70x544xbf16>
    %11 = vector.shape_cast %10 : vector<1x70x544xbf16> to vector<70x544xbf16>
    %cst_9 = arith.constant dense<0.000000e+00> : vector<68x544xf32>
    %12 = tpu.matmul %9, %11, %cst_9 {dimension_numbers = #tpu.dot_dimension_numbers<[1], [0], [0], [1], [0, 0, 1, 1], [], []>} : vector<68x70xbf16>, vector<70x544xbf16>, vector<68x544xf32> -> vector<68x544xf32>
    %13 = arith.addf %8, %12 : vector<68x544xf32>
    %14 = vector.extract_strided_slice %3 {offsets = [2, 0], sizes = [68, 70], strides = [1, 1]} : vector<70x70xbf16> to vector<68x70xbf16>
    %c2 = arith.constant 2 : index
    %c0_10 = arith.constant 0 : index
    %c0_11 = arith.constant 0 : index
    %15 = vector.load %arg2[%c2, %c0_10, %c0_11] : memref<9x70x544xbf16, #tpu.memory_space<vmem>>, vector<1x70x544xbf16>
    %16 = vector.shape_cast %15 : vector<1x70x544xbf16> to vector<70x544xbf16>
    %cst_12 = arith.constant dense<0.000000e+00> : vector<68x544xf32>
    %17 = tpu.matmul %14, %16, %cst_12 {dimension_numbers = #tpu.dot_dimension_numbers<[1], [0], [0], [1], [0, 0, 1, 1], [], []>} : vector<68x70xbf16>, vector<70x544xbf16>, vector<68x544xf32> -> vector<68x544xf32>
    %18 = arith.addf %13, %17 : vector<68x544xf32>
    %c0_13 = arith.constant 0 : index
    %c1_14 = arith.constant 1 : index
    %c0_15 = arith.constant 0 : index
    %c0_16 = arith.constant 0 : index
    %19 = vector.load %arg1[%c0_13, %c1_14, %c0_15, %c0_16] : memref<1x3x70x70xf32, #tpu.memory_space<vmem>>, vector<1x1x70x70xf32>
    %20 = vector.shape_cast %19 : vector<1x1x70x70xf32> to vector<70x70xf32>
    %21 = arith.truncf %20 : vector<70x70xf32> to vector<70x70xbf16>
    %22 = vector.extract_strided_slice %21 {offsets = [0, 0], sizes = [68, 70], strides = [1, 1]} : vector<70x70xbf16> to vector<68x70xbf16>
    %c3 = arith.constant 3 : index
    %c0_17 = arith.constant 0 : index
    %c0_18 = arith.constant 0 : index
    %23 = vector.load %arg2[%c3, %c0_17, %c0_18] : memref<9x70x544xbf16, #tpu.memory_space<vmem>>, vector<1x70x544xbf16>
    %24 = vector.shape_cast %23 : vector<1x70x544xbf16> to vector<70x544xbf16>
    %cst_19 = arith.constant dense<0.000000e+00> : vector<68x544xf32>
    %25 = tpu.matmul %22, %24, %cst_19 {dimension_numbers = #tpu.dot_dimension_numbers<[1], [0], [0], [1], [0, 0, 1, 1], [], []>} : vector<68x70xbf16>, vector<70x544xbf16>, vector<68x544xf32> -> vector<68x544xf32>
    %26 = arith.addf %18, %25 : vector<68x544xf32>
    %27 = vector.extract_strided_slice %21 {offsets = [1, 0], sizes = [68, 70], strides = [1, 1]} : vector<70x70xbf16> to vector<68x70xbf16>
    %c4 = arith.constant 4 : index
    %c0_20 = arith.constant 0 : index
    %c0_21 = arith.constant 0 : index
    %28 = vector.load %arg2[%c4, %c0_20, %c0_21] : memref<9x70x544xbf16, #tpu.memory_space<vmem>>, vector<1x70x544xbf16>
    %29 = vector.shape_cast %28 : vector<1x70x544xbf16> to vector<70x544xbf16>
    %cst_22 = arith.constant dense<0.000000e+00> : vector<68x544xf32>
    %30 = tpu.matmul %27, %29, %cst_22 {dimension_numbers = #tpu.dot_dimension_numbers<[1], [0], [0], [1], [0, 0, 1, 1], [], []>} : vector<68x70xbf16>, vector<70x544xbf16>, vector<68x544xf32> -> vector<68x544xf32>
    %31 = arith.addf %26, %30 : vector<68x544xf32>
    %32 = vector.extract_strided_slice %21 {offsets = [2, 0], sizes = [68, 70], strides = [1, 1]} : vector<70x70xbf16> to vector<68x70xbf16>
    %c5 = arith.constant 5 : index
    %c0_23 = arith.constant 0 : index
    %c0_24 = arith.constant 0 : index
    %33 = vector.load %arg2[%c5, %c0_23, %c0_24] : memref<9x70x544xbf16, #tpu.memory_space<vmem>>, vector<1x70x544xbf16>
    %34 = vector.shape_cast %33 : vector<1x70x544xbf16> to vector<70x544xbf16>
    %cst_25 = arith.constant dense<0.000000e+00> : vector<68x544xf32>
    %35 = tpu.matmul %32, %34, %cst_25 {dimension_numbers = #tpu.dot_dimension_numbers<[1], [0], [0], [1], [0, 0, 1, 1], [], []>} : vector<68x70xbf16>, vector<70x544xbf16>, vector<68x544xf32> -> vector<68x544xf32>
    %36 = arith.addf %31, %35 : vector<68x544xf32>
    %c0_26 = arith.constant 0 : index
    %c2_27 = arith.constant 2 : index
    %c0_28 = arith.constant 0 : index
    %c0_29 = arith.constant 0 : index
    %37 = vector.load %arg1[%c0_26, %c2_27, %c0_28, %c0_29] : memref<1x3x70x70xf32, #tpu.memory_space<vmem>>, vector<1x1x70x70xf32>
    %38 = vector.shape_cast %37 : vector<1x1x70x70xf32> to vector<70x70xf32>
    %39 = arith.truncf %38 : vector<70x70xf32> to vector<70x70xbf16>
    %40 = vector.extract_strided_slice %39 {offsets = [0, 0], sizes = [68, 70], strides = [1, 1]} : vector<70x70xbf16> to vector<68x70xbf16>
    %c6 = arith.constant 6 : index
    %c0_30 = arith.constant 0 : index
    %c0_31 = arith.constant 0 : index
    %41 = vector.load %arg2[%c6, %c0_30, %c0_31] : memref<9x70x544xbf16, #tpu.memory_space<vmem>>, vector<1x70x544xbf16>
    %42 = vector.shape_cast %41 : vector<1x70x544xbf16> to vector<70x544xbf16>
    %cst_32 = arith.constant dense<0.000000e+00> : vector<68x544xf32>
    %43 = tpu.matmul %40, %42, %cst_32 {dimension_numbers = #tpu.dot_dimension_numbers<[1], [0], [0], [1], [0, 0, 1, 1], [], []>} : vector<68x70xbf16>, vector<70x544xbf16>, vector<68x544xf32> -> vector<68x544xf32>
    %44 = arith.addf %36, %43 : vector<68x544xf32>
    %45 = vector.extract_strided_slice %39 {offsets = [1, 0], sizes = [68, 70], strides = [1, 1]} : vector<70x70xbf16> to vector<68x70xbf16>
    %c7 = arith.constant 7 : index
    %c0_33 = arith.constant 0 : index
    %c0_34 = arith.constant 0 : index
    %46 = vector.load %arg2[%c7, %c0_33, %c0_34] : memref<9x70x544xbf16, #tpu.memory_space<vmem>>, vector<1x70x544xbf16>
    %47 = vector.shape_cast %46 : vector<1x70x544xbf16> to vector<70x544xbf16>
    %cst_35 = arith.constant dense<0.000000e+00> : vector<68x544xf32>
    %48 = tpu.matmul %45, %47, %cst_35 {dimension_numbers = #tpu.dot_dimension_numbers<[1], [0], [0], [1], [0, 0, 1, 1], [], []>} : vector<68x70xbf16>, vector<70x544xbf16>, vector<68x544xf32> -> vector<68x544xf32>
    %49 = arith.addf %44, %48 : vector<68x544xf32>
    %50 = vector.extract_strided_slice %39 {offsets = [2, 0], sizes = [68, 70], strides = [1, 1]} : vector<70x70xbf16> to vector<68x70xbf16>
    %c8 = arith.constant 8 : index
    %c0_36 = arith.constant 0 : index
    %c0_37 = arith.constant 0 : index
    %51 = vector.load %arg2[%c8, %c0_36, %c0_37] : memref<9x70x544xbf16, #tpu.memory_space<vmem>>, vector<1x70x544xbf16>
    %52 = vector.shape_cast %51 : vector<1x70x544xbf16> to vector<70x544xbf16>
    %cst_38 = arith.constant dense<0.000000e+00> : vector<68x544xf32>
    %53 = tpu.matmul %50, %52, %cst_38 {dimension_numbers = #tpu.dot_dimension_numbers<[1], [0], [0], [1], [0, 0, 1, 1], [], []>} : vector<68x70xbf16>, vector<70x544xbf16>, vector<68x544xf32> -> vector<68x544xf32>
    %54 = arith.addf %49, %53 : vector<68x544xf32>
    %c0_39 = arith.constant 0 : index
    %c0_40 = arith.constant 0 : index
    %55 = vector.load %arg5[%c0_39, %c0_40] : memref<1x544xf32, #tpu.memory_space<vmem>>, vector<1x544xf32>
    %56 = vector.broadcast %55 : vector<1x544xf32> to vector<68x544xf32>
    %57 = arith.addf %54, %56 : vector<68x544xf32>
    %cst_41 = arith.constant 0.000000e+00 : f32
    %58 = vector.broadcast %cst_41 : f32 to vector<68x544xf32>
    %59 = arith.maximumf %57, %58 : vector<68x544xf32>
    %60 = vector.extract_strided_slice %59 {offsets = [0, 0], sizes = [68, 272], strides = [1, 1]} : vector<68x544xf32> to vector<68x272xf32>
    %61 = vector.extract_strided_slice %59 {offsets = [0, 272], sizes = [68, 272], strides = [1, 1]} : vector<68x544xf32> to vector<68x272xf32>
    %62 = arith.maximumf %60, %61 : vector<68x272xf32>
    %63 = arith.truncf %62 : vector<68x272xf32> to vector<68x272xbf16>
    %64 = tpu.iota {dimensions = array<i32: 0>} : vector<34x68xi32>
    %65 = tpu.iota {dimensions = array<i32: 1>} : vector<34x68xi32>
    %c2_i32 = arith.constant 2 : i32
    %66 = vector.broadcast %c2_i32 : i32 to vector<34x68xi32>
    %67 = arith.muli %66, %64 : vector<34x68xi32>
    %68 = arith.cmpi eq, %65, %67 : vector<34x68xi32>
    %69 = arith.extui %68 : vector<34x68xi1> to vector<34x68xi32>
    %70 = arith.sitofp %69 : vector<34x68xi32> to vector<34x68xf32>
    %71 = arith.truncf %70 : vector<34x68xf32> to vector<34x68xbf16>
    %c2_i32_42 = arith.constant 2 : i32
    %72 = vector.broadcast %c2_i32_42 : i32 to vector<34x68xi32>
    %73 = arith.muli %72, %64 : vector<34x68xi32>
    %c1_i32 = arith.constant 1 : i32
    %74 = vector.broadcast %c1_i32 : i32 to vector<34x68xi32>
    %75 = arith.addi %73, %74 : vector<34x68xi32>
    %76 = arith.cmpi eq, %65, %75 : vector<34x68xi32>
    %77 = arith.extui %76 : vector<34x68xi1> to vector<34x68xi32>
    %78 = arith.sitofp %77 : vector<34x68xi32> to vector<34x68xf32>
    %79 = arith.truncf %78 : vector<34x68xf32> to vector<34x68xbf16>
    %cst_43 = arith.constant dense<0.000000e+00> : vector<34x272xf32>
    %80 = tpu.matmul %71, %63, %cst_43 {dimension_numbers = #tpu.dot_dimension_numbers<[1], [0], [0], [1], [0, 0, 1, 1], [], []>} : vector<34x68xbf16>, vector<68x272xbf16>, vector<34x272xf32> -> vector<34x272xf32>
    %cst_44 = arith.constant dense<0.000000e+00> : vector<34x272xf32>
    %81 = tpu.matmul %79, %63, %cst_44 {dimension_numbers = #tpu.dot_dimension_numbers<[1], [0], [0], [1], [0, 0, 1, 1], [], []>} : vector<34x68xbf16>, vector<68x272xbf16>, vector<34x272xf32> -> vector<34x272xf32>
    %82 = arith.maximumf %80, %81 : vector<34x272xf32>
    %83 = arith.truncf %82 : vector<34x272xf32> to vector<34x272xbf16>
    %cst_45 = arith.constant 0.000000e+00 : f32
    %84 = vector.broadcast %cst_45 : f32 to vector<32x512xf32>
    %85 = vector.extract_strided_slice %83 {offsets = [0, 0], sizes = [32, 272], strides = [1, 1]} : vector<34x272xbf16> to vector<32x272xbf16>
    %c0_46 = arith.constant 0 : index
    %c0_47 = arith.constant 0 : index
    %c0_48 = arith.constant 0 : index
    %86 = vector.load %arg3[%c0_46, %c0_47, %c0_48] : memref<3x272x512xbf16, #tpu.memory_space<vmem>>, vector<1x272x512xbf16>
    %87 = vector.shape_cast %86 : vector<1x272x512xbf16> to vector<272x512xbf16>
    %cst_49 = arith.constant dense<0.000000e+00> : vector<32x512xf32>
    %88 = tpu.matmul %85, %87, %cst_49 {dimension_numbers = #tpu.dot_dimension_numbers<[1], [0], [0], [1], [0, 0, 1, 1], [], []>} : vector<32x272xbf16>, vector<272x512xbf16>, vector<32x512xf32> -> vector<32x512xf32>
    %89 = arith.addf %84, %88 : vector<32x512xf32>
    %90 = vector.extract_strided_slice %83 {offsets = [1, 0], sizes = [32, 272], strides = [1, 1]} : vector<34x272xbf16> to vector<32x272xbf16>
    %c1_50 = arith.constant 1 : index
    %c0_51 = arith.constant 0 : index
    %c0_52 = arith.constant 0 : index
    %91 = vector.load %arg3[%c1_50, %c0_51, %c0_52] : memref<3x272x512xbf16, #tpu.memory_space<vmem>>, vector<1x272x512xbf16>
    %92 = vector.shape_cast %91 : vector<1x272x512xbf16> to vector<272x512xbf16>
    %cst_53 = arith.constant dense<0.000000e+00> : vector<32x512xf32>
    %93 = tpu.matmul %90, %92, %cst_53 {dimension_numbers = #tpu.dot_dimension_numbers<[1], [0], [0], [1], [0, 0, 1, 1], [], []>} : vector<32x272xbf16>, vector<272x512xbf16>, vector<32x512xf32> -> vector<32x512xf32>
    %94 = arith.addf %89, %93 : vector<32x512xf32>
    %95 = vector.extract_strided_slice %83 {offsets = [2, 0], sizes = [32, 272], strides = [1, 1]} : vector<34x272xbf16> to vector<32x272xbf16>
    %c2_54 = arith.constant 2 : index
    %c0_55 = arith.constant 0 : index
    %c0_56 = arith.constant 0 : index
    %96 = vector.load %arg3[%c2_54, %c0_55, %c0_56] : memref<3x272x512xbf16, #tpu.memory_space<vmem>>, vector<1x272x512xbf16>
    %97 = vector.shape_cast %96 : vector<1x272x512xbf16> to vector<272x512xbf16>
    %cst_57 = arith.constant dense<0.000000e+00> : vector<32x512xf32>
    %98 = tpu.matmul %95, %97, %cst_57 {dimension_numbers = #tpu.dot_dimension_numbers<[1], [0], [0], [1], [0, 0, 1, 1], [], []>} : vector<32x272xbf16>, vector<272x512xbf16>, vector<32x512xf32> -> vector<32x512xf32>
    %99 = arith.addf %94, %98 : vector<32x512xf32>
    %c0_58 = arith.constant 0 : index
    %c0_59 = arith.constant 0 : index
    %100 = vector.load %arg6[%c0_58, %c0_59] : memref<1x512xf32, #tpu.memory_space<vmem>>, vector<1x512xf32>
    %101 = vector.broadcast %100 : vector<1x512xf32> to vector<32x512xf32>
    %102 = arith.addf %99, %101 : vector<32x512xf32>
    %cst_60 = arith.constant 0.000000e+00 : f32
    %103 = vector.broadcast %cst_60 : f32 to vector<32x512xf32>
    %104 = arith.maximumf %102, %103 : vector<32x512xf32>
    %105 = vector.extract_strided_slice %104 {offsets = [0, 0], sizes = [32, 256], strides = [1, 1]} : vector<32x512xf32> to vector<32x256xf32>
    %106 = vector.extract_strided_slice %104 {offsets = [0, 256], sizes = [32, 256], strides = [1, 1]} : vector<32x512xf32> to vector<32x256xf32>
    %107 = arith.maximumf %105, %106 : vector<32x256xf32>
    %108 = arith.truncf %107 : vector<32x256xf32> to vector<32x256xbf16>
    %109 = tpu.iota {dimensions = array<i32: 0>} : vector<16x32xi32>
    %110 = tpu.iota {dimensions = array<i32: 1>} : vector<16x32xi32>
    %c2_i32_61 = arith.constant 2 : i32
    %111 = vector.broadcast %c2_i32_61 : i32 to vector<16x32xi32>
    %112 = arith.muli %111, %109 : vector<16x32xi32>
    %113 = arith.cmpi eq, %110, %112 : vector<16x32xi32>
    %114 = arith.extui %113 : vector<16x32xi1> to vector<16x32xi32>
    %115 = arith.sitofp %114 : vector<16x32xi32> to vector<16x32xf32>
    %116 = arith.truncf %115 : vector<16x32xf32> to vector<16x32xbf16>
    %c2_i32_62 = arith.constant 2 : i32
    %117 = vector.broadcast %c2_i32_62 : i32 to vector<16x32xi32>
    %118 = arith.muli %117, %109 : vector<16x32xi32>
    %c1_i32_63 = arith.constant 1 : i32
    %119 = vector.broadcast %c1_i32_63 : i32 to vector<16x32xi32>
    %120 = arith.addi %118, %119 : vector<16x32xi32>
    %121 = arith.cmpi eq, %110, %120 : vector<16x32xi32>
    %122 = arith.extui %121 : vector<16x32xi1> to vector<16x32xi32>
    %123 = arith.sitofp %122 : vector<16x32xi32> to vector<16x32xf32>
    %124 = arith.truncf %123 : vector<16x32xf32> to vector<16x32xbf16>
    %cst_64 = arith.constant dense<0.000000e+00> : vector<16x256xf32>
    %125 = tpu.matmul %116, %108, %cst_64 {dimension_numbers = #tpu.dot_dimension_numbers<[1], [0], [0], [1], [0, 0, 1, 1], [], []>} : vector<16x32xbf16>, vector<32x256xbf16>, vector<16x256xf32> -> vector<16x256xf32>
    %cst_65 = arith.constant dense<0.000000e+00> : vector<16x256xf32>
    %126 = tpu.matmul %124, %108, %cst_65 {dimension_numbers = #tpu.dot_dimension_numbers<[1], [0], [0], [1], [0, 0, 1, 1], [], []>} : vector<16x32xbf16>, vector<32x256xbf16>, vector<16x256xf32> -> vector<16x256xf32>
    %127 = arith.maximumf %125, %126 : vector<16x256xf32>
    %128 = arith.truncf %127 : vector<16x256xf32> to vector<16x256xbf16>
    %cst_66 = arith.constant 0.000000e+00 : f32
    %129 = vector.broadcast %cst_66 : f32 to vector<14x448xf32>
    %130 = vector.extract_strided_slice %128 {offsets = [0, 0], sizes = [14, 256], strides = [1, 1]} : vector<16x256xbf16> to vector<14x256xbf16>
    %c0_67 = arith.constant 0 : index
    %c0_68 = arith.constant 0 : index
    %c0_69 = arith.constant 0 : index
    %131 = vector.load %arg4[%c0_67, %c0_68, %c0_69] : memref<3x256x448xbf16, #tpu.memory_space<vmem>>, vector<1x256x448xbf16>
    %132 = vector.shape_cast %131 : vector<1x256x448xbf16> to vector<256x448xbf16>
    %cst_70 = arith.constant dense<0.000000e+00> : vector<14x448xf32>
    %133 = tpu.matmul %130, %132, %cst_70 {dimension_numbers = #tpu.dot_dimension_numbers<[1], [0], [0], [1], [0, 0, 1, 1], [], []>} : vector<14x256xbf16>, vector<256x448xbf16>, vector<14x448xf32> -> vector<14x448xf32>
    %134 = arith.addf %129, %133 : vector<14x448xf32>
    %135 = vector.extract_strided_slice %128 {offsets = [1, 0], sizes = [14, 256], strides = [1, 1]} : vector<16x256xbf16> to vector<14x256xbf16>
    %c1_71 = arith.constant 1 : index
    %c0_72 = arith.constant 0 : index
    %c0_73 = arith.constant 0 : index
    %136 = vector.load %arg4[%c1_71, %c0_72, %c0_73] : memref<3x256x448xbf16, #tpu.memory_space<vmem>>, vector<1x256x448xbf16>
    %137 = vector.shape_cast %136 : vector<1x256x448xbf16> to vector<256x448xbf16>
    %cst_74 = arith.constant dense<0.000000e+00> : vector<14x448xf32>
    %138 = tpu.matmul %135, %137, %cst_74 {dimension_numbers = #tpu.dot_dimension_numbers<[1], [0], [0], [1], [0, 0, 1, 1], [], []>} : vector<14x256xbf16>, vector<256x448xbf16>, vector<14x448xf32> -> vector<14x448xf32>
    %139 = arith.addf %134, %138 : vector<14x448xf32>
    %140 = vector.extract_strided_slice %128 {offsets = [2, 0], sizes = [14, 256], strides = [1, 1]} : vector<16x256xbf16> to vector<14x256xbf16>
    %c2_75 = arith.constant 2 : index
    %c0_76 = arith.constant 0 : index
    %c0_77 = arith.constant 0 : index
    %141 = vector.load %arg4[%c2_75, %c0_76, %c0_77] : memref<3x256x448xbf16, #tpu.memory_space<vmem>>, vector<1x256x448xbf16>
    %142 = vector.shape_cast %141 : vector<1x256x448xbf16> to vector<256x448xbf16>
    %cst_78 = arith.constant dense<0.000000e+00> : vector<14x448xf32>
    %143 = tpu.matmul %140, %142, %cst_78 {dimension_numbers = #tpu.dot_dimension_numbers<[1], [0], [0], [1], [0, 0, 1, 1], [], []>} : vector<14x256xbf16>, vector<256x448xbf16>, vector<14x448xf32> -> vector<14x448xf32>
    %144 = arith.addf %139, %143 : vector<14x448xf32>
    %c0_79 = arith.constant 0 : index
    %c0_80 = arith.constant 0 : index
    %145 = vector.load %arg7[%c0_79, %c0_80] : memref<1x448xf32, #tpu.memory_space<vmem>>, vector<1x448xf32>
    %146 = vector.broadcast %145 : vector<1x448xf32> to vector<14x448xf32>
    %147 = arith.addf %144, %146 : vector<14x448xf32>
    %cst_81 = arith.constant 0.000000e+00 : f32
    %148 = vector.broadcast %cst_81 : f32 to vector<14x448xf32>
    %149 = arith.maximumf %147, %148 : vector<14x448xf32>
    %150 = arith.truncf %149 : vector<14x448xf32> to vector<14x448xbf16>
    %c0_82 = arith.constant 0 : index
    %c0_83 = arith.constant 0 : index
    %c0_84 = arith.constant 0 : index
    %151 = vector.load %arg8[%c0_82, %c0_83, %c0_84] : memref<1x14x448xbf16, #tpu.memory_space<vmem>>, vector<1x14x448xbf16>
    %152 = vector.shape_cast %151 : vector<1x14x448xbf16> to vector<14x448xbf16>
    %153 = vector.shape_cast %150 : vector<14x448xbf16> to vector<1x14x448xbf16>
    tpu.vector_store %arg8[%c0_82, %c0_83, %c0_84], %153 {strides = array<i32>} : memref<1x14x448xbf16, #tpu.memory_space<vmem>>, vector<1x14x448xbf16>,
    return
  }
  func.func @transform_0(%arg0: i32) -> (i32, i32, i32, i32) {
    %c0_i32 = arith.constant 0 : i32
    %c0_i32_0 = arith.constant 0 : i32
    %c0_i32_1 = arith.constant 0 : i32
    %c0_i32_2 = arith.constant 0 : i32
    return %arg0, %c0_i32, %c0_i32_0, %c0_i32_1 : i32, i32, i32, i32
  }
  func.func @transform_1(%arg0: i32) -> (i32, i32, i32) {
    %c0_i32 = arith.constant 0 : i32
    %c0_i32_0 = arith.constant 0 : i32
    %c0_i32_1 = arith.constant 0 : i32
    %c0_i32_2 = arith.constant 0 : i32
    return %c0_i32, %c0_i32_0, %c0_i32_1 : i32, i32, i32
  }
  func.func @transform_2(%arg0: i32) -> (i32, i32, i32) {
    %c0_i32 = arith.constant 0 : i32
    %c0_i32_0 = arith.constant 0 : i32
    %c0_i32_1 = arith.constant 0 : i32
    %c0_i32_2 = arith.constant 0 : i32
    return %c0_i32, %c0_i32_0, %c0_i32_1 : i32, i32, i32
  }
  func.func @transform_3(%arg0: i32) -> (i32, i32, i32) {
    %c0_i32 = arith.constant 0 : i32
    %c0_i32_0 = arith.constant 0 : i32
    %c0_i32_1 = arith.constant 0 : i32
    %c0_i32_2 = arith.constant 0 : i32
    return %c0_i32, %c0_i32_0, %c0_i32_1 : i32, i32, i32
  }
  func.func @transform_4(%arg0: i32) -> (i32, i32) {
    %c0_i32 = arith.constant 0 : i32
    %c0_i32_0 = arith.constant 0 : i32
    %c0_i32_1 = arith.constant 0 : i32
    return %c0_i32, %c0_i32_0 : i32, i32
  }
  func.func @transform_5(%arg0: i32) -> (i32, i32) {
    %c0_i32 = arith.constant 0 : i32
    %c0_i32_0 = arith.constant 0 : i32
    %c0_i32_1 = arith.constant 0 : i32
    return %c0_i32, %c0_i32_0 : i32, i32
  }
  func.func @transform_6(%arg0: i32) -> (i32, i32) {
    %c0_i32 = arith.constant 0 : i32
    %c0_i32_0 = arith.constant 0 : i32
    %c0_i32_1 = arith.constant 0 : i32
    return %c0_i32, %c0_i32_0 : i32, i32
  }
  func.func @transform_7(%arg0: i32) -> (i32, i32, i32) {
    %c0_i32 = arith.constant 0 : i32
    %c0_i32_0 = arith.constant 0 : i32
    %c0_i32_1 = arith.constant 0 : i32
    return %arg0, %c0_i32, %c0_i32_0 : i32, i32, i32
  }
}

module attributes {stable_mosaic.version = 11 : i64} {
  func.func @_head_kernel(%arg0: i32, %arg1: memref<2x14x448xbf16, #tpu.memory_space<vmem>>, %arg2: memref<1x32xf32, #tpu.memory_space<vmem>>, %arg3: memref<1x32xf32, #tpu.memory_space<vmem>>, %arg4: memref<1x224x512xbf16, #tpu.memory_space<vmem>>, %arg5: memref<1x512xf32, #tpu.memory_space<vmem>>, %arg6: memref<512x128xbf16, #tpu.memory_space<vmem>>, %arg7: memref<1x128xf32, #tpu.memory_space<vmem>>, %arg8: memref<128x128xbf16, #tpu.memory_space<vmem>>, %arg9: memref<1x128xf32, #tpu.memory_space<vmem>>, %arg10: memref<2x128xf32, #tpu.memory_space<vmem>>, %arg11: memref<2x7x224xbf16, #tpu.memory_space<vmem>>, %arg12: memref<2x512xf32, #tpu.memory_space<vmem>>) attributes {dimension_semantics = [#tpu.dimension_semantics<arbitrary>], iteration_bounds = array<i64: 7>, scalar_prefetch = 0 : i64, scratch_operands = 2 : i64, tpu.core_type = #tpu.core_type<tc>, window_params = [{pipeline_mode = #tpu.pipeline_mode<synchronous>, transform_indices = @transform_0, window_bounds = array<i64: 2, 14, 448>}, {pipeline_mode = #tpu.pipeline_mode<synchronous>, transform_indices = @transform_1, window_bounds = array<i64: 1, 32>}, {pipeline_mode = #tpu.pipeline_mode<synchronous>, transform_indices = @transform_2, window_bounds = array<i64: 1, 32>}, {transform_indices = @transform_3, window_bounds = array<i64: 1, 224, 512>}, {pipeline_mode = #tpu.pipeline_mode<synchronous>, transform_indices = @transform_4, window_bounds = array<i64: 1, 512>}, {pipeline_mode = #tpu.pipeline_mode<synchronous>, transform_indices = @transform_5, window_bounds = array<i64: 512, 128>}, {pipeline_mode = #tpu.pipeline_mode<synchronous>, transform_indices = @transform_6, window_bounds = array<i64: 1, 128>}, {pipeline_mode = #tpu.pipeline_mode<synchronous>, transform_indices = @transform_7, window_bounds = array<i64: 128, 128>}, {pipeline_mode = #tpu.pipeline_mode<synchronous>, transform_indices = @transform_8, window_bounds = array<i64: 1, 128>}, {pipeline_mode = #tpu.pipeline_mode<synchronous>, transform_indices = @transform_9, window_bounds = array<i64: 2, 128>}]} {
    %c0_i32 = arith.constant 0 : i32
    %0 = arith.cmpi eq, %arg0, %c0_i32 : i32
    %1 = arith.extui %0 : i1 to i32
    %c0_i32_0 = arith.constant 0 : i32
    %2 = arith.cmpi ne, %1, %c0_i32_0 : i32
    scf.if %2 {
      %c0_18 = arith.constant 0 : index
      %c0_19 = arith.constant 0 : index
      %c0_20 = arith.constant 0 : index
      %46 = vector.load %arg1[%c0_18, %c0_19, %c0_20] : memref<2x14x448xbf16, #tpu.memory_space<vmem>>, vector<2x14x448xbf16>
      %47 = arith.extf %46 : vector<2x14x448xbf16> to vector<2x14x448xf32>
      %48 = tpu.iota {dimensions = array<i32: 0>} : vector<448x32xi32>
      %c32_i32 = arith.constant 32 : i32
      %c0_i32_21 = arith.constant 0 : i32
      %49 = arith.cmpi eq, %c32_i32, %c0_i32_21 : i32
      %c1_i32_22 = arith.constant 1 : i32
      %50 = arith.select %49, %c1_i32_22, %c32_i32 : i32
      %51 = vector.broadcast %50 : i32 to vector<448x32xi32>
      %52 = arith.remsi %48, %51 : vector<448x32xi32>
      %c0_i32_23 = arith.constant 0 : i32
      %53 = vector.broadcast %c0_i32_23 : i32 to vector<448x32xi32>
      %54 = arith.cmpi ne, %52, %53 : vector<448x32xi32>
      %c0_i32_24 = arith.constant 0 : i32
      %55 = vector.broadcast %c0_i32_24 : i32 to vector<448x32xi32>
      %56 = arith.cmpi slt, %52, %55 : vector<448x32xi32>
      %c0_i32_25 = arith.constant 0 : i32
      %57 = arith.cmpi slt, %50, %c0_i32_25 : i32
      %58 = vector.broadcast %57 : i1 to vector<448x32xi1>
      %59 = vector.broadcast %58 : vector<448x32xi1> to vector<448x32xi1>
      %60 = arith.xori %56, %59 : vector<448x32xi1>
      %61 = arith.andi %60, %54 : vector<448x32xi1>
      %62 = vector.broadcast %50 : i32 to vector<448x32xi32>
      %63 = arith.addi %52, %62 : vector<448x32xi32>
      %64 = arith.select %61, %63, %52 : vector<448x32xi1>, vector<448x32xi32>
      %65 = tpu.iota {dimensions = array<i32: 1>} : vector<448x32xi32>
      %66 = arith.cmpi eq, %64, %65 : vector<448x32xi32>
      %67 = arith.extui %66 : vector<448x32xi1> to vector<448x32xi32>
      %68 = arith.sitofp %67 : vector<448x32xi32> to vector<448x32xf32>
      %69 = tpu.iota {dimensions = array<i32: 0>} : vector<32x448xi32>
      %70 = tpu.iota {dimensions = array<i32: 1>} : vector<32x448xi32>
      %c32_i32_26 = arith.constant 32 : i32
      %c0_i32_27 = arith.constant 0 : i32
      %71 = arith.cmpi eq, %c32_i32_26, %c0_i32_27 : i32
      %c1_i32_28 = arith.constant 1 : i32
      %72 = arith.select %71, %c1_i32_28, %c32_i32_26 : i32
      %73 = vector.broadcast %72 : i32 to vector<32x448xi32>
      %74 = arith.remsi %70, %73 : vector<32x448xi32>
      %c0_i32_29 = arith.constant 0 : i32
      %75 = vector.broadcast %c0_i32_29 : i32 to vector<32x448xi32>
      %76 = arith.cmpi ne, %74, %75 : vector<32x448xi32>
      %c0_i32_30 = arith.constant 0 : i32
      %77 = vector.broadcast %c0_i32_30 : i32 to vector<32x448xi32>
      %78 = arith.cmpi slt, %74, %77 : vector<32x448xi32>
      %c0_i32_31 = arith.constant 0 : i32
      %79 = arith.cmpi slt, %72, %c0_i32_31 : i32
      %80 = vector.broadcast %79 : i1 to vector<32x448xi1>
      %81 = vector.broadcast %80 : vector<32x448xi1> to vector<32x448xi1>
      %82 = arith.xori %78, %81 : vector<32x448xi1>
      %83 = arith.andi %82, %76 : vector<32x448xi1>
      %84 = vector.broadcast %72 : i32 to vector<32x448xi32>
      %85 = arith.addi %74, %84 : vector<32x448xi32>
      %86 = arith.select %83, %85, %74 : vector<32x448xi1>, vector<32x448xi32>
      %87 = arith.cmpi eq, %69, %86 : vector<32x448xi32>
      %88 = arith.extui %87 : vector<32x448xi1> to vector<32x448xi32>
      %89 = arith.sitofp %88 : vector<32x448xi32> to vector<32x448xf32>
      %cst_32 = arith.constant dense<0.000000e+00> : vector<14x448xf32>
      %90 = vector.multi_reduction <add>, %47, %cst_32 [0] : vector<2x14x448xf32> to vector<14x448xf32>
      %cst_33 = arith.constant dense<0.000000e+00> : vector<448xf32>
      %91 = vector.multi_reduction <add>, %90, %cst_33 [0] : vector<14x448xf32> to vector<448xf32>
      %92 = vector.shape_cast %91 : vector<448xf32> to vector<1x448xf32>
      %cst_34 = arith.constant dense<0.000000e+00> : vector<1x32xf32>
      %93 = tpu.matmul %92, %68, %cst_34 {dimension_numbers = #tpu.dot_dimension_numbers<[1], [0], [0], [1], [0, 0, 1, 1], [], []>} : vector<1x448xf32>, vector<448x32xf32>, vector<1x32xf32> -> vector<1x32xf32>
      %cst_35 = arith.constant 3.920000e+02 : f32
      %94 = vector.broadcast %cst_35 : f32 to vector<1x32xf32>
      %95 = arith.divf %93, %94 : vector<1x32xf32>
      %cst_36 = arith.constant dense<0.000000e+00> : vector<1x448xf32>
      %96 = tpu.matmul %95, %89, %cst_36 {dimension_numbers = #tpu.dot_dimension_numbers<[1], [0], [0], [1], [0, 0, 1, 1], [], []>} : vector<1x32xf32>, vector<32x448xf32>, vector<1x448xf32> -> vector<1x448xf32>
      %97 = vector.shape_cast %96 : vector<1x448xf32> to vector<1x1x448xf32>
      %98 = vector.broadcast %97 : vector<1x1x448xf32> to vector<2x14x448xf32>
      %99 = arith.subf %47, %98 : vector<2x14x448xf32>
      %100 = arith.mulf %99, %99 : vector<2x14x448xf32>
      %cst_37 = arith.constant dense<0.000000e+00> : vector<14x448xf32>
      %101 = vector.multi_reduction <add>, %100, %cst_37 [0] : vector<2x14x448xf32> to vector<14x448xf32>
      %cst_38 = arith.constant dense<0.000000e+00> : vector<448xf32>
      %102 = vector.multi_reduction <add>, %101, %cst_38 [0] : vector<14x448xf32> to vector<448xf32>
      %103 = vector.shape_cast %102 : vector<448xf32> to vector<1x448xf32>
      %cst_39 = arith.constant dense<0.000000e+00> : vector<1x32xf32>
      %104 = tpu.matmul %103, %68, %cst_39 {dimension_numbers = #tpu.dot_dimension_numbers<[1], [0], [0], [1], [0, 0, 1, 1], [], []>} : vector<1x448xf32>, vector<448x32xf32>, vector<1x32xf32> -> vector<1x32xf32>
      %cst_40 = arith.constant 3.920000e+02 : f32
      %105 = vector.broadcast %cst_40 : f32 to vector<1x32xf32>
      %106 = arith.divf %104, %105 : vector<1x32xf32>
      %c0_41 = arith.constant 0 : index
      %c0_42 = arith.constant 0 : index
      %107 = vector.load %arg2[%c0_41, %c0_42] : memref<1x32xf32, #tpu.memory_space<vmem>>, vector<1x32xf32>
      %cst_43 = arith.constant 9.99999974E-6 : f32
      %108 = vector.broadcast %cst_43 : f32 to vector<1x32xf32>
      %109 = arith.addf %106, %108 : vector<1x32xf32>
      %110 = math.rsqrt %109 : vector<1x32xf32>
      %111 = arith.mulf %107, %110 : vector<1x32xf32>
      %cst_44 = arith.constant dense<0.000000e+00> : vector<1x448xf32>
      %112 = tpu.matmul %111, %89, %cst_44 {dimension_numbers = #tpu.dot_dimension_numbers<[1], [0], [0], [1], [0, 0, 1, 1], [], []>} : vector<1x32xf32>, vector<32x448xf32>, vector<1x448xf32> -> vector<1x448xf32>
      %c0_45 = arith.constant 0 : index
      %c0_46 = arith.constant 0 : index
      %113 = vector.load %arg3[%c0_45, %c0_46] : memref<1x32xf32, #tpu.memory_space<vmem>>, vector<1x32xf32>
      %cst_47 = arith.constant dense<0.000000e+00> : vector<1x448xf32>
      %114 = tpu.matmul %113, %89, %cst_47 {dimension_numbers = #tpu.dot_dimension_numbers<[1], [0], [0], [1], [0, 0, 1, 1], [], []>} : vector<1x32xf32>, vector<32x448xf32>, vector<1x448xf32> -> vector<1x448xf32>
      %115 = tpu.iota {dimensions = array<i32: 0>} : vector<7x14xi32>
      %116 = tpu.iota {dimensions = array<i32: 1>} : vector<7x14xi32>
      %c2_i32 = arith.constant 2 : i32
      %117 = vector.broadcast %c2_i32 : i32 to vector<7x14xi32>
      %118 = arith.muli %117, %115 : vector<7x14xi32>
      %119 = arith.cmpi eq, %116, %118 : vector<7x14xi32>
      %120 = arith.extui %119 : vector<7x14xi1> to vector<7x14xi32>
      %121 = arith.sitofp %120 : vector<7x14xi32> to vector<7x14xf32>
      %c2_i32_48 = arith.constant 2 : i32
      %122 = vector.broadcast %c2_i32_48 : i32 to vector<7x14xi32>
      %123 = arith.muli %122, %115 : vector<7x14xi32>
      %c1_i32_49 = arith.constant 1 : i32
      %124 = vector.broadcast %c1_i32_49 : i32 to vector<7x14xi32>
      %125 = arith.addi %123, %124 : vector<7x14xi32>
      %126 = arith.cmpi eq, %116, %125 : vector<7x14xi32>
      %127 = arith.extui %126 : vector<7x14xi1> to vector<7x14xi32>
      %128 = arith.sitofp %127 : vector<7x14xi32> to vector<7x14xf32>
      %129 = vector.extract_strided_slice %99 {offsets = [0, 0, 0], sizes = [1, 14, 448], strides = [1, 1, 1]} : vector<2x14x448xf32> to vector<1x14x448xf32>
      %130 = vector.shape_cast %129 : vector<1x14x448xf32> to vector<14x448xf32>
      %131 = vector.broadcast %112 : vector<1x448xf32> to vector<14x448xf32>
      %132 = arith.mulf %130, %131 : vector<14x448xf32>
      %133 = vector.broadcast %114 : vector<1x448xf32> to vector<14x448xf32>
      %134 = arith.addf %132, %133 : vector<14x448xf32>
      %135 = vector.extract_strided_slice %134 {offsets = [0, 0], sizes = [14, 224], strides = [1, 1]} : vector<14x448xf32> to vector<14x224xf32>
      %136 = vector.extract_strided_slice %134 {offsets = [0, 224], sizes = [14, 224], strides = [1, 1]} : vector<14x448xf32> to vector<14x224xf32>
      %137 = arith.maximumf %135, %136 : vector<14x224xf32>
      %cst_50 = arith.constant dense<0.000000e+00> : vector<7x224xf32>
      %138 = tpu.matmul %121, %137, %cst_50 {dimension_numbers = #tpu.dot_dimension_numbers<[1], [0], [0], [1], [0, 0, 1, 1], [], []>} : vector<7x14xf32>, vector<14x224xf32>, vector<7x224xf32> -> vector<7x224xf32>
      %cst_51 = arith.constant dense<0.000000e+00> : vector<7x224xf32>
      %139 = tpu.matmul %128, %137, %cst_51 {dimension_numbers = #tpu.dot_dimension_numbers<[1], [0], [0], [1], [0, 0, 1, 1], [], []>} : vector<7x14xf32>, vector<14x224xf32>, vector<7x224xf32> -> vector<7x224xf32>
      %140 = arith.maximumf %138, %139 : vector<7x224xf32>
      %141 = arith.truncf %140 : vector<7x224xf32> to vector<7x224xbf16>
      %c0_52 = arith.constant 0 : index
      %c0_53 = arith.constant 0 : index
      %c0_54 = arith.constant 0 : index
      %142 = vector.load %arg11[%c0_52, %c0_53, %c0_54] : memref<2x7x224xbf16, #tpu.memory_space<vmem>>, vector<1x7x224xbf16>
      %143 = vector.shape_cast %142 : vector<1x7x224xbf16> to vector<7x224xbf16>
      %144 = vector.shape_cast %141 : vector<7x224xbf16> to vector<1x7x224xbf16>
      tpu.vector_store %arg11[%c0_52, %c0_53, %c0_54], %144 {strides = array<i32>} : memref<2x7x224xbf16, #tpu.memory_space<vmem>>, vector<1x7x224xbf16>,
      %145 = vector.extract_strided_slice %99 {offsets = [1, 0, 0], sizes = [1, 14, 448], strides = [1, 1, 1]} : vector<2x14x448xf32> to vector<1x14x448xf32>
      %146 = vector.shape_cast %145 : vector<1x14x448xf32> to vector<14x448xf32>
      %147 = vector.broadcast %112 : vector<1x448xf32> to vector<14x448xf32>
      %148 = arith.mulf %146, %147 : vector<14x448xf32>
      %149 = vector.broadcast %114 : vector<1x448xf32> to vector<14x448xf32>
      %150 = arith.addf %148, %149 : vector<14x448xf32>
      %151 = vector.extract_strided_slice %150 {offsets = [0, 0], sizes = [14, 224], strides = [1, 1]} : vector<14x448xf32> to vector<14x224xf32>
      %152 = vector.extract_strided_slice %150 {offsets = [0, 224], sizes = [14, 224], strides = [1, 1]} : vector<14x448xf32> to vector<14x224xf32>
      %153 = arith.maximumf %151, %152 : vector<14x224xf32>
      %cst_55 = arith.constant dense<0.000000e+00> : vector<7x224xf32>
      %154 = tpu.matmul %121, %153, %cst_55 {dimension_numbers = #tpu.dot_dimension_numbers<[1], [0], [0], [1], [0, 0, 1, 1], [], []>} : vector<7x14xf32>, vector<14x224xf32>, vector<7x224xf32> -> vector<7x224xf32>
      %cst_56 = arith.constant dense<0.000000e+00> : vector<7x224xf32>
      %155 = tpu.matmul %128, %153, %cst_56 {dimension_numbers = #tpu.dot_dimension_numbers<[1], [0], [0], [1], [0, 0, 1, 1], [], []>} : vector<7x14xf32>, vector<14x224xf32>, vector<7x224xf32> -> vector<7x224xf32>
      %156 = arith.maximumf %154, %155 : vector<7x224xf32>
      %157 = arith.truncf %156 : vector<7x224xf32> to vector<7x224xbf16>
      %c1_57 = arith.constant 1 : index
      %c0_58 = arith.constant 0 : index
      %c0_59 = arith.constant 0 : index
      %158 = vector.load %arg11[%c1_57, %c0_58, %c0_59] : memref<2x7x224xbf16, #tpu.memory_space<vmem>>, vector<1x7x224xbf16>
      %159 = vector.shape_cast %158 : vector<1x7x224xbf16> to vector<7x224xbf16>
      %160 = vector.shape_cast %157 : vector<7x224xbf16> to vector<1x7x224xbf16>
      tpu.vector_store %arg11[%c1_57, %c0_58, %c0_59], %160 {strides = array<i32>} : memref<2x7x224xbf16, #tpu.memory_space<vmem>>, vector<1x7x224xbf16>,
      %cst_60 = arith.constant 0.000000e+00 : f32
      %161 = vector.broadcast %cst_60 : f32 to vector<2x512xf32>
      %c0_61 = arith.constant 0 : index
      %c0_62 = arith.constant 0 : index
      %162 = vector.load %arg12[%c0_61, %c0_62] : memref<2x512xf32, #tpu.memory_space<vmem>>, vector<2x512xf32>
      tpu.vector_store %arg12[%c0_61, %c0_62], %161 {strides = array<i32>} : memref<2x512xf32, #tpu.memory_space<vmem>>, vector<2x512xf32>,
    } else {
    }
    %c0 = arith.constant 0 : index
    %c0_1 = arith.constant 0 : index
    %c0_2 = arith.constant 0 : index
    %3 = vector.load %arg4[%c0, %c0_1, %c0_2] : memref<1x224x512xbf16, #tpu.memory_space<vmem>>, vector<1x224x512xbf16>
    %4 = vector.shape_cast %3 : vector<1x224x512xbf16> to vector<224x512xbf16>
    %5 = tpu.iota {dimensions = array<i32: 1>} : vector<1x7xi32>
    %6 = vector.broadcast %arg0 : i32 to vector<1x7xi32>
    %7 = arith.cmpi eq, %5, %6 : vector<1x7xi32>
    %8 = arith.extui %7 : vector<1x7xi1> to vector<1x7xi32>
    %9 = arith.sitofp %8 : vector<1x7xi32> to vector<1x7xf32>
    %10 = arith.truncf %9 : vector<1x7xf32> to vector<1x7xbf16>
    %cst = arith.constant 0.000000e+00 : f32
    %11 = vector.broadcast %cst : f32 to vector<2x512xf32>
    %c0_3 = arith.constant 0 : index
    %c0_4 = arith.constant 0 : index
    %c0_5 = arith.constant 0 : index
    %12 = vector.load %arg11[%c0_3, %c0_4, %c0_5] : memref<2x7x224xbf16, #tpu.memory_space<vmem>>, vector<1x7x224xbf16>
    %13 = vector.shape_cast %12 : vector<1x7x224xbf16> to vector<7x224xbf16>
    %cst_6 = arith.constant dense<0.000000e+00> : vector<1x224xf32>
    %14 = tpu.matmul %10, %13, %cst_6 {dimension_numbers = #tpu.dot_dimension_numbers<[1], [0], [0], [1], [0, 0, 1, 1], [], []>} : vector<1x7xbf16>, vector<7x224xbf16>, vector<1x224xf32> -> vector<1x224xf32>
    %15 = arith.truncf %14 : vector<1x224xf32> to vector<1x224xbf16>
    %cst_7 = arith.constant dense<0.000000e+00> : vector<1x512xf32>
    %16 = tpu.matmul %15, %4, %cst_7 {dimension_numbers = #tpu.dot_dimension_numbers<[1], [0], [0], [1], [0, 0, 1, 1], [], []>} : vector<1x224xbf16>, vector<224x512xbf16>, vector<1x512xf32> -> vector<1x512xf32>
    %17 = tpu.iota {dimensions = array<i32: 0>} : vector<2x1xi32>
    %c0_i32_8 = arith.constant 0 : i32
    %18 = vector.broadcast %c0_i32_8 : i32 to vector<2x1xi32>
    %19 = arith.cmpi eq, %17, %18 : vector<2x1xi32>
    %20 = arith.extui %19 : vector<2x1xi1> to vector<2x1xi32>
    %21 = arith.sitofp %20 : vector<2x1xi32> to vector<2x1xf32>
    %22 = vector.broadcast %21 : vector<2x1xf32> to vector<2x512xf32>
    %23 = vector.broadcast %16 : vector<1x512xf32> to vector<2x512xf32>
    %24 = arith.mulf %22, %23 : vector<2x512xf32>
    %25 = arith.addf %11, %24 : vector<2x512xf32>
    %c1 = arith.constant 1 : index
    %c0_9 = arith.constant 0 : index
    %c0_10 = arith.constant 0 : index
    %26 = vector.load %arg11[%c1, %c0_9, %c0_10] : memref<2x7x224xbf16, #tpu.memory_space<vmem>>, vector<1x7x224xbf16>
    %27 = vector.shape_cast %26 : vector<1x7x224xbf16> to vector<7x224xbf16>
    %cst_11 = arith.constant dense<0.000000e+00> : vector<1x224xf32>
    %28 = tpu.matmul %10, %27, %cst_11 {dimension_numbers = #tpu.dot_dimension_numbers<[1], [0], [0], [1], [0, 0, 1, 1], [], []>} : vector<1x7xbf16>, vector<7x224xbf16>, vector<1x224xf32> -> vector<1x224xf32>
    %29 = arith.truncf %28 : vector<1x224xf32> to vector<1x224xbf16>
    %cst_12 = arith.constant dense<0.000000e+00> : vector<1x512xf32>
    %30 = tpu.matmul %29, %4, %cst_12 {dimension_numbers = #tpu.dot_dimension_numbers<[1], [0], [0], [1], [0, 0, 1, 1], [], []>} : vector<1x224xbf16>, vector<224x512xbf16>, vector<1x512xf32> -> vector<1x512xf32>
    %31 = tpu.iota {dimensions = array<i32: 0>} : vector<2x1xi32>
    %c1_i32 = arith.constant 1 : i32
    %32 = vector.broadcast %c1_i32 : i32 to vector<2x1xi32>
    %33 = arith.cmpi eq, %31, %32 : vector<2x1xi32>
    %34 = arith.extui %33 : vector<2x1xi1> to vector<2x1xi32>
    %35 = arith.sitofp %34 : vector<2x1xi32> to vector<2x1xf32>
    %36 = vector.broadcast %35 : vector<2x1xf32> to vector<2x512xf32>
    %37 = vector.broadcast %30 : vector<1x512xf32> to vector<2x512xf32>
    %38 = arith.mulf %36, %37 : vector<2x512xf32>
    %39 = arith.addf %25, %38 : vector<2x512xf32>
    %c0_13 = arith.constant 0 : index
    %c0_14 = arith.constant 0 : index
    %40 = vector.load %arg12[%c0_13, %c0_14] : memref<2x512xf32, #tpu.memory_space<vmem>>, vector<2x512xf32>
    %41 = arith.addf %40, %39 : vector<2x512xf32>
    %c0_15 = arith.constant 0 : index
    %c0_16 = arith.constant 0 : index
    %42 = vector.load %arg12[%c0_15, %c0_16] : memref<2x512xf32, #tpu.memory_space<vmem>>, vector<2x512xf32>
    tpu.vector_store %arg12[%c0_15, %c0_16], %41 {strides = array<i32>} : memref<2x512xf32, #tpu.memory_space<vmem>>, vector<2x512xf32>,
    %c6_i32 = arith.constant 6 : i32
    %43 = arith.cmpi eq, %arg0, %c6_i32 : i32
    %44 = arith.extui %43 : i1 to i32
    %c0_i32_17 = arith.constant 0 : i32
    %45 = arith.cmpi ne, %44, %c0_i32_17 : i32
    scf.if %45 {
      %c0_18 = arith.constant 0 : index
      %c0_19 = arith.constant 0 : index
      %46 = vector.load %arg12[%c0_18, %c0_19] : memref<2x512xf32, #tpu.memory_space<vmem>>, vector<2x512xf32>
      %c0_20 = arith.constant 0 : index
      %c0_21 = arith.constant 0 : index
      %47 = vector.load %arg5[%c0_20, %c0_21] : memref<1x512xf32, #tpu.memory_space<vmem>>, vector<1x512xf32>
      %48 = vector.broadcast %47 : vector<1x512xf32> to vector<2x512xf32>
      %49 = arith.addf %46, %48 : vector<2x512xf32>
      %cst_22 = arith.constant 0.000000e+00 : f32
      %50 = vector.broadcast %cst_22 : f32 to vector<2x512xf32>
      %51 = arith.maximumf %49, %50 : vector<2x512xf32>
      %52 = arith.truncf %51 : vector<2x512xf32> to vector<2x512xbf16>
      %c0_23 = arith.constant 0 : index
      %c0_24 = arith.constant 0 : index
      %53 = vector.load %arg6[%c0_23, %c0_24] : memref<512x128xbf16, #tpu.memory_space<vmem>>, vector<512x128xbf16>
      %cst_25 = arith.constant dense<0.000000e+00> : vector<2x128xf32>
      %54 = tpu.matmul %52, %53, %cst_25 {dimension_numbers = #tpu.dot_dimension_numbers<[1], [0], [0], [1], [0, 0, 1, 1], [], []>} : vector<2x512xbf16>, vector<512x128xbf16>, vector<2x128xf32> -> vector<2x128xf32>
      %c0_26 = arith.constant 0 : index
      %c0_27 = arith.constant 0 : index
      %55 = vector.load %arg7[%c0_26, %c0_27] : memref<1x128xf32, #tpu.memory_space<vmem>>, vector<1x128xf32>
      %56 = vector.broadcast %55 : vector<1x128xf32> to vector<2x128xf32>
      %57 = arith.addf %54, %56 : vector<2x128xf32>
      %cst_28 = arith.constant 0.000000e+00 : f32
      %58 = vector.broadcast %cst_28 : f32 to vector<2x128xf32>
      %59 = arith.maximumf %57, %58 : vector<2x128xf32>
      %60 = arith.truncf %59 : vector<2x128xf32> to vector<2x128xbf16>
      %c0_29 = arith.constant 0 : index
      %c0_30 = arith.constant 0 : index
      %61 = vector.load %arg8[%c0_29, %c0_30] : memref<128x128xbf16, #tpu.memory_space<vmem>>, vector<128x128xbf16>
      %cst_31 = arith.constant dense<0.000000e+00> : vector<2x128xf32>
      %62 = tpu.matmul %60, %61, %cst_31 {dimension_numbers = #tpu.dot_dimension_numbers<[1], [0], [0], [1], [0, 0, 1, 1], [], []>} : vector<2x128xbf16>, vector<128x128xbf16>, vector<2x128xf32> -> vector<2x128xf32>
      %c0_32 = arith.constant 0 : index
      %c0_33 = arith.constant 0 : index
      %63 = vector.load %arg9[%c0_32, %c0_33] : memref<1x128xf32, #tpu.memory_space<vmem>>, vector<1x128xf32>
      %64 = vector.broadcast %63 : vector<1x128xf32> to vector<2x128xf32>
      %65 = arith.addf %62, %64 : vector<2x128xf32>
      %c0_34 = arith.constant 0 : index
      %c0_35 = arith.constant 0 : index
      %66 = vector.load %arg10[%c0_34, %c0_35] : memref<2x128xf32, #tpu.memory_space<vmem>>, vector<2x128xf32>
      tpu.vector_store %arg10[%c0_34, %c0_35], %65 {strides = array<i32>} : memref<2x128xf32, #tpu.memory_space<vmem>>, vector<2x128xf32>,
    } else {
    }
    return
  }
  func.func @transform_0(%arg0: i32) -> (i32, i32, i32) {
    %c0_i32 = arith.constant 0 : i32
    %c0_i32_0 = arith.constant 0 : i32
    %c0_i32_1 = arith.constant 0 : i32
    %c0_i32_2 = arith.constant 0 : i32
    return %c0_i32, %c0_i32_0, %c0_i32_1 : i32, i32, i32
  }
  func.func @transform_1(%arg0: i32) -> (i32, i32) {
    %c0_i32 = arith.constant 0 : i32
    %c0_i32_0 = arith.constant 0 : i32
    %c0_i32_1 = arith.constant 0 : i32
    return %c0_i32, %c0_i32_0 : i32, i32
  }
  func.func @transform_2(%arg0: i32) -> (i32, i32) {
    %c0_i32 = arith.constant 0 : i32
    %c0_i32_0 = arith.constant 0 : i32
    %c0_i32_1 = arith.constant 0 : i32
    return %c0_i32, %c0_i32_0 : i32, i32
  }
  func.func @transform_3(%arg0: i32) -> (i32, i32, i32) {
    %c0_i32 = arith.constant 0 : i32
    %c0_i32_0 = arith.constant 0 : i32
    %c0_i32_1 = arith.constant 0 : i32
    return %arg0, %c0_i32, %c0_i32_0 : i32, i32, i32
  }
  func.func @transform_4(%arg0: i32) -> (i32, i32) {
    %c0_i32 = arith.constant 0 : i32
    %c0_i32_0 = arith.constant 0 : i32
    %c0_i32_1 = arith.constant 0 : i32
    return %c0_i32, %c0_i32_0 : i32, i32
  }
  func.func @transform_5(%arg0: i32) -> (i32, i32) {
    %c0_i32 = arith.constant 0 : i32
    %c0_i32_0 = arith.constant 0 : i32
    %c0_i32_1 = arith.constant 0 : i32
    return %c0_i32, %c0_i32_0 : i32, i32
  }
  func.func @transform_6(%arg0: i32) -> (i32, i32) {
    %c0_i32 = arith.constant 0 : i32
    %c0_i32_0 = arith.constant 0 : i32
    %c0_i32_1 = arith.constant 0 : i32
    return %c0_i32, %c0_i32_0 : i32, i32
  }
  func.func @transform_7(%arg0: i32) -> (i32, i32) {
    %c0_i32 = arith.constant 0 : i32
    %c0_i32_0 = arith.constant 0 : i32
    %c0_i32_1 = arith.constant 0 : i32
    return %c0_i32, %c0_i32_0 : i32, i32
  }
  func.func @transform_8(%arg0: i32) -> (i32, i32) {
    %c0_i32 = arith.constant 0 : i32
    %c0_i32_0 = arith.constant 0 : i32
    %c0_i32_1 = arith.constant 0 : i32
    return %c0_i32, %c0_i32_0 : i32, i32
  }
  func.func @transform_9(%arg0: i32) -> (i32, i32) {
    %c0_i32 = arith.constant 0 : i32
    %c0_i32_0 = arith.constant 0 : i32
    %c0_i32_1 = arith.constant 0 : i32
    return %c0_i32, %c0_i32_0 : i32, i32
  }
}

</mosaic_0001>

<bundles_post_ra>
// kernel: net_forward.3
= control target key start
LH: loop header
LB: loop body
LE: loop exit
PB: predicated region body
PF: predicated region fallthrough
CT: control target
= control target key end

     0   :  { %14 = vsyncpa [#allocation5], 0  ;;  %s5003_s30 = smov 0   ;;  %s6777_s0 = inlined_call_operand.vmem [shape: bf16[2,14,448], index: 0, kind: input, shape index: {}]   ;;  %s6778_s1 = inlined_call_operand.vmem [shape: f32[1,32], index: 1, kind: input, shape index: {}]   ;;  %s6779_s2 = inlined_call_operand.vmem [shape: f32[1,32], index: 2, kind: input, shape index: {}]   ;;  %s6780_s3 = inlined_call_operand.vmem [shape: bf16[7,224,512], index: 3, kind: input, shape index: {}]   ;;  %s6781_s4 = inlined_call_operand.vmem [shape: f32[1,512], index: 4, kind: input, shape index: {}]   ;;  %s6782_s5 = inlined_call_operand.vmem [shape: bf16[512,128], index: 5, kind: input, shape index: {}]   ;;  %s6783_s6 = inlined_call_operand.vmem [shape: f32[1,128], index: 6, kind: input, shape index: {}]   ;;  %s6784_s7 = inlined_call_operand.vmem [shape: bf16[128,128], index: 7, kind: input, shape index: {}]   ;;  %s6785_s8 = inlined_call_operand.vmem [shape: f32[1,128], index: 8, kind: input, shape index: {}]   ;;  %s6786_s9 = inlined_call_operand.hbm [shape: f32[2,128], index: 9, kind: output, shape index: {}]  }
   0x1 LB: > { %s5009_s10 = sadd.s32 4294967295, %s4939_s30   ;;  %p3988_p0 = scmp.ge.s32.totalorder %s4939_s30, 1  ;;  %s4939_s30 = sphi %s5003_s30, %s20_s30  }
   0x2   : > { %p283_p1 = scmp.lt.s32.totalorder %s4939_s30, 8 }
   0x4   : > { %p284_p2 = pnand %p3988_p0, %p283_p1 }
   0x6   : > { %287 = sbr.rel (%p284_p2) target bundleno = 2559 (0x9ff), region = 56 }
   0xd   : > { %p314_p3 = scmp.lt.s32.totalorder %s5009_s10, 6  ;;  %p3990_p4 = scmp.ne.s32.totalorder %s5009_s10, 0 }
   0xf   : > { %s315_s11 = scalar_select %p314_p3, %s5009_s10, 6 }
  0x10   : > { %323 = sbr.rel (%p3990_p4) target bundleno = 1399 (0x577), region = 60 }
  0x11   : > { %s4716_s12 = smul.u32 448, %s315_s11 }
  0x13   : > { %s5018_s15 = scalar_lea.vmem %s6780_s3, %s4716_s12 }
  0x17   : > { %v348_v0 = vlaneseq  ;;  %v5024_v1 = vld [vmem:[%s6777_s0] sm:$0xff]  ;;  %v5029_v2 = vld [vmem:[%s6777_s0 + $0x10] sm:$0x77]  ;;  %v6825_v3 = vmov 0.0|0.0   ;;  %v5048_v9 = vld [vmem:[%s6777_s0 + $0x8] sm:$0xff]  ;;  %v6924_v36 = vmov 0 }
  0x18   : > { %6915 = vst [vmem:[#allocation7_spill] sm:$0xff] %v5024_v1  ;;  %6916 = vst [vmem:[#allocation8_spill] sm:$0xff] %v5029_v2  ;;  %4540 = vmatprep.subr.bf16.mxu1 %v6825_v3  ;;  %v5035_v4 = vld [vmem:[%s6777_s0 + $0x20] sm:$0xff]  ;;  %v5040_v5 = vld [vmem:[%s6777_s0 + $0x30] sm:$0x77]  ;;  %v6928_v38 = vmov 0 }
  0x19   : > { %6917 = vst [vmem:[#allocation9_spill] sm:$0xff] %v5035_v4  ;;  %6918 = vst [vmem:[#allocation10_spill] sm:$0xff] %v5040_v5  ;;  %v5050_v10 = vshrl.u32 %v348_v0, 7  ;;  %v5052_v11 = vand.u32 127, %v348_v0  ;;  %v6930_v39 = vmov 0  ;;  %v6932_v40 = vmov 0 }
  0x1a   : > { %6919 = vst [vmem:[#allocation11_spill] sm:$0xff] %v5048_v9  ;;  %v6934_v41 = vmov 0  ;;  %v6850_v42 = vmov 1.0|1.0   ;;  %v6936_v52 = vmov 0  ;;  %v6938_v59 = vmov 0 }
  0x1b   : > { %v381_v18 = vadd.s32 256, %v5050_v10  ;;  %v382_v19 = vadd.s32 264, %v5050_v10  ;;  %v383_v20 = vadd.s32 272, %v5050_v10  ;;  %v384_v21 = vadd.s32 280, %v5050_v10  ;;  %s4944_s18 = smov 32  }
  0x1c   : > { %v385_v22 = vadd.s32 288, %v5050_v10  ;;  %v386_v23 = vadd.s32 296, %v5050_v10  ;;  %v365_v24 = vadd.s32 128, %v5050_v10  ;;  %v366_v25 = vadd.s32 136, %v5050_v10 }
  0x1d   : > { %v633_v26 = vand.u32 31, %v381_v18  ;;  %v640_v27 = vand.u32 31, %v382_v19  ;;  %v647_v28 = vand.u32 31, %v383_v20  ;;  %v654_v29 = vand.u32 31, %v384_v21 }
  0x1e   : > { %v661_v30 = vand.u32 31, %v385_v22  ;;  %v668_v31 = vand.u32 31, %v386_v23  ;;  %v521_v32 = vand.u32 31, %v365_v24  ;;  %v528_v33 = vand.u32 31, %v366_v25 }
  0x1f   : > { %vm5069_vm0 = vcmp.eq.s32.totalorder %v633_v26, %v5052_v11  ;;  %vm5074_vm1 = vcmp.eq.s32.totalorder %v640_v27, %v5052_v11  ;;  %vm5079_vm2 = vcmp.eq.s32.totalorder %v647_v28, %v5052_v11  ;;  %vm5084_vm3 = vcmp.eq.s32.totalorder %v654_v29, %v5052_v11 }
  0x20   : > { %v6925_v36 = vsel %vm5079_vm2, 4294967295, %v6924_v36  ;;  %vm6789_vm4 = vmpackc.low %vm5074_vm1, %vm5069_vm0  ;;  %vm5093_vm5 = vcmp.eq.s32.totalorder %v661_v30, %v5052_v11  ;;  %vm5098_vm6 = vcmp.eq.s32.totalorder %v668_v31, %v5052_v11  ;;  %vm5103_vm7 = vcmp.eq.s32.totalorder %v521_v32, %v5052_v11 }
  0x21   : > { %v6929_v38 = vsel %vm5093_vm5, 4294967295, %v6928_v38  ;;  %v6931_v39 = vsel %vm5098_vm6, 4294967295, %v6930_v39  ;;  %v6933_v40 = vsel %vm5103_vm7, 4294967295, %v6932_v40  ;;  %vm5108_vm8 = vcmp.eq.s32.totalorder %v528_v33, %v5052_v11  ;;  %4542 = vmatpush1.bf16.msk.msra.mxu1 %vm6789_vm4, %v6850_v42  ;;  %vm6788_vm9 = vmpackc.low %vm5084_vm3, %vm5079_vm2 }
  0x22   : > { %v6935_v41 = vsel %vm5108_vm8, 4294967295, %v6934_v41  ;;  %v5119_v43 = vadd.s32 8, %v5050_v10  ;;  %v409_v44 = vand.u32 31, %v5050_v10  ;;  %v387_v45 = vadd.s32 304, %v5050_v10  ;;  %4543 = vmatprep.subr.bf16.mxu1 %v6825_v3  ;;  %vm6787_vm10 = vmpackc.low %vm5108_vm8, %vm5103_vm7 }
  0x23   : > { %v388_v46 = vadd.s32 312, %v5050_v10  ;;  %v367_v47 = vadd.s32 144, %v5050_v10  ;;  %v368_v48 = vadd.s32 152, %v5050_v10  ;;  %v5132_v49 = vadd.s32 16, %v5050_v10  ;;  %4509 = vmatprep.subr.msk.bf16.mxu0 %vm6787_vm10, %v6850_v42 }
  0x24   : > { %v5135_v50 = vadd.s32 24, %v5050_v10  ;;  %v416_v51 = vand.u32 31, %v5119_v43  ;;  %vm5143_vm11 = vcmp.eq.s32.totalorder %v409_v44, %v5052_v11  ;;  %v675_v53 = vand.u32 31, %v387_v45 }
  0x25   : > { %v6937_v52 = vsel %vm5143_vm11, 4294967295, %v6936_v52  ;;  %v682_v54 = vand.u32 31, %v388_v46  ;;  %v535_v55 = vand.u32 31, %v367_v47  ;;  %v542_v56 = vand.u32 31, %v368_v48  ;;  %4545 = vmatpush1.bf16.msk.msra.mxu1 %vm6788_vm9, %v6850_v42 }
  0x26   : > { %v423_v57 = vand.u32 31, %v5132_v49  ;;  %v430_v58 = vand.u32 31, %v5135_v50  ;;  %vm5166_vm13 = vcmp.eq.s32.totalorder %v416_v51, %v5052_v11  ;;  %vm5171_vm14 = vcmp.eq.s32.totalorder %v675_v53, %v5052_v11  ;;  %4546 = vmatprep.subr.bf16.mxu1 %v6825_v3 }
  0x27   : > { %v6939_v59 = vsel %vm5166_vm13, 4294967295, %v6938_v59  ;;  %v6940_v60 = vmov 0  ;;  %vm5176_vm15 = vcmp.eq.s32.totalorder %v682_v54, %v5052_v11  ;;  %v6942_v61 = vmov 0  ;;  %vm6792_vm10 = vmpackc.low %vm5166_vm13, %vm5143_vm11 }
  0x28   : > { %v6941_v60 = vsel %vm5171_vm14, 4294967295, %v6940_v60  ;;  %v6943_v61 = vsel %vm5176_vm15, 4294967295, %v6942_v61  ;;  %v389_v62 = vadd.s32 320, %v5050_v10  ;;  %vm5187_vm9 = vcmp.eq.s32.totalorder %v535_v55, %v5052_v11  ;;  %4511 = vmatpush3.bf16.msk.msra.mxu0 %vm6792_vm10, %v6850_v42  ;;  %vm6952_vm10 = vmpackc.low %vm5098_vm6, %vm5093_vm5 }
  0x29   : > { %v6944_v63 = vmov 0  ;;  %vm5192_vm4 = vcmp.eq.s32.totalorder %v542_v56, %v5052_v11  ;;  %v6946_v0 = vmov 0  ;;  %vm5197_vm12 = vcmp.eq.s32.totalorder %v423_v57, %v5052_v11  ;;  %4548 = vmatpush1.bf16.msk.msra.mxu1 %vm6952_vm10, %v6850_v42 }
  0x2a   : > { %v6945_v63 = vsel %vm5187_vm9, 4294967295, %v6944_v63  ;;  %v6947_v0 = vsel %vm5192_vm4, 4294967295, %v6946_v0  ;;  %v6948_v18 = vmov 0  ;;  %vm5202_vm7 = vcmp.eq.s32.totalorder %v430_v58, %v5052_v11  ;;  %vm6795_vm8 = vmpackc.low %vm5192_vm4, %vm5187_vm9  ;;  %4549 = vmatprep.subr.bf16.mxu1 %v6825_v3 }
  0x2b   : > { %v6949_v18 = vsel %vm5197_vm12, 4294967295, %v6948_v18  ;;  %v6950_v19 = vmov 0  ;;  %v390_v20 = vadd.s32 328, %v5050_v10  ;;  %v689_v21 = vand.u32 31, %v389_v62  ;;  %4513 = vmatprep.subr.msk.bf16.mxu0 %vm6795_vm8, %v6850_v42  ;;  %vm6797_vm11 = vmpackc.low %vm5202_vm7, %vm5197_vm12 }
  0x2c   : > { %v6951_v19 = vsel %vm5202_vm7, 4294967295, %v6950_v19  ;;  %v369_v22 = vadd.s32 160, %v5050_v10  ;;  %v370_v23 = vadd.s32 168, %v5050_v10  ;;  %v353_v24 = vadd.s32 32, %v5050_v10  ;;  %4515 = vmatpush3.bf16.msk.msra.mxu0 %vm6797_vm11, %v6850_v42  ;;  %vm6972_vm11 = vmpackc.low %vm5176_vm15, %vm5171_vm14 }
  0x2d   : > { %v354_v25 = vadd.s32 40, %v5050_v10  ;;  %v391_v26 = vadd.s32 336, %v5050_v10  ;;  %v392_v27 = vadd.s32 344, %v5050_v10  ;;  %v696_v28 = vand.u32 31, %v390_v20  ;;  %4551 = vmatpush1.bf16.msk.msra.mxu1 %vm6972_vm11, %v6850_v42 }
  0x2e   : > { %vm5240_vm13 = vcmp.eq.s32.totalorder %v689_v21, %v5052_v11  ;;  %v6953_v29 = vmov 0  ;;  %v549_v30 = vand.u32 31, %v369_v22  ;;  %v556_v31 = vand.u32 31, %v370_v23  ;;  %4552 = vmatprep.subr.bf16.mxu1 %v6825_v3 }
  0x2f   : > { %v6954_v29 = vsel %vm5240_vm13, 4294967295, %v6953_v29  ;;  %v437_v32 = vand.u32 31, %v353_v24  ;;  %v444_v33 = vand.u32 31, %v354_v25  ;;  %v703_v44 = vand.u32 31, %v391_v26 }
  0x30   : > { %v710_v45 = vand.u32 31, %v392_v27  ;;  %vm5256_vm8 = vcmp.eq.s32.totalorder %v696_v28, %v5052_v11  ;;  %v6955_v46 = vmov 0  ;;  %vm5261_vm9 = vcmp.eq.s32.totalorder %v549_v30, %v5052_v11 }
  0x31   : > { %v6956_v46 = vsel %vm5256_vm8, 4294967295, %v6955_v46  ;;  %v6957_v47 = vmov 0  ;;  %vm5266_vm10 = vcmp.eq.s32.totalorder %v556_v31, %v5052_v11  ;;  %v6960_v48 = vmov 0 }
  0x32   : > { %v6958_v47 = vsel %vm5261_vm9, 4294967295, %v6957_v47  ;;  %v6961_v48 = vsel %vm5266_vm10, 4294967295, %v6960_v48  ;;  %v371_v51 = vadd.s32 176, %v5050_v10  ;;  %vm5276_vm12 = vcmp.eq.s32.totalorder %v437_v32, %v5052_v11  ;;  %vm6803_vm6 = vmpackc.low %vm5266_vm10, %vm5261_vm9 }
  0x33   : > { %6959 = vst [vmem:[#allocation12_spill] sm:$0xff] %v6958_v47  ;;  %v6962_v53 = vmov 0  ;;  %vm5281_vm7 = vcmp.eq.s32.totalorder %v444_v33, %v5052_v11  ;;  %v6965_v54 = vmov 0  ;;  %vm5286_vm4 = vcmp.eq.s32.totalorder %v703_v44, %v5052_v11  ;;  %4517 = vmatprep.subr.msk.bf16.mxu0 %vm6803_vm6, %v6850_v42  ;;  %vm6976_vm9 = vmpackc.low %vm5256_vm8, %vm5240_vm13 }
  0x34   : > { %v6963_v53 = vsel %vm5276_vm12, 4294967295, %v6962_v53  ;;  %v6966_v54 = vsel %vm5281_vm7, 4294967295, %v6965_v54  ;;  %v6968_v55 = vmov 0  ;;  %vm5291_vm5 = vcmp.eq.s32.totalorder %v710_v45, %v5052_v11  ;;  %vm6805_vm11 = vmpackc.low %vm5281_vm7, %vm5276_vm12  ;;  %4554 = vmatpush1.bf16.msk.msra.mxu1 %vm6976_vm9, %v6850_v42 }
  0x35   : > { %6964 = vst [vmem:[#allocation13_spill] sm:$0xff] %v6963_v53  ;;  %6967 = vst [vmem:[#allocation14_spill] sm:$0xff] %v6966_v54  ;;  %v6969_v55 = vsel %vm5286_vm4, 4294967295, %v6968_v55  ;;  %v6970_v56 = vmov 0  ;;  %v372_v57 = vadd.s32 184, %v5050_v10  ;;  %v563_v58 = vand.u32 31, %v371_v51  ;;  %4519 = vmatpush3.bf16.msk.msra.mxu0 %vm6805_vm11, %v6850_v42  ;;  %4555 = vmatprep.subr.bf16.mxu1 %v6825_v3 }
  0x36   : > { %v6971_v56 = vsel %vm5291_vm5, 4294967295, %v6970_v56  ;;  %v355_v62 = vadd.s32 48, %v5050_v10  ;;  %v356_v20 = vadd.s32 56, %v5050_v10  ;;  %v393_v21 = vadd.s32 352, %v5050_v10 }
  0x37   : > { %v394_v22 = vadd.s32 360, %v5050_v10  ;;  %v373_v23 = vadd.s32 192, %v5050_v10  ;;  %v374_v24 = vadd.s32 200, %v5050_v10  ;;  %v570_v25 = vand.u32 31, %v372_v57 }
  0x38   : > { %vm5330_vm6 = vcmp.eq.s32.totalorder %v563_v58, %v5052_v11  ;;  %v6973_v26 = vmov 0  ;;  %v451_v27 = vand.u32 31, %v355_v62  ;;  %v458_v28 = vand.u32 31, %v356_v20 }
  0x39   : > { %v6974_v26 = vsel %vm5330_vm6, 4294967295, %v6973_v26  ;;  %v717_v30 = vand.u32 31, %v393_v21  ;;  %v724_v31 = vand.u32 31, %v394_v22  ;;  %v577_v32 = vand.u32 31, %v373_v23 }
  0x3a   : > { %6975 = vst [vmem:[#allocation15_spill] sm:$0xff] %v6974_v26  ;;  %v584_v33 = vand.u32 31, %v374_v24  ;;  %vm5345_vm12 = vcmp.eq.s32.totalorder %v570_v25, %v5052_v11  ;;  %v6977_v44 = vmov 0  ;;  %vm5350_vm7 = vcmp.eq.s32.totalorder %v451_v27, %v5052_v11 }
  0x3b   : > { %v6978_v44 = vsel %vm5345_vm12, 4294967295, %v6977_v44  ;;  %v6980_v45 = vmov 0  ;;  %vm5355_vm10 = vcmp.eq.s32.totalorder %v458_v28, %v5052_v11  ;;  %v6983_v51 = vmov 0  ;;  %vm6813_vm9 = vmpackc.low %vm5345_vm12, %vm5330_vm6 }
  0x3c   : > { %6979 = vst [vmem:[#allocation16_spill] sm:$0xff] %v6978_v44  ;;  %v6981_v45 = vsel %vm5350_vm7, 4294967295, %v6980_v45  ;;  %v6984_v51 = vsel %vm5355_vm10, 4294967295, %v6983_v51  ;;  %v357_v57 = vadd.s32 64, %v5050_v10  ;;  %vm5366_vm11 = vcmp.eq.s32.totalorder %v717_v30, %v5052_v11  ;;  %4521 = vmatprep.subr.msk.bf16.mxu0 %vm6813_vm9, %v6850_v42  ;;  %vm6814_vm15 = vmpackc.low %vm5355_vm10, %vm5350_vm7 }
  0x3d   : > { %6982 = vst [vmem:[#allocation17_spill] sm:$0xff] %v6981_v45  ;;  %6985 = vst [vmem:[#allocation18_spill] sm:$0xff] %v6984_v51  ;;  %v6986_v58 = vmov 0  ;;  %vm5371_vm13 = vcmp.eq.s32.totalorder %v724_v31, %v5052_v11  ;;  %vm5376_vm8 = vcmp.eq.s32.totalorder %v577_v32, %v5052_v11  ;;  %v6990_v20 = vmov 0  ;;  %4523 = vmatpush3.bf16.msk.msra.mxu0 %vm6814_vm15, %v6850_v42 }
  0x3e   : > { %v6987_v58 = vsel %vm5366_vm11, 4294967295, %v6986_v58  ;;  %v6991_v20 = vsel %vm5376_vm8, 4294967295, %v6990_v20  ;;  %vm5381_vm14 = vcmp.eq.s32.totalorder %v584_v33, %v5052_v11  ;;  %v6993_v21 = vmov 0  ;;  %vm6996_vm9 = vmpackc.low %vm5291_vm5, %vm5286_vm4 }
  0x3f   : > { %6992 = vst [vmem:[#allocation19_spill] sm:$0xff] %v6991_v20  ;;  %v6994_v21 = vsel %vm5381_vm14, 4294967295, %v6993_v21  ;;  %v358_v22 = vadd.s32 72, %v5050_v10  ;;  %v465_v23 = vand.u32 31, %v357_v57  ;;  %v395_v24 = vadd.s32 368, %v5050_v10  ;;  %4557 = vmatpush1.bf16.msk.msra.mxu1 %vm6996_vm9, %v6850_v42  ;;  %vm6818_vm15 = vmpackc.low %vm5381_vm14, %vm5376_vm8 }
  0x40   : > { %6995 = vst [vmem:[#allocation20_spill] sm:$0xff] %v6994_v21  ;;  %v396_v25 = vadd.s32 376, %v5050_v10  ;;  %v375_v27 = vadd.s32 208, %v5050_v10  ;;  %v376_v28 = vadd.s32 216, %v5050_v10  ;;  %v359_v30 = vadd.s32 80, %v5050_v10  ;;  %4558 = vmatprep.subr.bf16.mxu1 %v6825_v3  ;;  %4525 = vmatprep.subr.msk.bf16.mxu0 %vm6818_vm15, %v6850_v42  ;;  %vm7019_vm15 = vmpackc.low %vm5371_vm13, %vm5366_vm11 }
  0x41   : > { %v360_v31 = vadd.s32 88, %v5050_v10  ;;  %v472_v32 = vand.u32 31, %v358_v22  ;;  %vm5419_vm7 = vcmp.eq.s32.totalorder %v465_v23, %v5052_v11  ;;  %v6997_v33 = vmov 0 }
  0x42   : > { %v6998_v33 = vsel %vm5419_vm7, 4294967295, %v6997_v33  ;;  %v731_v57 = vand.u32 31, %v395_v24  ;;  %v738_v17 = vand.u32 31, %v396_v25  ;;  %v591_v22 = vand.u32 31, %v375_v27 }
  0x43   : > { %6999 = vst [vmem:[#allocation21_spill] sm:$0xff] %v6998_v33  ;;  %v598_v23 = vand.u32 31, %v376_v28  ;;  %v479_v15 = vand.u32 31, %v359_v30  ;;  %v486_v24 = vand.u32 31, %v360_v31  ;;  %vm5435_vm10 = vcmp.eq.s32.totalorder %v472_v32, %v5052_v11  ;;  %4560 = vmatpush1.bf16.msk.msra.mxu1 %vm7019_vm15, %v6850_v42 }
  0x44   : > { %v7000_v25 = vmov 0  ;;  %vm5440_vm6 = vcmp.eq.s32.totalorder %v731_v57, %v5052_v11  ;;  %v7003_v8 = vmov 0  ;;  %vm5445_vm9 = vcmp.eq.s32.totalorder %v738_v17, %v5052_v11  ;;  %vm7020_vm5 = vmpackc.low %vm5435_vm10, %vm5419_vm7  ;;  %4561 = vmatprep.subr.bf16.mxu1 %v6825_v3 }
  0x45   : > { %v7001_v25 = vsel %vm5435_vm10, 4294967295, %v7000_v25  ;;  %v7004_v8 = vsel %vm5440_vm6, 4294967295, %v7003_v8  ;;  %v7005_v13 = vmov 0  ;;  %v397_v27 = vadd.s32 384, %v5050_v10  ;;  %4527 = vmatpush3.bf16.msk.msra.mxu0 %vm7020_vm5, %v6850_v42 }
  0x46   : > { %7002 = vst [vmem:[#allocation22_spill] sm:$0xff] %v7001_v25  ;;  %v7006_v13 = vsel %vm5445_vm9, 4294967295, %v7005_v13  ;;  %vm5455_vm8 = vcmp.eq.s32.totalorder %v591_v22, %v5052_v11  ;;  %v7007_v28 = vmov 0  ;;  %vm5460_vm14 = vcmp.eq.s32.totalorder %v598_v23, %v5052_v11 }
  0x47   : > { %v7008_v28 = vsel %vm5455_vm8, 4294967295, %v7007_v28  ;;  %v7010_v30 = vmov 0  ;;  %vm5465_vm12 = vcmp.eq.s32.totalorder %v479_v15, %v5052_v11  ;;  %v7013_v17 = vmov 0  ;;  %vm6830_vm15 = vmpackc.low %vm5460_vm14, %vm5455_vm8 }
  0x48   : > { %7009 = vst [vmem:[#allocation23_spill] sm:$0xff] %v7008_v28  ;;  %v7011_v30 = vsel %vm5460_vm14, 4294967295, %v7010_v30  ;;  %v7014_v17 = vsel %vm5465_vm12, 4294967295, %v7013_v17  ;;  %vm5470_vm4 = vcmp.eq.s32.totalorder %v486_v24, %v5052_v11  ;;  %v7016_v31 = vmov 0  ;;  %4529 = vmatprep.subr.msk.bf16.mxu0 %vm6830_vm15, %v6850_v42  ;;  %vm7023_vm15 = vmpackc.low %vm5445_vm9, %vm5440_vm6 }
  0x49   : > { %7012 = vst [vmem:[#allocation24_spill] sm:$0xff] %v7011_v30  ;;  %7015 = vst [vmem:[#allocation25_spill] sm:$0xff] %v7014_v17  ;;  %v7017_v31 = vsel %vm5470_vm4, 4294967295, %v7016_v31  ;;  %v398_v15 = vadd.s32 392, %v5050_v10  ;;  %v745_v32 = vand.u32 31, %v397_v27  ;;  %v377_v57 = vadd.s32 224, %v5050_v10  ;;  %4563 = vmatpush1.bf16.msk.msra.mxu1 %vm7023_vm15, %v6850_v42 }
  0x4a   : > { %7018 = vst [vmem:[#allocation26_spill] sm:$0xff] %v7017_v31  ;;  %v378_v22 = vadd.s32 232, %v5050_v10  ;;  %v361_v23 = vadd.s32 96, %v5050_v10  ;;  %v362_v24 = vadd.s32 104, %v5050_v10  ;;  %v399_v6 = vadd.s32 400, %v5050_v10  ;;  %vm6834_vm5 = vmpackc.low %vm5470_vm4, %vm5465_vm12 }
  0x4b   : > { %v400_v16 = vadd.s32 408, %v5050_v10  ;;  %v752_v27 = vand.u32 31, %v398_v15  ;;  %vm5513_vm2 = vcmp.eq.s32.totalorder %v745_v32, %v5052_v11  ;;  %v7021_v12 = vmov 0  ;;  %4531 = vmatpush3.bf16.msk.msra.mxu0 %vm6834_vm5, %v6850_v42 }
  0x4c   : > { %v7022_v12 = vsel %vm5513_vm2, 4294967295, %v7021_v12  ;;  %v605_v14 = vand.u32 31, %v377_v57  ;;  %v612_v7 = vand.u32 31, %v378_v22  ;;  %v493_v3 = vand.u32 31, %v361_v23 }
  0x4d   : > { %v500_v33 = vand.u32 31, %v362_v24  ;;  %v759_v30 = vand.u32 31, %v399_v6  ;;  %v766_v25 = vand.u32 31, %v400_v16  ;;  %vm5530_vm8 = vcmp.eq.s32.totalorder %v752_v27, %v5052_v11 }
  0x4e   : > { %v7024_v15 = vmov 0  ;;  %vm5535_vm14 = vcmp.eq.s32.totalorder %v605_v14, %v5052_v11  ;;  %v7026_v6 = vmov 0  ;;  %vm5540_vm7 = vcmp.eq.s32.totalorder %v612_v7, %v5052_v11 }
  0x4f   : > { %v7025_v15 = vsel %vm5530_vm8, 4294967295, %v7024_v15  ;;  %v7027_v6 = vsel %vm5535_vm14, 4294967295, %v7026_v6  ;;  %v7029_v16 = vmov 0  ;;  %v379_v32 = vadd.s32 240, %v5050_v10  ;;  %vm6844_vm15 = vmpackc.low %vm5540_vm7, %vm5535_vm14 }
  0x50   : > { %7028 = vst [vmem:[#allocation27_spill] sm:$0xff] %v7027_v6  ;;  %v7030_v16 = vsel %vm5540_vm7, 4294967295, %v7029_v16  ;;  %v7032_v57 = vmov 0.0|0.0   ;;  %vm5551_vm5 = vcmp.eq.s32.totalorder %v493_v3, %v5052_v11  ;;  %v7033_v14 = vmov 0  ;;  %4533 = vmatprep.subr.msk.bf16.mxu0 %vm6844_vm15, %v6850_v42  ;;  %vm7047_vm15 = vmpackc.low %vm5530_vm8, %vm5513_vm2  ;;  %v7181_v23 = vld [vmem:[#allocation25_spill] sm:$0xff] }
  0x51   : > { %7031 = vst [vmem:[#allocation28_spill] sm:$0xff] %v7030_v16  ;;  %4564 = vmatprep.subr.bf16.mxu1 %v7032_v57  ;;  %v7034_v14 = vsel %vm5551_vm5, 4294967295, %v7033_v14  ;;  %vm5556_vm12 = vcmp.eq.s32.totalorder %v500_v33, %v5052_v11  ;;  %v7036_v7 = vmov 0  ;;  %vm5561_vm4 = vcmp.eq.s32.totalorder %v759_v30, %v5052_v11  ;;  %v7179_v22 = vld [vmem:[#allocation26_spill] sm:$0xff] }
  0x52   : > { %7035 = vst [vmem:[#allocation29_spill] sm:$0xff] %v7034_v14  ;;  %v7037_v7 = vsel %vm5556_vm12, 4294967295, %v7036_v7  ;;  %vm5566_vm10 = vcmp.eq.s32.totalorder %v766_v25, %v5052_v11  ;;  %v380_v3 = vadd.s32 248, %v5050_v10  ;;  %v619_v33 = vand.u32 31, %v379_v32  ;;  %vm6853_vm6 = vmpackc.low %vm5556_vm12, %vm5551_vm5  ;;  %4566 = vmatpush1.bf16.msk.msra.mxu1 %vm7047_vm15, %v6850_v42 }
  0x53   : > { %7038 = vst [vmem:[#allocation30_spill] sm:$0xff] %v7037_v7  ;;  %v363_v24 = vadd.s32 112, %v5050_v10  ;;  %v364_v30 = vadd.s32 120, %v5050_v10  ;;  %v401_v25 = vadd.s32 416, %v5050_v10  ;;  %v402_v27 = vadd.s32 424, %v5050_v10  ;;  %4535 = vmatpush3.bf16.msk.msra.mxu0 %vm6853_vm6, %v6850_v42  ;;  %4567 = vmatprep.subr.bf16.mxu1 %v7032_v57 }
  0x54   : > { %v7043_v32 = vunpack.c.h.bf16 %v5024_v1  ;;  %v7044_v17 = vunpack.c.h.bf16 %v5035_v4  ;;  %v7045_v16 = vunpack.c.h.bf16 %v5029_v2  ;;  %vm7046_vm9 = vcmask 1045504  }
  0x55   : > { %v626_v28 = vand.u32 31, %v380_v3  ;;  %vm5609_vm14 = vcmp.eq.s32.totalorder %v619_v33, %v5052_v11  ;;  %v773_v7 = vand.u32 31, %v401_v25  ;;  %v780_v20 = vand.u32 31, %v402_v27  ;;  %vm7052_vm15 = vmmov %vm7046_vm9 }
  0x56   : > { %v1347_v31 = vadd.f32 %v7044_v17, %v7043_v32  ;;  %v1357_v6 = vsel %vm7046_vm9, %v7045_v16, 0.0  ;;  %v7048_v17 = vmov 0  ;;  %v507_v16 = vand.u32 31, %v363_v24  ;;  %vm7071_vm2 = vmmov %vm7052_vm15 }
  0x57   : > { %v7049_v17 = vsel %vm5609_vm14, 4294967295, %v7048_v17  ;;  %v514_v32 = vand.u32 31, %v364_v30  ;;  %v7051_v14 = vunpack.c.h.bf16 %v5040_v5  ;;  %v7053_v33 = vunpack.c.l.bf16 %v5024_v1  ;;  %vm7073_vm8 = vmmov %vm7071_vm2 }
  0x58   : > { %7050 = vst [vmem:[#allocation31_spill] sm:$0xff] %v7049_v17  ;;  %v7054_v42 = vunpack.c.l.bf16 %v5035_v4  ;;  %vm5626_vm6 = vcmp.eq.s32.totalorder %v626_v28, %v5052_v11  ;;  %v7055_v24 = vmov 0  ;;  %vm5631_vm5 = vcmp.eq.s32.totalorder %v507_v16, %v5052_v11  ;;  %v5648_v28 = vld [vmem:[%s6777_s0 + $0x28] sm:$0xff] }
  0x59   : > { %v1358_v3 = vsel %vm7052_vm15, %v7051_v14, 0.0  ;;  %v7056_v24 = vsel %vm5626_vm6, 4294967295, %v7055_v24  ;;  %v7058_v30 = vmov 0  ;;  %vm5636_vm9 = vcmp.eq.s32.totalorder %v514_v32, %v5052_v11  ;;  %7065 = vst [vmem:[#allocation36_spill] sm:$0xff] %v5648_v28  ;;  %vm7076_vm15 = vmpackc.low %vm5566_vm10, %vm5561_vm4 }
  0x5a   : > { %v1346_v21 = vadd.f32 %v7054_v42, %v7053_v33  ;;  %7057 = vst [vmem:[#allocation32_spill] sm:$0xff] %v7056_v24  ;;  %v7059_v30 = vsel %vm5631_vm5, 4294967295, %v7058_v30  ;;  %v7061_v25 = vmov 0  ;;  %v1359_v14 = vadd.f32 %v1358_v3, %v1357_v6  ;;  %v5643_v42 = vld [vmem:[%s6777_s0 + $0x18] sm:$0x77] }
  0x5b   : > { %7060 = vst [vmem:[#allocation33_spill] sm:$0xff] %v7059_v30  ;;  %v7062_v25 = vsel %vm5636_vm9, 4294967295, %v7061_v25  ;;  %7064 = vst [vmem:[#allocation35_spill] sm:$0xff] %v5643_v42  ;;  %vm5655_vm12 = vcmp.eq.s32.totalorder %v773_v7, %v5052_v11  ;;  %vm5660_vm7 = vcmp.eq.s32.totalorder %v780_v20, %v5052_v11  ;;  %v7070_v16 = vunpack.c.l.bf16 %v5029_v2  ;;  %v5673_v7 = vld [vmem:[%s6777_s0 + $0x38] sm:$0x77] }
  0x5c   : > { %7063 = vst [vmem:[#allocation34_spill] sm:$0xff] %v7062_v25  ;;  %v7072_v3 = vunpack.c.l.bf16 %v5040_v5  ;;  %7074 = vst [vmem:[#allocation37_spill] sm:$0xff] %v5673_v7  ;;  %v7075_v4 = vmov 1.0|1.0   ;;  %vm7078_vm11 = vcmask 1045504   ;;  %v404_v5 = vadd.s32 440, %v5050_v10 }
  0x5d   : > { %v1354_v32 = vsel %vm7071_vm2, %v7070_v16, 0.0  ;;  %4569 = vmatpush1.bf16.msk.msra.mxu1 %vm7076_vm15, %v7075_v4  ;;  %vm7077_vm2 = vmpackc.low %vm5626_vm6, %vm5609_vm14  ;;  %v1375_v20 = vsel %vm7078_vm11, %v1359_v14, 0.0  ;;  %v6877_v2 = vunpack.c.h.bf16 %v5648_v28  ;;  %v6880_v51 = vunpack.c.h.bf16 %v5673_v7  ;;  %v7189_v27 = vld [vmem:[#allocation30_spill] sm:$0xff]  ;;  %v7191_v6 = vld [vmem:[#allocation29_spill] sm:$0xff] }
  0x5e   : > { %v1355_v33 = vsel %vm7073_vm8, %v7072_v3, 0.0  ;;  %4537 = vmatprep.subr.msk.bf16.mxu0 %vm7077_vm2, %v7075_v4  ;;  %vm6874_vm8 = vmpackc.low %vm5636_vm9, %vm5631_vm5  ;;  %v403_v3 = vadd.s32 432, %v5050_v10  ;;  %4570 = vmatprep.subr.bf16.mxu1 %v7032_v57  ;;  %v1376_v14 = vadd.f32 %v1375_v20, %v1347_v31  ;;  %v794_v25 = vand.u32 31, %v404_v5 }
  0x5f   : > { %v1356_v16 = vadd.f32 %v1355_v33, %v1354_v32  ;;  %4539 = vmatpush3.bf16.msk.msra.mxu0 %vm6874_vm8, %v7075_v4  ;;  %vm6875_vm15 = vmpackc.low %vm5660_vm7, %vm5655_vm12  ;;  %v6883_v33 = vunpack.c.h.bf16 %v5643_v42  ;;  %vm6882_vm2 = vcmask 523264   ;;  %vm6879_vm5 = vcmask 521216  }
  0x60   : > { %v787_v17 = vand.u32 31, %v403_v3  ;;  %v1377_v24 = vrot.slane %v1376_v14, 4  ;;  %v1351_v20 = vsel %vm6882_vm2, %v6877_v2, 0.0  ;;  %vm7095_vm14 = vnez %v6929_v38 }
  0x61   : > { %v1367_v1 = vsel %vm7078_vm11, %v1356_v16, 0.0  ;;  %4572 = vmatpush1.bf16.msk.msra.mxu1 %vm6875_vm15, %v7075_v4  ;;  %vm5723_vm11 = vcmp.eq.s32.totalorder %v794_v25, %v5052_v11  ;;  %v1364_v25 = vsel %vm6879_vm5, %v6883_v33, 0.0  ;;  %v1249_v35 = vadd.s32 384, %v5052_v11 }
  0x62   : > { %v1368_v45 = vadd.f32 %v1367_v1, %v1346_v21  ;;  %vm5718_vm8 = vcmp.eq.s32.totalorder %v787_v17, %v5052_v11  ;;  %v7083_v1 = vunpack.c.h.bf16 %v5048_v9  ;;  %v1378_v16 = vadd.f32 %v1377_v24, %v1376_v14  ;;  %4573 = vmatprep.subr.bf16.mxu1 %v7032_v57  ;;  %v7201_v5 = vld [vmem:[#allocation33_spill] sm:$0xff] }
  0x63   : > { %vm6888_vm15 = vmpackc.low %vm5723_vm11, %vm5718_vm8  ;;  %v6890_v24 = vunpack.c.l.bf16 %v5048_v9  ;;  %v6889_v14 = vunpack.c.l.bf16 %v5648_v28  ;;  %v1275_v38 = vand.u32 31, %v1249_v35  ;;  %v7129_v62 = vmov 0  ;;  %v7199_v31 = vld [vmem:[#allocation34_spill] sm:$0xff] }
  0x64   : > { %v1350_v21 = vsel %vm6882_vm2, %v7083_v1, 0.0  ;;  %v1369_v3 = vrot.slane %v1368_v45, 4  ;;  %v1365_v1 = vsel %vm6879_vm5, %v6880_v51, 0.0  ;;  %v1379_v2 = vrot.slane %v1378_v16, 2 }
  0x65   : > { %v1352_v17 = vadd.f32 %v1351_v20, %v1350_v21  ;;  %v1366_v32 = vadd.f32 %v1365_v1, %v1364_v25  ;;  %4575 = vmatpush1.bf16.msk.msra.mxu1 %vm6888_vm15, %v7075_v4  ;;  %v1348_v21 = vadd.f32 %v6889_v14, %v6890_v24  ;;  %v7084_v20 = vunpack.c.l.bf16 %v5643_v42 }
  0x66   : > { %v1370_v30 = vadd.f32 %v1369_v3, %v1368_v45  ;;  %vm7085_vm5 = vcmask 1045504   ;;  %v7086_v45 = vunpack.c.l.bf16 %v5673_v7  ;;  %4624 = vmatprep.subr.bf16.mxu1 %v7032_v57 }
  0x67   : > { %v1391_v26 = vsel %vm6882_vm2, %v1352_v17, 0.0  ;;  %v1360_v51 = vsel %vm7085_vm5, %v7084_v20, 0.0  ;;  %vm7087_vm9 = vmmov %vm7085_vm5  ;;  %v1380_v17 = vadd.f32 %v1379_v2, %v1378_v16  ;;  %vm7088_vm2 = vcmask 521216  }
  0x68   : > { %v1361_v3 = vsel %vm7087_vm9, %v7086_v45, 0.0  ;;  %v1371_v25 = vrot.slane %v1370_v30, 2  ;;  %v1392_v1 = vsel %vm7088_vm2, %v1366_v32, 0.0  ;;  %vm7089_vm15 = vmmov %vm7085_vm5  ;;  %vm7090_vm5 = vcmask 523264  }
  0x69   : > { %v1362_v33 = vadd.f32 %v1361_v3, %v1360_v51  ;;  %v1393_v44 = vadd.f32 %v1392_v1, %v1391_v26  ;;  %v1381_v9 = vrot.slane %v1380_v17, 1  ;;  %vm7091_vm9 = vmpackc.low %vm5074_vm1, %vm5069_vm0  ;;  %vm7097_vm0 = vnez %v6943_v61 }
  0x6a   : > { %v1372_v53 = vadd.f32 %v1371_v25, %v1370_v30  ;;  %vm7098_vm1 = vnez %v6941_v60  ;;  %v4943_v60 = vmov 0.0  }
  0x6b   : > { %v1383_v14 = vsel %vm7089_vm15, %v1362_v33, 0.0  ;;  %v1394_v24 = vrot.slane %v1393_v44, 4  ;;  %v1382_v42 = vadd.f32 %v1381_v9, %v1380_v17  ;;  %vm7092_vm15 = vnez %v6925_v36  ;;  %2698 = vst [vmem:[#allocation3] sm:$0xff] %v4943_v60  ;;  %v7196_v33 = vld [vmem:[#allocation31_spill] sm:$0xff] }
  0x6c   : > { %v1384_v28 = vadd.f32 %v1383_v14, %v1348_v21  ;;  %v1373_v20 = vrot.slane %v1372_v53, 1  ;;  %vm7093_vm2 = vmpackc.low %vm5084_vm3, %vm7092_vm15  ;;  %vm7100_vm3 = vnez %v6956_v46  ;;  %vm7101_vm15 = vnez %v6954_v29 }
  0x6d   : > { %v1395_v54 = vadd.f32 %v1394_v24, %v1393_v44  ;;  %1467 = vmatprep.mubr.f32.mxu0 %v1382_v42  ;;  %v1248_v46 = vadd.s32 256, %v5052_v11  ;;  %v7184_v42 = vld [vmem:[#allocation28_spill] sm:$0xff]  ;;  %v6034_v24 = vsub.s32 0, %v5050_v10 }
  0x6e   : > { %v1385_v7 = vrot.slane %v1384_v28, 4  ;;  %v1374_v45 = vadd.f32 %v1373_v20, %v1372_v53  ;;  %v7204_v20 = vld [vmem:[#allocation7_spill] sm:$0xff] }
  0x6f   : > { %v1396_v2 = vrot.slane %v1395_v54, 2  ;;  %v1268_v53 = vand.u32 31, %v1248_v46 }
  0x70   : > { %v1386_v16 = vadd.f32 %v1385_v7, %v1384_v28  ;;  %1468 = vmatmul.mubr.f32.vlgmr.msra.gmra.mrb[0].mxu0 %v1374_v45  ;;  %v7186_v28 = vld [vmem:[#allocation27_spill] sm:$0xff]  ;;  %v7194_v7 = vld [vmem:[#allocation32_spill] sm:$0xff]  ;;  %v7205_v45 = vunpack.c.l.bf16 %v7204_v20 }
  0x71   : > { %v1397_v32 = vadd.f32 %v1396_v2, %v1395_v54  ;;  %1613 = vmatprep.mubr.f32.mxu0 %v4943_v60 }
  0x72   : > { %v1387_v51 = vrot.slane %v1386_v16, 2 }
  0x73   : > { %v1398_v3 = vrot.slane %v1397_v32, 1 }
  0x74   : > { %v1388_v47 = vadd.f32 %v1387_v51, %v1386_v16  ;;  %v7206_v16 = vld [vmem:[#allocation8_spill] sm:$0xff] }
  0x75   : > { %v1399_v26 = vadd.f32 %v1398_v3, %v1397_v32  ;;  %v7207_v32 = vunpack.c.l.bf16 %v7206_v16  ;;  %v7208_v3 = vld [vmem:[#allocation9_spill] sm:$0xff] }
  0x76   : > { %v1389_v1 = vrot.slane %v1388_v47, 1 }
  0x77   : > { %4119 = vmatprep.mubr.msk.f32.mxu1 %vm7090_vm5, %v1399_v26  ;;  %vm7094_vm5 = vnez %v6931_v39  ;;  %v7209_v26 = vunpack.c.l.bf16 %v7208_v3 }
  0x78   : > { %v1390_v30 = vadd.f32 %v1389_v1, %v1388_v47  ;;  %vm7096_vm6 = vmpackc.low %vm7094_vm5, %vm7095_vm14  ;;  %vm7104_vm14 = vnez %v6969_v55 }
  0x7a   : > { %1538 = vmatmul.mubr.f32.vlgmr.msra.gmra.mrb[0].mxu1 %v1390_v30  ;;  %v7210_v30 = vld [vmem:[#allocation10_spill] sm:$0xff] }
  0x7b   : > { %4626 = vmatpush1.bf16.msk.msra.mxu1 %vm7091_vm9, %v7075_v4  ;;  %vm7099_vm9 = vmpackc.low %vm7097_vm0, %vm7098_vm1  ;;  %vm7106_vm0 = vnez %v6987_v58 }
  0x7c   : > { %4627 = vmatprep.subr.bf16.mxu1 %v7032_v57  ;;  %vm7107_vm1 = vmpackc.low %vm5371_vm13, %vm7106_vm0 }
  0x7d   : > { %vm7114_vm13 = vmpackc.low %vm5566_vm10, %vm5561_vm4 }
  0x7e   : > { %vm7116_vm0 = vmpackc.low %vm5723_vm11, %vm5718_vm8 }
  0x7f   : > { %4629 = vmatpush1.bf16.msk.msra.mxu1 %vm7093_vm2, %v7075_v4  ;;  %vm7102_vm2 = vmpackc.low %vm7100_vm3, %vm7101_vm15  ;;  %vm7109_vm3 = vnez %v7004_v8  ;;  %v1247_v8 = vadd.s32 128, %v5052_v11 }
  0x80   : > { %4630 = vmatprep.subr.bf16.mxu1 %v7032_v57 }
  0x81   : > { %v1261_v9 = vand.u32 31, %v1247_v8  ;;  %v7211_v8 = vunpack.c.l.bf16 %v7210_v30 }
  0x83   : > { %4632 = vmatpush1.bf16.msk.msra.mxu1 %vm7096_vm6, %v7075_v4  ;;  %vm7103_vm6 = vnez %v6971_v56  ;;  %vm1299_vm4 = vcmp.eq.s32.totalorder %v5050_v10, %v1261_v9  ;;  %vm1303_vm10 = vcmp.eq.s32.totalorder %v5119_v43, %v1261_v9  ;;  %vm1307_vm11 = vcmp.eq.s32.totalorder %v5132_v49, %v1261_v9 }
  0x84   : > { %4633 = vmatprep.subr.bf16.mxu1 %v7032_v57  ;;  %vm7105_vm5 = vmpackc.low %vm7103_vm6, %vm7104_vm14  ;;  %vm7112_vm6 = vnez %v7022_v12  ;;  %v1254_v12 = vand.u32 31, %v5052_v11 }
  0x87   : > { %4635 = vmatpush1.bf16.msk.msra.mxu1 %vm7099_vm9, %v7075_v4  ;;  %vm7108_vm9 = vnez %v7006_v13 }
  0x88   : > { %4636 = vmatprep.subr.bf16.mxu1 %v7032_v57  ;;  %vm7110_vm15 = vmpackc.low %vm7108_vm9, %vm7109_vm3  ;;  %vm1311_vm9 = vcmp.eq.s32.totalorder %v5135_v50, %v1261_v9 }
  0x89   : > { %vm5873_vm3 = vmpackc.low %vm1311_vm9, %vm1307_vm11 }
  0x8b   : > { %4638 = vmatpush1.bf16.msk.msra.mxu1 %vm7102_vm2, %v7075_v4  ;;  %vm7111_vm2 = vnez %v7025_v15  ;;  %v7174_v15 = vld [vmem:[#allocation24_spill] sm:$0xff] }
  0x8c   : > { %4639 = vmatprep.subr.bf16.mxu1 %v7032_v57  ;;  %vm7113_vm14 = vmpackc.low %vm7111_vm2, %vm7112_vm6  ;;  %vm1310_vm2 = vcmp.eq.s32.totalorder %v5135_v50, %v1254_v12 }
  0x8f   : > { %4641 = vmatpush1.bf16.msk.msra.mxu1 %vm7105_vm5, %v7075_v4  ;;  %vm7115_vm5 = vmpackc.low %vm5660_vm7, %vm5655_vm12  ;;  %vm1298_vm12 = vcmp.eq.s32.totalorder %v5050_v10, %v1254_v12 }
  0x90   : > { %4642 = vmatprep.subr.bf16.mxu1 %v7032_v57  ;;  %vm5854_vm7 = vmpackc.low %vm1303_vm10, %vm1299_vm4  ;;  %vm1304_vm4 = vcmp.eq.s32.totalorder %v5119_v43, %v1268_v53  ;;  %vm1309_vm10 = vcmp.eq.s32.totalorder %v5132_v49, %v1275_v38 }
  0x91   : > { %4577 = vmatprep.subr.msk.bf16.mxu0 %vm5854_vm7, %v7075_v4 }
  0x93   : > { %4644 = vmatpush1.bf16.msk.msra.mxu1 %vm7107_vm1, %v7075_v4  ;;  %vm1302_vm1 = vcmp.eq.s32.totalorder %v5119_v43, %v1254_v12 }
  0x94   : > { %4645 = vmatprep.subr.bf16.mxu1 %v7032_v57  ;;  %vm5863_vm8 = vmpackc.low %vm1302_vm1, %vm1298_vm12  ;;  %vm1313_vm12 = vcmp.eq.s32.totalorder %v5135_v50, %v1275_v38  ;;  %vm6905_vm1 = vcmask 261120  }
  0x95   : > { %4579 = vmatpush1.bf16.msk.msra.mxu0 %vm5863_vm8, %v7075_v4  ;;  %vm5912_vm9 = vmpackc.low %vm1313_vm12, %vm1309_vm10  ;;  %vm7136_vm10 = vnez %v6939_v59  ;;  %vm7137_vm12 = vnez %v6937_v52  ;;  %v7156_v52 = vld [vmem:[#allocation15_spill] sm:$0xff]  ;;  %v7159_v59 = vld [vmem:[#allocation18_spill] sm:$0xff] }
  0x96   : > { %4581 = vmatprep.subr.msk.bf16.mxu0 %vm5873_vm3, %v7075_v4  ;;  %v7130_v62 = vsel %vm5912_vm9, 4294967295, %v7129_v62 }
  0x97   : > { %4647 = vmatpush1.bf16.msk.msra.mxu1 %vm7110_vm15, %v7075_v4  ;;  %vm1306_vm15 = vcmp.eq.s32.totalorder %v5132_v49, %v1254_v12  ;;  %v7212_v12 = vunpack.c.h.bf16 %v7204_v20 }
  0x98   : > { %4648 = vmatprep.subr.bf16.mxu1 %v7032_v57  ;;  %vm5882_vm6 = vmpackc.low %vm1310_vm2, %vm1306_vm15  ;;  %vm1308_vm15 = vcmp.eq.s32.totalorder %v5132_v49, %v1268_v53  ;;  %vm1312_vm2 = vcmp.eq.s32.totalorder %v5135_v50, %v1268_v53  ;;  %v7151_v49 = vld [vmem:[#allocation13_spill] sm:$0xff]  ;;  %v7154_v50 = vld [vmem:[#allocation16_spill] sm:$0xff] }
  0x99   : > { %4583 = vmatpush1.bf16.msk.msra.mxu0 %vm5882_vm6, %v7075_v4 }
  0x9b   : > { %4650 = vmatpush1.bf16.msk.msra.mxu1 %vm7113_vm14, %v7075_v4  ;;  %vm1301_vm14 = vcmp.eq.s32.totalorder %v5050_v10, %v1275_v38 }
  0x9c   : > { %4651 = vmatprep.subr.bf16.mxu1 %v7032_v57 }
  0x9f   : > { %4653 = vmatpush1.bf16.msk.msra.mxu1 %vm7114_vm13, %v7075_v4  ;;  %vm1305_vm13 = vcmp.eq.s32.totalorder %v5119_v43, %v1275_v38  ;;  %v7131_v43 = vmov 0  ;;  %v7213_v38 = vunpack.c.h.bf16 %v7206_v16 }
  0xa0   : > { %4654 = vmatprep.subr.bf16.mxu1 %v7032_v57 }
  0xa3   : > { %4656 = vmatpush1.bf16.msk.msra.mxu1 %vm7115_vm5, %v7075_v4  ;;  %vm5891_vm5 = vmpackc.low %vm1305_vm13, %vm1301_vm14  ;;  %vm7133_vm13 = vnez %v6935_v41  ;;  %v7149_v41 = vld [vmem:[#allocation14_spill] sm:$0xff] }
  0xa4   : > { %4657 = vmatprep.subr.bf16.mxu1 %v7032_v57  ;;  %4585 = vmatprep.subr.msk.bf16.mxu0 %vm5891_vm5, %v7075_v4  ;;  %vm5926_vm14 = vmpackc.low %vm1312_vm2, %vm1308_vm15  ;;  %vm7139_vm2 = vnez %v6947_v0  ;;  %v7164_v0 = vld [vmem:[#allocation20_spill] sm:$0xff]  ;;  %v7176_v57 = vld [vmem:[#allocation23_spill] sm:$0xff] }
  0xa5   : > { %v7132_v43 = vsel %vm5926_vm14, 4294967295, %v7131_v43  ;;  %vm7138_vm15 = vmpackc.low %vm7136_vm10, %vm7137_vm12 }
  0xa7   : > { %4659 = vmatpush1.bf16.msk.msra.mxu1 %vm7116_vm0, %v7075_v4  ;;  %vm1300_vm0 = vcmp.eq.s32.totalorder %v5050_v10, %v1268_v53 }
  0xa8   : > { %4685 = vmatprep.subr.msk.bf16.mxu1 %vm5891_vm5, %v7075_v4  ;;  %vm5908_vm11 = vmpackc.low %vm1304_vm4, %vm1300_vm0  ;;  %vm7134_vm0 = vnez %v6933_v40  ;;  %v7146_v40 = vld [vmem:[#allocation12_spill] sm:$0xff] }
  0xa9   : > { %vm7135_vm4 = vmpackc.low %vm7133_vm13, %vm7134_vm0  ;;  %vm7142_vm13 = vnez %v6951_v19  ;;  %vm7143_vm0 = vnez %v6949_v18  ;;  %vm7147_vm10 = vnez %v7146_v40  ;;  %v7166_v18 = vld [vmem:[#allocation19_spill] sm:$0xff]  ;;  %v7169_v19 = vld [vmem:[#allocation22_spill] sm:$0xff] }
 0x143   : > { %v4397_v61 = vpop.f32.mrb[0].mxu0 }
 0x144   : > { %v4398_v29 = vpop.f32.mrb[1].mxu0 }
 0x145   : > { %v4399_v47 = vadd.f32 %v4398_v29, %v4397_v61  ;;  %v7214_v29 = vunpack.c.h.bf16 %v7208_v3 }
 0x14d   : > { %v1539_v54 = vpop.f32.mrb[0].mxu1 }
 0x14e   : > { %v1540_v55 = vadd.f32 %v4399_v47, %v1539_v54  ;;  %v1541_v56 = vpop.f32.mrb[1].mxu1  ;;  %v7215_v47 = vunpack.c.h.bf16 %v7210_v30 }
 0x150   : > { %v1544_v44 = vmul.f32 0.0025510204, %v1540_v55 }
 0x152   : > { %4128 = vmatmul.mubr.msk.f32.vlgmr.msra.gmra.mrb[2].mxu0 %vm6905_vm1, %v1544_v44 }
 0x153   : > { %4587 = vmatpush1.bf16.msk.msra.mxu0 %vm5908_vm11, %v7075_v4  ;;  %1684 = vmatprep.mubr.f32.mxu0 %v4943_v60 }
 0x154   : > { %4589 = vmatprep.subr.msk.bf16.mxu0 %vm5912_vm9, %v7075_v4 }
 0x157   : > { %4591 = vmatpush1.bf16.msk.msra.mxu0 %vm5926_vm14, %v7075_v4  ;;  %vm7140_vm14 = vnez %v6945_v63  ;;  %v7161_v63 = vld [vmem:[#allocation17_spill] sm:$0xff] }
 0x158   : > { %4593 = vmatprep.subr.msk.bf16.mxu0 %vm7135_vm4, %v7075_v4  ;;  %vm7141_vm9 = vmpackc.low %vm7139_vm2, %vm7140_vm14  ;;  %vm7152_vm14 = vnez %v7151_v49  ;;  %vm7155_vm2 = vnez %v7154_v50 }
 0x159   : > { %vm7144_vm4 = vmpackc.low %vm7142_vm13, %vm7143_vm0  ;;  %vm7157_vm13 = vnez %v7156_v52 }
 0x15a   : > { %4137 = vmatmul.mubr.msk.f32.vlgmr.msra.gmra.mrb[4].mxu0 %vm6905_vm1, %v1544_v44  ;;  %vm7145_vm1 = vnez %v6961_v48  ;;  %vm7158_vm0 = vmpackc.low %vm7155_vm2, %vm7157_vm13  ;;  %v7171_v48 = vld [vmem:[#allocation21_spill] sm:$0xff] }
 0x15b   : > { %4595 = vmatpush3.bf16.msk.msra.mxu0 %vm7138_vm15, %v7075_v4  ;;  %vm7148_vm12 = vmpackc.low %vm7145_vm1, %vm7147_vm10  ;;  %vm7150_vm15 = vnez %v7149_v41  ;;  %vm7162_vm1 = vnez %v7161_v63  ;;  %vm7172_vm2 = vnez %v7171_v48 }
 0x15c   : > { %4597 = vmatprep.subr.msk.bf16.mxu0 %vm7141_vm9, %v7075_v4  ;;  %vm7153_vm9 = vmpackc.low %vm7150_vm15, %vm7152_vm14  ;;  %vm7167_vm15 = vnez %v7166_v18 }
 0x15f   : > { %4599 = vmatpush3.bf16.msk.msra.mxu0 %vm7144_vm4, %v7075_v4  ;;  %vm7160_vm4 = vnez %v7159_v59 }
 0x160   : > { %4601 = vmatprep.subr.msk.bf16.mxu0 %vm7148_vm12, %v7075_v4  ;;  %vm7163_vm10 = vmpackc.low %vm7160_vm4, %vm7162_vm1  ;;  %vm7165_vm12 = vnez %v7164_v0  ;;  %vm7177_vm4 = vnez %v7176_v57 }
 0x161   : > { %vm7168_vm14 = vmpackc.low %vm7165_vm12, %vm7167_vm15  ;;  %vm7182_vm12 = vnez %v7181_v23 }
 0x163   : > { %4603 = vmatpush3.bf16.msk.msra.mxu0 %vm7153_vm9, %v7075_v4  ;;  %vm7170_vm9 = vnez %v7169_v19 }
 0x164   : > { %4605 = vmatprep.subr.msk.bf16.mxu0 %vm7158_vm0, %v7075_v4  ;;  %vm7173_vm13 = vmpackc.low %vm7170_vm9, %vm7172_vm2  ;;  %vm7175_vm0 = vnez %v7174_v15  ;;  %vm7187_vm9 = vnez %v7186_v28 }
 0x165   : > { %vm7178_vm1 = vmpackc.low %vm7175_vm0, %vm7177_vm4  ;;  %vm7192_vm0 = vnez %v7191_v6 }
 0x167   : > { %4607 = vmatpush3.bf16.msk.msra.mxu0 %vm7163_vm10, %v7075_v4  ;;  %vm7180_vm10 = vnez %v7179_v22 }
 0x168   : > { %4609 = vmatprep.subr.msk.bf16.mxu0 %vm7168_vm14, %v7075_v4  ;;  %vm7183_vm15 = vmpackc.low %vm7180_vm10, %vm7182_vm12  ;;  %vm7185_vm14 = vnez %v7184_v42  ;;  %vm7197_vm10 = vnez %v7196_v33  ;;  %v7223_v33 = vld [vmem:[#allocation35_spill] sm:$0xff] }
 0x169   : > { %vm7188_vm2 = vmpackc.low %vm7185_vm14, %vm7187_vm9  ;;  %vm7202_vm14 = vnez %v7201_v5  ;;  %v7230_v3 = vunpack.c.h.bf16 %v7223_v33 }
 0x16b   : > { %4611 = vmatpush3.bf16.msk.msra.mxu0 %vm7173_vm13, %v7075_v4  ;;  %vm7190_vm13 = vnez %v7189_v27  ;;  %v7221_v27 = vld [vmem:[#allocation11_spill] sm:$0xff] }
 0x16c   : > { %4613 = vmatprep.subr.msk.bf16.mxu0 %vm7178_vm1, %v7075_v4  ;;  %vm7193_vm4 = vmpackc.low %vm7190_vm13, %vm7192_vm0  ;;  %vm7195_vm1 = vnez %v7194_v7  ;;  %v7222_v6 = vunpack.c.l.bf16 %v7221_v27  ;;  %v7229_v16 = vunpack.c.h.bf16 %v7221_v27 }
 0x16d   : > { %vm7198_vm12 = vmpackc.low %vm7195_vm1, %vm7197_vm10 }
 0x16f   : > { %4615 = vmatpush3.bf16.msk.msra.mxu0 %vm7183_vm15, %v7075_v4  ;;  %vm7200_vm15 = vnez %v7199_v31  ;;  %v7224_v31 = vunpack.c.l.bf16 %v7223_v33 }
 0x170   : > { %4617 = vmatprep.subr.msk.bf16.mxu0 %vm7188_vm2, %v7075_v4  ;;  %vm7203_vm9 = vmpackc.low %vm7200_vm15, %vm7202_vm14  ;;  %vm7216_vm2 = vcmask 1045504   ;;  %vm7236_vm14 = vcmask 523264  }
 0x171   : > { %vm7217_vm13 = vmmov %vm7216_vm2 }
 0x172   : > { %vm7218_vm0 = vmmov %vm7216_vm2 }
 0x173   : > { %4619 = vmatpush3.bf16.msk.msra.mxu0 %vm7193_vm4, %v7075_v4  ;;  %vm7219_vm4 = vmmov %vm7218_vm0 }
 0x174   : > { %4621 = vmatprep.subr.msk.bf16.mxu0 %vm7198_vm12, %v7075_v4  ;;  %vm7220_vm1 = vmmov %vm7218_vm0 }
 0x175   : > { %vm7233_vm10 = vmmov %vm7218_vm0 }
 0x176   : > { %vm7234_vm12 = vmmov %vm7218_vm0 }
 0x177   : > { %4623 = vmatpush3.bf16.msk.msra.mxu0 %vm7203_vm9, %v7075_v4  ;;  %vm7235_vm15 = vmmov %vm7218_vm0 }
 0x178   : > { %4661 = vmatprep.subr.msk.bf16.mxu0 %vm5854_vm7, %v7075_v4  ;;  %vm7237_vm9 = vmmov %vm7236_vm14 }
 0x225   : > { %v1615_v14 = vpop.f32.mrb[2].mxu0 }
 0x226   : > { %v1694_v21 = vrot.slane %v1615_v14, %v6034_v24  ;;  %v1617_v17 = vpop.f32.mrb[3].mxu0  ;;  %v7225_v14 = vld [vmem:[#allocation36_spill] sm:$0xff] }
 0x227   : > { %v1698_v25 = vrot.slane %v1617_v17, %v6034_v24  ;;  %v7231_v30 = vunpack.c.h.bf16 %v7225_v14 }
 0x228   : > { %v6040_v2 = vsub.f32 %v7205_v45, %v1694_v21  ;;  %v6044_v51 = vsub.f32 %v7207_v32, %v1694_v21  ;;  %v6048_v1 = vsub.f32 %v7209_v26, %v1694_v21  ;;  %v6052_v9 = vsub.f32 %v7211_v8, %v1694_v21 }
 0x229   : > { %v6056_v35 = vsub.f32 %v7212_v12, %v1698_v25  ;;  %v6060_v61 = vsub.f32 %v7213_v38, %v1698_v25  ;;  %v6064_v46 = vsub.f32 %v7214_v29, %v1698_v25  ;;  %v6068_v53 = vsub.f32 %v7215_v47, %v1698_v25  ;;  %v7227_v25 = vld [vmem:[#allocation37_spill] sm:$0xff] }
 0x22a   : > { %v1723_v54 = vmul.f32 %v6040_v2, %v6040_v2  ;;  %v1727_v55 = vmul.f32 %v6044_v51, %v6044_v51  ;;  %v1731_v56 = vmul.f32 %v6048_v1, %v6048_v1  ;;  %v1735_v44 = vmul.f32 %v6052_v9, %v6052_v9 }
 0x22b   : > { %v1724_v40 = vmul.f32 %v6056_v35, %v6056_v35  ;;  %v1728_v41 = vmul.f32 %v6060_v61, %v6060_v61  ;;  %v1732_v49 = vmul.f32 %v6064_v46, %v6064_v46  ;;  %v1736_v50 = vmul.f32 %v6068_v53, %v6068_v53 }
 0x22c   : > { %v1745_v52 = vsel %vm7216_vm2, %v1727_v55, 0.0  ;;  %v1746_v59 = vsel %vm7217_vm13, %v1735_v44, 0.0  ;;  %v1739_v48 = vadd.f32 %v1731_v56, %v1723_v54  ;;  %v7226_v21 = vunpack.c.l.bf16 %v7225_v14 }
 0x22d   : > { %v1747_v63 = vadd.f32 %v1746_v59, %v1745_v52  ;;  %v1748_v0 = vsel %vm7218_vm0, %v1728_v41, 0.0  ;;  %v1749_v18 = vsel %vm7219_vm4, %v1736_v50, 0.0  ;;  %v1686_v19 = vpop.f32.mrb[4].mxu0  ;;  %v1740_v23 = vadd.f32 %v1732_v49, %v1724_v40  ;;  %vm7240_vm4 = vmmov %vm7237_vm9 }
 0x22e   : > { %v1702_v15 = vrot.slane %v1686_v19, %v6034_v24  ;;  %v1688_v57 = vpop.f32.mrb[5].mxu0  ;;  %v1750_v42 = vadd.f32 %v1749_v18, %v1748_v0  ;;  %v7228_v20 = vunpack.c.l.bf16 %v7227_v25  ;;  %v7232_v12 = vunpack.c.h.bf16 %v7227_v25 }
 0x22f   : > { %v1706_v22 = vrot.slane %v1688_v57, %v6034_v24  ;;  %v1757_v28 = vsel %vm7220_vm1, %v1747_v63, 0.0  ;;  %vm7238_vm2 = vcmask 521216  }
 0x230   : > { %v6095_v7 = vsub.f32 %v7222_v6, %v1702_v15  ;;  %v6099_v5 = vsub.f32 %v7224_v31, %v1702_v15  ;;  %v6103_v17 = vsub.f32 %v7226_v21, %v1702_v15  ;;  %v6107_v45 = vsub.f32 %v7228_v20, %v1702_v15  ;;  %vm7239_vm13 = vmmov %vm7238_vm2 }
 0x231   : > { %v6111_v32 = vsub.f32 %v7229_v16, %v1706_v22  ;;  %v6115_v26 = vsub.f32 %v7230_v3, %v1706_v22  ;;  %v6119_v8 = vsub.f32 %v7231_v30, %v1706_v22  ;;  %v6123_v38 = vsub.f32 %v7232_v12, %v1706_v22  ;;  %vm7241_vm1 = vmmov %vm7238_vm2 }
 0x232   : > { %v1725_v29 = vmul.f32 %v6095_v7, %v6095_v7  ;;  %v1729_v47 = vmul.f32 %v6099_v5, %v6099_v5  ;;  %v1733_v54 = vmul.f32 %v6103_v17, %v6103_v17  ;;  %v1737_v55 = vmul.f32 %v6107_v45, %v6107_v45 }
 0x233   : > { %v1726_v56 = vmul.f32 %v6111_v32, %v6111_v32  ;;  %v1730_v44 = vmul.f32 %v6115_v26, %v6115_v26  ;;  %v1734_v40 = vmul.f32 %v6119_v8, %v6119_v8  ;;  %v1738_v41 = vmul.f32 %v6123_v38, %v6123_v38 }
 0x234   : > { %v1741_v49 = vadd.f32 %v1733_v54, %v1725_v29  ;;  %v1751_v50 = vsel %vm7233_vm10, %v1729_v47, 0.0  ;;  %v1752_v52 = vsel %vm7234_vm12, %v1737_v55, 0.0  ;;  %v1765_v59 = vsel %vm7235_vm15, %v1750_v42, 0.0  ;;  %vm7242_vm10 = vmmov %vm7240_vm4 }
 0x235   : > { %v1753_v63 = vadd.f32 %v1752_v52, %v1751_v50  ;;  %v1742_v0 = vsel %vm7236_vm14, %v1726_v56, 0.0  ;;  %v1743_v18 = vsel %vm7237_vm9, %v1734_v40, 0.0  ;;  %v1754_v19 = vsel %vm7238_vm2, %v1730_v44, 0.0 }
 0x236   : > { %v1744_v15 = vadd.f32 %v1743_v18, %v1742_v0  ;;  %v1755_v57 = vsel %vm7239_vm13, %v1738_v41, 0.0  ;;  %v1766_v22 = vadd.f32 %v1765_v59, %v1740_v23  ;;  %v1758_v27 = vadd.f32 %v1757_v28, %v1739_v48 }
 0x237   : > { %v1756_v6 = vadd.f32 %v1755_v57, %v1754_v19  ;;  %v1773_v33 = vsel %vm7218_vm0, %v1753_v63, 0.0  ;;  %vm7243_vm12 = vnez %v7130_v62  ;;  %vm7244_vm15 = vnez %v7132_v43  ;;  %v2083_v19 = vld [vmem:[%s6779_s2] sm:$0x1] }
 0x238   : > { %v1767_v31 = vrot.slane %v1766_v22, 4  ;;  %v1759_v14 = vrot.slane %v1758_v27, 4  ;;  %v1781_v21 = vsel %vm7240_vm4, %v1744_v15, 0.0  ;;  %v1774_v42 = vadd.f32 %v1773_v33, %v1741_v49 }
 0x239   : > { %v1782_v25 = vsel %vm7241_vm1, %v1756_v6, 0.0  ;;  %vm7245_vm14 = vcmask 261120   ;;  %vm4945_vm13 = vmmov 1  }
 0x23a   : > { %v1768_v20 = vadd.f32 %v1767_v31, %v1766_v22  ;;  %v1760_v16 = vadd.f32 %v1759_v14, %v1758_v27  ;;  %v1783_v3 = vadd.f32 %v1782_v25, %v1781_v21  ;;  %v1775_v30 = vrot.slane %v1774_v42, 4  ;;  %v1934_v14 = vld [vmem:[%s6778_s1] sm:$0x1]  ;;  %vm6243_vm4 = vmpackc.low %vm7218_vm0, %vm4945_vm13 }
 0x23c   : > { %v1769_v12 = vrot.slane %v1768_v20, 2  ;;  %v1761_v29 = vrot.slane %v1760_v16, 2  ;;  %v1784_v47 = vrot.slane %v1783_v3, 4  ;;  %v1776_v54 = vadd.f32 %v1775_v30, %v1774_v42 }
 0x23e   : > { %v1770_v23 = vadd.f32 %v1769_v12, %v1768_v20  ;;  %v1762_v48 = vadd.f32 %v1761_v29, %v1760_v16  ;;  %v1785_v28 = vadd.f32 %v1784_v47, %v1783_v3  ;;  %v1777_v55 = vrot.slane %v1776_v54, 2 }
 0x240   : > { %v1771_v56 = vrot.slane %v1770_v23, 1  ;;  %v1763_v44 = vrot.slane %v1762_v48, 1  ;;  %v1786_v40 = vrot.slane %v1785_v28, 2  ;;  %v1778_v41 = vadd.f32 %v1777_v55, %v1776_v54 }
 0x242   : > { %v1772_v50 = vadd.f32 %v1771_v56, %v1770_v23  ;;  %v1787_v49 = vadd.f32 %v1786_v40, %v1785_v28  ;;  %v1764_v52 = vadd.f32 %v1763_v44, %v1762_v48  ;;  %v1779_v59 = vrot.slane %v1778_v41, 1 }
 0x244   : > { %1857 = vmatprep.mubr.f32.mxu0 %v1772_v50  ;;  %v1788_v63 = vrot.slane %v1787_v49, 1  ;;  %v1780_v18 = vadd.f32 %v1779_v59, %v1778_v41 }
 0x245   : > { %1858 = vmatmul.mubr.f32.vlgmr.msra.gmra.mrb[6].mxu0 %v1764_v52 }
 0x246   : > { %v1789_v0 = vadd.f32 %v1788_v63, %v1787_v49  ;;  %4663 = vmatpush1.bf16.msk.msra.mxu0 %vm5863_vm8, %v7075_v4  ;;  %2005 = vmatprep.mubr.f32.mxu0 %v4943_v60 }
 0x247   : > { %4665 = vmatprep.subr.msk.bf16.mxu0 %vm5873_vm3, %v7075_v4 }
 0x248   : > { %4194 = vmatprep.mubr.msk.f32.mxu1 %vm7242_vm10, %v1789_v0 }
 0x249   : > { %1928 = vmatmul.mubr.f32.vlgmr.msra.gmra.mrb[2].mxu1 %v1780_v18 }
 0x24a   : > { %4667 = vmatpush1.bf16.msk.msra.mxu0 %vm5882_vm6, %v7075_v4  ;;  %4687 = vmatpush1.bf16.msk.msra.mxu1 %vm5908_vm11, %v7075_v4 }
 0x24b   : > { %4669 = vmatprep.subr.msk.bf16.mxu0 %vm5891_vm5, %v7075_v4  ;;  %4689 = vmatprep.subr.msk.bf16.mxu1 %vm7243_vm12, %v7075_v4  ;;  %vm7246_vm5 = vmmov %vm7245_vm14 }
 0x24c   : > { %2222 = vmatprep.mubr.f32.mxu1 %v4943_v60  ;;  %vm7247_vm9 = vmmov %vm7246_vm5 }
 0x24e   : > { %4691 = vmatpush1.bf16.msk.msra.mxu1 %vm7244_vm15, %v7075_v4 }
 0x251   : > { %4230 = vmatmul.mubr.msk.f32.vlgmr.msra.gmra.mrb[4].mxu1 %vm7245_vm14, %v2083_v19 }
 0x252   : > { %2463 = vmatprep.mubr.f32.mxu1 %v4943_v60 }
 0x318   : > { %v4432_v39 = vpop.f32.mrb[6].mxu0 }
 0x319   : > { %v4433_v15 = vpop.f32.mrb[7].mxu0 }
 0x31a   : > { %v4434_v57 = vadd.f32 %v4433_v15, %v4432_v39 }
 0x31c   : > { %v1929_v22 = vpop.f32.mrb[2].mxu1 }
 0x31d   : > { %v1930_v27 = vadd.f32 %v4434_v57, %v1929_v22  ;;  %v1931_v6 = vpop.f32.mrb[3].mxu1 }
 0x31f   : > { %v1933_v33 = vmul.f32 0.0025510204, %v1930_v27 }
 0x321   : > { %v1935_v31 = vadd.f32 1e-05, %v1933_v33 }
 0x323   : > { %4773 = vrsqrt.f32 %v1935_v31 }
 0x324   : > { %v2224_v13 = vpop.f32.mrb[4].mxu1 }
 0x325   : > { %v2226_v58 = vpop.f32.mrb[5].mxu1  ;;  %v2272_v16 = vrot.slane %v2224_v13, %v6034_v24 }
 0x326   : > { %v2276_v37 = vrot.slane %v2226_v58, %v6034_v24 }
 0x32d   : > { %v4774_v21 = vpop.eup %4773 }
 0x32e   : > { %v1937_v42 = vmul.f32 %v4774_v21, %v1934_v14 }
 0x330   : > { %4203 = vmatmul.mubr.msk.f32.vlgmr.msra.gmra.mrb[8].mxu0 %vm7246_vm5, %v1937_v42 }
 0x331   : > { %4671 = vmatpush1.bf16.msk.msra.mxu0 %vm5908_vm11, %v7075_v4  ;;  %2076 = vmatprep.mubr.f32.mxu0 %v4943_v60  ;;  %vm7248_vm11 = vmmov %vm7246_vm5 }
 0x332   : > { %4673 = vmatprep.subr.msk.bf16.mxu0 %vm7243_vm12, %v7075_v4 }
 0x335   : > { %4675 = vmatpush1.bf16.msk.msra.mxu0 %vm7244_vm15, %v7075_v4 }
 0x336   : > { %4677 = vmatprep.subr.msk.bf16.mxu0 %vm5854_vm7, %v7075_v4  ;;  %vm7249_vm7 = vmmov %vm7246_vm5 }
 0x338   : > { %4212 = vmatmul.mubr.msk.f32.vlgmr.msra.gmra.mrb[10].mxu0 %vm7247_vm9, %v1937_v42  ;;  %vm2480_vm9 = vcmask 1043456  }
 0x339   : > { %4679 = vmatpush1.bf16.msk.msra.mxu0 %vm5863_vm8, %v7075_v4  ;;  %2151 = vmatprep.mubr.f32.mxu0 %v4943_v60  ;;  %vm7250_vm8 = vmmov %vm7246_vm5 }
 0x33a   : > { %4681 = vmatprep.subr.msk.bf16.mxu0 %vm5873_vm3, %v7075_v4  ;;  %vm7251_vm3 = vmmov %vm7246_vm5  ;;  %vm2315_vm5 = vcmask 113664  }
 0x33b   : > { %vm7253_vm2 = vmmov %vm7251_vm3 }
 0x33c   : > { %vm7256_vm10 = vmmov %vm7253_vm2 }
 0x33d   : > { %4683 = vmatpush1.bf16.msk.msra.mxu0 %vm5882_vm6, %v7075_v4  ;;  %vm7252_vm6 = vmmov %vm7251_vm3 }
 0x33e   : > { %vm7257_vm15 = vmmov %vm7253_vm2 }
 0x33f   : > { %vm7258_vm14 = vmmov %vm7253_vm2 }
 0x340   : > { %4221 = vmatmul.mubr.msk.f32.vlgmr.msra.gmra.mrb[12].mxu0 %vm7248_vm11, %v2083_v19  ;;  %vm2481_vm11 = vsmask.f32 3328 }
 0x341   : > { %2389 = vmatprep.mubr.f32.mxu0 %v4943_v60 }
 0x403   : > { %v2007_v62 = vpop.f32.mrb[8].mxu0 }
 0x404   : > { %v2009_v43 = vpop.f32.mrb[9].mxu0  ;;  %v2240_v36 = vrot.slane %v2007_v62, %v6034_v24 }
 0x405   : > { %v2244_v3 = vrot.slane %v2009_v43, %v6034_v24 }
 0x407   : > { %v2254_v18 = vmul.f32 %v2244_v3, %v6056_v35  ;;  %v2258_v19 = vmul.f32 %v2244_v3, %v6060_v61 }
 0x40b   : > { %v2078_v34 = vpop.f32.mrb[10].mxu0 }
 0x40c   : > { %v2248_v25 = vrot.slane %v2078_v34, %v6034_v24  ;;  %v2080_v20 = vpop.f32.mrb[11].mxu0 }
 0x40d   : > { %v2252_v4 = vrot.slane %v2080_v20, %v6034_v24 }
 0x40e   : > { %v2492_v30 = vmul.f32 %v2248_v25, %v6103_v17  ;;  %v2255_v12 = vmul.f32 %v2248_v25, %v6095_v7  ;;  %v2259_v29 = vmul.f32 %v2248_v25, %v6099_v5  ;;  %v2496_v47 = vmul.f32 %v2248_v25, %v6107_v45 }
 0x40f   : > { %v2493_v54 = vmul.f32 %v2252_v4, %v6119_v8  ;;  %v2256_v23 = vmul.f32 %v2252_v4, %v6111_v32  ;;  %v2260_v48 = vmul.f32 %v2252_v4, %v6115_v26  ;;  %v2497_v28 = vmul.f32 %v2252_v4, %v6123_v38 }
 0x410   : > { %v2500_v55 = vadd.f32 %v2492_v30, %v2272_v16  ;;  %v2279_v56 = vadd.f32 %v2272_v16, %v2255_v12  ;;  %v2283_v44 = vadd.f32 %v2272_v16, %v2259_v29  ;;  %v2504_v40 = vadd.f32 %v2496_v47, %v2272_v16 }
 0x411   : > { %v2501_v41 = vadd.f32 %v2493_v54, %v2276_v37  ;;  %v2280_v17 = vadd.f32 %v2276_v37, %v2256_v23  ;;  %v2284_v50 = vadd.f32 %v2276_v37, %v2260_v48  ;;  %v2505_v7 = vadd.f32 %v2497_v28, %v2276_v37 }
 0x412   : > { %v2253_v5 = vmul.f32 %v2240_v36, %v6040_v2  ;;  %v2257_v45 = vmul.f32 %v2240_v36, %v6044_v51  ;;  %v2490_v8 = vmul.f32 %v2240_v36, %v6048_v1  ;;  %v2494_v38 = vmul.f32 %v2240_v36, %v6052_v9 }
 0x413   : > { %v2153_v49 = vpop.f32.mrb[12].mxu0  ;;  %v4753_v32 = vpack.i.bf16 %v2501_v41, %v2500_v55  ;;  %v4743_v52 = vpack.i.bf16 %v2280_v17, %v2279_v56  ;;  %v4748_v26 = vpack.i.bf16 %v2284_v50, %v2283_v44  ;;  %v4763_v59 = vpack.i.bf16 %v2505_v7, %v2504_v40 }
 0x414   : > { %v2264_v63 = vrot.slane %v2153_v49, %v6034_v24  ;;  %v2155_v0 = vpop.f32.mrb[13].mxu0  ;;  %v2491_v51 = vmul.f32 %v2244_v3, %v6064_v46  ;;  %v2495_v1 = vmul.f32 %v2244_v3, %v6068_v53  ;;  %v2229_v53 = vmul.u32 2, %v5050_v10 }
 0x415   : > { %v2268_v2 = vrot.slane %v2155_v0, %v6034_v24  ;;  %4754 = vrot.lane.b32.xlu1 %v4753_v32, %s4944_s18  ;;  %4744 = vrot.lane.b32.xlu0 %v4743_v52, %s4944_s18 }
 0x416   : > { %v2277_v39 = vadd.f32 %v2264_v63, %v2253_v5  ;;  %v2281_v15 = vadd.f32 %v2264_v63, %v2257_v45  ;;  %v6234_v57 = vadd.f32 %v2490_v8, %v2264_v63  ;;  %v2502_v9 = vadd.f32 %v2494_v38, %v2264_v63 }
 0x417   : > { %v2278_v22 = vadd.f32 %v2268_v2, %v2254_v18  ;;  %v2282_v27 = vadd.f32 %v2268_v2, %v2258_v19  ;;  %v2499_v6 = vadd.f32 %v2491_v51, %v2268_v2  ;;  %v2503_v35 = vadd.f32 %v2495_v1, %v2268_v2  ;;  %v2487_v2 = vld [vmem:[#allocation2] sm:$0xff] }
 0x418   : > { %v2233_v36 = vadd.s32 1, %v2229_v53  ;;  %vm2230_vm1 = vcmp.eq.s32.totalorder %v5052_v11, %v2229_v53 }
 0x419   : > { %4749 = vrot.lane.b32.xlu0 %v4748_v26, %s4944_s18  ;;  %v4758_v61 = vpack.i.bf16 %v2282_v27, %v2278_v22  ;;  %v4768_v24 = vpack.i.bf16 %v2503_v35, %v2499_v6  ;;  %v4231_v45 = vsel %vm2230_vm1, 1.0, %v4943_v60 }
 0x41a   : > { %vm2234_vm12 = vcmp.eq.s32.totalorder %v5052_v11, %v2233_v36 }
 0x41b   : > { %4759 = vrot.lane.b32.xlu1 %v4758_v61, %s4944_s18  ;;  %v4232_v32 = vsel %vm2234_vm12, 1.0, %v4943_v60 }
 0x41d   : > { %4764 = vrot.lane.b32.xlu0 %v4763_v59, %s4944_s18 }
 0x41f   : > { %4769 = vrot.lane.b32.xlu1 %v4768_v24, %s4944_s18 }
 0x487   : > { %v4745_v33 = vpop.permute.xlu0 %4744  ;;  %v4755_v31 = vpop.permute.xlu1 %4754 }
 0x488   : > { %v4747_v46 = vunpack.i.h.bf16 %v4745_v33  ;;  %v4746_v14 = vunpack.i.l.bf16 %v4745_v33  ;;  %v4757_v21 = vunpack.i.h.bf16 %v4755_v31  ;;  %v4756_v42 = vunpack.i.l.bf16 %v4755_v31 }
 0x48a   : > { %v2304_v58 = vsel %vm7249_vm7, %v4746_v14, %v4747_v46  ;;  %v2525_v3 = vsel %vm7251_vm3, %v4756_v42, %v4757_v21  ;;  %vm2483_vm7 = vcmask 785412   ;;  %vm6277_vm3 = vmand %vm2480_vm9, %vm2481_vm11 }
 0x48b   : > { %v4750_v13 = vpop.permute.xlu0 %4749  ;;  %v2312_v4 = vmax.f32 %v2278_v22, %v2304_v58  ;;  %v2533_v41 = vmax.f32 %v2499_v6, %v2525_v3  ;;  %v2695_v6 = vld [vmem:[#allocation2 + $0x8] sm:$0xff] }
 0x48c   : > { %v4752_v62 = vunpack.i.h.bf16 %v4750_v13  ;;  %v4751_v43 = vunpack.i.l.bf16 %v4750_v13 }
 0x48d   : > { %v4760_v34 = vpop.permute.xlu1 %4759 }
 0x48e   : > { %v2306_v25 = vsel %vm7250_vm8, %v4751_v43, %v4752_v62  ;;  %v4762_v20 = vunpack.i.h.bf16 %v4760_v34  ;;  %v4761_v16 = vunpack.i.l.bf16 %v4760_v34  ;;  %vm2484_vm8 = vsmask.f32 7424 }
 0x48f   : > { %v2314_v37 = vmax.f32 %v2282_v27, %v2306_v25  ;;  %v4765_v30 = vpop.permute.xlu0 %4764 }
 0x490   : > { %v2305_v10 = vsel %vm7252_vm6, %v4762_v20, %v4751_v43  ;;  %v2303_v12 = vsel %vm7253_vm2, %v4761_v16, %v4746_v14  ;;  %v4767_v29 = vunpack.i.h.bf16 %v4765_v30  ;;  %v4766_v47 = vunpack.i.l.bf16 %v4765_v30  ;;  %vm6281_vm6 = vmand %vm2483_vm7, %vm2484_vm8 }
 0x491   : > { %v2313_v23 = vmax.f32 %v2281_v15, %v2305_v10  ;;  %v2311_v48 = vmax.f32 %v2277_v39, %v2303_v12  ;;  %v4770_v28 = vpop.permute.xlu1 %4769  ;;  %v4692_v55 = vpack.c.bf16 %v2314_v37, %v2312_v4  ;;  %vm2486_vm2 = vmor %vm6281_vm6, %vm6277_vm3 }
 0x492   : > { %v2527_v56 = vsel %vm7256_vm10, %v4766_v47, %v4767_v29  ;;  %v4772_v44 = vunpack.i.h.bf16 %v4770_v28  ;;  %v4771_v40 = vunpack.i.l.bf16 %v4770_v28 }
 0x493   : > { %v4695_v17 = vpack.c.bf16 %v2313_v23, %v2311_v48  ;;  %v2535_v50 = vmax.f32 %v2503_v35, %v2527_v56  ;;  %4694 = vmatprep.subr.msk.bf16.mxu0 %vm6243_vm4, %v4692_v55  ;;  %4700 = vmatprep.subr.msk.bf16.mxu1 %vm6243_vm4, %v4692_v55 }
 0x494   : > { %v2526_v7 = vsel %vm7257_vm15, %v4772_v44, %v4766_v47  ;;  %v2524_v5 = vsel %vm7258_vm14, %v4771_v40, %v4756_v42 }
 0x495   : > { %v2534_v8 = vmax.f32 %v2502_v9, %v2526_v7  ;;  %v2532_v49 = vmax.f32 %v6234_v57, %v2524_v5  ;;  %4697 = vmatpush1.bf16.msk.msra.mxu0 %vm6243_vm4, %v4695_v17  ;;  %4703 = vmatpush1.bf16.msk.msra.mxu1 %vm6243_vm4, %v4695_v17  ;;  %v4704_v11 = vpack.c.bf16 %v2535_v50, %v2533_v41 }
 0x497   : > { %v4707_v52 = vpack.c.bf16 %v2534_v8, %v2532_v49  ;;  %4706 = vmatprep.subr.msk.bf16.mxu0 %vm6243_vm4, %v4704_v11  ;;  %4712 = vmatprep.subr.msk.bf16.mxu1 %vm6243_vm4, %v4704_v11 }
 0x498   : > { %4235 = vmatmul.mubr.msk.f32.vlgmr.msra.gmra.mrb[14].mxu0 %vm2315_vm5, %v4231_v45  ;;  %4238 = vmatmul.mubr.msk.f32.vlgmr.msra.gmra.mrb[6].mxu1 %vm2315_vm5, %v4232_v32 }
 0x499   : > { %4709 = vmatpush1.bf16.msk.msra.mxu0 %vm6243_vm4, %v4707_v52  ;;  %4715 = vmatpush1.bf16.msk.msra.mxu1 %vm6243_vm4, %v4707_v52 }
 0x49a   : > { %2606 = vmatprep.mubr.f32.mxu0 %v4943_v60  ;;  %2677 = vmatprep.mubr.f32.mxu1 %v4943_v60 }
 0x49c   : > { %4242 = vmatmul.mubr.msk.f32.vlgmr.msra.gmra.mrb[16].mxu0 %vm2315_vm5, %v4231_v45  ;;  %4245 = vmatmul.mubr.msk.f32.vlgmr.msra.gmra.mrb[8].mxu1 %vm2315_vm5, %v4232_v32 }
 0x56b   : > { %v2391_v59 = vpop.f32.mrb[14].mxu0  ;;  %v2465_v38 = vpop.f32.mrb[6].mxu1 }
 0x56c   : > { %v2470_v0 = vmax.f32 %v2391_v59, %v2465_v38  ;;  %v2393_v60 = vpop.f32.mrb[15].mxu0  ;;  %v2467_v18 = vpop.f32.mrb[7].mxu1 }
 0x56d   : > { %v2471_v19 = vmax.f32 %v2393_v60, %v2467_v18 }
 0x56f   : > { %v4363_v51 = vpack.c.bf16 %v2471_v19, %v2470_v0  ;;  %v2608_v1 = vpop.f32.mrb[16].mxu0  ;;  %v2679_v39 = vpop.f32.mrb[8].mxu1 }
 0x570   : > { %v2684_v15 = vmax.f32 %v2608_v1, %v2679_v39  ;;  %v2610_v57 = vpop.f32.mrb[17].mxu0  ;;  %v2681_v9 = vpop.f32.mrb[9].mxu1 }
 0x571   : > { %v2488_v22 = vsel %vm2486_vm2, %v4363_v51, %v2487_v2  ;;  %v2685_v27 = vmax.f32 %v2610_v57, %v2681_v9 }
 0x572   : > { %2489 = vst [vmem:[#allocation2] sm:$0xff] %v2488_v22 }
 0x573   : > { %v4364_v35 = vpack.c.bf16 %v2685_v27, %v2684_v15 }
 0x575   : > { %v2696_v61 = vsel %vm2486_vm2, %v4364_v35, %v2695_v6 }
 0x576   : > { %2697 = vst [vmem:[#allocation2 + $0x8] sm:$0xff] %v2696_v61 }
 0x577 PF: > { %vm2772_vm13 = vcmask 1042432   ;;  %vm2773_vm0 = vcmask 1043456   ;;  %v4946_v31 = vmov 65535   ;;  %v6909_v53 = vmov 0   ;;  %v6291_v42 = vld [vmem:[%s5018_s15 + $0x4] ss:$16 sps:$4 sm:$0xff]  }
 0x578   : > { %v2774_v46 = vsel %vm2772_vm13, 4294967295, %v4946_v31  ;;  %2814 = vmatprep.mubr.bf16.mxu0 %v6909_v53  ;;  %v6908_v21 = vlaneseq  ;;  %v6294_v13 = vld [vmem:[%s5018_s15] ss:$16 sps:$4 sm:$0xff]   ;;  %v2757_v62 = vstv %s5009_s10  ;;  %3109 = vmatprep.subr.bf16.mxu1 %v6291_v42  ;;  %v6304_v20 = vld [vmem:[%s5018_s15 + $0xc] ss:$16 sps:$4 sm:$0xff]   ;;  %v6906_v3 = vmov 0.0  }
 0x579   : > { %v2762_v24 = vld [vmem:[#allocation2] sm:$0xff]  ;;  %v6296_v58 = vsel %vm2773_vm0, %v2774_v46, 0  ;;  %3110 = vmatpush1.bf16.msra.mxu1 %v6294_v13  ;;  %vm2768_vm1 = vcmask 56320   ;;  %v6315_v37 = vld [vmem:[%s5018_s15 + $0x8] ss:$16 sps:$4 sm:$0xff]   ;;  %vm3105_vm10 = vcmask 785408  }
 0x57a   : > { %v4249_v33 = vcombine.high %v2762_v24, %v2762_v24  ;;  %v4248_v14 = vcombine.low %v2762_v24, %v2762_v24  ;;  %v2756_v25 = vand.u32 127, %v6908_v21  ;;  %v6308_v16 = vld [vmem:[%s5018_s15 + $0x24] ss:$16 sps:$4 sm:$0xff]   ;;  %v6311_v36 = vld [vmem:[%s5018_s15 + $0x20] ss:$16 sps:$4 sm:$0xff]   ;;  %p4316_p5 = scmp.ne.s32.totalorder %s5009_s10, 6 }
 0x57b   : > { %3111 = vmatprep.subr.bf16.mxu1 %v6308_v16  ;;  %v6322_v10 = vld [vmem:[%s5018_s15 + $0x2c] ss:$16 sps:$4 sm:$0xff]   ;;  %v6325_v12 = vld [vmem:[%s5018_s15 + $0x44] ss:$16 sps:$4 sm:$0xff]   ;;  %v6329_v29 = vld [vmem:[%s5018_s15 + $0x40] ss:$16 sps:$4 sm:$0xff]  }
 0x57c   : > { %v2780_v43 = vand.u32 %v4249_v33, %v6296_v58  ;;  %v2777_v34 = vand.u32 %v4248_v14, %v6296_v58  ;;  %vm2758_vm4 = vcmp.eq.s32.totalorder %v2756_v25, %v2757_v62  ;;  %v6335_v47 = vld [vmem:[%s5018_s15 + $0x64] ss:$16 sps:$4 sm:$0xff]   ;;  %v6339_v54 = vld [vmem:[%s5018_s15 + $0x28] ss:$16 sps:$4 sm:$0xff]   ;;  %v6343_v23 = vld [vmem:[%s5018_s15 + $0x4c] ss:$16 sps:$4 sm:$0xff]  }
 0x57d   : > { %v4247_v4 = vsel %vm2758_vm4, 1.0, %v6906_v3  ;;  %3112 = vmatpush1.bf16.msra.mxu1 %v6311_v36  ;;  %v6347_v48 = vld [vmem:[%s5018_s15 + $0x60] ss:$16 sps:$4 sm:$0xff]   ;;  %v6351_v28 = vld [vmem:[%s5018_s15 + $0x84] ss:$16 sps:$4 sm:$0xff]   ;;  %vm4951_vm14 = vmmov (!%p4316_p5), 0  }
 0x57e   : > { %2782 = vmatprep.subr.bf16.mxu0 %v2780_v43  ;;  %v6318_v30 = vpack.c.bf16 %v4247_v4, %v4247_v4  ;;  %3113 = vmatprep.subr.bf16.mxu1 %v6325_v12  ;;  %v6355_v55 = vld [vmem:[%s5018_s15 + $0x48] ss:$16 sps:$4 sm:$0xff]   ;;  %v6359_v56 = vld [vmem:[%s5018_s15 + $0x6c] ss:$16 sps:$4 sm:$0xff]   ;;  %v6363_v44 = vld [vmem:[%s5018_s15 + $0x80] ss:$16 sps:$4 sm:$0xff]  }
 0x57f   : > { %2783 = vmatpush1.bf16.msra.mxu0 %v2777_v34  ;;  %v6367_v40 = vld [vmem:[%s5018_s15 + $0xa4] ss:$16 sps:$4 sm:$0xff]   ;;  %v6371_v41 = vld [vmem:[%s5018_s15 + $0x68] ss:$16 sps:$4 sm:$0xff]   ;;  %v6375_v17 = vld [vmem:[%s5018_s15 + $0x8c] ss:$16 sps:$4 sm:$0xff]  }
 0x580   : > { %3150 = vmatprep.subr.bf16.mxu0 %v6304_v20  ;;  %v6379_v50 = vld [vmem:[%s5018_s15 + $0xa0] ss:$16 sps:$4 sm:$0xff]   ;;  %v6383_v7 = vld [vmem:[%s5018_s15 + $0xc4] ss:$16 sps:$4 sm:$0xff]   ;;  %v6387_v5 = vld [vmem:[%s5018_s15 + $0x88] ss:$16 sps:$4 sm:$0xff]  }
 0x581   : > { %3114 = vmatpush1.bf16.msra.mxu1 %v6329_v29  ;;  %v6391_v45 = vld [vmem:[%s5018_s15 + $0xac] ss:$16 sps:$4 sm:$0xff]   ;;  %v6395_v8 = vld [vmem:[%s5018_s15 + $0xc0] ss:$16 sps:$4 sm:$0xff]   ;;  %v6399_v49 = vld [vmem:[%s5018_s15 + $0xe4] ss:$16 sps:$4 sm:$0xff]  }
 0x582   : > { %4250 = vmatmul.mubr.msk.bf16.vlgmr.msra.gmra.mrb[0].mxu0 %vm2768_vm1, %v6318_v30  ;;  %3115 = vmatprep.subr.bf16.mxu1 %v6335_v47  ;;  %v6403_v11 = vld [vmem:[%s5018_s15 + $0xa8] ss:$16 sps:$4 sm:$0xff]   ;;  %v6407_v32 = vld [vmem:[%s5018_s15 + $0xcc] ss:$16 sps:$4 sm:$0xff]   ;;  %v6411_v52 = vld [vmem:[%s5018_s15 + $0xe0] ss:$16 sps:$4 sm:$0xff]  }
 0x583   : > { %3151 = vmatpush1.bf16.msra.mxu0 %v6315_v37  ;;  %v6415_v26 = vld [vmem:[%s5018_s15 + $0x104] ss:$16 sps:$4 sm:$0xff]   ;;  %v6419_v59 = vld [vmem:[%s5018_s15 + $0xc8] ss:$16 sps:$4 sm:$0xff]   ;;  %v6423_v38 = vld [vmem:[%s5018_s15 + $0xec] ss:$16 sps:$4 sm:$0xff]  }
 0x584   : > { %3152 = vmatprep.subr.bf16.mxu0 %v6322_v10  ;;  %v6427_v63 = vld [vmem:[%s5018_s15 + $0x100] ss:$16 sps:$4 sm:$0xff]   ;;  %v6431_v0 = vld [vmem:[%s5018_s15 + $0x124] ss:$16 sps:$4 sm:$0xff]   ;;  %v6435_v60 = vld [vmem:[%s5018_s15 + $0xe8] ss:$16 sps:$4 sm:$0xff]  }
 0x585   : > { %3116 = vmatpush1.bf16.msra.mxu1 %v6347_v48  ;;  %v6439_v18 = vld [vmem:[%s5018_s15 + $0x10c] ss:$16 sps:$4 sm:$0xff]   ;;  %v6442_v19 = vld [vmem:[%s5018_s15 + $0x120] ss:$16 sps:$4 sm:$0xff]   ;;  %v6447_v2 = vld [vmem:[%s5018_s15 + $0x144] ss:$16 sps:$4 sm:$0xff]  }
 0x586   : > { %3117 = vmatprep.subr.bf16.mxu1 %v6351_v28  ;;  %v6451_v51 = vld [vmem:[%s5018_s15 + $0x108] ss:$16 sps:$4 sm:$0xff]   ;;  %v6455_v1 = vld [vmem:[%s5018_s15 + $0x12c] ss:$16 sps:$4 sm:$0xff]   ;;  %v6459_v39 = vld [vmem:[%s5018_s15 + $0x140] ss:$16 sps:$4 sm:$0xff]  }
 0x587   : > { %3153 = vmatpush1.bf16.msra.mxu0 %v6339_v54  ;;  %v6463_v15 = vld [vmem:[%s5018_s15 + $0x164] ss:$16 sps:$4 sm:$0xff]   ;;  %v6467_v57 = vld [vmem:[%s5018_s15 + $0x128] ss:$16 sps:$4 sm:$0xff]   ;;  %v6471_v9 = vld [vmem:[%s5018_s15 + $0x14c] ss:$16 sps:$4 sm:$0xff]  }
 0x588   : > { %3154 = vmatprep.subr.bf16.mxu0 %v6343_v23  ;;  %v6475_v22 = vld [vmem:[%s5018_s15 + $0x160] ss:$16 sps:$4 sm:$0xff]   ;;  %v6479_v27 = vld [vmem:[%s5018_s15 + $0x184] ss:$16 sps:$4 sm:$0xff]   ;;  %v6483_v6 = vld [vmem:[%s5018_s15 + $0x148] ss:$16 sps:$4 sm:$0xff]  }
 0x589   : > { %3118 = vmatpush1.bf16.msra.mxu1 %v6363_v44  ;;  %v6487_v35 = vld [vmem:[%s5018_s15 + $0x16c] ss:$16 sps:$4 sm:$0xff]   ;;  %v6491_v61 = vld [vmem:[%s5018_s15 + $0x180] ss:$16 sps:$4 sm:$0xff]   ;;  %v6496_v24 = vld [vmem:[%s5018_s15 + $0x168] ss:$16 sps:$4 sm:$0xff]  }
 0x58a   : > { %3119 = vmatprep.subr.bf16.mxu1 %v6367_v40  ;;  %7263 = vst [vmem:[#allocation38_spill] sm:$0xff] %v6496_v24  ;;  %v6500_v33 = vld [vmem:[%s5018_s15 + $0x18c] ss:$16 sps:$4 sm:$0xff]   ;;  %v6505_v31 = vld [vmem:[%s5018_s15 + $0x188] ss:$16 sps:$4 sm:$0xff]  }
 0x58b   : > { %3155 = vmatpush1.bf16.msra.mxu0 %v6355_v55  ;;  %7264 = vst [vmem:[#allocation39_spill] sm:$0xff] %v6500_v33  ;;  %7265 = vst [vmem:[#allocation40_spill] sm:$0xff] %v6505_v31  ;;  %v6510_v46 = vld [vmem:[%s5018_s15 + $0x1a4] ss:$16 sps:$4 sm:$0xff]   ;;  %v6513_v14 = vld [vmem:[%s5018_s15 + $0x1ac] ss:$16 sps:$4 sm:$0xff]  }
 0x58c   : > { %3156 = vmatprep.subr.bf16.mxu0 %v6359_v56  ;;  %7266 = vst [vmem:[#allocation41_spill] sm:$0xff] %v6510_v46  ;;  %7267 = vst [vmem:[#allocation42_spill] sm:$0xff] %v6513_v14  ;;  %v6516_v62 = vld [vmem:[%s5018_s15 + $0x1a0] ss:$16 sps:$4 sm:$0xff]   ;;  %v6519_v43 = vld [vmem:[%s5018_s15 + $0x1a8] ss:$16 sps:$4 sm:$0xff]  }
 0x58d   : > { %3120 = vmatpush1.bf16.msra.mxu1 %v6379_v50  ;;  %v3221_v34 = vld [vmem:[#allocation2 + $0x8] sm:$0xff] }
 0x58e   : > { %3121 = vmatprep.subr.bf16.mxu1 %v6383_v7  ;;  %v4311_v25 = vcombine.high %v3221_v34, %v3221_v34  ;;  %v4310_v3 = vcombine.low %v3221_v34, %v3221_v34 }
 0x58f   : > { %3157 = vmatpush1.bf16.msra.mxu0 %v6371_v41 }
 0x590   : > { %3158 = vmatprep.subr.bf16.mxu0 %v6375_v17  ;;  %v3231_v4 = vand.u32 %v4311_v25, %v6296_v58  ;;  %v3388_v25 = vld [vmem:[#allocation3] sm:$0xff] }
 0x591   : > { %3122 = vmatpush1.bf16.msra.mxu1 %v6395_v8 }
 0x592   : > { %3123 = vmatprep.subr.bf16.mxu1 %v6399_v49 }
 0x593   : > { %3159 = vmatpush1.bf16.msra.mxu0 %v6387_v5 }
 0x594   : > { %3160 = vmatprep.subr.bf16.mxu0 %v6391_v45 }
 0x595   : > { %3124 = vmatpush1.bf16.msra.mxu1 %v6411_v52 }
 0x596   : > { %3125 = vmatprep.subr.bf16.mxu1 %v6415_v26 }
 0x597   : > { %3161 = vmatpush1.bf16.msra.mxu0 %v6403_v11 }
 0x598   : > { %3162 = vmatprep.subr.bf16.mxu0 %v6407_v32 }
 0x599   : > { %3126 = vmatpush1.bf16.msra.mxu1 %v6427_v63 }
 0x59a   : > { %3127 = vmatprep.subr.bf16.mxu1 %v6431_v0 }
 0x59b   : > { %3163 = vmatpush1.bf16.msra.mxu0 %v6419_v59 }
 0x59c   : > { %3164 = vmatprep.subr.bf16.mxu0 %v6423_v38 }
 0x59d   : > { %3128 = vmatpush1.bf16.msra.mxu1 %v6442_v19 }
 0x59e   : > { %3129 = vmatprep.subr.bf16.mxu1 %v6447_v2 }
 0x59f   : > { %3165 = vmatpush1.bf16.msra.mxu0 %v6435_v60 }
 0x5a0   : > { %3166 = vmatprep.subr.bf16.mxu0 %v6439_v18 }
 0x5a1   : > { %3130 = vmatpush1.bf16.msra.mxu1 %v6459_v39 }
 0x5a2   : > { %3131 = vmatprep.subr.bf16.mxu1 %v6463_v15 }
 0x5a3   : > { %3167 = vmatpush1.bf16.msra.mxu0 %v6451_v51 }
 0x5a4   : > { %3168 = vmatprep.subr.bf16.mxu0 %v6455_v1 }
 0x5a5   : > { %3132 = vmatpush1.bf16.msra.mxu1 %v6475_v22 }
 0x5a6   : > { %3133 = vmatprep.subr.bf16.mxu1 %v6479_v27 }
 0x5a7   : > { %3169 = vmatpush1.bf16.msra.mxu0 %v6467_v57 }
 0x5a8   : > { %3170 = vmatprep.subr.bf16.mxu0 %v6471_v9 }
 0x5a9   : > { %3134 = vmatpush1.bf16.msra.mxu1 %v6491_v61 }
 0x5aa   : > { %3135 = vmatprep.subr.bf16.mxu1 %v6510_v46 }
 0x5ab   : > { %3171 = vmatpush1.bf16.msra.mxu0 %v6483_v6 }
 0x5ac   : > { %3172 = vmatprep.subr.bf16.mxu0 %v6487_v35 }
 0x5ad   : > { %3136 = vmatpush1.bf16.msra.mxu1 %v6516_v62 }
 0x5ae   : > { %3233 = vmatprep.subr.bf16.mxu1 %v3231_v4 }
 0x5af   : > { %3173 = vmatpush1.bf16.msra.mxu0 %v6496_v24  ;;  %v3228_v24 = vand.u32 %v4310_v3, %v6296_v58  ;;  %v7272_v58 = vld [vmem:[#allocation40_spill] sm:$0xff] }
 0x5b0   : > { %3174 = vmatprep.subr.bf16.mxu0 %v6500_v33 }
 0x5b3   : > { %3175 = vmatpush1.bf16.msra.mxu0 %v6505_v31 }
 0x5b4   : > { %3176 = vmatprep.subr.bf16.mxu0 %v6513_v14 }
 0x5b7   : > { %3177 = vmatpush1.bf16.msra.mxu0 %v6519_v43 }
 0x5b8   : > { %3279 = vmatprep.subr.bf16.mxu0 %v6291_v42  ;;  %v7268_v42 = vmov 0  }
 0x655   : > { %v2816_v21 = vpop.f32.mrb[0].mxu0 }
 0x656   : > { %v2818_v53 = vpop.f32.mrb[1].mxu0  ;;  %v2823_v14 = vpack.c.bf16 %v2816_v21, %v2816_v21  ;;  %v7270_v21 = vld [vmem:[#allocation38_spill] sm:$0xff] }
 0x657   : > { %v2824_v31 = vpack.c.bf16 %v2818_v53, %v2818_v53  ;;  %v2820_v33 = vpop.f32.mrb[2].mxu0  ;;  %v7269_v53 = vld [vmem:[#allocation41_spill] sm:$0xff] }
 0x658   : > { %v2821_v46 = vpop.f32.mrb[3].mxu0 }
 0x659   : > { %4307 = vmatprep.mubr.msk.bf16.mxu1 %vm3105_vm10, %v2824_v31  ;;  %4308 = vmatprep.mubr.msk.bf16.mxu0 %vm3105_vm10, %v2824_v31 }
 0x65a   : > { %3142 = vmatmul.mubr.bf16.vlgmr.msra.gmra.mrb[0].mxu1 %v2823_v14  ;;  %3183 = vmatmul.mubr.bf16.vlgmr.msra.gmra.mrb[4].mxu0 %v2823_v14 }
 0x65b   : > { %3234 = vmatpush1.bf16.msra.mxu1 %v3228_v24  ;;  %3265 = vmatprep.mubr.bf16.mxu1 %v7268_v42 }
 0x65c   : > { %3320 = vmatprep.subr.bf16.mxu1 %v6304_v20  ;;  %3280 = vmatpush1.bf16.msra.mxu0 %v6294_v13  ;;  %v7271_v13 = vld [vmem:[#allocation39_spill] sm:$0xff]  ;;  %v7273_v20 = vld [vmem:[#allocation42_spill] sm:$0xff] }
 0x65d   : > { %3281 = vmatprep.subr.bf16.mxu0 %v6308_v16  ;;  %v7274_v16 = vlaneseq }
 0x660   : > { %3282 = vmatpush1.bf16.msra.mxu0 %v6311_v36  ;;  %v6589_v36 = vshrl.u32 %v7274_v16, 7  ;;  %v4868_v16 = vld [vmem:[%s6782_s5 + $0xc8] sm:$0xff] (!%p4316_p5)  }
 0x661   : > { %3283 = vmatprep.subr.bf16.mxu0 %v6325_v12 }
 0x662   : > { %4312 = vmatmul.mubr.msk.bf16.vlgmr.msra.gmra.mrb[4].mxu1 %vm2768_vm1, %v6318_v30  ;;  %v6592_v3 = vsub.s32 0, %v6589_v36  ;;  %vm3193_vm12 = vcmp.eq.s32.totalorder %v6589_v36, 0  ;;  %v7275_v30 = vmov 0.0   ;;  %vm3361_vm15 = vcmp.eq.s32.totalorder %v6589_v36, 1 }
 0x663   : > { %3321 = vmatpush1.bf16.msra.mxu1 %v6315_v37 }
 0x664   : > { %3322 = vmatprep.subr.bf16.mxu1 %v6322_v10  ;;  %3284 = vmatpush1.bf16.msra.mxu0 %v6329_v29  ;;  %v4309_v10 = vsel %vm3193_vm12, 1.0, %v7275_v30 }
 0x665   : > { %3285 = vmatprep.subr.bf16.mxu0 %v6335_v47 }
 0x667   : > { %3323 = vmatpush1.bf16.msra.mxu1 %v6339_v54 }
 0x668   : > { %3324 = vmatprep.subr.bf16.mxu1 %v6343_v23  ;;  %3286 = vmatpush1.bf16.msra.mxu0 %v6347_v48 }
 0x669   : > { %3287 = vmatprep.subr.bf16.mxu0 %v6351_v28 }
 0x66b   : > { %3325 = vmatpush1.bf16.msra.mxu1 %v6355_v55 }
 0x66c   : > { %3326 = vmatprep.subr.bf16.mxu1 %v6359_v56  ;;  %3288 = vmatpush1.bf16.msra.mxu0 %v6363_v44 }
 0x66d   : > { %3289 = vmatprep.subr.bf16.mxu0 %v6367_v40 }
 0x66f   : > { %3327 = vmatpush1.bf16.msra.mxu1 %v6371_v41 }
 0x670   : > { %3328 = vmatprep.subr.bf16.mxu1 %v6375_v17  ;;  %3290 = vmatpush1.bf16.msra.mxu0 %v6379_v50 }
 0x671   : > { %3291 = vmatprep.subr.bf16.mxu0 %v6383_v7 }
 0x673   : > { %3329 = vmatpush1.bf16.msra.mxu1 %v6387_v5 }
 0x674   : > { %3330 = vmatprep.subr.bf16.mxu1 %v6391_v45  ;;  %3292 = vmatpush1.bf16.msra.mxu0 %v6395_v8 }
 0x675   : > { %3293 = vmatprep.subr.bf16.mxu0 %v6399_v49 }
 0x677   : > { %3331 = vmatpush1.bf16.msra.mxu1 %v6403_v11 }
 0x678   : > { %3332 = vmatprep.subr.bf16.mxu1 %v6407_v32  ;;  %3294 = vmatpush1.bf16.msra.mxu0 %v6411_v52  ;;  %v4949_v52 = vmov 1983009808  }
 0x679   : > { %3295 = vmatprep.subr.bf16.mxu0 %v6415_v26  ;;  %v3396_v26 = vunpack.c.l.s4 %v4949_v52  ;;  %v3430_v52 = vsub.s32 (!%p4316_p5), 2, %v6589_v36 }
 0x67b   : > { %3333 = vmatpush1.bf16.msra.mxu1 %v6419_v59 }
 0x67c   : > { %3334 = vmatprep.subr.bf16.mxu1 %v6423_v38  ;;  %3296 = vmatpush1.bf16.msra.mxu0 %v6427_v63  ;;  %v4315_v38 = vsel %vm3361_vm15, 1.0, %v7275_v30  ;;  %v4870_v30 = vld [vmem:[%s6782_s5 + $0x88] sm:$0xff] (!%p4316_p5)  }
 0x67d   : > { %3297 = vmatprep.subr.bf16.mxu0 %v6431_v0 }
 0x67f   : > { %3335 = vmatpush1.bf16.msra.mxu1 %v6435_v60 }
 0x680   : > { %3336 = vmatprep.subr.bf16.mxu1 %v6439_v18  ;;  %3298 = vmatpush1.bf16.msra.mxu0 %v6442_v19 }
 0x681   : > { %3299 = vmatprep.subr.bf16.mxu0 %v6447_v2 }
 0x683   : > { %3337 = vmatpush1.bf16.msra.mxu1 %v6451_v51  ;;  %v3397_v51 = vunpack.c.0.s8 %v3396_v26  ;;  %v4892_v26 = vld [vmem:[%s6782_s5 + $0xf8] sm:$0xff] (!%p4316_p5)  }
 0x684   : > { %3338 = vmatprep.subr.bf16.mxu1 %v6455_v1  ;;  %3300 = vmatpush1.bf16.msra.mxu0 %v6459_v39 }
 0x685   : > { %3301 = vmatprep.subr.bf16.mxu0 %v6463_v15  ;;  %v6609_v31 = vsub.s32 %v3397_v51, %v6589_v36 }
 0x687   : > { %3339 = vmatpush1.bf16.msra.mxu1 %v6467_v57 }
 0x688   : > { %3340 = vmatprep.subr.bf16.mxu1 %v6471_v9  ;;  %3302 = vmatpush1.bf16.msra.mxu0 %v6475_v22 }
 0x689   : > { %3303 = vmatprep.subr.bf16.mxu0 %v6479_v27 }
 0x68b   : > { %3341 = vmatpush1.bf16.msra.mxu1 %v6483_v6 }
 0x68c   : > { %3342 = vmatprep.subr.bf16.mxu1 %v6487_v35  ;;  %3304 = vmatpush1.bf16.msra.mxu0 %v6491_v61 }
 0x68d   : > { %3305 = vmatprep.subr.bf16.mxu0 %v7269_v53  ;;  %v4863_v53 = vld [vmem:[%s6782_s5 + $0x40] sm:$0xff] (!%p4316_p5)  }
 0x68f   : > { %3343 = vmatpush1.bf16.msra.mxu1 %v7270_v21  ;;  %v4864_v21 = vld [vmem:[%s6782_s5 + $0xc0] sm:$0xff] (!%p4316_p5)  }
 0x690   : > { %3344 = vmatprep.subr.bf16.mxu1 %v7271_v13  ;;  %3306 = vmatpush1.bf16.msra.mxu0 %v6516_v62  ;;  %v4865_v13 = vld [vmem:[%s6782_s5] sm:$0xff] (!%p4316_p5)  }
 0x691   : > { %4435 = vmatprep.subr.bf16.mxu0 (!%p4316_p5), %v4863_v53  ;;  %v4901_v53 = vld [vmem:[%s6784_s7 + $0x30] sm:$0xff] (!%p4316_p5)  }
 0x693   : > { %3345 = vmatpush1.bf16.msra.mxu1 %v7272_v58  ;;  %v4866_v58 = vld [vmem:[%s6782_s5 + $0x80] sm:$0xff] (!%p4316_p5)  }
 0x694   : > { %3346 = vmatprep.subr.bf16.mxu1 %v7273_v20  ;;  %v4867_v20 = vld [vmem:[%s6782_s5 + $0x48] sm:$0xff] (!%p4316_p5)  }
 0x697   : > { %3347 = vmatpush1.bf16.msra.mxu1 %v6519_v43 }
 0x698   : > { %4457 = vmatprep.subr.bf16.mxu1 (!%p4316_p5), %v4864_v21  ;;  %v4902_v21 = vld [vmem:[%s6784_s7 + $0x38] sm:$0xff] (!%p4316_p5)  }
 0x72d   : > { %v3143_v37 = vpop.f32.mrb[0].mxu1  ;;  %v3184_v12 = vpop.f32.mrb[4].mxu0 }
 0x72e   : > { %v3199_v29 = vrot.slane %v3143_v37, %v6592_v3  ;;  %v3207_v47 = vrot.slane %v3184_v12, %v6592_v3  ;;  %v3145_v54 = vpop.f32.mrb[1].mxu1  ;;  %v3186_v23 = vpop.f32.mrb[5].mxu0  ;;  %v4869_v37 = vld [vmem:[%s6782_s5 + $0x8] sm:$0xff] (!%p4316_p5)   ;;  %v4872_v12 = vld [vmem:[%s6782_s5 + $0xd0] sm:$0xff] (!%p4316_p5)  }
 0x72f   : > { %v3203_v48 = vrot.slane %v3145_v54, %v6592_v3  ;;  %v3211_v28 = vrot.slane %v3186_v23, %v6592_v3  ;;  %v3147_v55 = vpop.f32.mrb[2].mxu1  ;;  %v3188_v56 = vpop.f32.mrb[6].mxu0  ;;  %v4875_v54 = vld [vmem:[%s6782_s5 + $0x58] sm:$0xff] (!%p4316_p5)  }
 0x730   : > { %v3212_v44 = vmul.f32 %v4309_v10, %v3199_v29  ;;  %v3214_v40 = vmul.f32 %v4309_v10, %v3207_v47  ;;  %v3148_v41 = vpop.f32.mrb[3].mxu1  ;;  %v3189_v17 = vpop.f32.mrb[7].mxu0  ;;  %v4873_v29 = vld [vmem:[%s6782_s5 + $0x10] sm:$0xff] (!%p4316_p5)   ;;  %v4876_v23 = vld [vmem:[%s6782_s5 + $0xd8] sm:$0xff] (!%p4316_p5)   ;;  %v4879_v55 = vld [vmem:[%s6782_s5 + $0x60] sm:$0xff] (!%p4316_p5)  }
 0x731   : > { %v3213_v50 = vmul.f32 %v4309_v10, %v3203_v48  ;;  %v3215_v7 = vmul.f32 %v4309_v10, %v3211_v28  ;;  %v4871_v10 = vld [vmem:[%s6782_s5 + $0x50] sm:$0xff] (!%p4316_p5)   ;;  %v4877_v48 = vld [vmem:[%s6782_s5 + $0x18] sm:$0xff] (!%p4316_p5)   ;;  %v4880_v56 = vld [vmem:[%s6782_s5 + $0xe0] sm:$0xff] (!%p4316_p5)  }
 0x732   : > { %v4874_v47 = vld [vmem:[%s6782_s5 + $0x90] sm:$0xff] (!%p4316_p5)   ;;  %v4878_v28 = vld [vmem:[%s6782_s5 + $0x98] sm:$0xff] (!%p4316_p5)   ;;  %v4883_v41 = vld [vmem:[%s6782_s5 + $0x68] sm:$0xff] (!%p4316_p5)  }
 0x733   : > { %v4884_v17 = vld [vmem:[%s6782_s5 + $0xe8] sm:$0xff] (!%p4316_p5)  }
 0x735   : > { %v3267_v5 = vpop.f32.mrb[4].mxu1 }
 0x736   : > { %v3269_v45 = vpop.f32.mrb[5].mxu1  ;;  %v3274_v11 = vpack.c.bf16 %v3267_v5, %v3267_v5  ;;  %v4887_v5 = vld [vmem:[%s6782_s5 + $0x70] sm:$0xff] (!%p4316_p5)  }
 0x737   : > { %v3275_v8 = vpack.c.bf16 %v3269_v45, %v3269_v45  ;;  %v3271_v49 = vpop.f32.mrb[6].mxu1  ;;  %v4888_v45 = vld [vmem:[%s6782_s5 + $0xf0] sm:$0xff] (!%p4316_p5)  }
 0x738   : > { %v3272_v32 = vpop.f32.mrb[7].mxu1  ;;  %v4890_v49 = vld [vmem:[%s6782_s5 + $0xb0] sm:$0xff] (!%p4316_p5)  }
 0x739   : > { %4313 = vmatprep.mubr.msk.bf16.mxu0 %vm3105_vm10, %v3275_v8  ;;  %4314 = vmatprep.mubr.msk.bf16.mxu1 %vm3105_vm10, %v3275_v8  ;;  %v4889_v8 = vld [vmem:[%s6782_s5 + $0x30] sm:$0xff] (!%p4316_p5)   ;;  %v4891_v32 = vld [vmem:[%s6782_s5 + $0x78] sm:$0xff] (!%p4316_p5)  }
 0x73a   : > { %3312 = vmatmul.mubr.bf16.vlgmr.msra.gmra.mrb[8].mxu0 %v3274_v11  ;;  %3353 = vmatmul.mubr.bf16.vlgmr.msra.gmra.mrb[8].mxu1 %v3274_v11  ;;  %v3426_v11 = vsub.s32 (!%p4316_p5), 1, %v6589_v36 }
 0x73b   : > { %4436 = vmatpush3.bf16.msra.mxu0 (!%p4316_p5), %v4865_v13  ;;  %4458 = vmatpush3.bf16.msra.mxu1 (!%p4316_p5), %v4866_v58  ;;  %v4317_v58 = vld [vmem:[%s6783_s6] ss:$0 sm:$0xff] (!%p4316_p5) }
 0x73c   : > { %4437 = vmatprep.subr.bf16.mxu0 (!%p4316_p5), %v4867_v20  ;;  %4459 = vmatprep.subr.bf16.mxu1 (!%p4316_p5), %v4868_v16 }
 0x73f   : > { %4438 = vmatpush3.bf16.msra.mxu0 (!%p4316_p5), %v4869_v37  ;;  %4460 = vmatpush3.bf16.msra.mxu1 (!%p4316_p5), %v4870_v30 }
 0x740   : > { %4439 = vmatprep.subr.bf16.mxu0 (!%p4316_p5), %v4871_v10  ;;  %4461 = vmatprep.subr.bf16.mxu1 (!%p4316_p5), %v4872_v12 }
 0x743   : > { %4440 = vmatpush3.bf16.msra.mxu0 (!%p4316_p5), %v4873_v29  ;;  %4462 = vmatpush3.bf16.msra.mxu1 (!%p4316_p5), %v4874_v47 }
 0x744   : > { %4441 = vmatprep.subr.bf16.mxu0 (!%p4316_p5), %v4875_v54  ;;  %4463 = vmatprep.subr.bf16.mxu1 (!%p4316_p5), %v4876_v23 }
 0x747   : > { %4442 = vmatpush3.bf16.msra.mxu0 (!%p4316_p5), %v4877_v48  ;;  %4464 = vmatpush3.bf16.msra.mxu1 (!%p4316_p5), %v4878_v28 }
 0x748   : > { %4443 = vmatprep.subr.bf16.mxu0 (!%p4316_p5), %v4879_v55  ;;  %4465 = vmatprep.subr.bf16.mxu1 (!%p4316_p5), %v4880_v56  ;;  %v4350_v56 = vld [vmem:[%s6785_s8] ss:$0 sm:$0xff] (!%p4316_p5) }
 0x80d   : > { %v3313_v59 = vpop.f32.mrb[8].mxu0  ;;  %v3354_v63 = vpop.f32.mrb[8].mxu1 }
 0x80e   : > { %v3367_v0 = vrot.slane %v3313_v59, %v6592_v3  ;;  %v3375_v60 = vrot.slane %v3354_v63, %v6592_v3  ;;  %v3315_v18 = vpop.f32.mrb[9].mxu0  ;;  %v3356_v19 = vpop.f32.mrb[9].mxu1  ;;  %v3434_v59 = vsub.s32 (!%p4316_p5), 3, %v6589_v36  ;;  %v4894_v63 = vld [vmem:[%s6782_s5 + $0xb8] sm:$0xff] (!%p4316_p5)  }
 0x80f   : > { %v3371_v2 = vrot.slane %v3315_v18, %v6592_v3  ;;  %v3379_v1 = vrot.slane %v3356_v19, %v6592_v3  ;;  %v3317_v39 = vpop.f32.mrb[10].mxu0  ;;  %v3358_v15 = vpop.f32.mrb[10].mxu1 }
 0x810   : > { %v3380_v57 = vmul.f32 %v4315_v38, %v3367_v0  ;;  %v3382_v9 = vmul.f32 %v4315_v38, %v3375_v60  ;;  %v3318_v22 = vpop.f32.mrb[11].mxu0  ;;  %v3359_v27 = vpop.f32.mrb[11].mxu1  ;;  %v3418_v0 = vld [vmem:[%s6781_s4] sm:$0xf] (!%p4316_p5) }
 0x811   : > { %v3381_v6 = vmul.f32 %v4315_v38, %v3371_v2  ;;  %v3383_v35 = vmul.f32 %v4315_v38, %v3379_v1  ;;  %v4893_v38 = vld [vmem:[%s6782_s5 + $0x38] sm:$0xff] (!%p4316_p5)   ;;  %v3423_v60 = vrot.slane (!%p4316_p5), %v3418_v0, %v6592_v3  ;;  %v3427_v18 = vrot.slane (!%p4316_p5), %v3418_v0, %v3426_v11 }
 0x812   : > { %v3384_v61 = vadd.f32 %v3380_v57, %v3212_v44  ;;  %v3386_v24 = vadd.f32 %v3382_v9, %v3214_v40  ;;  %v4881_v44 = vld [vmem:[%s6782_s5 + $0x20] sm:$0xff] (!%p4316_p5)   ;;  %v3431_v36 = vrot.slane (!%p4316_p5), %v3418_v0, %v3430_v52  ;;  %v3435_v19 = vrot.slane (!%p4316_p5), %v3418_v0, %v3434_v59 }
 0x813   : > { %v3385_v33 = vadd.f32 %v3381_v6, %v3213_v50  ;;  %v3387_v46 = vadd.f32 %v3383_v35, %v3215_v7  ;;  %v4882_v40 = vld [vmem:[%s6782_s5 + $0xa0] sm:$0xff] (!%p4316_p5)   ;;  %4444 = vmatpush3.bf16.msra.mxu0 (!%p4316_p5), %v4881_v44  ;;  %v4885_v50 = vld [vmem:[%s6782_s5 + $0x28] sm:$0xff] (!%p4316_p5)   ;;  %v4950_v2 = vmov (!%p4316_p5), 0.0   ;;  %v3436_v51 = vcombine.low (!%p4316_p5), %v3423_v60, %v3427_v18 }
 0x814   : > { %4466 = vmatpush3.bf16.msra.mxu1 (!%p4316_p5), %v4882_v40  ;;  %4445 = vmatprep.subr.bf16.mxu0 (!%p4316_p5), %v4883_v41  ;;  %v4886_v7 = vld [vmem:[%s6782_s5 + $0xa8] sm:$0xff] (!%p4316_p5)   ;;  %v3437_v1 = vcombine.low (!%p4316_p5), %v3431_v36, %v3435_v19 }
 0x815   : > { %v3393_v14 = vcombine.low %v3384_v61, %v3385_v33  ;;  %v3394_v62 = vcombine.low %v3386_v24, %v3387_v46  ;;  %4467 = vmatprep.subr.bf16.mxu1 (!%p4316_p5), %v4884_v17  ;;  %v3444_v15 = vrot.slane (!%p4316_p5), %v3436_v51, %v6609_v31 }
 0x816   : > { %v3451_v57 = vrot.slane (!%p4316_p5), %v3437_v1, %v6609_v31 }
 0x817   : > { %v3401_v43 = vrot.slane %v3393_v14, %v6609_v31  ;;  %v3408_v34 = vrot.slane %v3394_v62, %v6609_v31  ;;  %3416 = sbr.rel (%p4316_p5) target bundleno = 2534 (0x9e6), region = 64  ;;  %4446 = vmatpush3.bf16.msra.mxu0 (!%p4316_p5), %v4885_v50  ;;  %v4895_v14 = vld [vmem:[%s6784_s7] sm:$0xff] (!%p4316_p5)  }
 0x818   : > { %4468 = vmatpush3.bf16.msra.mxu1 (!%p4316_p5), %v4886_v7  ;;  %4447 = vmatprep.subr.bf16.mxu0 (!%p4316_p5), %v4887_v5  ;;  %v3452_v9 = vcombine.low (!%p4316_p5), %v3444_v15, %v3451_v57 }
 0x819   : > { %v3409_v4 = vcombine.low %v3401_v43, %v3408_v34  ;;  %4469 = vmatprep.subr.bf16.mxu1 (!%p4316_p5), %v4888_v45  ;;  %v4896_v34 = vld [vmem:[%s6784_s7 + $0x8] sm:$0xff] (!%p4316_p5)  }
 0x81b   : > { %v3411_v42 = vadd.f32 %v3409_v4, %v3388_v25  ;;  %4448 = vmatpush3.bf16.msra.mxu0 (!%p4316_p5), %v4889_v8  ;;  %v4898_v25 = vld [vmem:[%s6784_s7 + $0x18] sm:$0xff] (!%p4316_p5)   ;;  %v4899_v4 = vld [vmem:[%s6784_s7 + $0x20] sm:$0xff] (!%p4316_p5)  }
 0x81c   : > { %4470 = vmatpush3.bf16.msra.mxu1 (!%p4316_p5), %v4890_v49  ;;  %4449 = vmatprep.subr.bf16.mxu0 (!%p4316_p5), %v4891_v32 }
 0x81d   : > { %3412 = vst [vmem:[#allocation3] sm:$0xff] %v3411_v42  ;;  %4471 = vmatprep.subr.bf16.mxu1 (!%p4316_p5), %v4892_v26  ;;  %v4900_v42 = vld [vmem:[%s6784_s7 + $0x28] sm:$0xff] (!%p4316_p5)  }
 0x81f   : > { %4450 = vmatpush3.bf16.msra.mxu0 %v4893_v38 }
 0x820   : > { %4472 = vmatpush3.bf16.msra.mxu1 %v4894_v63  ;;  %4488 = vmatprep.subr.bf16.mxu0 %v4950_v2 }
 0x824   : > { %v3417_v39 = vld [vmem:[#allocation3] sm:$0xff] }
 0x825   : > { %v3454_v22 = vadd.f32 %v3452_v9, %v3417_v39 }
 0x827   : > { %v3455_v27 = vmax.f32 %v3454_v22, 0.0 }
 0x829   : > { %v3464_v6 = vrot.slane %v3455_v27, %v6609_v31  ;;  %v3457_v35 = vcombine.high %v3455_v27, %v3455_v27 }
 0x82b   : > { %v3472_v61 = vcombine.high %v3464_v6, %v3464_v6  ;;  %v3471_v3 = vrot.slane %v3457_v35, %v6609_v31  ;;  %v3478_v24 = vpack.c.bf16 %v3464_v6, %v3464_v6  ;;  %v4897_v31 = vld [vmem:[%s6784_s7 + $0x10] sm:$0xff]  }
 0x82d   : > { %v3479_v33 = vpack.c.bf16 %v3472_v61, %v3472_v61  ;;  %v3473_v46 = vcombine.high %v3471_v3, %v3471_v3  ;;  %v3480_v62 = vpack.c.bf16 %v3471_v3, %v3471_v3 }
 0x82f   : > { %3777 = vmatprep.mubr.bf16.mxu0 %v3479_v33  ;;  %v3481_v43 = vpack.c.bf16 %v3473_v46, %v3473_v46 }
 0x830   : > { %3778 = vmatmul.mubr.bf16.vlgmr.msra.gmra.mrb[0].mxu0 %v3478_v24 }
 0x831   : > { %3817 = vmatprep.mubr.bf16.mxu1 %v3481_v43  ;;  %4489 = vmatpush3.bf16.msra.mxu0 %v4895_v14 }
 0x832   : > { %3818 = vmatmul.mubr.bf16.vlgmr.msra.gmra.mrb[0].mxu1 %v3480_v62  ;;  %4490 = vmatprep.subr.bf16.mxu0 %v4950_v2 }
 0x833   : > { %4504 = vmatprep.mubr.msk.bf16.mxu0 %vm4951_vm14, %v4950_v2 }
 0x835   : > { %4491 = vmatpush3.bf16.msra.mxu0 %v4896_v34 }
 0x836   : > { %4492 = vmatprep.subr.bf16.mxu0 %v4950_v2 }
 0x839   : > { %4493 = vmatpush3.bf16.msra.mxu0 %v4897_v31 }
 0x83a   : > { %4494 = vmatprep.subr.bf16.mxu0 %v4950_v2 }
 0x83d   : > { %4495 = vmatpush3.bf16.msra.mxu0 %v4898_v25 }
 0x83e   : > { %4496 = vmatprep.subr.bf16.mxu0 %v4950_v2 }
 0x841   : > { %4497 = vmatpush3.bf16.msra.mxu0 %v4899_v4 }
 0x842   : > { %4498 = vmatprep.subr.bf16.mxu0 %v4950_v2 }
 0x845   : > { %4499 = vmatpush3.bf16.msra.mxu0 %v4900_v42 }
 0x846   : > { %4500 = vmatprep.subr.bf16.mxu0 %v4950_v2 }
 0x849   : > { %4501 = vmatpush3.bf16.msra.mxu0 %v4901_v53 }
 0x84a   : > { %4502 = vmatprep.subr.bf16.mxu0 %v4950_v2 }
 0x84d   : > { %4503 = vmatpush3.bf16.msra.mxu0 %v4902_v21 }
 0x903   : > { %v4451_v13 = vpop.f32.mrb[0].mxu0 }
 0x904   : > { %v4452_v20 = vpop.f32.mrb[1].mxu0 }
 0x905   : > { %v4473_v16 = vpop.f32.mrb[0].mxu1  ;;  %v4453_v37 = vadd.f32 %v4452_v20, %v4451_v13  ;;  %v4454_v30 = vpop.f32.mrb[2].mxu0 }
 0x906   : > { %v4474_v10 = vpop.f32.mrb[1].mxu1  ;;  %v4455_v12 = vpop.f32.mrb[3].mxu0 }
 0x907   : > { %v3780_v29 = vadd.f32 %v4453_v37, %v4317_v58  ;;  %v4475_v47 = vadd.f32 %v4474_v10, %v4473_v16  ;;  %v4476_v54 = vpop.f32.mrb[2].mxu1 }
 0x908   : > { %v4477_v23 = vpop.f32.mrb[3].mxu1 }
 0x909   : > { %v3820_v48 = vadd.f32 %v4475_v47, %v3780_v29 }
 0x90b   : > { %v3825_v28 = vmax.f32 %v3820_v48, 0.0 }
 0x90d   : > { %v3826_v55 = vpack.c.bf16 %v3825_v28, %v3825_v28 }
 0x90f   : > { %4505 = vmatmul.mubr.bf16.vlgmr.msra.gmra.mrb[4].mxu0 %v3826_v55 }
 0x9e2   : > { %v3932_v44 = vpop.f32.mrb[4].mxu0 }
 0x9e3   : > { %v3933_v40 = vadd.f32 %v4350_v56, %v3932_v44  ;;  %v4506_v41 = vpop.f32.mrb[5].mxu0 }
 0x9e4   : > { %v3935_v17 = vpop.f32.mrb[6].mxu0 }
 0x9e5   : > { %3938 = vst [vmem:[#allocation4] sm:$0x3] %v3933_v40  ;;  %v4507_v50 = vpop.f32.mrb[7].mxu0 }
 0x9e6 PF: > { %p4721_p6 = scmp.eq.s32.totalorder %s5009_s10, 6  ;;  %s4952_s28 = smov [#allocation4]  }
 0x9e7   : > { %s3946_s29 = sshll.u32 %s4952_s28, 4  ;;  %s3947_s29 = int_to_ptr.vmem [resolvable:$true] %s3946_s29 }
 0x9e8   : > { %s4903_s11 = scalar_lea.vmem %s3947_s29, 32  ;;  %p4910_p10 = scmp.lt.s32.totalorder %s3947_s29, %s3947_s29 }
 0x9e9   : > { %p4904_p7 = scmp.ne.s32.totalorder %s3947_s29, %s4903_s11  ;;  %p4911_p11 = scmp.lt.s32.totalorder %s4903_s11, %s4903_s11 }
 0x9eb   : > { %p4905_p8 = pnand %p4904_p7, %p4721_p6  ;;  %p4912_p12 = por %p4911_p11, %p4910_p10 }
 0x9ed   : > { %p4906_p9 = pneg %p4905_p8 }
 0x9ef   : > { %p4913_p13 = pnand %p4912_p12, %p4906_p9 }
 0x9f1   : > { %4916 = shalt.err (!%p4913_p13)
}
 0x9f2   : > { %s4917_s14 = scalar_lea.hbm %s6786_s9, 32 }
 0x9f3   : > { %p4918_p0 = scmp.ne.s32.totalorder %s6786_s9, %s4917_s14  ;;  %p4923_p3 = scmp.lt.u32.totalorder %s4917_s14, %s6786_s9 }
 0x9f5   : > { %p4919_p1 = pnand %p4918_p0, %p4721_p6 }
 0x9f7   : > { %p4920_p2 = pneg %p4919_p1 }
 0x9f9   : > { %p4925_p4 = pnand %p4923_p3, %p4920_p2 }
 0x9fb   : > { %4928 = shalt.err (!%p4925_p4)
}
 0x9fc   : > { %4718 = dma.vmem_to_hbm [thread:$0]  (%p4721_p6), %s3947_s29, 32, %s6786_s9, [#allocation5]  }
 0x9fd   : > { %4934 = dma.done.wait (%p4721_p6), [#allocation5], 32  }
 0x9fe   : > { %4936 = vsyncadd (%p4721_p6), [#allocation5], 4294967264 }
 0x9ff PF: > { %s20_s30 = sadd.s32 1, %s4939_s30  }
 0xa00   : > { %p17_p5 = scmp.ge.s32.totalorder %s20_s30, 9  }
 0xa02   :  { %19 = sbr.rel (!%p17_p5) target bundleno = 1 (0x1), region = 93 }
 0xa09   :  { %3959 = vsyncpa [#allocation5], 1 }
 0xa0a   :  { %3961 = vsyncpa [#allocation5 + $0x1], 1 }

// kernel: net_forward.2
= control target key start
LH: loop header
LB: loop body
LE: loop exit
PB: predicated region body
PF: predicated region fallthrough
CT: control target
= control target key end

     0   :  { %s11934_s24 = smov 0   ;;  %s15271_s0 = inlined_call_operand.vmem [shape: f32[2,3,70,70], index: 0, kind: input, shape index: {}]   ;;  %s15272_s1 = inlined_call_operand.vmem [shape: bf16[9,70,544], index: 1, kind: input, shape index: {}]   ;;  %s15273_s2 = inlined_call_operand.vmem [shape: bf16[3,272,512], index: 2, kind: input, shape index: {}]   ;;  %s15274_s3 = inlined_call_operand.vmem [shape: bf16[3,256,448], index: 3, kind: input, shape index: {}]   ;;  %s15275_s4 = inlined_call_operand.vmem [shape: f32[1,544], index: 4, kind: input, shape index: {}]   ;;  %s15276_s5 = inlined_call_operand.vmem [shape: f32[1,512], index: 5, kind: input, shape index: {}]   ;;  %s15277_s6 = inlined_call_operand.vmem [shape: f32[1,448], index: 6, kind: input, shape index: {}]   ;;  %s15278_s7 = inlined_call_operand.vmem [shape: bf16[2,14,448], index: 7, kind: output, shape index: {}]  }
   0x1 LB: > { %s8812_s25 = sadd.s32 4294967295, %s11888_s24   ;;  %p8816_p0 = scmp.ge.s32.totalorder %s11888_s24, 1  ;;  %s11888_s24 = sphi %s11934_s24, %s17_s24  }
   0x2   : > { %p237_p1 = scmp.lt.s32.totalorder %s11888_s24, 3 }
   0x4   : > { %p238_p2 = pnand %p8816_p0, %p237_p1 }
   0x6   : > { %241 = sbr.rel (%p238_p2) target bundleno = 2190 (0x88e), region = 48 }
   0xd   : > { %v10991_v0 = vld [vmem:[%s15272_s1 + $0xb8] ss:$20 sps:$4 sm:$0xff]   ;;  %v10993_v1 = vld [vmem:[%s15272_s1 + $0xc0] ss:$20 sps:$4 sm:$0xff]   ;;  %v15281_v2 = vmov 0   ;;  %p269_p3 = scmp.lt.s32.totalorder %s8812_s25, 1 }
   0xe   : > { %570 = vmatprep.mubr.bf16.mxu0 %v15281_v2  ;;  %651 = vmatprep.mubr.bf16.mxu1 %v15281_v2  ;;  %v10995_v3 = vld [vmem:[%s15272_s1 + $0xb4] ss:$20 sps:$4 sm:$0xff]   ;;  %v10996_v4 = vld [vmem:[%s15272_s1 + $0xbc] ss:$20 sps:$4 sm:$0xff]   ;;  %v11002_v8 = vld [vmem:[%s15272_s1 + $0xe4] ss:$20 sps:$4 sm:$0xff]  }
   0xf   : > { %538 = vmatprep.subr.bf16.mxu0 %v10991_v0  ;;  %619 = vmatprep.subr.bf16.mxu1 %v10993_v1  ;;  %v10997_v5 = vld [vmem:[%s15272_s1 + $0xe0] ss:$20 sps:$4 sm:$0xff]   ;;  %s15320_s25 = smov (!%p269_p3, %s8812_s25), 1  ;;  %v10999_v6 = vld [vmem:[%s15272_s1 + $0xe8] ss:$20 sps:$4 sm:$0xff]   ;;  %vm522_vm0 = vcmask 1042432  }
  0x10   : > { %539 = vmatpush1.bf16.msra.mxu0 %v10995_v3  ;;  %620 = vmatpush1.bf16.msra.mxu1 %v10996_v4  ;;  %v11001_v7 = vld [vmem:[%s15272_s1 + $0xdc] ss:$20 sps:$4 sm:$0xff]   ;;  %s10913_s19 = smul.u32 216, %s15320_s25  ;;  %v11007_v11 = vld [vmem:[%s15272_s1 + $0x104] ss:$20 sps:$4 sm:$0xff]   ;;  %vm506_vm2 = vcmask 572416  }
  0x11   : > { %540 = vmatprep.subr.bf16.mxu0 %v10997_v5  ;;  %621 = vmatprep.subr.bf16.mxu1 %v10999_v6  ;;  %v11003_v9 = vld [vmem:[%s15272_s1 + $0x108] ss:$20 sps:$4 sm:$0xff]   ;;  %v11005_v10 = vld [vmem:[%s15272_s1 + $0x110] ss:$20 sps:$4 sm:$0xff]   ;;  %v11008_v12 = vld [vmem:[%s15272_s1 + $0x10c] ss:$20 sps:$4 sm:$0xff]  }
  0x12   : > { %v11009_v13 = vld [vmem:[%s15272_s1 + $0x130] ss:$20 sps:$4 sm:$0xff]   ;;  %s11989_s11 = scalar_lea.vmem %s15271_s0, %s10913_s19  ;;  %v11011_v14 = vld [vmem:[%s15272_s1 + $0x138] ss:$20 sps:$4 sm:$0xff]   ;;  %v11014_v16 = vld [vmem:[%s15272_s1 + $0x134] ss:$20 sps:$4 sm:$0xff]  }
  0x13   : > { %v11013_v15 = vld [vmem:[%s15272_s1 + $0x12c] ss:$20 sps:$4 sm:$0xff]   ;;  %v8844_v17 = vld [vmem:[%s15272_s1 + $0x154] sm:$0x77]  ;;  %vm349_vm1 = vsmask.f32 7424 }
  0x14   : > { %541 = vmatpush1.bf16.msra.mxu0 %v11001_v7  ;;  %622 = vmatpush1.bf16.msra.mxu1 %v11002_v8  ;;  %v8845_v18 = vld [vmem:[%s15272_s1 + $0x15c] sm:$0x77]  ;;  %v281_v20 = vld [vmem:[%s11989_s11 + $0x8] sm:$0xff]  ;;  %v8868_v21 = vcombine.high %v8844_v17, %v8844_v17  ;;  %v8867_v22 = vcombine.low %v8844_v17, %v8844_v17  ;;  %v282_v23 = vld [vmem:[%s11989_s11 + $0x10] sm:$0xff]  ;;  %v15287_v46 = vmov 0.0   ;;  %vm11892_vm3 = vmmov 0  }
  0x15   : > { %542 = vmatprep.subr.bf16.mxu0 %v11003_v9  ;;  %623 = vmatprep.subr.bf16.mxu1 %v11005_v10  ;;  %v280_v19 = vld [vmem:[%s11989_s11] sm:$0xff]  ;;  %v283_v24 = vld [vmem:[%s11989_s11 + $0x18] sm:$0xff]  ;;  %v8870_v27 = vcombine.high %v8845_v18, %v8845_v18  ;;  %v8869_v28 = vcombine.low %v8845_v18, %v8845_v18  ;;  %v285_v30 = vld [vmem:[%s11989_s11 + $0x28] sm:$0xff]  ;;  %vm1181_vm4 = vcmask 1046528   ;;  %s11893_s18 = smov 112   ;;  %vm4665_vm5 = vcmask 916480  }
  0x16   : > { %v12010_v25 = vpack.c.bf16 %v281_v20, %v280_v19  ;;  %v284_v26 = vld [vmem:[%s11989_s11 + $0x20] sm:$0xff]  ;;  %v12013_v29 = vpack.c.bf16 %v283_v24, %v282_v23  ;;  %v524_v36 = vsel %vm522_vm0, %v8867_v22, 0  ;;  %v286_v42 = vld [vmem:[%s11989_s11 + $0x30] sm:$0xff]  ;;  %v287_v43 = vld [vmem:[%s11989_s11 + $0x38] sm:$0xff]  ;;  %vm4817_vm10 = vcmask 1041408   ;;  %s10136_s17 = sshll.u32 %s15320_s25, 5 }
  0x17   : > { %v12019_v35 = vpack.c.bf16 %v285_v30, %v284_v26  ;;  %v530_v37 = vsel %vm522_vm0, %v8869_v28, 0  ;;  %v11023_v40 = vld [vmem:[%s15272_s1 + $0xc] ss:$20 sps:$4 sm:$0xff]   ;;  %v11019_v47 = vld [vmem:[%s15272_s1 + $0xc4] ss:$20 sps:$4 sm:$0xff]   ;;  %v12049_v50 = vpack.c.bf16 %v287_v43, %v286_v42  ;;  %vm4807_vm11 = vcmask 556032   ;;  %s278_s20 = scalar_lea.vmem %s15278_s7, %s10136_s17 }
  0x18   : > { %543 = vmatpush1.bf16.msra.mxu0 %v11007_v11  ;;  %624 = vmatpush1.bf16.msra.mxu1 %v11008_v12  ;;  %v351_v31 = vshrl.u32 %v12010_v25, 16  ;;  %v353_v32 = vshll.u32 %v12010_v25, 16  ;;  %v358_v33 = vshll.u32 %v12013_v29, 16  ;;  %v362_v41 = vshrl.u32 %v12013_v29, 16  ;;  %v11021_v48 = vld [vmem:[%s15272_s1 + $0x8] ss:$20 sps:$4 sm:$0xff]  }
  0x19   : > { %544 = vmatprep.subr.bf16.mxu0 %v11009_v13  ;;  %625 = vmatprep.subr.bf16.mxu1 %v11011_v14  ;;  %v366_v45 = vshll.u32 %v12019_v35, 16  ;;  %v11026_v49 = vld [vmem:[%s15272_s1 + $0x34] ss:$20 sps:$4 sm:$0xff]   ;;  %v11020_v51 = vld [vmem:[%s15272_s1 + $0xec] ss:$20 sps:$4 sm:$0xff]   ;;  %v370_v56 = vshrl.u32 %v12019_v35, 16 }
  0x1a   : > { %v355_v34 = vrot.slane %v353_v32, 1  ;;  %v360_v38 = vrot.slane %v358_v33, 1  ;;  %v11024_v54 = vld [vmem:[%s15272_s1 + $0x30] ss:$20 sps:$4 sm:$0xff]   ;;  %v374_v57 = vshll.u32 %v12049_v50, 16  ;;  %v378_v10 = vshrl.u32 %v12049_v50, 16 }
  0x1b   : > { %v368_v53 = vrot.slane %v366_v45, 1  ;;  %v11030_v55 = vld [vmem:[%s15272_s1 + $0x5c] ss:$20 sps:$4 sm:$0xff]   ;;  %v288_v59 = vld [vmem:[%s11989_s11 + $0x40] sm:$0x3f] }
  0x1c   : > { %545 = vmatpush1.bf16.msra.mxu0 %v11013_v15  ;;  %626 = vmatpush1.bf16.msra.mxu1 %v11014_v16  ;;  %v356_v39 = vor.u32 %v355_v34, %v351_v31  ;;  %v364_v52 = vor.u32 %v362_v41, %v360_v38  ;;  %v11027_v60 = vld [vmem:[%s15272_s1 + $0x114] ss:$20 sps:$4 sm:$0xff]   ;;  %v11028_v61 = vld [vmem:[%s15272_s1 + $0x58] ss:$20 sps:$4 sm:$0xff]   ;;  %v376_v63 = vrot.slane %v374_v57, 1  ;;  %v12091_v4 = vpack.c.bf16 %v288_v59, %v288_v59 }
  0x1d   : > { %8872 = vmatprep.subr.msk.bf16.mxu0 %vm522_vm0, %v8868_v21  ;;  %8878 = vmatprep.subr.msk.bf16.mxu1 %vm522_vm0, %v8870_v27  ;;  %v11033_v62 = vld [vmem:[%s15272_s1 + $0x84] ss:$20 sps:$4 sm:$0xff]   ;;  %v11031_v0 = vld [vmem:[%s15272_s1 + $0x80] ss:$20 sps:$4 sm:$0xff]   ;;  %v319_v1 = vld [vmem:[%s15272_s1 + $0xa8] sm:$0x77]  ;;  %v372_v3 = vor.u32 %v370_v56, %v368_v53 }
  0x1e   : > { %v12032_v44 = vsel %vm349_vm1, %v356_v39, %v360_v38  ;;  %v12066_v58 = vsel %vm349_vm1, %v364_v52, %v368_v53  ;;  %v11034_v5 = vld [vmem:[%s15272_s1 + $0x13c] ss:$20 sps:$4 sm:$0xff]   ;;  %v11036_v6 = vld [vmem:[%s15272_s1 + $0x164] ss:$0 sps:$4 sm:$0x77]   ;;  %v8912_v7 = vcombine.high %v319_v1, %v319_v1  ;;  %v8911_v8 = vcombine.low %v319_v1, %v319_v1 }
  0x1f   : > { %v12101_v9 = vsel %vm349_vm1, %v372_v3, %v376_v63  ;;  %v382_v11 = vshll.u32 %v12091_v4, 16  ;;  %v536_v12 = vsel %vm522_vm0, %v11036_v6, 0  ;;  %v11040_v14 = vld [vmem:[%s15272_s1 + $0x4] ss:$20 sps:$4 sm:$0xff]   ;;  %v380_v15 = vor.u32 %v378_v10, %v376_v63  ;;  %v11038_v20 = vld [vmem:[%s15272_s1] ss:$20 sps:$4 sm:$0xff]  }
  0x20   : > { %547 = vmatpush1.bf16.msra.mxu0 %v524_v36  ;;  %628 = vmatpush1.bf16.msra.mxu1 %v530_v37  ;;  %v906_v13 = vsel %vm522_vm0, %v8911_v8, 0  ;;  %v386_v18 = vshrl.u32 %v12091_v4, 16  ;;  %v11043_v21 = vld [vmem:[%s15272_s1 + $0x2c] ss:$20 sps:$4 sm:$0xff]   ;;  %v11044_v22 = vld [vmem:[%s15272_s1 + $0x10] ss:$20 sps:$4 sm:$0xff]  }
  0x21   : > { %10247 = vmatprep.subr.bf16.mxu0 %v15287_v46  ;;  %995 = vmatprep.subr.bf16.mxu1 %v11023_v40  ;;  %v384_v16 = vrot.slane %v382_v11, 1  ;;  %v11041_v23 = vld [vmem:[%s15272_s1 + $0x28] ss:$20 sps:$4 sm:$0xff]   ;;  %v11045_v24 = vld [vmem:[%s15272_s1 + $0x38] ss:$20 sps:$4 sm:$0xff]   ;;  %v1183_v6 = vrot.slane %v12013_v29, 1 }
  0x22   : > { %v11048_v26 = vld [vmem:[%s15272_s1 + $0x54] ss:$20 sps:$4 sm:$0xff]   ;;  %v11046_v27 = vld [vmem:[%s15272_s1 + $0x50] ss:$20 sps:$4 sm:$0xff]   ;;  %v11050_v32 = vld [vmem:[%s15272_s1 + $0x78] ss:$20 sps:$4 sm:$0xff]  }
  0x23   : > { %8873 = vmatmul.mubr.msk.bf16.vlgmr.msra.gmra.mrb[0].mxu0 %vm506_vm2, %v12032_v44  ;;  %8879 = vmatmul.mubr.msk.bf16.vlgmr.msra.gmra.mrb[0].mxu1 %vm506_vm2, %v12032_v44  ;;  %v12120_v17 = vsel %vm349_vm1, %v380_v15, %v384_v16  ;;  %v388_v19 = vor.u32 %v386_v18, %v384_v16  ;;  %v11049_v28 = vld [vmem:[%s15272_s1 + $0x60] ss:$20 sps:$4 sm:$0xff]   ;;  %v11052_v30 = vld [vmem:[%s15272_s1 + $0x7c] ss:$20 sps:$4 sm:$0xff]   ;;  %v11069_v52 = vld [vmem:[%s15272_s1 + $0x1b8] ss:$20 sps:$4 sm:$0xff]  }
  0x24   : > { %580 = vmatprep.mubr.bf16.mxu0 %v15281_v2  ;;  %661 = vmatprep.mubr.bf16.mxu1 %v15281_v2  ;;  %v318_v31 = vld [vmem:[%s15272_s1 + $0xa0] sm:$0x77]  ;;  %v11053_v33 = vld [vmem:[%s15272_s1 + $0x88] ss:$20 sps:$4 sm:$0xff]   ;;  %v1185_v11 = vrot.slane %v12019_v35, 1  ;;  %v1187_v18 = vrot.slane %v12049_v50, 1 }
  0x25   : > { %10248 = vmatpush3.bf16.msra.mxu0 %v11019_v47  ;;  %996 = vmatpush1.bf16.msra.mxu1 %v11021_v48  ;;  %v11056_v34 = vld [vmem:[%s15272_s1 + $0xb0] ss:$0 sps:$4 sm:$0x77]   ;;  %v8909_v36 = vcombine.low %v318_v31, %v318_v31  ;;  %v8910_v37 = vcombine.high %v318_v31, %v318_v31  ;;  %v11059_v38 = vld [vmem:[%s15272_s1 + $0x16c] ss:$20 sps:$4 sm:$0xff]  }
  0x26   : > { %10249 = vmatprep.subr.bf16.mxu0 %v15287_v46  ;;  %997 = vmatprep.subr.bf16.mxu1 %v11026_v49  ;;  %v912_v40 = vsel %vm522_vm0, %v11056_v34, 0  ;;  %v11065_v41 = vld [vmem:[%s15272_s1 + $0x174] ss:$20 sps:$4 sm:$0xff]   ;;  %v11063_v43 = vld [vmem:[%s15272_s1 + $0x170] ss:$20 sps:$4 sm:$0xff]   ;;  %v12348_v15 = vsel %vm1181_vm4, %v1183_v6, %v1185_v11 }
  0x27   : > { %v900_v39 = vsel %vm522_vm0, %v8909_v36, 0  ;;  %v11057_v42 = vld [vmem:[%s15272_s1 + $0x168] ss:$20 sps:$4 sm:$0xff]   ;;  %v11060_v47 = vld [vmem:[%s15272_s1 + $0x190] ss:$20 sps:$4 sm:$0xff]  }
  0x28   : > { %v11068_v45 = vld [vmem:[%s15272_s1 + $0x19c] ss:$20 sps:$4 sm:$0xff]   ;;  %v11066_v48 = vld [vmem:[%s15272_s1 + $0x198] ss:$20 sps:$4 sm:$0xff]   ;;  %v11072_v53 = vld [vmem:[%s15272_s1 + $0x1c0] ss:$20 sps:$4 sm:$0xff]  }
  0x29   : > { %10250 = vmatpush3.bf16.msra.mxu0 %v11020_v51  ;;  %998 = vmatpush1.bf16.msra.mxu1 %v11024_v54  ;;  %v11071_v49 = vld [vmem:[%s15272_s1 + $0x1bc] ss:$20 sps:$4 sm:$0xff]   ;;  %v11074_v51 = vld [vmem:[%s15272_s1 + $0x1c4] ss:$20 sps:$4 sm:$0xff]   ;;  %v8955_v56 = vld [vmem:[%s15272_s1 + $0x208] sm:$0x77] }
  0x2a   : > { %10251 = vmatprep.subr.bf16.mxu0 %v15287_v46  ;;  %999 = vmatprep.subr.bf16.mxu1 %v11030_v55  ;;  %v11077_v54 = vld [vmem:[%s15272_s1 + $0x1e4] ss:$20 sps:$4 sm:$0xff]   ;;  %v11080_v55 = vld [vmem:[%s15272_s1 + $0x1ec] ss:$20 sps:$4 sm:$0xff]   ;;  %v11078_v59 = vld [vmem:[%s15272_s1 + $0x1e8] ss:$20 sps:$4 sm:$0xff]  }
  0x2b   : > { %8874 = vmatmul.mubr.msk.bf16.gmra.mrb[4].mxu0 %vm506_vm2, %v12066_v58  ;;  %8880 = vmatmul.mubr.msk.bf16.gmra.mrb[4].mxu1 %vm506_vm2, %v12066_v58  ;;  %v11075_v57 = vld [vmem:[%s15272_s1 + $0x1e0] ss:$20 sps:$4 sm:$0xff]   ;;  %v11089_v3 = vld [vmem:[%s15272_s1 + $0x228] ss:$20 sps:$4 sm:$0xff]   ;;  %v11087_v8 = vld [vmem:[%s15272_s1 + $0x224] ss:$20 sps:$4 sm:$0xff]  }
  0x2c   : > { %590 = vmatprep.mubr.bf16.mxu0 %v15281_v2  ;;  %671 = vmatprep.mubr.bf16.mxu1 %v15281_v2  ;;  %v11092_v10 = vld [vmem:[%s15272_s1 + $0x250] ss:$20 sps:$4 sm:$0xff]   ;;  %v11109_v34 = vld [vmem:[%s15272_s1 + $0x248] ss:$20 sps:$4 sm:$0xff]  }
  0x2d   : > { %10252 = vmatpush3.bf16.msra.mxu0 %v11027_v60  ;;  %1000 = vmatpush1.bf16.msra.mxu1 %v11028_v61  ;;  %v8979_v60 = vcombine.high %v8955_v56, %v8955_v56  ;;  %v9034_v16 = vld [vmem:[%s15272_s1 + $0x2c4] sm:$0x77]  ;;  %v9002_v36 = vld [vmem:[%s11989_s11 + $0x58] sm:$0xff] }
  0x2e   : > { %10253 = vmatprep.subr.bf16.mxu0 %v15287_v46  ;;  %1001 = vmatprep.subr.bf16.mxu1 %v11033_v62  ;;  %v8978_v62 = vcombine.low %v8955_v56, %v8955_v56  ;;  %v11125_v56 = vld [vmem:[%s15272_s1 + $0x2d4] ss:$20 sps:$4 sm:$0xff]  }
  0x31   : > { %10254 = vmatpush3.bf16.msra.mxu0 %v11034_v5  ;;  %1002 = vmatpush1.bf16.msra.mxu1 %v11031_v0  ;;  %v1324_v0 = vsel %vm522_vm0, %v8978_v62, 0  ;;  %v1182_v5 = vrot.slane %v12010_v25, 1 }
  0x32   : > { %10255 = vmatprep.subr.bf16.mxu0 %v15287_v46  ;;  %8920 = vmatprep.subr.msk.bf16.mxu1 %vm522_vm0, %v8912_v7  ;;  %v11085_v7 = vld [vmem:[%s15272_s1 + $0x178] ss:$20 sps:$4 sm:$0xff]  }
  0x33   : > { %8875 = vmatmul.mubr.msk.bf16.gmra.mrb[8].mxu0 %vm506_vm2, %v12101_v9  ;;  %8881 = vmatmul.mubr.msk.bf16.gmra.mrb[8].mxu1 %vm506_vm2, %v12101_v9 }
  0x34   : > { %600 = vmatprep.mubr.bf16.mxu0 %v15281_v2  ;;  %681 = vmatprep.mubr.bf16.mxu1 %v15281_v2 }
  0x35   : > { %10256 = vmatpush3.bf16.msra.mxu0 %v536_v12  ;;  %1004 = vmatpush1.bf16.msra.mxu1 %v906_v13  ;;  %v11096_v12 = vld [vmem:[%s15272_s1 + $0x278] ss:$20 sps:$4 sm:$0xff]   ;;  %v11093_v13 = vld [vmem:[%s15272_s1 + $0x1c8] ss:$20 sps:$4 sm:$0xff]  }
  0x36   : > { %914 = vmatprep.subr.bf16.mxu0 %v11040_v14  ;;  %10277 = vmatprep.subr.bf16.mxu1 %v15287_v46  ;;  %v11094_v14 = vld [vmem:[%s15272_s1 + $0x274] ss:$20 sps:$4 sm:$0xff]  }
  0x3b   : > { %8876 = vmatmul.mubr.msk.bf16.gmra.mrb[12].mxu0 %vm506_vm2, %v12120_v17  ;;  %8882 = vmatmul.mubr.msk.bf16.gmra.mrb[12].mxu1 %vm506_vm2, %v12120_v17 }
  0x3c   : > { %610 = vmatprep.mubr.bf16.mxu0 %v15281_v2  ;;  %691 = vmatprep.mubr.bf16.mxu1 %v15281_v2 }
  0x43   : > { %8877 = vmatmul.mubr.msk.bf16.gmra.mrb[16].mxu0 %vm506_vm2, %v388_v19  ;;  %8883 = vmatmul.mubr.msk.bf16.gmra.mrb[16].mxu1 %vm506_vm2, %v388_v19 }
  0x44   : > { %10257 = vmatprep.mubr.msk.bf16.mxu0 %vm11892_vm3, %v15287_v46  ;;  %1027 = vmatprep.mubr.bf16.mxu1 %v15281_v2 }
  0x4b   : > { %10258 = vmatmul.mubr.msk.bf16.vlgmr.msra.gmra.mrb[20].mxu0 %vm506_vm2, %v12032_v44  ;;  %8921 = vmatmul.mubr.msk.bf16.vlgmr.msra.gmra.mrb[0].mxu1 %vm506_vm2, %v12010_v25  ;;  %v11062_v44 = vld [vmem:[%s15272_s1 + $0x194] ss:$20 sps:$4 sm:$0xff]  }
  0x4c   : > { %10261 = vmatprep.mubr.msk.bf16.mxu0 %vm11892_vm3, %v15287_v46  ;;  %1037 = vmatprep.mubr.bf16.mxu1 %v15281_v2 }
  0x4d   : > { %915 = vmatpush1.bf16.msra.mxu0 %v11038_v20  ;;  %10278 = vmatpush3.bf16.msra.mxu1 %v11044_v22  ;;  %v9059_v20 = vcombine.high %v9034_v16, %v9034_v16  ;;  %v9058_v22 = vcombine.low %v9034_v16, %v9034_v16 }
  0x4e   : > { %916 = vmatprep.subr.bf16.mxu0 %v11043_v21  ;;  %10279 = vmatprep.subr.bf16.mxu1 %v15287_v46  ;;  %v11102_v21 = vld [vmem:[%s15272_s1 + $0x218] ss:$0 sps:$4 sm:$0x77]  }
  0x51   : > { %917 = vmatpush1.bf16.msra.mxu0 %v11041_v23  ;;  %10280 = vmatpush3.bf16.msra.mxu1 %v11045_v24  ;;  %v12375_v23 = vsel %vm1181_vm4, %v1185_v11, %v1187_v18  ;;  %v1799_v24 = vsel %vm522_vm0, %v9058_v22, 0  ;;  %v11143_v11 = vld [vmem:[%s15272_s1 + $0x34c] ss:$20 sps:$4 sm:$0xff]   ;;  %v11155_v22 = vld [vmem:[%s15272_s1 + $0x390] ss:$20 sps:$4 sm:$0xff]  }
  0x52   : > { %918 = vmatprep.subr.bf16.mxu0 %v11048_v26  ;;  %10281 = vmatprep.subr.bf16.mxu1 %v15287_v46  ;;  %v11106_v26 = vld [vmem:[%s15272_s1 + $0x220] ss:$20 sps:$4 sm:$0xff]  }
  0x53   : > { %10262 = vmatmul.mubr.msk.bf16.gmra.mrb[24].mxu0 %vm506_vm2, %v12066_v58  ;;  %8922 = vmatmul.mubr.msk.bf16.gmra.mrb[4].mxu1 %vm506_vm2, %v12013_v29  ;;  %v8956_v58 = vld [vmem:[%s15272_s1 + $0x210] sm:$0x77] }
  0x54   : > { %10265 = vmatprep.mubr.msk.bf16.mxu0 %vm11892_vm3, %v15287_v46  ;;  %1047 = vmatprep.mubr.bf16.mxu1 %v15281_v2  ;;  %v8981_v61 = vcombine.high %v8956_v58, %v8956_v58  ;;  %v8980_v63 = vcombine.low %v8956_v58, %v8956_v58 }
  0x55   : > { %919 = vmatpush1.bf16.msra.mxu0 %v11046_v27  ;;  %10282 = vmatpush3.bf16.msra.mxu1 %v11049_v28  ;;  %v12391_v27 = vrot.slane %v12091_v4, 1 }
  0x56   : > { %920 = vmatprep.subr.bf16.mxu0 %v11052_v30  ;;  %10283 = vmatprep.subr.bf16.mxu1 %v15287_v46  ;;  %v1330_v1 = vsel %vm522_vm0, %v8980_v63, 0  ;;  %v9001_v30 = vld [vmem:[%s11989_s11 + $0x50] sm:$0xff]  ;;  %v9008_v63 = vld [vmem:[%s11989_s11 + $0x88] sm:$0x3f] }
  0x57   : > { %v12396_v28 = vsel %vm1181_vm4, %v1187_v18, %v12391_v27 }
  0x59   : > { %921 = vmatpush1.bf16.msra.mxu0 %v11050_v32  ;;  %10284 = vmatpush3.bf16.msra.mxu1 %v11053_v33  ;;  %v11104_v32 = vld [vmem:[%s15272_s1 + $0x21c] ss:$20 sps:$4 sm:$0xff]   ;;  %v11110_v33 = vld [vmem:[%s15272_s1 + $0x22c] ss:$20 sps:$4 sm:$0xff]  }
  0x5a   : > { %8914 = vmatprep.subr.msk.bf16.mxu0 %vm522_vm0, %v8910_v37  ;;  %10285 = vmatprep.subr.bf16.mxu1 %v15287_v46  ;;  %v9003_v37 = vld [vmem:[%s11989_s11 + $0x60] sm:$0xff] }
  0x5b   : > { %10266 = vmatmul.mubr.msk.bf16.gmra.mrb[28].mxu0 %vm506_vm2, %v12101_v9  ;;  %8923 = vmatmul.mubr.msk.bf16.gmra.mrb[8].mxu1 %vm506_vm2, %v12019_v35  ;;  %v12319_v9 = vsel %vm1181_vm4, %v1182_v5, %v1183_v6  ;;  %v11128_v5 = vld [vmem:[%s15272_s1 + $0x2fc] ss:$20 sps:$4 sm:$0xff]   ;;  %v11134_v6 = vld [vmem:[%s15272_s1 + $0x304] ss:$20 sps:$4 sm:$0xff]  }
  0x5c   : > { %10269 = vmatprep.mubr.msk.bf16.mxu0 %vm11892_vm3, %v15287_v46  ;;  %1057 = vmatprep.mubr.bf16.mxu1 %v15281_v2 }
  0x5d   : > { %923 = vmatpush1.bf16.msra.mxu0 %v900_v39  ;;  %10286 = vmatpush3.bf16.msra.mxu1 %v912_v40  ;;  %v11111_v39 = vld [vmem:[%s15272_s1 + $0x254] ss:$20 sps:$4 sm:$0xff]   ;;  %v11114_v40 = vld [vmem:[%s15272_s1 + $0x270] ss:$20 sps:$4 sm:$0xff]  }
  0x5e   : > { %1338 = vmatprep.subr.bf16.mxu0 %v11059_v38  ;;  %1419 = vmatprep.subr.bf16.mxu1 %v11065_v41  ;;  %v11107_v38 = vld [vmem:[%s15272_s1 + $0x244] ss:$20 sps:$4 sm:$0xff]   ;;  %v12443_v41 = vpack.c.bf16 %v9003_v37, %v9002_v36  ;;  %v11152_v37 = vld [vmem:[%s15272_s1 + $0x308] ss:$20 sps:$4 sm:$0xff]  }
  0x5f   : > { %v11158_v36 = vld [vmem:[%s15272_s1 + $0x3b8] ss:$20 sps:$4 sm:$0xff]  }
  0x63   : > { %10270 = vmatmul.mubr.msk.bf16.gmra.mrb[32].mxu0 %vm506_vm2, %v12120_v17  ;;  %8924 = vmatmul.mubr.msk.bf16.gmra.mrb[12].mxu1 %vm506_vm2, %v12049_v50  ;;  %v11097_v17 = vld [vmem:[%s15272_s1 + $0x29c] ss:$20 sps:$4 sm:$0xff]  }
  0x64   : > { %10273 = vmatprep.mubr.msk.bf16.mxu0 %vm11892_vm3, %v15287_v46  ;;  %1067 = vmatprep.mubr.bf16.mxu1 %v15281_v2 }
  0x6b   : > { %10274 = vmatmul.mubr.msk.bf16.gmra.mrb[36].mxu0 %vm506_vm2, %v388_v19  ;;  %8925 = vmatmul.mubr.msk.bf16.gmra.mrb[20].mxu1 %vm506_vm2, %v12091_v4  ;;  %v11100_v19 = vld [vmem:[%s15272_s1 + $0x1f0] ss:$20 sps:$4 sm:$0xff]  }
  0x6c   : > { %946 = vmatprep.mubr.bf16.mxu0 %v15281_v2  ;;  %10287 = vmatprep.mubr.msk.bf16.mxu1 %vm11892_vm3, %v15287_v46 }
  0x73   : > { %8915 = vmatmul.mubr.msk.bf16.vlgmr.msra.gmra.mrb[0].mxu0 %vm506_vm2, %v12010_v25  ;;  %10288 = vmatmul.mubr.msk.bf16.vlgmr.msra.gmra.mrb[24].mxu1 %vm506_vm2, %v12010_v25  ;;  %v11086_v25 = vld [vmem:[%s15272_s1 + $0x1a0] ss:$20 sps:$4 sm:$0xff]  }
  0x74   : > { %956 = vmatprep.mubr.bf16.mxu0 %v15281_v2  ;;  %10291 = vmatprep.mubr.msk.bf16.mxu1 %vm11892_vm3, %v15287_v46 }
  0x75   : > { %1339 = vmatpush1.bf16.msra.mxu0 %v11057_v42  ;;  %1420 = vmatpush1.bf16.msra.mxu1 %v11063_v43  ;;  %v11112_v42 = vld [vmem:[%s15272_s1 + $0x26c] ss:$20 sps:$4 sm:$0xff]   ;;  %v11115_v43 = vld [vmem:[%s15272_s1 + $0x27c] ss:$20 sps:$4 sm:$0xff]  }
  0x76   : > { %1340 = vmatprep.subr.bf16.mxu0 %v11062_v44  ;;  %1421 = vmatprep.subr.bf16.mxu1 %v11068_v45  ;;  %v11118_v44 = vld [vmem:[%s15272_s1 + $0x298] ss:$20 sps:$4 sm:$0xff]  }
  0x77   : > { %v9004_v45 = vld [vmem:[%s11989_s11 + $0x68] sm:$0xff] }
  0x79   : > { %1341 = vmatpush1.bf16.msra.mxu0 %v11060_v47  ;;  %1422 = vmatpush1.bf16.msra.mxu1 %v11066_v48  ;;  %v9005_v47 = vld [vmem:[%s11989_s11 + $0x70] sm:$0xff] }
  0x7a   : > { %1342 = vmatprep.subr.bf16.mxu0 %v11071_v49  ;;  %1423 = vmatprep.subr.bf16.mxu1 %v11074_v51  ;;  %v11116_v48 = vld [vmem:[%s15272_s1 + $0x294] ss:$20 sps:$4 sm:$0xff]   ;;  %v11119_v49 = vld [vmem:[%s15272_s1 + $0x2a4] ss:$20 sps:$4 sm:$0xff]   ;;  %v9033_v51 = vld [vmem:[%s15272_s1 + $0x2bc] sm:$0x77] }
  0x7b   : > { %8916 = vmatmul.mubr.msk.bf16.gmra.mrb[4].mxu0 %vm506_vm2, %v12013_v29  ;;  %10292 = vmatmul.mubr.msk.bf16.gmra.mrb[28].mxu1 %vm506_vm2, %v12013_v29  ;;  %v11090_v29 = vld [vmem:[%s15272_s1 + $0x24c] ss:$20 sps:$4 sm:$0xff]  }
  0x7c   : > { %966 = vmatprep.mubr.bf16.mxu0 %v15281_v2  ;;  %10295 = vmatprep.mubr.msk.bf16.mxu1 %vm11892_vm3, %v15287_v46 }
  0x7d   : > { %1343 = vmatpush1.bf16.msra.mxu0 %v11069_v52  ;;  %1424 = vmatpush1.bf16.msra.mxu1 %v11072_v53  ;;  %v9057_v52 = vcombine.high %v9033_v51, %v9033_v51  ;;  %v9056_v53 = vcombine.low %v9033_v51, %v9033_v51 }
  0x7e   : > { %1344 = vmatprep.subr.bf16.mxu0 %v11077_v54  ;;  %1425 = vmatprep.subr.bf16.mxu1 %v11080_v55  ;;  %v11122_v54 = vld [vmem:[%s15272_s1 + $0x2cc] ss:$0 sps:$4 sm:$0x77]   ;;  %v12477_v55 = vpack.c.bf16 %v9005_v47, %v9004_v45 }
  0x7f   : > { %v1805_v58 = vsel %vm522_vm0, %v11122_v54, 0 }
  0x80   : > { %v2131_v51 = vshrl.u32 %v12477_v55, 16 }
  0x81   : > { %1345 = vmatpush1.bf16.msra.mxu0 %v11075_v57  ;;  %1426 = vmatpush1.bf16.msra.mxu1 %v11078_v59  ;;  %v1793_v57 = vsel %vm522_vm0, %v9056_v53, 0  ;;  %v11131_v59 = vld [vmem:[%s15272_s1 + $0x2dc] ss:$20 sps:$4 sm:$0xff]  }
  0x82   : > { %8983 = vmatprep.subr.msk.bf16.mxu0 %vm522_vm0, %v8979_v60  ;;  %8989 = vmatprep.subr.msk.bf16.mxu1 %vm522_vm0, %v8981_v61  ;;  %v9006_v60 = vld [vmem:[%s11989_s11 + $0x78] sm:$0xff]  ;;  %v9007_v61 = vld [vmem:[%s11989_s11 + $0x80] sm:$0xff] }
  0x83   : > { %8917 = vmatmul.mubr.msk.bf16.gmra.mrb[8].mxu0 %vm506_vm2, %v12019_v35  ;;  %10296 = vmatmul.mubr.msk.bf16.gmra.mrb[32].mxu1 %vm506_vm2, %v12019_v35  ;;  %v11099_v35 = vld [vmem:[%s15272_s1 + $0x2a0] ss:$20 sps:$4 sm:$0xff]   ;;  %v12498_v62 = vpack.c.bf16 %v9007_v61, %v9006_v60  ;;  %v9172_v60 = vld [vmem:[%s15272_s1 + $0x42c] sm:$0x77] }
  0x84   : > { %976 = vmatprep.mubr.bf16.mxu0 %v15281_v2  ;;  %10299 = vmatprep.mubr.msk.bf16.mxu1 %vm11892_vm3, %v15287_v46 }
  0x85   : > { %1347 = vmatpush1.bf16.msra.mxu0 %v1324_v0  ;;  %1428 = vmatpush1.bf16.msra.mxu1 %v1330_v1  ;;  %v12508_v0 = vpack.c.bf16 %v9008_v63, %v9008_v63  ;;  %v11123_v1 = vld [vmem:[%s15272_s1 + $0x2d0] ss:$20 sps:$4 sm:$0xff]  }
  0x86   : > { %10307 = vmatprep.subr.bf16.mxu0 %v15287_v46  ;;  %1888 = vmatprep.subr.bf16.mxu1 %v11089_v3  ;;  %v11129_v3 = vld [vmem:[%s15272_s1 + $0x2d8] ss:$20 sps:$4 sm:$0xff]  }
  0x8b   : > { %8918 = vmatmul.mubr.msk.bf16.gmra.mrb[12].mxu0 %vm506_vm2, %v12049_v50  ;;  %10300 = vmatmul.mubr.msk.bf16.gmra.mrb[36].mxu1 %vm506_vm2, %v12049_v50  ;;  %v1336_v50 = vsel %vm522_vm0, %v11102_v21, 0 }
  0x8c   : > { %986 = vmatprep.mubr.bf16.mxu0 %v15281_v2  ;;  %10303 = vmatprep.mubr.msk.bf16.mxu1 %vm11892_vm3, %v15287_v46 }
  0x93   : > { %8919 = vmatmul.mubr.msk.bf16.gmra.mrb[40].mxu0 %vm506_vm2, %v12091_v4  ;;  %10304 = vmatmul.mubr.msk.bf16.gmra.mrb[40].mxu1 %vm506_vm2, %v12091_v4  ;;  %v9000_v4 = vld [vmem:[%s11989_s11 + $0x48] sm:$0xff] }
  0x94   : > { %1370 = vmatprep.mubr.bf16.mxu0 %v15281_v2  ;;  %1451 = vmatprep.mubr.bf16.mxu1 %v15281_v2  ;;  %v12413_v31 = vpack.c.bf16 %v9001_v30, %v9000_v4  ;;  %v2124_v4 = vshrl.u32 %v12443_v41, 16  ;;  %v11151_v30 = vld [vmem:[%s15272_s1 + $0x2e0] ss:$20 sps:$4 sm:$0xff]  }
  0x9b   : > { %8984 = vmatmul.mubr.msk.bf16.vlgmr.msra.gmra.mrb[0].mxu0 %vm506_vm2, %v12319_v9  ;;  %8990 = vmatmul.mubr.msk.bf16.vlgmr.msra.gmra.mrb[0].mxu1 %vm506_vm2, %v12319_v9 }
  0x9c   : > { %1380 = vmatprep.mubr.bf16.mxu0 %v15281_v2  ;;  %1461 = vmatprep.mubr.bf16.mxu1 %v15281_v2 }
  0x9d   : > { %10308 = vmatpush3.bf16.msra.mxu0 %v11085_v7  ;;  %1889 = vmatpush1.bf16.msra.mxu1 %v11087_v8  ;;  %v11126_v7 = vld [vmem:[%s15272_s1 + $0x2f8] ss:$20 sps:$4 sm:$0xff]   ;;  %v11132_v8 = vld [vmem:[%s15272_s1 + $0x300] ss:$20 sps:$4 sm:$0xff]  }
  0x9e   : > { %10309 = vmatprep.subr.bf16.mxu0 %v15287_v46  ;;  %1890 = vmatprep.subr.bf16.mxu1 %v11092_v10  ;;  %v11140_v10 = vld [vmem:[%s15272_s1 + $0x32c] ss:$20 sps:$4 sm:$0xff]  }
  0xa1   : > { %10310 = vmatpush3.bf16.msra.mxu0 %v11086_v25  ;;  %1891 = vmatpush1.bf16.msra.mxu1 %v11090_v29  ;;  %v11135_v25 = vld [vmem:[%s15272_s1 + $0x320] ss:$20 sps:$4 sm:$0xff]   ;;  %v11138_v29 = vld [vmem:[%s15272_s1 + $0x328] ss:$20 sps:$4 sm:$0xff]  }
  0xa2   : > { %10311 = vmatprep.subr.bf16.mxu0 %v15287_v46  ;;  %1892 = vmatprep.subr.bf16.mxu1 %v11096_v12  ;;  %v11146_v12 = vld [vmem:[%s15272_s1 + $0x354] ss:$20 sps:$4 sm:$0xff]  }
  0xa3   : > { %8985 = vmatmul.mubr.msk.bf16.gmra.mrb[4].mxu0 %vm506_vm2, %v12348_v15  ;;  %8991 = vmatmul.mubr.msk.bf16.gmra.mrb[4].mxu1 %vm506_vm2, %v12348_v15 }
  0xa4   : > { %1390 = vmatprep.mubr.bf16.mxu0 %v15281_v2  ;;  %1471 = vmatprep.mubr.bf16.mxu1 %v15281_v2 }
  0xa5   : > { %10312 = vmatpush3.bf16.msra.mxu0 %v11093_v13  ;;  %1893 = vmatpush1.bf16.msra.mxu1 %v11094_v14  ;;  %v9102_v13 = vld [vmem:[%s15272_s1 + $0x370] sm:$0x77]  ;;  %v11141_v14 = vld [vmem:[%s15272_s1 + $0x348] ss:$20 sps:$4 sm:$0xff]  }
  0xa6   : > { %10313 = vmatprep.subr.bf16.mxu0 %v15287_v46  ;;  %1894 = vmatprep.subr.bf16.mxu1 %v11099_v35  ;;  %v11144_v35 = vld [vmem:[%s15272_s1 + $0x350] ss:$20 sps:$4 sm:$0xff]   ;;  %v9126_v16 = vcombine.high %v9102_v13, %v9102_v13  ;;  %v9125_v18 = vcombine.low %v9102_v13, %v9102_v13 }
  0xa9   : > { %10314 = vmatpush3.bf16.msra.mxu0 %v11100_v19  ;;  %1895 = vmatpush1.bf16.msra.mxu1 %v11097_v17 }
  0xaa   : > { %10315 = vmatprep.subr.bf16.mxu0 %v15287_v46  ;;  %9067 = vmatprep.subr.msk.bf16.mxu1 %vm522_vm0, %v9059_v20  ;;  %v2281_v20 = vsel %vm522_vm0, %v9125_v18, 0 }
  0xab   : > { %8986 = vmatmul.mubr.msk.bf16.gmra.mrb[8].mxu0 %vm506_vm2, %v12375_v23  ;;  %8992 = vmatmul.mubr.msk.bf16.gmra.mrb[8].mxu1 %vm506_vm2, %v12375_v23 }
  0xac   : > { %1400 = vmatprep.mubr.bf16.mxu0 %v15281_v2  ;;  %1481 = vmatprep.mubr.bf16.mxu1 %v15281_v2 }
  0xad   : > { %10316 = vmatpush3.bf16.msra.mxu0 %v1336_v50  ;;  %1897 = vmatpush1.bf16.msra.mxu1 %v1799_v24  ;;  %v2114_v50 = vshrl.u32 %v12413_v31, 16 }
  0xae   : > { %1807 = vmatprep.subr.bf16.mxu0 %v11106_v26  ;;  %10337 = vmatprep.subr.bf16.mxu1 %v15287_v46  ;;  %v2120_v26 = vshll.u32 %v12443_v41, 16 }
  0xb3   : > { %8987 = vmatmul.mubr.msk.bf16.gmra.mrb[12].mxu0 %vm506_vm2, %v12396_v28  ;;  %8993 = vmatmul.mubr.msk.bf16.gmra.mrb[12].mxu1 %vm506_vm2, %v12396_v28 }
  0xb4   : > { %1410 = vmatprep.mubr.bf16.mxu0 %v15281_v2  ;;  %1491 = vmatprep.mubr.bf16.mxu1 %v15281_v2 }
  0xbb   : > { %8988 = vmatmul.mubr.msk.bf16.gmra.mrb[44].mxu0 %vm506_vm2, %v12391_v27  ;;  %8994 = vmatmul.mubr.msk.bf16.gmra.mrb[44].mxu1 %vm506_vm2, %v12391_v27 }
  0xbc   : > { %10317 = vmatprep.mubr.msk.bf16.mxu0 %vm11892_vm3, %v15287_v46  ;;  %1920 = vmatprep.mubr.bf16.mxu1 %v15281_v2 }
  0xc3   : > { %10318 = vmatmul.mubr.msk.bf16.vlgmr.msra.gmra.mrb[48].mxu0 %vm506_vm2, %v12319_v9  ;;  %9068 = vmatmul.mubr.msk.bf16.vlgmr.msra.gmra.mrb[0].mxu1 %vm506_vm2, %v12413_v31  ;;  %v11137_v9 = vld [vmem:[%s15272_s1 + $0x324] ss:$20 sps:$4 sm:$0xff]  }
  0xc4   : > { %10321 = vmatprep.mubr.msk.bf16.mxu0 %vm11892_vm3, %v15287_v46  ;;  %1930 = vmatprep.mubr.bf16.mxu1 %v15281_v2 }
  0xc5   : > { %1808 = vmatpush1.bf16.msra.mxu0 %v11104_v32  ;;  %10338 = vmatpush3.bf16.msra.mxu1 %v11110_v33  ;;  %v2127_v33 = vshll.u32 %v12477_v55, 16 }
  0xc6   : > { %1809 = vmatprep.subr.bf16.mxu0 %v11109_v34  ;;  %10339 = vmatprep.subr.bf16.mxu1 %v15287_v46  ;;  %v11153_v34 = vld [vmem:[%s15272_s1 + $0x38c] ss:$20 sps:$4 sm:$0xff]  }
  0xc9   : > { %1810 = vmatpush1.bf16.msra.mxu0 %v11107_v38  ;;  %10340 = vmatpush3.bf16.msra.mxu1 %v11111_v39  ;;  %v11156_v38 = vld [vmem:[%s15272_s1 + $0x3b4] ss:$20 sps:$4 sm:$0xff]  }
  0xca   : > { %1811 = vmatprep.subr.bf16.mxu0 %v11114_v40  ;;  %10341 = vmatprep.subr.bf16.mxu1 %v15287_v46  ;;  %v2129_v40 = vrot.slane %v2127_v33, 1 }
  0xcb   : > { %10322 = vmatmul.mubr.msk.bf16.gmra.mrb[52].mxu0 %vm506_vm2, %v12348_v15  ;;  %9069 = vmatmul.mubr.msk.bf16.gmra.mrb[4].mxu1 %vm506_vm2, %v12443_v41  ;;  %v9103_v15 = vld [vmem:[%s15272_s1 + $0x378] sm:$0x77] }
  0xcc   : > { %10325 = vmatprep.mubr.msk.bf16.mxu0 %vm11892_vm3, %v15287_v46  ;;  %1940 = vmatprep.mubr.bf16.mxu1 %v15281_v2  ;;  %v9128_v17 = vcombine.high %v9103_v15, %v9103_v15  ;;  %v9127_v19 = vcombine.low %v9103_v15, %v9103_v15  ;;  %v2133_v61 = vor.u32 %v2131_v51, %v2129_v40  ;;  %v11172_v15 = vld [vmem:[%s15272_s1 + $0x388] ss:$20 sps:$4 sm:$0xff]  }
  0xcd   : > { %1812 = vmatpush1.bf16.msra.mxu0 %v11112_v42  ;;  %10342 = vmatpush3.bf16.msra.mxu1 %v11115_v43  ;;  %v11162_v42 = vld [vmem:[%s15272_s1 + $0x3e0] ss:$20 sps:$4 sm:$0xff]  }
  0xce   : > { %1813 = vmatprep.subr.bf16.mxu0 %v11118_v44  ;;  %10343 = vmatprep.subr.bf16.mxu1 %v15287_v46  ;;  %v2287_v21 = vsel %vm522_vm0, %v9127_v19, 0 }
  0xd1   : > { %1814 = vmatpush1.bf16.msra.mxu0 %v11116_v48  ;;  %10344 = vmatpush3.bf16.msra.mxu1 %v11119_v49 }
  0xd2   : > { %9061 = vmatprep.subr.msk.bf16.mxu0 %vm522_vm0, %v9057_v52  ;;  %10345 = vmatprep.subr.bf16.mxu1 %v15287_v46  ;;  %v2134_v52 = vshll.u32 %v12498_v62, 16 }
  0xd3   : > { %10326 = vmatmul.mubr.msk.bf16.gmra.mrb[56].mxu0 %vm506_vm2, %v12375_v23  ;;  %9070 = vmatmul.mubr.msk.bf16.gmra.mrb[8].mxu1 %vm506_vm2, %v12477_v55  ;;  %v2116_v23 = vshll.u32 %v12413_v31, 16 }
  0xd4   : > { %10329 = vmatprep.mubr.msk.bf16.mxu0 %vm11892_vm3, %v15287_v46  ;;  %1950 = vmatprep.mubr.bf16.mxu1 %v15281_v2  ;;  %v2136_v63 = vrot.slane %v2134_v52, 1 }
  0xd5   : > { %1816 = vmatpush1.bf16.msra.mxu0 %v1793_v57  ;;  %10346 = vmatpush3.bf16.msra.mxu1 %v1805_v58  ;;  %v2118_v24 = vrot.slane %v2116_v23, 1  ;;  %v11159_v57 = vld [vmem:[%s15272_s1 + $0x330] ss:$20 sps:$4 sm:$0xff]  }
  0xd6   : > { %2295 = vmatprep.subr.bf16.mxu0 %v11125_v56  ;;  %2376 = vmatprep.subr.bf16.mxu1 %v11131_v59  ;;  %v11160_v58 = vld [vmem:[%s15272_s1 + $0x3dc] ss:$20 sps:$4 sm:$0xff]  }
  0xd7   : > { %v11165_v59 = vld [vmem:[%s15272_s1 + $0x408] ss:$20 sps:$4 sm:$0xff]  }
  0xdb   : > { %10330 = vmatmul.mubr.msk.bf16.gmra.mrb[60].mxu0 %vm506_vm2, %v12396_v28  ;;  %9071 = vmatmul.mubr.msk.bf16.gmra.mrb[12].mxu1 %vm506_vm2, %v12498_v62  ;;  %v2122_v28 = vrot.slane %v2120_v26, 1 }
  0xdc   : > { %10333 = vmatprep.mubr.msk.bf16.mxu0 %vm11892_vm3, %v15287_v46  ;;  %1960 = vmatprep.mubr.bf16.mxu1 %v15281_v2 }
  0xdd   : > { %v2126_v39 = vor.u32 %v2124_v4, %v2122_v28  ;;  %v2608_v4 = vrot.slane %v12443_v41, 1 }
  0xdf   : > { %v12649_v49 = vsel %vm349_vm1, %v2126_v39, %v2129_v40  ;;  %v11176_v39 = vld [vmem:[%s15272_s1 + $0x394] ss:$20 sps:$4 sm:$0xff]   ;;  %v11173_v40 = vld [vmem:[%s15272_s1 + $0x3ac] ss:$20 sps:$4 sm:$0xff]  }
  0xe3   : > { %10334 = vmatmul.mubr.msk.bf16.gmra.mrb[64].mxu0 %vm506_vm2, %v12391_v27  ;;  %9072 = vmatmul.mubr.msk.bf16.gmra.mrb[48].mxu1 %vm506_vm2, %v12508_v0  ;;  %v2119_v27 = vor.u32 %v2118_v24, %v2114_v50 }
  0xe4   : > { %1839 = vmatprep.mubr.bf16.mxu0 %v15281_v2  ;;  %10347 = vmatprep.mubr.msk.bf16.mxu1 %vm11892_vm3, %v15287_v46 }
  0xe5   : > { %v12615_v32 = vsel %vm349_vm1, %v2119_v27, %v2122_v28  ;;  %v2607_v28 = vrot.slane %v12413_v31, 1 }
  0xeb   : > { %9062 = vmatmul.mubr.msk.bf16.vlgmr.msra.gmra.mrb[0].mxu0 %vm506_vm2, %v12413_v31  ;;  %10348 = vmatmul.mubr.msk.bf16.vlgmr.msra.gmra.mrb[52].mxu1 %vm506_vm2, %v12413_v31  ;;  %v11175_v31 = vld [vmem:[%s15272_s1 + $0x3b0] ss:$20 sps:$4 sm:$0xff]  }
  0xec   : > { %1849 = vmatprep.mubr.bf16.mxu0 %v15281_v2  ;;  %10351 = vmatprep.mubr.msk.bf16.mxu1 %vm11892_vm3, %v15287_v46 }
  0xed   : > { %2296 = vmatpush1.bf16.msra.mxu0 %v11123_v1  ;;  %2377 = vmatpush1.bf16.msra.mxu1 %v11129_v3  ;;  %v11163_v1 = vld [vmem:[%s15272_s1 + $0x404] ss:$20 sps:$4 sm:$0xff]  }
  0xee   : > { %2297 = vmatprep.subr.bf16.mxu0 %v11128_v5  ;;  %2378 = vmatprep.subr.bf16.mxu1 %v11134_v6  ;;  %v11166_v3 = vld [vmem:[%s15272_s1 + $0x358] ss:$20 sps:$4 sm:$0xff]   ;;  %v9197_v6 = vcombine.high %v9172_v60, %v9172_v60 }
  0xf1   : > { %2298 = vmatpush1.bf16.msra.mxu0 %v11126_v7  ;;  %2379 = vmatpush1.bf16.msra.mxu1 %v11132_v8  ;;  %v11168_v7 = vld [vmem:[%s15272_s1 + $0x380] ss:$0 sps:$4 sm:$0x77]   ;;  %v9196_v8 = vcombine.low %v9172_v60, %v9172_v60 }
  0xf2   : > { %2299 = vmatprep.subr.bf16.mxu0 %v11137_v9  ;;  %2380 = vmatprep.subr.bf16.mxu1 %v11140_v10  ;;  %v2293_v13 = vsel %vm522_vm0, %v11168_v7, 0 }
  0xf3   : > { %9063 = vmatmul.mubr.msk.bf16.gmra.mrb[4].mxu0 %vm506_vm2, %v12443_v41  ;;  %10352 = vmatmul.mubr.msk.bf16.gmra.mrb[56].mxu1 %vm506_vm2, %v12443_v41  ;;  %v2610_v41 = vrot.slane %v12477_v55, 1 }
  0xf4   : > { %1859 = vmatprep.mubr.bf16.mxu0 %v15281_v2  ;;  %10355 = vmatprep.mubr.msk.bf16.mxu1 %vm11892_vm3, %v15287_v46 }
  0xf5   : > { %2300 = vmatpush1.bf16.msra.mxu0 %v11135_v25  ;;  %2381 = vmatpush1.bf16.msra.mxu1 %v11138_v29  ;;  %v12687_v25 = vsel %vm349_vm1, %v2133_v61, %v2136_v63  ;;  %v2138_v29 = vshrl.u32 %v12498_v62, 16  ;;  %v11178_v61 = vld [vmem:[%s15272_s1 + $0x3d4] ss:$20 sps:$4 sm:$0xff]  }
  0xf6   : > { %2301 = vmatprep.subr.bf16.mxu0 %v11143_v11  ;;  %2382 = vmatprep.subr.bf16.mxu1 %v11146_v12  ;;  %v2141_v11 = vshll.u32 %v12508_v0, 16 }
  0xf9   : > { %2302 = vmatpush1.bf16.msra.mxu0 %v11141_v14  ;;  %2383 = vmatpush1.bf16.msra.mxu1 %v11144_v35  ;;  %v2755_v14 = vsel %vm522_vm0, %v9196_v8, 0  ;;  %v2140_v35 = vor.u32 %v2138_v29, %v2136_v63  ;;  %v9171_v63 = vld [vmem:[%s15272_s1 + $0x424] sm:$0x77] }
  0xfa   : > { %9130 = vmatprep.subr.msk.bf16.mxu0 %vm522_vm0, %v9126_v16  ;;  %9136 = vmatprep.subr.msk.bf16.mxu1 %vm522_vm0, %v9128_v17  ;;  %v2143_v16 = vrot.slane %v2141_v11, 1  ;;  %v9195_v7 = vcombine.high %v9171_v63, %v9171_v63  ;;  %v9194_v8 = vcombine.low %v9171_v63, %v9171_v63 }
  0xfb   : > { %9064 = vmatmul.mubr.msk.bf16.gmra.mrb[8].mxu0 %vm506_vm2, %v12477_v55  ;;  %10356 = vmatmul.mubr.msk.bf16.gmra.mrb[60].mxu1 %vm506_vm2, %v12477_v55  ;;  %v11180_v55 = vld [vmem:[%s15272_s1 + $0x3d8] ss:$20 sps:$4 sm:$0xff]  }
  0xfc   : > { %1869 = vmatprep.mubr.bf16.mxu0 %v15281_v2  ;;  %10359 = vmatprep.mubr.msk.bf16.mxu1 %vm11892_vm3, %v15287_v46 }
  0xfd   : > { %2304 = vmatpush1.bf16.msra.mxu0 %v2281_v20  ;;  %2385 = vmatpush1.bf16.msra.mxu1 %v2287_v21  ;;  %v12710_v20 = vsel %vm349_vm1, %v2140_v35, %v2143_v16  ;;  %v11191_v35 = vld [vmem:[%s15272_s1 + $0x43c] ss:$20 sps:$4 sm:$0xff]  }
  0xfe   : > { %10367 = vmatprep.subr.bf16.mxu0 %v15287_v46  ;;  %2844 = vmatprep.subr.bf16.mxu1 %v11155_v22  ;;  %v2145_v22 = vshrl.u32 %v12508_v0, 16 }
 0x100   : > { %v12721_v24 = vor.u32 %v2145_v22, %v2143_v16  ;;  %v12837_v16 = vrot.slane %v12508_v0, 1 }
 0x103   : > { %9065 = vmatmul.mubr.msk.bf16.gmra.mrb[12].mxu0 %vm506_vm2, %v12498_v62  ;;  %10360 = vmatmul.mubr.msk.bf16.gmra.mrb[64].mxu1 %vm506_vm2, %v12498_v62 }
 0x104   : > { %1879 = vmatprep.mubr.bf16.mxu0 %v15281_v2  ;;  %10363 = vmatprep.mubr.msk.bf16.mxu1 %vm11892_vm3, %v15287_v46 }
 0x10b   : > { %9066 = vmatmul.mubr.msk.bf16.gmra.mrb[68].mxu0 %vm506_vm2, %v12508_v0  ;;  %10364 = vmatmul.mubr.msk.bf16.gmra.mrb[68].mxu1 %vm506_vm2, %v12508_v0 }
 0x10c   : > { %2327 = vmatprep.mubr.bf16.mxu0 %v15281_v2  ;;  %2408 = vmatprep.mubr.bf16.mxu1 %v15281_v2 }
 0x113   : > { %9131 = vmatmul.mubr.msk.bf16.vlgmr.msra.gmra.mrb[0].mxu0 %vm506_vm2, %v12615_v32  ;;  %9137 = vmatmul.mubr.msk.bf16.vlgmr.msra.gmra.mrb[0].mxu1 %vm506_vm2, %v12615_v32 }
 0x114   : > { %2337 = vmatprep.mubr.bf16.mxu0 %v15281_v2  ;;  %2418 = vmatprep.mubr.bf16.mxu1 %v15281_v2 }
 0x115   : > { %10368 = vmatpush3.bf16.msra.mxu0 %v11151_v30  ;;  %2845 = vmatpush1.bf16.msra.mxu1 %v11153_v34 }
 0x116   : > { %v12639_v43 = vpop.f32.mrb[16].mxu0  ;;  %10369 = vmatprep.subr.bf16.mxu0 %v15287_v46  ;;  %v12642_v44 = vpop.f32.mrb[16].mxu1  ;;  %2846 = vmatprep.subr.bf16.mxu1 %v11158_v36  ;;  %v12739_v36 = vsel %vm1181_vm4, %v2607_v28, %v2608_v4 }
 0x117   : > { %v12644_v45 = vpop.f32.mrb[17].mxu0  ;;  %v12646_v47 = vpop.f32.mrb[17].mxu1 }
 0x118   : > { %v616_v48 = vpop.f32.mrb[18].mxu0  ;;  %v697_v53 = vpop.f32.mrb[18].mxu1 }
 0x119   : > { %v617_v54 = vpop.f32.mrb[19].mxu0  ;;  %10370 = vmatpush3.bf16.msra.mxu0 %v11152_v37  ;;  %v698_v56 = vpop.f32.mrb[19].mxu1  ;;  %2847 = vmatpush1.bf16.msra.mxu1 %v11156_v38  ;;  %v11170_v38 = vld [vmem:[%s15272_s1 + $0x384] ss:$20 sps:$4 sm:$0xff]  }
 0x11a   : > { %10371 = vmatprep.subr.bf16.mxu0 %v15287_v46  ;;  %2848 = vmatprep.subr.bf16.mxu1 %v11162_v42 }
 0x11b   : > { %9132 = vmatmul.mubr.msk.bf16.gmra.mrb[4].mxu0 %vm506_vm2, %v12649_v49  ;;  %9138 = vmatmul.mubr.msk.bf16.gmra.mrb[4].mxu1 %vm506_vm2, %v12649_v49 }
 0x11c   : > { %2347 = vmatprep.mubr.bf16.mxu0 %v15281_v2  ;;  %2428 = vmatprep.mubr.bf16.mxu1 %v15281_v2 }
 0x11d   : > { %10372 = vmatpush3.bf16.msra.mxu0 %v11159_v57  ;;  %2849 = vmatpush1.bf16.msra.mxu1 %v11160_v58  ;;  %v12777_v57 = vsel %vm1181_vm4, %v2608_v4, %v2610_v41 }
 0x11e   : > { %v12678_v5 = vpop.f32.mrb[20].mxu0  ;;  %10373 = vmatprep.subr.bf16.mxu0 %v15287_v46  ;;  %2850 = vmatprep.subr.bf16.mxu1 %v11165_v59 }
 0x11f   : > { %v10259_v9 = vpop.f32.mrb[21].mxu0 }
 0x120   : > { %v12684_v10 = vpop.f32.mrb[22].mxu0 }
 0x121   : > { %v10260_v12 = vpop.f32.mrb[23].mxu0  ;;  %10374 = vmatpush3.bf16.msra.mxu0 %v11166_v3  ;;  %2851 = vmatpush1.bf16.msra.mxu1 %v11163_v1  ;;  %v2612_v1 = vrot.slane %v12498_v62, 1  ;;  %v11185_v3 = vld [vmem:[%s15272_s1 + $0x40c] ss:$20 sps:$4 sm:$0xff]  }
 0x122   : > { %10375 = vmatprep.subr.bf16.mxu0 %v15287_v46  ;;  %9205 = vmatprep.subr.msk.bf16.mxu1 %vm522_vm0, %v9197_v6  ;;  %v11188_v62 = vld [vmem:[%s15272_s1 + $0x434] ss:$0 sps:$4 sm:$0x77]  }
 0x123   : > { %9133 = vmatmul.mubr.msk.bf16.gmra.mrb[8].mxu0 %vm506_vm2, %v12687_v25  ;;  %9139 = vmatmul.mubr.msk.bf16.gmra.mrb[8].mxu1 %vm506_vm2, %v12687_v25  ;;  %v12814_v12 = vsel %vm1181_vm4, %v2610_v41, %v2612_v1  ;;  %v11195_v41 = vld [vmem:[%s15272_s1 + $0x440] ss:$20 sps:$4 sm:$0xff]  }
 0x124   : > { %2357 = vmatprep.mubr.bf16.mxu0 %v15281_v2  ;;  %2438 = vmatprep.mubr.bf16.mxu1 %v15281_v2 }
 0x125   : > { %10376 = vmatpush3.bf16.msra.mxu0 %v2293_v13  ;;  %2853 = vmatpush1.bf16.msra.mxu1 %v2755_v14 }
 0x126   : > { %v12704_v17 = vpop.f32.mrb[24].mxu0  ;;  %2763 = vmatprep.subr.bf16.mxu0 %v11172_v15  ;;  %10397 = vmatprep.subr.bf16.mxu1 %v15287_v46  ;;  %v2749_v15 = vsel %vm522_vm0, %v9194_v8, 0 }
 0x127   : > { %v10263_v18 = vpop.f32.mrb[25].mxu0 }
 0x128   : > { %v12707_v19 = vpop.f32.mrb[26].mxu0 }
 0x129   : > { %v10264_v21 = vpop.f32.mrb[27].mxu0 }
 0x12b   : > { %9134 = vmatmul.mubr.msk.bf16.gmra.mrb[12].mxu0 %vm506_vm2, %v12710_v20  ;;  %9140 = vmatmul.mubr.msk.bf16.gmra.mrb[12].mxu1 %vm506_vm2, %v12710_v20 }
 0x12c   : > { %2367 = vmatprep.mubr.bf16.mxu0 %v15281_v2  ;;  %2448 = vmatprep.mubr.bf16.mxu1 %v15281_v2 }
 0x12e   : > { %v12719_v23 = vpop.f32.mrb[28].mxu0 }
 0x12f   : > { %v10267_v50 = vpop.f32.mrb[29].mxu0 }
 0x130   : > { %v12723_v26 = vpop.f32.mrb[30].mxu0  ;;  %v12844_v50 = vsel %vm1181_vm4, %v2612_v1, %v12837_v16  ;;  %v11201_v1 = vld [vmem:[%s15272_s1 + $0x488] ss:$20 sps:$4 sm:$0xff]  }
 0x131   : > { %v10268_v27 = vpop.f32.mrb[31].mxu0 }
 0x133   : > { %9135 = vmatmul.mubr.msk.bf16.gmra.mrb[72].mxu0 %vm506_vm2, %v12721_v24  ;;  %9141 = vmatmul.mubr.msk.bf16.gmra.mrb[72].mxu1 %vm506_vm2, %v12721_v24 }
 0x134   : > { %10377 = vmatprep.mubr.msk.bf16.mxu0 %vm11892_vm3, %v15287_v46  ;;  %2876 = vmatprep.mubr.bf16.mxu1 %v15281_v2 }
 0x136   : > { %v12734_v30 = vpop.f32.mrb[32].mxu0 }
 0x137   : > { %v10271_v33 = vpop.f32.mrb[33].mxu0 }
 0x138   : > { %v12736_v34 = vpop.f32.mrb[34].mxu0 }
 0x139   : > { %v10272_v37 = vpop.f32.mrb[35].mxu0 }
 0x13b   : > { %10378 = vmatmul.mubr.msk.bf16.vlgmr.msra.gmra.mrb[76].mxu0 %vm506_vm2, %v12615_v32  ;;  %9206 = vmatmul.mubr.msk.bf16.vlgmr.msra.gmra.mrb[0].mxu1 %vm506_vm2, %v12739_v36  ;;  %v11177_v32 = vld [vmem:[%s15272_s1 + $0x3bc] ss:$20 sps:$4 sm:$0xff]  }
 0x13c   : > { %10381 = vmatprep.mubr.msk.bf16.mxu0 %vm11892_vm3, %v15287_v46  ;;  %2886 = vmatprep.mubr.bf16.mxu1 %v15281_v2 }
 0x13d   : > { %2764 = vmatpush1.bf16.msra.mxu0 %v11170_v38  ;;  %10398 = vmatpush3.bf16.msra.mxu1 %v11176_v39 }
 0x13e   : > { %v12764_v42 = vpop.f32.mrb[36].mxu0  ;;  %v1069_v48 = vpop.f32.mrb[20].mxu1  ;;  %2765 = vmatprep.subr.bf16.mxu0 %v11175_v31  ;;  %10399 = vmatprep.subr.bf16.mxu1 %v15287_v46 }
 0x13f   : > { %v12771_v51 = vadd.f32 %v1069_v48, %v12642_v44  ;;  %v10275_v52 = vpop.f32.mrb[37].mxu0  ;;  %v1071_v53 = vpop.f32.mrb[21].mxu1  ;;  %v11181_v44 = vld [vmem:[%s15272_s1 + $0x3e4] ss:$20 sps:$4 sm:$0xff]  }
 0x140   : > { %v12774_v54 = vadd.f32 %v1071_v53, %v12646_v47  ;;  %v769_v56 = vpop.f32.mrb[38].mxu0  ;;  %v1073_v58 = vpop.f32.mrb[22].mxu1  ;;  %v11184_v47 = vld [vmem:[%s15272_s1 + $0x400] ss:$20 sps:$4 sm:$0xff]  }
 0x141   : > { %v10276_v59 = vpop.f32.mrb[39].mxu0  ;;  %v1074_v60 = vpop.f32.mrb[23].mxu1  ;;  %2766 = vmatpush1.bf16.msra.mxu0 %v11173_v40  ;;  %10400 = vmatpush3.bf16.msra.mxu1 %v11177_v32  ;;  %v11194_v40 = vld [vmem:[%s15272_s1 + $0x464] ss:$20 sps:$4 sm:$0xff]   ;;  %v11198_v32 = vld [vmem:[%s15272_s1 + $0x468] ss:$20 sps:$4 sm:$0xff]  }
 0x142   : > { %2767 = vmatprep.subr.bf16.mxu0 %v11180_v55  ;;  %10401 = vmatprep.subr.bf16.mxu1 %v15287_v46  ;;  %v11206_v52 = vld [vmem:[%s15272_s1 + $0x494] ss:$20 sps:$4 sm:$0xff]  }
 0x143   : > { %10382 = vmatmul.mubr.msk.bf16.gmra.mrb[80].mxu0 %vm506_vm2, %v12649_v49  ;;  %9207 = vmatmul.mubr.msk.bf16.gmra.mrb[4].mxu1 %vm506_vm2, %v12777_v57  ;;  %v11182_v49 = vld [vmem:[%s15272_s1 + $0x3fc] ss:$20 sps:$4 sm:$0xff]  }
 0x144   : > { %10385 = vmatprep.mubr.msk.bf16.mxu0 %vm11892_vm3, %v15287_v46  ;;  %2896 = vmatprep.mubr.bf16.mxu1 %v15281_v2 }
 0x145   : > { %2768 = vmatpush1.bf16.msra.mxu0 %v11178_v61  ;;  %10402 = vmatpush3.bf16.msra.mxu1 %v11181_v44 }
 0x146   : > { %v1110_v6 = vpop.f32.mrb[24].mxu1  ;;  %2769 = vmatprep.subr.bf16.mxu0 %v11184_v47  ;;  %10403 = vmatprep.subr.bf16.mxu1 %v15287_v46 }
 0x147   : > { %v12811_v9 = vadd.f32 %v1110_v6, %v12678_v5  ;;  %v10289_v29 = vpop.f32.mrb[25].mxu1  ;;  %v2761_v5 = vsel %vm522_vm0, %v11188_v62, 0  ;;  %v11207_v6 = vld [vmem:[%s15272_s1 + $0x4b0] ss:$20 sps:$4 sm:$0xff]  }
 0x148   : > { %v1113_v11 = vpop.f32.mrb[26].mxu1 }
 0x149   : > { %v12817_v13 = vadd.f32 %v1113_v11, %v12684_v10  ;;  %v10290_v14 = vpop.f32.mrb[27].mxu1  ;;  %2770 = vmatpush1.bf16.msra.mxu0 %v11182_v49  ;;  %10404 = vmatpush3.bf16.msra.mxu1 %v11185_v3  ;;  %v11197_v10 = vld [vmem:[%s15272_s1 + $0x444] ss:$20 sps:$4 sm:$0xff]  }
 0x14a   : > { %9199 = vmatprep.subr.msk.bf16.mxu0 %vm522_vm0, %v9195_v7  ;;  %10405 = vmatprep.subr.bf16.mxu1 %v15287_v46  ;;  %v9249_v49 = vld [vmem:[%s15272_s1 + $0x4d8] sm:$0x77]  ;;  %v9250_v3 = vld [vmem:[%s15272_s1 + $0x4e0] sm:$0x77] }
 0x14b   : > { %10386 = vmatmul.mubr.msk.bf16.gmra.mrb[84].mxu0 %vm506_vm2, %v12687_v25  ;;  %9208 = vmatmul.mubr.msk.bf16.gmra.mrb[8].mxu1 %vm506_vm2, %v12814_v12  ;;  %v11210_v7 = vld [vmem:[%s15272_s1 + $0x4b8] ss:$20 sps:$4 sm:$0xff]   ;;  %v9275_v8 = vcombine.high %v9250_v3, %v9250_v3  ;;  %v9272_v62 = vcombine.low %v9249_v49, %v9249_v49  ;;  %v9274_v29 = vcombine.low %v9250_v3, %v9250_v3  ;;  %v11238_v3 = vld [vmem:[%s15272_s1 + $0x4f0] ss:$20 sps:$4 sm:$0xff]  }
 0x14c   : > { %10389 = vmatprep.mubr.msk.bf16.mxu0 %vm11892_vm3, %v15287_v46  ;;  %2906 = vmatprep.mubr.bf16.mxu1 %v15281_v2 }
 0x14d   : > { %2772 = vmatpush1.bf16.msra.mxu0 %v2749_v15  ;;  %10406 = vmatpush3.bf16.msra.mxu1 %v2761_v5  ;;  %v3218_v11 = vsel %vm522_vm0, %v9272_v62, 0  ;;  %v3224_v14 = vsel %vm522_vm0, %v9274_v29, 0  ;;  %v11221_v15 = vld [vmem:[%s15272_s1 + $0x4f8] ss:$20 sps:$4 sm:$0xff]  }
 0x14e   : > { %v1118_v18 = vpop.f32.mrb[28].mxu1  ;;  %3232 = vmatprep.subr.bf16.mxu0 %v11191_v35  ;;  %3313 = vmatprep.subr.bf16.mxu1 %v11197_v10  ;;  %v9217_v5 = vld [vmem:[%s11989_s11 + $0x98] sm:$0xff] }
 0x14f   : > { %v12840_v21 = vadd.f32 %v1118_v18, %v12704_v17  ;;  %v10293_v25 = vpop.f32.mrb[29].mxu1  ;;  %v11217_v10 = vld [vmem:[%s15272_s1 + $0x448] ss:$20 sps:$4 sm:$0xff]  }
 0x150   : > { %v1121_v22 = vpop.f32.mrb[30].mxu1  ;;  %v11219_v18 = vld [vmem:[%s15272_s1 + $0x4f4] ss:$20 sps:$4 sm:$0xff]   ;;  %v9218_v25 = vld [vmem:[%s11989_s11 + $0xa0] sm:$0xff] }
 0x151   : > { %v12847_v27 = vadd.f32 %v1121_v22, %v12707_v19  ;;  %v10294_v28 = vpop.f32.mrb[31].mxu1  ;;  %v9219_v22 = vld [vmem:[%s11989_s11 + $0xa8] sm:$0xff] }
 0x152   : > { %v11222_v28 = vld [vmem:[%s15272_s1 + $0x51c] ss:$20 sps:$4 sm:$0xff]  }
 0x153   : > { %10390 = vmatmul.mubr.msk.bf16.gmra.mrb[88].mxu0 %vm506_vm2, %v12710_v20  ;;  %9209 = vmatmul.mubr.msk.bf16.gmra.mrb[12].mxu1 %vm506_vm2, %v12844_v50 }
 0x154   : > { %10393 = vmatprep.mubr.msk.bf16.mxu0 %vm11892_vm3, %v15287_v46  ;;  %2916 = vmatprep.mubr.bf16.mxu1 %v15281_v2 }
 0x156   : > { %v1126_v0 = vpop.f32.mrb[32].mxu1 }
 0x157   : > { %v12857_v17 = vadd.f32 %v1126_v0, %v12719_v23  ;;  %v10297_v4 = vpop.f32.mrb[33].mxu1 }
 0x158   : > { %v1129_v33 = vpop.f32.mrb[34].mxu1 }
 0x159   : > { %v12860_v19 = vadd.f32 %v1129_v33, %v12723_v26  ;;  %v10298_v37 = vpop.f32.mrb[35].mxu1  ;;  %v11228_v33 = vld [vmem:[%s15272_s1 + $0x548] ss:$20 sps:$4 sm:$0xff]  }
 0x15b   : > { %10394 = vmatmul.mubr.msk.bf16.gmra.mrb[92].mxu0 %vm506_vm2, %v12721_v24  ;;  %9210 = vmatmul.mubr.msk.bf16.gmra.mrb[76].mxu1 %vm506_vm2, %v12837_v16  ;;  %v11189_v24 = vld [vmem:[%s15272_s1 + $0x438] ss:$20 sps:$4 sm:$0xff]  }
 0x15c   : > { %2795 = vmatprep.mubr.bf16.mxu0 %v15281_v2  ;;  %10407 = vmatprep.mubr.msk.bf16.mxu1 %vm11892_vm3, %v15287_v46 }
 0x15e   : > { %v1134_v20 = vpop.f32.mrb[36].mxu1 }
 0x15f   : > { %v12870_v23 = vadd.f32 %v1134_v20, %v12734_v30  ;;  %v10301_v38 = vpop.f32.mrb[37].mxu1  ;;  %v11200_v30 = vld [vmem:[%s15272_s1 + $0x46c] ss:$20 sps:$4 sm:$0xff]  }
 0x160   : > { %v1137_v39 = vpop.f32.mrb[38].mxu1 }
 0x161   : > { %v12873_v26 = vadd.f32 %v1137_v39, %v12736_v34  ;;  %v10302_v31 = vpop.f32.mrb[39].mxu1  ;;  %v11192_v34 = vld [vmem:[%s15272_s1 + $0x460] ss:$20 sps:$4 sm:$0xff]  }
 0x162   : > { %v13011_v31 = vpack.c.bf16 %v9219_v22, %v9218_v25 }
 0x163   : > { %9200 = vmatmul.mubr.msk.bf16.vlgmr.msra.gmra.mrb[0].mxu0 %vm506_vm2, %v12739_v36  ;;  %10408 = vmatmul.mubr.msk.bf16.vlgmr.msra.gmra.mrb[80].mxu1 %vm506_vm2, %v12739_v36  ;;  %v11203_v36 = vld [vmem:[%s15272_s1 + $0x48c] ss:$20 sps:$4 sm:$0xff]  }
 0x164   : > { %2805 = vmatprep.mubr.bf16.mxu0 %v15281_v2  ;;  %10411 = vmatprep.mubr.msk.bf16.mxu1 %vm11892_vm3, %v15287_v46  ;;  %v3545_v22 = vshll.u32 %v13011_v31, 16 }
 0x165   : > { %3233 = vmatpush1.bf16.msra.mxu0 %v11189_v24  ;;  %3314 = vmatpush1.bf16.msra.mxu1 %v11195_v41 }
 0x166   : > { %v988_v48 = vpop.f32.mrb[40].mxu0  ;;  %v1142_v55 = vpop.f32.mrb[40].mxu1  ;;  %3234 = vmatprep.subr.bf16.mxu0 %v11194_v40  ;;  %3315 = vmatprep.subr.bf16.mxu1 %v11200_v30 }
 0x167   : > { %v12907_v53 = vadd.f32 %v988_v48, %v12639_v43  ;;  %v12910_v56 = vadd.f32 %v1142_v55, %v12764_v42  ;;  %v990_v58 = vpop.f32.mrb[41].mxu0  ;;  %v10305_v59 = vpop.f32.mrb[41].mxu1  ;;  %v11204_v43 = vld [vmem:[%s15272_s1 + $0x490] ss:$20 sps:$4 sm:$0xff]   ;;  %v9319_v55 = vld [vmem:[%s15272_s1 + $0x594] sm:$0x77] }
 0x168   : > { %v12913_v60 = vadd.f32 %v990_v58, %v12644_v45  ;;  %v992_v61 = vpop.f32.mrb[42].mxu0  ;;  %v1145_v44 = vpop.f32.mrb[42].mxu1  ;;  %v11209_v45 = vld [vmem:[%s15272_s1 + $0x4b4] ss:$20 sps:$4 sm:$0xff]   ;;  %v11212_v42 = vld [vmem:[%s15272_s1 + $0x4bc] ss:$20 sps:$4 sm:$0xff]  }
 0x169   : > { %v993_v47 = vpop.f32.mrb[43].mxu0  ;;  %3235 = vmatpush1.bf16.msra.mxu0 %v11192_v34  ;;  %v10306_v63 = vpop.f32.mrb[43].mxu1  ;;  %3316 = vmatpush1.bf16.msra.mxu1 %v11198_v32  ;;  %v11226_v48 = vld [vmem:[%s15272_s1 + $0x544] ss:$20 sps:$4 sm:$0xff]   ;;  %v11232_v58 = vld [vmem:[%s15272_s1 + $0x4c0] ss:$20 sps:$4 sm:$0xff]   ;;  %v9343_v44 = vcombine.low %v9319_v55, %v9319_v55 }
 0x16a   : > { %3236 = vmatprep.subr.bf16.mxu0 %v11203_v36  ;;  %3317 = vmatprep.subr.bf16.mxu1 %v11206_v52  ;;  %v9220_v36 = vld [vmem:[%s11989_s11 + $0xb0] sm:$0xff]  ;;  %v9221_v52 = vld [vmem:[%s11989_s11 + $0xb8] sm:$0xff]  ;;  %v11234_v61 = vld [vmem:[%s15272_s1 + $0x4e8] ss:$0 sps:$4 sm:$0x77]  }
 0x16b   : > { %9201 = vmatmul.mubr.msk.bf16.gmra.mrb[4].mxu0 %vm506_vm2, %v12777_v57  ;;  %10412 = vmatmul.mubr.msk.bf16.gmra.mrb[84].mxu1 %vm506_vm2, %v12777_v57  ;;  %v9273_v57 = vcombine.high %v9249_v49, %v9249_v49  ;;  %v3230_v49 = vsel %vm522_vm0, %v11234_v61, 0 }
 0x16c   : > { %2815 = vmatprep.mubr.bf16.mxu0 %v15281_v2  ;;  %10415 = vmatprep.mubr.msk.bf16.mxu1 %vm11892_vm3, %v15287_v46 }
 0x16d   : > { %3237 = vmatpush1.bf16.msra.mxu0 %v11201_v1  ;;  %3318 = vmatpush1.bf16.msra.mxu1 %v11204_v43  ;;  %v13053_v1 = vpack.c.bf16 %v9221_v52, %v9220_v36  ;;  %v11243_v36 = vld [vmem:[%s15272_s1 + $0x524] ss:$20 sps:$4 sm:$0xff]  }
 0x16e   : > { %3238 = vmatprep.subr.bf16.mxu0 %v11209_v45  ;;  %3319 = vmatprep.subr.bf16.mxu1 %v11212_v42 }
 0x171   : > { %3239 = vmatpush1.bf16.msra.mxu0 %v11207_v6  ;;  %3320 = vmatpush1.bf16.msra.mxu1 %v11210_v7  ;;  %v9223_v6 = vld [vmem:[%s11989_s11 + $0xc8] sm:$0xff] }
 0x172   : > { %9277 = vmatprep.subr.msk.bf16.mxu0 %vm522_vm0, %v9273_v57  ;;  %9283 = vmatprep.subr.msk.bf16.mxu1 %vm522_vm0, %v9275_v8 }
 0x173   : > { %9202 = vmatmul.mubr.msk.bf16.gmra.mrb[8].mxu0 %vm506_vm2, %v12814_v12  ;;  %10416 = vmatmul.mubr.msk.bf16.gmra.mrb[88].mxu1 %vm506_vm2, %v12814_v12  ;;  %v9216_v12 = vld [vmem:[%s11989_s11 + $0x90] sm:$0xff] }
 0x174   : > { %2825 = vmatprep.mubr.bf16.mxu0 %v15281_v2  ;;  %10419 = vmatprep.mubr.msk.bf16.mxu1 %vm11892_vm3, %v15287_v46  ;;  %v12976_v35 = vpack.c.bf16 %v9217_v5, %v9216_v12 }
 0x175   : > { %3241 = vmatpush1.bf16.msra.mxu0 %v3218_v11  ;;  %3322 = vmatpush1.bf16.msra.mxu1 %v3224_v14 }
 0x176   : > { %10427 = vmatprep.subr.bf16.mxu0 %v15287_v46  ;;  %3801 = vmatprep.subr.bf16.mxu1 %v11221_v15  ;;  %v3541_v15 = vshll.u32 %v12976_v35, 16 }
 0x178   : > { %v3543_v25 = vrot.slane %v3541_v15, 1 }
 0x17b   : > { %9203 = vmatmul.mubr.msk.bf16.gmra.mrb[12].mxu0 %vm506_vm2, %v12844_v50  ;;  %10420 = vmatmul.mubr.msk.bf16.gmra.mrb[92].mxu1 %vm506_vm2, %v12844_v50  ;;  %v11218_v50 = vld [vmem:[%s15272_s1 + $0x470] ss:$20 sps:$4 sm:$0xff]  }
 0x17c   : > { %2835 = vmatprep.mubr.bf16.mxu0 %v15281_v2  ;;  %10423 = vmatprep.mubr.msk.bf16.mxu1 %vm11892_vm3, %v15287_v46 }
 0x183   : > { %9204 = vmatmul.mubr.msk.bf16.gmra.mrb[96].mxu0 %vm506_vm2, %v12837_v16  ;;  %10424 = vmatmul.mubr.msk.bf16.gmra.mrb[96].mxu1 %vm506_vm2, %v12837_v16  ;;  %v11224_v16 = vld [vmem:[%s15272_s1 + $0x520] ss:$20 sps:$4 sm:$0xff]  }
 0x184   : > { %3264 = vmatprep.mubr.bf16.mxu0 %v15281_v2  ;;  %3345 = vmatprep.mubr.bf16.mxu1 %v15281_v2 }
 0x18b   : > { %9278 = vmatmul.mubr.msk.bf16.vlgmr.msra.gmra.mrb[0].mxu0 %vm506_vm2, %v12976_v35  ;;  %9284 = vmatmul.mubr.msk.bf16.vlgmr.msra.gmra.mrb[0].mxu1 %vm506_vm2, %v12976_v35 }
 0x18c   : > { %3274 = vmatprep.mubr.bf16.mxu0 %v15281_v2  ;;  %3355 = vmatprep.mubr.bf16.mxu1 %v15281_v2 }
 0x18d   : > { %10428 = vmatpush3.bf16.msra.mxu0 %v11217_v10  ;;  %3802 = vmatpush1.bf16.msra.mxu1 %v11219_v18 }
 0x18e   : > { %v1412_v0 = vpop.f32.mrb[44].mxu0  ;;  %v1493_v4 = vpop.f32.mrb[44].mxu1  ;;  %10429 = vmatprep.subr.bf16.mxu0 %v15287_v46  ;;  %3803 = vmatprep.subr.bf16.mxu1 %v11224_v16  ;;  %v3539_v16 = vshrl.u32 %v12976_v35, 16 }
 0x18f   : > { %v13006_v37 = vadd.f32 %v1412_v0, %v12907_v53  ;;  %v13009_v20 = vadd.f32 %v1493_v4, %v12771_v51  ;;  %v1414_v38 = vpop.f32.mrb[45].mxu0  ;;  %v1495_v39 = vpop.f32.mrb[45].mxu1  ;;  %v11225_v51 = vld [vmem:[%s15272_s1 + $0x498] ss:$20 sps:$4 sm:$0xff]   ;;  %v3547_v0 = vrot.slane %v3545_v22, 1 }
 0x190   : > { %v13014_v24 = vadd.f32 %v1414_v38, %v12913_v60  ;;  %v13017_v41 = vadd.f32 %v1495_v39, %v12774_v54  ;;  %v1416_v40 = vpop.f32.mrb[46].mxu0  ;;  %v1497_v30 = vpop.f32.mrb[46].mxu1  ;;  %v11231_v54 = vld [vmem:[%s15272_s1 + $0x570] ss:$20 sps:$4 sm:$0xff]   ;;  %v11229_v53 = vld [vmem:[%s15272_s1 + $0x56c] ss:$20 sps:$4 sm:$0xff]   ;;  %v9344_v60 = vcombine.high %v9319_v55, %v9319_v55 }
 0x191   : > { %v1417_v34 = vpop.f32.mrb[47].mxu0  ;;  %10430 = vmatpush3.bf16.msra.mxu0 %v11218_v50  ;;  %v1498_v32 = vpop.f32.mrb[47].mxu1  ;;  %3804 = vmatpush1.bf16.msra.mxu1 %v11222_v28  ;;  %v3549_v40 = vshrl.u32 %v13011_v31, 16  ;;  %v3552_v30 = vshll.u32 %v13053_v1, 16  ;;  %v11239_v55 = vld [vmem:[%s15272_s1 + $0x514] ss:$20 sps:$4 sm:$0xff]  }
 0x192   : > { %10431 = vmatprep.subr.bf16.mxu0 %v15287_v46  ;;  %3805 = vmatprep.subr.bf16.mxu1 %v11228_v33 }
 0x193   : > { %9279 = vmatmul.mubr.msk.bf16.gmra.mrb[4].mxu0 %vm506_vm2, %v13011_v31  ;;  %9285 = vmatmul.mubr.msk.bf16.gmra.mrb[4].mxu1 %vm506_vm2, %v13011_v31 }
 0x194   : > { %3284 = vmatprep.mubr.bf16.mxu0 %v15281_v2  ;;  %3365 = vmatprep.mubr.bf16.mxu1 %v15281_v2 }
 0x195   : > { %10432 = vmatpush3.bf16.msra.mxu0 %v11225_v51  ;;  %3806 = vmatpush1.bf16.msra.mxu1 %v11226_v48  ;;  %v11236_v51 = vld [vmem:[%s15272_s1 + $0x4ec] ss:$20 sps:$4 sm:$0xff]  }
 0x196   : > { %v1534_v59 = vpop.f32.mrb[48].mxu0  ;;  %10433 = vmatprep.subr.bf16.mxu0 %v15287_v46  ;;  %3807 = vmatprep.subr.bf16.mxu1 %v11231_v54  ;;  %v11241_v48 = vld [vmem:[%s15272_s1 + $0x518] ss:$20 sps:$4 sm:$0xff]   ;;  %v3554_v54 = vrot.slane %v3552_v30, 1 }
 0x197   : > { %v13051_v47 = vadd.f32 %v1534_v59, %v12811_v9  ;;  %v10319_v63 = vpop.f32.mrb[49].mxu0  ;;  %v3712_v9 = vsel %vm522_vm0, %v9343_v44, 0 }
 0x198   : > { %v1537_v43 = vpop.f32.mrb[50].mxu0 }
 0x199   : > { %v13056_v45 = vadd.f32 %v1537_v43, %v12817_v13  ;;  %v10320_v42 = vpop.f32.mrb[51].mxu0  ;;  %10434 = vmatpush3.bf16.msra.mxu0 %v11232_v58  ;;  %3808 = vmatpush1.bf16.msra.mxu1 %v11229_v53  ;;  %v9222_v13 = vld [vmem:[%s11989_s11 + $0xc0] sm:$0xff] }
 0x19a   : > { %10435 = vmatprep.subr.bf16.mxu0 %v15287_v46  ;;  %9352 = vmatprep.subr.msk.bf16.mxu1 %vm522_vm0, %v9344_v60  ;;  %v13077_v62 = vpack.c.bf16 %v9223_v6, %v9222_v13  ;;  %v11246_v58 = vld [vmem:[%s15272_s1 + $0x540] ss:$20 sps:$4 sm:$0xff]   ;;  %v11250_v6 = vld [vmem:[%s15272_s1 + $0x568] ss:$20 sps:$4 sm:$0xff]  }
 0x19b   : > { %9280 = vmatmul.mubr.msk.bf16.gmra.mrb[8].mxu0 %vm506_vm2, %v13053_v1  ;;  %9286 = vmatmul.mubr.msk.bf16.gmra.mrb[8].mxu1 %vm506_vm2, %v13053_v1 }
 0x19c   : > { %3294 = vmatprep.mubr.bf16.mxu0 %v15281_v2  ;;  %3375 = vmatprep.mubr.bf16.mxu1 %v15281_v2 }
 0x19d   : > { %10436 = vmatpush3.bf16.msra.mxu0 %v3230_v49  ;;  %3810 = vmatpush1.bf16.msra.mxu1 %v3712_v9  ;;  %v3556_v9 = vshrl.u32 %v13053_v1, 16 }
 0x19e   : > { %v1542_v7 = vpop.f32.mrb[52].mxu0  ;;  %3720 = vmatprep.subr.bf16.mxu0 %v11238_v3  ;;  %10457 = vmatprep.subr.bf16.mxu1 %v15287_v46  ;;  %v3559_v3 = vshll.u32 %v13077_v62, 16 }
 0x19f   : > { %v13075_v57 = vadd.f32 %v1542_v7, %v12840_v21  ;;  %v10323_v8 = vpop.f32.mrb[53].mxu0  ;;  %v9224_v21 = vld [vmem:[%s11989_s11 + $0xd0] sm:$0x3f] }
 0x1a0   : > { %v1545_v29 = vpop.f32.mrb[54].mxu0  ;;  %v13093_v10 = vpack.c.bf16 %v9224_v21, %v9224_v21  ;;  %v9318_v7 = vld [vmem:[%s15272_s1 + $0x58c] sm:$0x77]  ;;  %v3558_v8 = vor.u32 %v3556_v9, %v3554_v54  ;;  %v11251_v21 = vld [vmem:[%s15272_s1 + $0x574] ss:$20 sps:$4 sm:$0xff]  }
 0x1a1   : > { %v13080_v11 = vadd.f32 %v1545_v29, %v12847_v27  ;;  %v10324_v14 = vpop.f32.mrb[55].mxu0  ;;  %v3561_v29 = vrot.slane %v3559_v3, 1 }
 0x1a2   : > { %v11248_v14 = vld [vmem:[%s15272_s1 + $0x564] ss:$20 sps:$4 sm:$0xff]  }
 0x1a3   : > { %9281 = vmatmul.mubr.msk.bf16.gmra.mrb[12].mxu0 %vm506_vm2, %v13077_v62  ;;  %9287 = vmatmul.mubr.msk.bf16.gmra.mrb[12].mxu1 %vm506_vm2, %v13077_v62 }
 0x1a4   : > { %3304 = vmatprep.mubr.bf16.mxu0 %v15281_v2  ;;  %3385 = vmatprep.mubr.bf16.mxu1 %v15281_v2 }
 0x1a6   : > { %v1550_v12 = vpop.f32.mrb[56].mxu0 }
 0x1a7   : > { %v13091_v5 = vadd.f32 %v1550_v12, %v12857_v17  ;;  %v10327_v27 = vpop.f32.mrb[57].mxu0  ;;  %v3544_v17 = vor.u32 %v3543_v25, %v3539_v16  ;;  %v9342_v12 = vcombine.high %v9318_v7, %v9318_v7 }
 0x1a8   : > { %v1553_v18 = vpop.f32.mrb[58].mxu0  ;;  %v9341_v27 = vcombine.low %v9318_v7, %v9318_v7 }
 0x1a9   : > { %v13098_v50 = vadd.f32 %v1553_v18, %v12860_v19  ;;  %v10328_v28 = vpop.f32.mrb[59].mxu0  ;;  %v13111_v39 = vsel %vm349_vm1, %v3544_v17, %v3547_v0  ;;  %v11254_v18 = vld [vmem:[%s15272_s1 + $0x59c] ss:$0 sps:$4 sm:$0x77]   ;;  %v3563_v17 = vshrl.u32 %v13077_v62, 16 }
 0x1aa   : > { %v13192_v28 = vsel %vm349_vm1, %v3558_v8, %v3561_v29 }
 0x1ab   : > { %9282 = vmatmul.mubr.msk.bf16.gmra.mrb[100].mxu0 %vm506_vm2, %v13093_v10  ;;  %9288 = vmatmul.mubr.msk.bf16.gmra.mrb[100].mxu1 %vm506_vm2, %v13093_v10  ;;  %v3565_v30 = vor.u32 %v3563_v17, %v3561_v29  ;;  %v11272_v29 = vld [vmem:[%s15272_s1 + $0x5fc] ss:$20 sps:$4 sm:$0xff]  }
 0x1ac   : > { %10437 = vmatprep.mubr.msk.bf16.mxu0 %vm11892_vm3, %v15287_v46  ;;  %3833 = vmatprep.mubr.bf16.mxu1 %v15281_v2 }
 0x1ae   : > { %v1558_v4 = vpop.f32.mrb[60].mxu0 }
 0x1af   : > { %v13108_v33 = vadd.f32 %v1558_v4, %v12870_v23  ;;  %v10331_v19 = vpop.f32.mrb[61].mxu0  ;;  %v11242_v23 = vld [vmem:[%s15272_s1 + $0x4fc] ss:$20 sps:$4 sm:$0xff]  }
 0x1b0   : > { %v1561_v38 = vpop.f32.mrb[62].mxu0 }
 0x1b1   : > { %v13116_v34 = vadd.f32 %v1561_v38, %v12873_v26  ;;  %v10332_v32 = vpop.f32.mrb[63].mxu0  ;;  %v3551_v26 = vor.u32 %v3549_v40, %v3547_v0  ;;  %v3566_v0 = vshll.u32 %v13093_v10, 16  ;;  %v3718_v38 = vsel %vm522_vm0, %v11254_v18, 0  ;;  %v11257_v40 = vld [vmem:[%s15272_s1 + $0x5a4] ss:$20 sps:$4 sm:$0xff]  }
 0x1b3   : > { %10438 = vmatmul.mubr.msk.bf16.vlgmr.msra.gmra.mrb[104].mxu0 %vm506_vm2, %v12976_v35  ;;  %9353 = vmatmul.mubr.msk.bf16.vlgmr.msra.gmra.mrb[0].mxu1 %vm506_vm2, %v13111_v39  ;;  %v13154_v42 = vsel %vm349_vm1, %v3551_v26, %v3554_v54  ;;  %v3568_v32 = vrot.slane %v3566_v0, 1  ;;  %v11267_v0 = vld [vmem:[%s15272_s1 + $0x5f0] ss:$20 sps:$4 sm:$0xff]  }
 0x1b4   : > { %10441 = vmatprep.mubr.msk.bf16.mxu0 %vm11892_vm3, %v15287_v46  ;;  %3843 = vmatprep.mubr.bf16.mxu1 %v15281_v2 }
 0x1b5   : > { %3721 = vmatpush1.bf16.msra.mxu0 %v11236_v51  ;;  %10458 = vmatpush3.bf16.msra.mxu1 %v11242_v23  ;;  %v13220_v54 = vsel %vm349_vm1, %v3565_v30, %v3568_v32 }
 0x1b6   : > { %v1566_v52 = vpop.f32.mrb[64].mxu0  ;;  %v1962_v53 = vpop.f32.mrb[48].mxu1  ;;  %3722 = vmatprep.subr.bf16.mxu0 %v11241_v48  ;;  %10459 = vmatprep.subr.bf16.mxu1 %v15287_v46 }
 0x1b7   : > { %v13145_v59 = vadd.f32 %v1566_v52, %v12910_v56  ;;  %v13148_v60 = vadd.f32 %v1962_v53, %v13009_v20  ;;  %v10335_v61 = vpop.f32.mrb[65].mxu0  ;;  %v1964_v44 = vpop.f32.mrb[49].mxu1  ;;  %v11244_v20 = vld [vmem:[%s15272_s1 + $0x53c] ss:$20 sps:$4 sm:$0xff]   ;;  %v3570_v52 = vshrl.u32 %v13093_v10, 16 }
 0x1b8   : > { %v13151_v63 = vadd.f32 %v1964_v44, %v13017_v41  ;;  %v1569_v43 = vpop.f32.mrb[66].mxu0  ;;  %v1966_v49 = vpop.f32.mrb[50].mxu1  ;;  %v11247_v41 = vld [vmem:[%s15272_s1 + $0x54c] ss:$20 sps:$4 sm:$0xff]  }
 0x1b9   : > { %v10336_v13 = vpop.f32.mrb[67].mxu0  ;;  %v1967_v56 = vpop.f32.mrb[51].mxu1  ;;  %3723 = vmatpush1.bf16.msra.mxu0 %v11239_v55  ;;  %10460 = vmatpush3.bf16.msra.mxu1 %v11243_v36 }
 0x1ba   : > { %3724 = vmatprep.subr.bf16.mxu0 %v11246_v58  ;;  %10461 = vmatprep.subr.bf16.mxu1 %v15287_v46  ;;  %v13236_v58 = vor.u32 %v3570_v52, %v3568_v32  ;;  %v11255_v56 = vld [vmem:[%s15272_s1 + $0x5a0] ss:$20 sps:$4 sm:$0xff]  }
 0x1bb   : > { %10442 = vmatmul.mubr.msk.bf16.gmra.mrb[108].mxu0 %vm506_vm2, %v13011_v31  ;;  %9354 = vmatmul.mubr.msk.bf16.gmra.mrb[4].mxu1 %vm506_vm2, %v13154_v42 }
 0x1bc   : > { %10445 = vmatprep.mubr.msk.bf16.mxu0 %vm11892_vm3, %v15287_v46  ;;  %3853 = vmatprep.mubr.bf16.mxu1 %v15281_v2 }
 0x1bd   : > { %3725 = vmatpush1.bf16.msra.mxu0 %v11244_v20  ;;  %10462 = vmatpush3.bf16.msra.mxu1 %v11247_v41  ;;  %v11261_v20 = vld [vmem:[%s15272_s1 + $0x5a8] ss:$20 sps:$4 sm:$0xff]   ;;  %v11260_v41 = vld [vmem:[%s15272_s1 + $0x5cc] ss:$20 sps:$4 sm:$0xff]  }
 0x1be   : > { %v2003_v15 = vpop.f32.mrb[52].mxu1  ;;  %3726 = vmatprep.subr.bf16.mxu0 %v11250_v6  ;;  %10463 = vmatprep.subr.bf16.mxu1 %v15287_v46  ;;  %v11264_v6 = vld [vmem:[%s15272_s1 + $0x5d0] ss:$20 sps:$4 sm:$0xff]  }
 0x1bf   : > { %v13189_v16 = vadd.f32 %v2003_v15, %v13051_v47  ;;  %v10349_v25 = vpop.f32.mrb[53].mxu1  ;;  %v3706_v47 = vsel %vm522_vm0, %v9341_v27, 0 }
 0x1c0   : > { %v2006_v22 = vpop.f32.mrb[54].mxu1 }
 0x1c1   : > { %v13197_v4 = vadd.f32 %v2006_v22, %v13056_v45  ;;  %v10350_v19 = vpop.f32.mrb[55].mxu1  ;;  %3727 = vmatpush1.bf16.msra.mxu0 %v11248_v14  ;;  %10464 = vmatpush3.bf16.msra.mxu1 %v11251_v21  ;;  %v11263_v45 = vld [vmem:[%s15272_s1 + $0x5ac] ss:$20 sps:$4 sm:$0xff]  }
 0x1c2   : > { %9346 = vmatprep.subr.msk.bf16.mxu0 %vm522_vm0, %v9342_v12  ;;  %10465 = vmatprep.subr.bf16.mxu1 %v15287_v46  ;;  %v9387_v19 = vld [vmem:[%s15272_s1 + $0x640] sm:$0x77] }
 0x1c3   : > { %10446 = vmatmul.mubr.msk.bf16.gmra.mrb[112].mxu0 %vm506_vm2, %v13053_v1  ;;  %9355 = vmatmul.mubr.msk.bf16.gmra.mrb[8].mxu1 %vm506_vm2, %v13192_v28  ;;  %v9410_v30 = vcombine.low %v9387_v19, %v9387_v19 }
 0x1c4   : > { %10449 = vmatprep.mubr.msk.bf16.mxu0 %vm11892_vm3, %v15287_v46  ;;  %3863 = vmatprep.mubr.bf16.mxu1 %v15281_v2 }
 0x1c5   : > { %3729 = vmatpush1.bf16.msra.mxu0 %v3706_v47  ;;  %10466 = vmatpush3.bf16.msra.mxu1 %v3718_v38  ;;  %v9388_v47 = vld [vmem:[%s15272_s1 + $0x648] sm:$0x77] }
 0x1c6   : > { %v2011_v51 = vpop.f32.mrb[56].mxu1  ;;  %4188 = vmatprep.subr.bf16.mxu0 %v11257_v40  ;;  %4269 = vmatprep.subr.bf16.mxu1 %v11263_v45  ;;  %v11273_v38 = vld [vmem:[%s15272_s1 + $0x618] ss:$20 sps:$4 sm:$0xff]   ;;  %v11276_v40 = vld [vmem:[%s15272_s1 + $0x620] ss:$20 sps:$4 sm:$0xff]   ;;  %v9413_v45 = vcombine.high %v9388_v47, %v9388_v47  ;;  %v9412_v32 = vcombine.low %v9388_v47, %v9388_v47 }
 0x1c7   : > { %v13217_v23 = vadd.f32 %v2011_v51, %v13075_v57  ;;  %v10353_v48 = vpop.f32.mrb[57].mxu1  ;;  %v4174_v51 = vsel %vm522_vm0, %v9410_v30, 0 }
 0x1c8   : > { %v2014_v26 = vpop.f32.mrb[58].mxu1  ;;  %v4180_v48 = vsel %vm522_vm0, %v9412_v32, 0 }
 0x1c9   : > { %v13223_v55 = vadd.f32 %v2014_v26, %v13080_v11  ;;  %v10354_v36 = vpop.f32.mrb[59].mxu1  ;;  %v4033_v26 = vrot.slane %v13011_v31, 1  ;;  %v11284_v31 = vld [vmem:[%s15272_s1 + $0x5d8] ss:$20 sps:$4 sm:$0xff]  }
 0x1ca   : > { %v11283_v36 = vld [vmem:[%s15272_s1 + $0x5b0] ss:$20 sps:$4 sm:$0xff]  }
 0x1cb   : > { %10450 = vmatmul.mubr.msk.bf16.gmra.mrb[116].mxu0 %vm506_vm2, %v13077_v62  ;;  %9356 = vmatmul.mubr.msk.bf16.gmra.mrb[12].mxu1 %vm506_vm2, %v13220_v54 }
 0x1cc   : > { %10453 = vmatprep.mubr.msk.bf16.mxu0 %vm11892_vm3, %v15287_v46  ;;  %3873 = vmatprep.mubr.bf16.mxu1 %v15281_v2 }
 0x1ce   : > { %v2019_v57 = vpop.f32.mrb[60].mxu1 }
 0x1cf   : > { %v13234_v53 = vadd.f32 %v2019_v57, %v13091_v5  ;;  %v10357_v11 = vpop.f32.mrb[61].mxu1 }
 0x1d0   : > { %v2022_v61 = vpop.f32.mrb[62].mxu1 }
 0x1d1   : > { %v13239_v44 = vadd.f32 %v2022_v61, %v13098_v50  ;;  %v10358_v43 = vpop.f32.mrb[63].mxu1 }
 0x1d3   : > { %10454 = vmatmul.mubr.msk.bf16.gmra.mrb[120].mxu0 %vm506_vm2, %v13093_v10  ;;  %9357 = vmatmul.mubr.msk.bf16.gmra.mrb[104].mxu1 %vm506_vm2, %v13236_v58 }
 0x1d4   : > { %3752 = vmatprep.mubr.bf16.mxu0 %v15281_v2  ;;  %10467 = vmatprep.mubr.msk.bf16.mxu1 %vm11892_vm3, %v15287_v46 }
 0x1d6   : > { %v2027_v5 = vpop.f32.mrb[64].mxu1 }
 0x1d7   : > { %v13249_v49 = vadd.f32 %v2027_v5, %v13108_v33  ;;  %v10361_v9 = vpop.f32.mrb[65].mxu1  ;;  %v11266_v33 = vld [vmem:[%s15272_s1 + $0x5d4] ss:$20 sps:$4 sm:$0xff]  }
 0x1d8   : > { %v2030_v3 = vpop.f32.mrb[66].mxu1 }
 0x1d9   : > { %v13252_v50 = vadd.f32 %v2030_v3, %v13116_v34  ;;  %v10362_v13 = vpop.f32.mrb[67].mxu1  ;;  %v11258_v34 = vld [vmem:[%s15272_s1 + $0x5c8] ss:$20 sps:$4 sm:$0xff]  }
 0x1db   : > { %9347 = vmatmul.mubr.msk.bf16.vlgmr.msra.gmra.mrb[0].mxu0 %vm506_vm2, %v13111_v39  ;;  %10468 = vmatmul.mubr.msk.bf16.vlgmr.msra.gmra.mrb[108].mxu1 %vm506_vm2, %v13111_v39  ;;  %v11269_v39 = vld [vmem:[%s15272_s1 + $0x5f4] ss:$20 sps:$4 sm:$0xff]  }
 0x1dc   : > { %3762 = vmatprep.mubr.bf16.mxu0 %v15281_v2  ;;  %10471 = vmatprep.mubr.msk.bf16.mxu1 %vm11892_vm3, %v15287_v46 }
 0x1dd   : > { %4189 = vmatpush1.bf16.msra.mxu0 %v11255_v56  ;;  %4270 = vmatpush1.bf16.msra.mxu1 %v11261_v20 }
 0x1de   : > { %v1881_v7 = vpop.f32.mrb[68].mxu0  ;;  %v2035_v8 = vpop.f32.mrb[68].mxu1  ;;  %4190 = vmatprep.subr.bf16.mxu0 %v11260_v41  ;;  %4271 = vmatprep.subr.bf16.mxu1 %v11266_v33  ;;  %v11286_v41 = vld [vmem:[%s15272_s1 + $0x628] ss:$20 sps:$4 sm:$0xff]  }
 0x1df   : > { %v13286_v14 = vadd.f32 %v1881_v7, %v13006_v37  ;;  %v13289_v21 = vadd.f32 %v2035_v8, %v13145_v59  ;;  %v1883_v15 = vpop.f32.mrb[69].mxu0  ;;  %v10365_v12 = vpop.f32.mrb[69].mxu1  ;;  %v11270_v37 = vld [vmem:[%s15272_s1 + $0x5f8] ss:$20 sps:$4 sm:$0xff]  }
 0x1e0   : > { %v13292_v27 = vadd.f32 %v1883_v15, %v13014_v24  ;;  %v1885_v18 = vpop.f32.mrb[70].mxu0  ;;  %v2038_v25 = vpop.f32.mrb[70].mxu1  ;;  %v11275_v24 = vld [vmem:[%s15272_s1 + $0x61c] ss:$20 sps:$4 sm:$0xff]   ;;  %v11278_v59 = vld [vmem:[%s15272_s1 + $0x624] ss:$20 sps:$4 sm:$0xff]  }
 0x1e1   : > { %v1886_v22 = vpop.f32.mrb[71].mxu0  ;;  %4191 = vmatpush1.bf16.msra.mxu0 %v11258_v34  ;;  %v10366_v17 = vpop.f32.mrb[71].mxu1  ;;  %4272 = vmatpush1.bf16.msra.mxu1 %v11264_v6  ;;  %v11287_v34 = vld [vmem:[%s15272_s1 + $0x650] ss:$0 sps:$4 sm:$0x77]  }
 0x1e2   : > { %4192 = vmatprep.subr.bf16.mxu0 %v11269_v39  ;;  %4273 = vmatprep.subr.bf16.mxu1 %v11272_v29 }
 0x1e3   : > { %9348 = vmatmul.mubr.msk.bf16.gmra.mrb[4].mxu0 %vm506_vm2, %v13154_v42  ;;  %10472 = vmatmul.mubr.msk.bf16.gmra.mrb[112].mxu1 %vm506_vm2, %v13154_v42  ;;  %v9411_v42 = vcombine.high %v9387_v19, %v9387_v19 }
 0x1e4   : > { %3772 = vmatprep.mubr.bf16.mxu0 %v15281_v2  ;;  %10475 = vmatprep.mubr.msk.bf16.mxu1 %vm11892_vm3, %v15287_v46 }
 0x1e5   : > { %4193 = vmatpush1.bf16.msra.mxu0 %v11267_v0  ;;  %4274 = vmatpush1.bf16.msra.mxu1 %v11270_v37 }
 0x1e6   : > { %4194 = vmatprep.subr.bf16.mxu0 %v11275_v24  ;;  %4275 = vmatprep.subr.bf16.mxu1 %v11278_v59 }
 0x1e9   : > { %4195 = vmatpush1.bf16.msra.mxu0 %v11273_v38  ;;  %4276 = vmatpush1.bf16.msra.mxu1 %v11276_v40 }
 0x1ea   : > { %9415 = vmatprep.subr.msk.bf16.mxu0 %vm522_vm0, %v9411_v42  ;;  %9421 = vmatprep.subr.msk.bf16.mxu1 %vm522_vm0, %v9413_v45 }
 0x1eb   : > { %9349 = vmatmul.mubr.msk.bf16.gmra.mrb[8].mxu0 %vm506_vm2, %v13192_v28  ;;  %10476 = vmatmul.mubr.msk.bf16.gmra.mrb[116].mxu1 %vm506_vm2, %v13192_v28  ;;  %v4032_v28 = vrot.slane %v12976_v35, 1  ;;  %v4035_v35 = vrot.slane %v13053_v1, 1 }
 0x1ec   : > { %3782 = vmatprep.mubr.bf16.mxu0 %v15281_v2  ;;  %10479 = vmatprep.mubr.msk.bf16.mxu1 %vm11892_vm3, %v15287_v46 }
 0x1ed   : > { %4197 = vmatpush1.bf16.msra.mxu0 %v4174_v51  ;;  %4278 = vmatpush1.bf16.msra.mxu1 %v4180_v48  ;;  %v13382_v3 = vsel %vm1181_vm4, %v4033_v26, %v4035_v35 }
 0x1ee   : > { %10487 = vmatprep.subr.bf16.mxu0 %v15287_v46 }
 0x1f3   : > { %9350 = vmatmul.mubr.msk.bf16.gmra.mrb[12].mxu0 %vm506_vm2, %v13220_v54  ;;  %10480 = vmatmul.mubr.msk.bf16.gmra.mrb[120].mxu1 %vm506_vm2, %v13220_v54  ;;  %v13353_v54 = vsel %vm1181_vm4, %v4032_v28, %v4033_v26 }
 0x1f4   : > { %3792 = vmatprep.mubr.bf16.mxu0 %v15281_v2  ;;  %10483 = vmatprep.mubr.msk.bf16.mxu1 %vm11892_vm3, %v15287_v46 }
 0x1fb   : > { %9351 = vmatmul.mubr.msk.bf16.gmra.mrb[124].mxu0 %vm506_vm2, %v13236_v58  ;;  %10484 = vmatmul.mubr.msk.bf16.gmra.mrb[124].mxu1 %vm506_vm2, %v13236_v58 }
 0x1fc   : > { %4220 = vmatprep.mubr.bf16.mxu0 %v15281_v2  ;;  %4301 = vmatprep.mubr.bf16.mxu1 %v15281_v2 }
 0x203   : > { %9416 = vmatmul.mubr.msk.bf16.vlgmr.msra.gmra.mrb[0].mxu0 %vm506_vm2, %v13353_v54  ;;  %9422 = vmatmul.mubr.msk.bf16.vlgmr.msra.gmra.mrb[0].mxu1 %vm506_vm2, %v13353_v54 }
 0x204   : > { %4230 = vmatprep.mubr.bf16.mxu0 %v15281_v2  ;;  %4311 = vmatprep.mubr.bf16.mxu1 %v15281_v2 }
 0x205   : > { %10488 = vmatpush3.bf16.msra.mxu0 %v11283_v36 }
 0x206   : > { %v2369_v52 = vpop.f32.mrb[72].mxu0  ;;  %v2450_v57 = vpop.f32.mrb[72].mxu1  ;;  %10489 = vmatprep.subr.bf16.mxu0 %v15287_v46 }
 0x207   : > { %v13370_v11 = vadd.f32 %v2369_v52, %v13286_v14  ;;  %v13373_v58 = vadd.f32 %v2450_v57, %v13148_v60  ;;  %v2371_v61 = vpop.f32.mrb[73].mxu0  ;;  %v2452_v43 = vpop.f32.mrb[73].mxu1  ;;  %v11285_v60 = vld [vmem:[%s15272_s1 + $0x600] ss:$20 sps:$4 sm:$0xff]   ;;  %v4186_v14 = vsel %vm522_vm0, %v11287_v34, 0 }
 0x208   : > { %v13376_v5 = vadd.f32 %v2371_v61, %v13292_v27  ;;  %v13379_v1 = vadd.f32 %v2452_v43, %v13151_v63  ;;  %v2373_v9 = vpop.f32.mrb[74].mxu0  ;;  %v2454_v13 = vpop.f32.mrb[74].mxu1  ;;  %v4037_v63 = vrot.slane %v13077_v62, 1 }
 0x209   : > { %v2374_v56 = vpop.f32.mrb[75].mxu0  ;;  %10490 = vmatpush3.bf16.msra.mxu0 %v11284_v31  ;;  %v2455_v20 = vpop.f32.mrb[75].mxu1 }
 0x20a   : > { %10491 = vmatprep.subr.bf16.mxu0 %v15287_v46  ;;  %v4038_v39 = vsel %vm1181_vm4, %v4035_v35, %v4037_v63 }
 0x20b   : > { %9417 = vmatmul.mubr.msk.bf16.gmra.mrb[4].mxu0 %vm506_vm2, %v13382_v3  ;;  %9423 = vmatmul.mubr.msk.bf16.gmra.mrb[4].mxu1 %vm506_vm2, %v13382_v3 }
 0x20c   : > { %4240 = vmatprep.mubr.bf16.mxu0 %v15281_v2  ;;  %4321 = vmatprep.mubr.bf16.mxu1 %v15281_v2 }
 0x20d   : > { %10492 = vmatpush3.bf16.msra.mxu0 %v11285_v60 }
 0x20e   : > { %v2491_v33 = vpop.f32.mrb[76].mxu0  ;;  %10493 = vmatprep.subr.bf16.mxu0 %v15287_v46 }
 0x20f   : > { %v2533_v6 = vadd.f32 %v2491_v33, %v13189_v16  ;;  %v10379_v7 = vpop.f32.mrb[77].mxu0  ;;  %v13412_v16 = vrot.slane %v13093_v10, 1 }
 0x210   : > { %v2494_v8 = vpop.f32.mrb[78].mxu0 }
 0x211   : > { %v2538_v62 = vadd.f32 %v2494_v8, %v13197_v4  ;;  %v10380_v29 = vpop.f32.mrb[79].mxu0  ;;  %10494 = vmatpush3.bf16.msra.mxu0 %v11286_v41  ;;  %v4040_v18 = vsel %vm1181_vm4, %v4037_v63, %v13412_v16 }
 0x212   : > { %10495 = vmatprep.subr.bf16.mxu0 %v15287_v46 }
 0x213   : > { %9418 = vmatmul.mubr.msk.bf16.gmra.mrb[8].mxu0 %vm506_vm2, %v4038_v39  ;;  %9424 = vmatmul.mubr.msk.bf16.gmra.mrb[8].mxu1 %vm506_vm2, %v4038_v39 }
 0x214   : > { %4250 = vmatprep.mubr.bf16.mxu0 %v15281_v2  ;;  %4331 = vmatprep.mubr.bf16.mxu1 %v15281_v2 }
 0x215   : > { %10496 = vmatpush3.bf16.msra.mxu0 %v4186_v14 }
 0x216   : > { %v2499_v15 = vpop.f32.mrb[80].mxu0 }
 0x217   : > { %v2543_v4 = vadd.f32 %v2499_v15, %v13217_v23  ;;  %v10383_v12 = vpop.f32.mrb[81].mxu0 }
 0x218   : > { %v2502_v27 = vpop.f32.mrb[82].mxu0 }
 0x219   : > { %v2548_v25 = vadd.f32 %v2502_v27, %v13223_v55  ;;  %v10384_v22 = vpop.f32.mrb[83].mxu0 }
 0x21b   : > { %9419 = vmatmul.mubr.msk.bf16.gmra.mrb[12].mxu0 %vm506_vm2, %v4040_v18  ;;  %9425 = vmatmul.mubr.msk.bf16.gmra.mrb[12].mxu1 %vm506_vm2, %v4040_v18 }
 0x21c   : > { %4260 = vmatprep.mubr.bf16.mxu0 %v15281_v2  ;;  %4341 = vmatprep.mubr.bf16.mxu1 %v15281_v2 }
 0x21e   : > { %v2507_v10 = vpop.f32.mrb[84].mxu0 }
 0x21f   : > { %v2553_v17 = vadd.f32 %v2507_v10, %v13234_v53  ;;  %v10387_v23 = vpop.f32.mrb[85].mxu0 }
 0x220   : > { %v2510_v0 = vpop.f32.mrb[86].mxu0 }
 0x221   : > { %v2558_v37 = vadd.f32 %v2510_v0, %v13239_v44  ;;  %v10388_v24 = vpop.f32.mrb[87].mxu0 }
 0x223   : > { %9420 = vmatmul.mubr.msk.bf16.gmra.mrb[128].mxu0 %vm506_vm2, %v13412_v16  ;;  %9426 = vmatmul.mubr.msk.bf16.gmra.mrb[128].mxu1 %vm506_vm2, %v13412_v16 }
 0x224   : > { %10497 = vmatprep.mubr.msk.bf16.mxu0 %vm11892_vm3, %v15287_v46  ;;  %4859 = vmatprep.mubr.bf16.mxu1 %v15281_v2 }
 0x226   : > { %v2515_v55 = vpop.f32.mrb[88].mxu0 }
 0x227   : > { %v2563_v59 = vadd.f32 %v2515_v55, %v13249_v49  ;;  %v10391_v53 = vpop.f32.mrb[89].mxu0 }
 0x228   : > { %v2518_v19 = vpop.f32.mrb[90].mxu0 }
 0x229   : > { %v2568_v47 = vadd.f32 %v2518_v19, %v13252_v50  ;;  %v10392_v44 = vpop.f32.mrb[91].mxu0 }
 0x22b   : > { %10498 = vmatmul.mubr.msk.bf16.vlgmr.msra.gmra.mrb[132].mxu0 %vm506_vm2, %v13353_v54 }
 0x22c   : > { %10501 = vmatprep.mubr.msk.bf16.mxu0 %vm11892_vm3, %v15287_v46 }
 0x22e   : > { %v2523_v38 = vpop.f32.mrb[92].mxu0  ;;  %v2918_v40 = vpop.f32.mrb[76].mxu1 }
 0x22f   : > { %v2573_v42 = vadd.f32 %v2523_v38, %v13289_v21  ;;  %v3039_v45 = vadd.f32 %v2918_v40, %v13373_v58  ;;  %v10395_v30 = vpop.f32.mrb[93].mxu0  ;;  %v2920_v32 = vpop.f32.mrb[77].mxu1 }
 0x230   : > { %v3040_v49 = vadd.f32 %v2920_v32, %v13379_v1  ;;  %v2526_v51 = vpop.f32.mrb[94].mxu0  ;;  %v2922_v48 = vpop.f32.mrb[78].mxu1 }
 0x231   : > { %v10396_v50 = vpop.f32.mrb[95].mxu0  ;;  %v2923_v28 = vpop.f32.mrb[79].mxu1 }
 0x233   : > { %10502 = vmatmul.mubr.msk.bf16.gmra.mrb[136].mxu0 %vm506_vm2, %v13382_v3 }
 0x234   : > { %10505 = vmatprep.mubr.msk.bf16.mxu0 %vm11892_vm3, %v15287_v46 }
 0x236   : > { %v2959_v26 = vpop.f32.mrb[80].mxu1 }
 0x237   : > { %v3001_v54 = vadd.f32 %v2959_v26, %v2533_v6  ;;  %v10409_v36 = vpop.f32.mrb[81].mxu1 }
 0x238   : > { %v2962_v21 = vpop.f32.mrb[82].mxu1 }
 0x239   : > { %v3006_v35 = vadd.f32 %v2962_v21, %v2538_v62  ;;  %v10410_v31 = vpop.f32.mrb[83].mxu1 }
 0x23b   : > { %10506 = vmatmul.mubr.msk.bf16.gmra.mrb[140].mxu0 %vm506_vm2, %v4038_v39 }
 0x23c   : > { %10509 = vmatprep.mubr.msk.bf16.mxu0 %vm11892_vm3, %v15287_v46 }
 0x23e   : > { %v2967_v52 = vpop.f32.mrb[84].mxu1 }
 0x23f   : > { %v3011_v57 = vadd.f32 %v2967_v52, %v2543_v4  ;;  %v10413_v58 = vpop.f32.mrb[85].mxu1 }
 0x240   : > { %v2970_v61 = vpop.f32.mrb[86].mxu1 }
 0x241   : > { %v3016_v43 = vadd.f32 %v2970_v61, %v2548_v25  ;;  %v10414_v1 = vpop.f32.mrb[87].mxu1 }
 0x243   : > { %10510 = vmatmul.mubr.msk.bf16.gmra.mrb[144].mxu0 %vm506_vm2, %v4040_v18 }
 0x244   : > { %10513 = vmatprep.mubr.msk.bf16.mxu0 %vm11892_vm3, %v15287_v46 }
 0x246   : > { %v2975_v9 = vpop.f32.mrb[88].mxu1 }
 0x247   : > { %v3021_v3 = vadd.f32 %v2975_v9, %v2553_v17  ;;  %v10417_v13 = vpop.f32.mrb[89].mxu1 }
 0x248   : > { %v2978_v56 = vpop.f32.mrb[90].mxu1 }
 0x249   : > { %v3026_v20 = vadd.f32 %v2978_v56, %v2558_v37  ;;  %v10418_v60 = vpop.f32.mrb[91].mxu1 }
 0x24b   : > { %10514 = vmatmul.mubr.msk.bf16.gmra.mrb[148].mxu0 %vm506_vm2, %v13412_v16 }
 0x24c   : > { %4985 = vmatprep.mubr.bf16.mxu0 %v15281_v2 }
 0x24e   : > { %v2983_v63 = vpop.f32.mrb[92].mxu1 }
 0x24f   : > { %v3031_v41 = vadd.f32 %v2983_v63, %v2563_v59  ;;  %v10421_v33 = vpop.f32.mrb[93].mxu1 }
 0x250   : > { %v2986_v34 = vpop.f32.mrb[94].mxu1 }
 0x251   : > { %v3036_v6 = vadd.f32 %v2986_v34, %v2568_v47  ;;  %v10422_v7 = vpop.f32.mrb[95].mxu1 }
 0x256   : > { %v2837_v8 = vpop.f32.mrb[96].mxu0  ;;  %v2991_v39 = vpop.f32.mrb[96].mxu1 }
 0x257   : > { %v3037_v62 = vadd.f32 %v2837_v8, %v13370_v11  ;;  %v3041_v29 = vadd.f32 %v2991_v39, %v2573_v42  ;;  %v2839_v14 = vpop.f32.mrb[97].mxu0  ;;  %v10425_v15 = vpop.f32.mrb[97].mxu1 }
 0x258   : > { %v3038_v4 = vadd.f32 %v2839_v14, %v13376_v5  ;;  %v2841_v12 = vpop.f32.mrb[98].mxu0  ;;  %v2994_v27 = vpop.f32.mrb[98].mxu1 }
 0x259   : > { %v2842_v16 = vpop.f32.mrb[99].mxu0  ;;  %v10426_v18 = vpop.f32.mrb[99].mxu1 }
 0x27e   : > { %v3306_v25 = vpop.f32.mrb[100].mxu0  ;;  %v3387_v22 = vpop.f32.mrb[100].mxu1 }
 0x27f   : > { %v13455_v10 = vadd.f32 %v3306_v25, %v3037_v62  ;;  %v3508_v17 = vadd.f32 %v3387_v22, %v3039_v45  ;;  %v3308_v23 = vpop.f32.mrb[101].mxu0  ;;  %v3389_v0 = vpop.f32.mrb[101].mxu1 }
 0x280   : > { %v13457_v37 = vadd.f32 %v3308_v23, %v3038_v4  ;;  %v3509_v24 = vadd.f32 %v3389_v0, %v3040_v49  ;;  %v3310_v11 = vpop.f32.mrb[102].mxu0  ;;  %v3391_v55 = vpop.f32.mrb[102].mxu1 }
 0x281   : > { %v3311_v59 = vpop.f32.mrb[103].mxu0  ;;  %v3392_v53 = vpop.f32.mrb[103].mxu1  ;;  %v15289_v11 = vlaneseq }
 0x286   : > { %v3428_v19 = vpop.f32.mrb[104].mxu0 }
 0x287   : > { %v3470_v5 = vadd.f32 %v3428_v19, %v3001_v54  ;;  %v10439_v47 = vpop.f32.mrb[105].mxu0  ;;  %v13480_v19 = vshrl.u32 %v15289_v11, 7 }
 0x288   : > { %v3431_v44 = vpop.f32.mrb[106].mxu0 }
 0x289   : > { %v3475_v38 = vadd.f32 %v3431_v44, %v3006_v35  ;;  %v10440_v40 = vpop.f32.mrb[107].mxu0 }
 0x28e   : > { %v3436_v42 = vpop.f32.mrb[108].mxu0 }
 0x28f   : > { %v3480_v30 = vadd.f32 %v3436_v42, %v3011_v57  ;;  %v10443_v32 = vpop.f32.mrb[109].mxu0 }
 0x290   : > { %v3439_v51 = vpop.f32.mrb[110].mxu0  ;;  %v13491_v32 = vsub.s32 2, %v13480_v19 }
 0x291   : > { %v3485_v45 = vadd.f32 %v3439_v51, %v3016_v43  ;;  %v10444_v48 = vpop.f32.mrb[111].mxu0 }
 0x292   : > { %15299 = vst [vmem:[#allocation3_spill] sm:$0xff] %v13491_v32 }
 0x296   : > { %v3444_v50 = vpop.f32.mrb[112].mxu0 }
 0x297   : > { %v3490_v28 = vadd.f32 %v3444_v50, %v3021_v3  ;;  %v10447_v26 = vpop.f32.mrb[113].mxu0  ;;  %v13502_v50 = vsub.s32 1, %v13480_v19 }
 0x298   : > { %v3447_v49 = vpop.f32.mrb[114].mxu0 }
 0x299   : > { %v3495_v36 = vadd.f32 %v3447_v49, %v3026_v20  ;;  %v10448_v21 = vpop.f32.mrb[115].mxu0  ;;  %15300 = vst [vmem:[#allocation4_spill] sm:$0xff] %v13502_v50 }
 0x29e   : > { %v3452_v31 = vpop.f32.mrb[116].mxu0 }
 0x29f   : > { %v3500_v52 = vadd.f32 %v3452_v31, %v3031_v41  ;;  %v10451_v58 = vpop.f32.mrb[117].mxu0 }
 0x2a0   : > { %v3455_v54 = vpop.f32.mrb[118].mxu0 }
 0x2a1   : > { %v3505_v61 = vadd.f32 %v3455_v54, %v3036_v6  ;;  %v10452_v1 = vpop.f32.mrb[119].mxu0 }
 0x2a6   : > { %v3460_v35 = vpop.f32.mrb[120].mxu0  ;;  %v3875_v9 = vpop.f32.mrb[104].mxu1 }
 0x2a7   : > { %v3510_v13 = vadd.f32 %v3460_v35, %v3041_v29  ;;  %v13459_v57 = vadd.f32 %v3875_v9, %v3508_v17  ;;  %v10455_v56 = vpop.f32.mrb[121].mxu0  ;;  %v3877_v43 = vpop.f32.mrb[105].mxu1 }
 0x2a8   : > { %v13461_v60 = vadd.f32 %v3877_v43, %v3509_v24  ;;  %v3463_v3 = vpop.f32.mrb[122].mxu0  ;;  %v3879_v63 = vpop.f32.mrb[106].mxu1 }
 0x2a9   : > { %v10456_v33 = vpop.f32.mrb[123].mxu0  ;;  %v3880_v20 = vpop.f32.mrb[107].mxu1 }
 0x2ae   : > { %v3916_v34 = vpop.f32.mrb[108].mxu1 }
 0x2af   : > { %v13463_v7 = vadd.f32 %v3916_v34, %v3470_v5  ;;  %v10469_v41 = vpop.f32.mrb[109].mxu1 }
 0x2b0   : > { %v3919_v8 = vpop.f32.mrb[110].mxu1 }
 0x2b1   : > { %v13465_v6 = vadd.f32 %v3919_v8, %v3475_v38  ;;  %v10470_v39 = vpop.f32.mrb[111].mxu1 }
 0x2b6   : > { %v3924_v62 = vpop.f32.mrb[112].mxu1 }
 0x2b7   : > { %v13467_v29 = vadd.f32 %v3924_v62, %v3480_v30  ;;  %v10473_v14 = vpop.f32.mrb[113].mxu1  ;;  %v13488_v30 = vsub.s32 0, %v13480_v19 }
 0x2b8   : > { %v3927_v15 = vpop.f32.mrb[114].mxu1 }
 0x2b9   : > { %v13469_v4 = vadd.f32 %v3927_v15, %v3485_v45  ;;  %v10474_v12 = vpop.f32.mrb[115].mxu1  ;;  %15298 = vst [vmem:[#allocation2_spill] sm:$0xff] %v13488_v30 }
 0x2be   : > { %v3932_v27 = vpop.f32.mrb[116].mxu1 }
 0x2bf   : > { %v13471_v16 = vadd.f32 %v3932_v27, %v3490_v28  ;;  %v10477_v18 = vpop.f32.mrb[117].mxu1 }
 0x2c0   : > { %v3935_v25 = vpop.f32.mrb[118].mxu1 }
 0x2c1   : > { %v13473_v22 = vadd.f32 %v3935_v25, %v3495_v36  ;;  %v10478_v17 = vpop.f32.mrb[119].mxu1 }
 0x2c6   : > { %v3940_v23 = vpop.f32.mrb[120].mxu1 }
 0x2c7   : > { %v13475_v0 = vadd.f32 %v3940_v23, %v3500_v52  ;;  %v10481_v24 = vpop.f32.mrb[121].mxu1 }
 0x2c8   : > { %v3943_v55 = vpop.f32.mrb[122].mxu1 }
 0x2c9   : > { %v13477_v59 = vadd.f32 %v3943_v55, %v3505_v61  ;;  %v10482_v53 = vpop.f32.mrb[123].mxu1 }
 0x2ce   : > { %v3794_v5 = vpop.f32.mrb[124].mxu0  ;;  %v3948_v47 = vpop.f32.mrb[124].mxu1 }
 0x2cf   : > { %v13483_v44 = vadd.f32 %v3794_v5, %v13455_v10  ;;  %v13485_v38 = vadd.f32 %v3948_v47, %v3510_v13  ;;  %v3796_v40 = vpop.f32.mrb[125].mxu0  ;;  %v10485_v42 = vpop.f32.mrb[125].mxu1  ;;  %v13499_v10 = vld [vmem:[%s15275_s4] sm:$0x1f] }
 0x2d0   : > { %v13494_v51 = vadd.f32 %v3796_v40, %v13457_v37  ;;  %v3798_v45 = vpop.f32.mrb[126].mxu0  ;;  %v3951_v48 = vpop.f32.mrb[126].mxu1  ;;  %v13506_v49 = vrot.slane %v13499_v10, %v13488_v30  ;;  %v13510_v37 = vrot.slane %v13499_v10, %v13491_v32  ;;  %v13514_v36 = vrot.slane %v13499_v10, %v13502_v50 }
 0x2d1   : > { %v3799_v28 = vpop.f32.mrb[127].mxu0  ;;  %v10486_v26 = vpop.f32.mrb[127].mxu1 }
 0x2d6   : > { %v4222_v21 = vpop.f32.mrb[0].mxu0  ;;  %v4303_v31 = vpop.f32.mrb[0].mxu1 }
 0x2d7   : > { %v13517_v52 = vadd.f32 %v13506_v49, %v4222_v21  ;;  %v13520_v58 = vadd.f32 %v13510_v37, %v4303_v31  ;;  %v4224_v54 = vpop.f32.mrb[1].mxu0  ;;  %v13522_v61 = vpop.f32.mrb[1].mxu1 }
 0x2d8   : > { %v13525_v1 = vadd.f32 %v13514_v36, %v4224_v54  ;;  %v4226_v35 = vpop.f32.mrb[2].mxu0  ;;  %v4307_v9 = vpop.f32.mrb[2].mxu1 }
 0x2d9   : > { %v13528_v13 = vadd.f32 %v13506_v49, %v4226_v35  ;;  %v13531_v56 = vadd.f32 %v13510_v37, %v4307_v9  ;;  %v4228_v43 = vpop.f32.mrb[3].mxu0  ;;  %v13533_v3 = vpop.f32.mrb[3].mxu1  ;;  %v15285_v33 = vmax.f32 %v13520_v58, 0.0 }
 0x2da   : > { %v13536_v63 = vadd.f32 %v13514_v36, %v4228_v43 }
 0x2db   : > { %v15286_v20 = vmax.f32 %v13531_v56, 0.0 }
 0x2dd   : > { %v10926_v34 = vpack.i.bf16 %v15286_v20, %v15285_v33 }
 0x2de   : > { %v4232_v41 = vpop.f32.mrb[4].mxu0  ;;  %v4313_v8 = vpop.f32.mrb[4].mxu1 }
 0x2df   : > { %v13545_v39 = vadd.f32 %v13506_v49, %v4232_v41  ;;  %v13548_v62 = vadd.f32 %v13510_v37, %v4313_v8  ;;  %10927 = vrot.lane.b32.xlu1 %v10926_v34, %s11893_s18  ;;  %v4234_v14 = vpop.f32.mrb[5].mxu0  ;;  %v13551_v15 = vpop.f32.mrb[5].mxu1 }
 0x2e0   : > { %v13554_v12 = vadd.f32 %v13514_v36, %v4234_v14  ;;  %v4236_v27 = vpop.f32.mrb[6].mxu0  ;;  %v4317_v18 = vpop.f32.mrb[6].mxu1 }
 0x2e1   : > { %v13557_v25 = vadd.f32 %v13506_v49, %v4236_v27  ;;  %v13560_v17 = vadd.f32 %v13510_v37, %v4317_v18  ;;  %v4238_v23 = vpop.f32.mrb[7].mxu0  ;;  %v13562_v24 = vpop.f32.mrb[7].mxu1  ;;  %v15283_v53 = vmax.f32 %v13548_v62, 0.0 }
 0x2e2   : > { %v13565_v55 = vadd.f32 %v13514_v36, %v4238_v23 }
 0x2e3   : > { %v15284_v5 = vmax.f32 %v13560_v17, 0.0 }
 0x2e5   : > { %v10931_v47 = vpack.i.bf16 %v15284_v5, %v15283_v53 }
 0x2e6   : > { %v4242_v40 = vpop.f32.mrb[8].mxu0  ;;  %v4323_v42 = vpop.f32.mrb[8].mxu1 }
 0x2e7   : > { %v13574_v45 = vadd.f32 %v13506_v49, %v4242_v40  ;;  %v13577_v48 = vadd.f32 %v13510_v37, %v4323_v42  ;;  %10932 = vrot.lane.b32.xlu1 %v10931_v47, %s11893_s18  ;;  %v4244_v28 = vpop.f32.mrb[9].mxu0  ;;  %v13580_v26 = vpop.f32.mrb[9].mxu1 }
 0x2e8   : > { %v13583_v21 = vadd.f32 %v13514_v36, %v4244_v28  ;;  %v4246_v31 = vpop.f32.mrb[10].mxu0  ;;  %v4327_v54 = vpop.f32.mrb[10].mxu1 }
 0x2e9   : > { %v13586_v35 = vadd.f32 %v13506_v49, %v4246_v31  ;;  %v13589_v9 = vadd.f32 %v13510_v37, %v4327_v54  ;;  %v4248_v43 = vpop.f32.mrb[11].mxu0  ;;  %v13591_v34 = vpop.f32.mrb[11].mxu1  ;;  %v15279_v8 = vmax.f32 %v13577_v48, 0.0 }
 0x2ea   : > { %v13594_v41 = vadd.f32 %v13514_v36, %v4248_v43 }
 0x2eb   : > { %v15280_v14 = vmax.f32 %v13589_v9, 0.0 }
 0x2ed   : > { %v10936_v27 = vpack.i.bf16 %v15280_v14, %v15279_v8 }
 0x2ee   : > { %v4252_v18 = vpop.f32.mrb[12].mxu0  ;;  %v4333_v23 = vpop.f32.mrb[12].mxu1 }
 0x2ef   : > { %v13603_v47 = vadd.f32 %v13506_v49, %v4252_v18  ;;  %v13606_v40 = vadd.f32 %v13510_v37, %v4333_v23  ;;  %10937 = vrot.lane.b32.xlu0 %v10936_v27, %s11893_s18  ;;  %v4254_v42 = vpop.f32.mrb[13].mxu0  ;;  %v13609_v28 = vpop.f32.mrb[13].mxu1 }
 0x2f0   : > { %v13612_v31 = vadd.f32 %v13514_v36, %v4254_v42  ;;  %v4256_v54 = vpop.f32.mrb[14].mxu0  ;;  %v4337_v43 = vpop.f32.mrb[14].mxu1 }
 0x2f1   : > { %v13615_v8 = vadd.f32 %v13506_v49, %v4256_v54  ;;  %v13618_v14 = vadd.f32 %v13510_v37, %v4337_v43  ;;  %v4258_v18 = vpop.f32.mrb[15].mxu0  ;;  %v13620_v2 = vpop.f32.mrb[15].mxu1  ;;  %v15294_v27 = vmax.f32 %v13606_v40, 0.0  ;;  %v13632_v43 = vsub.s32 3, %v13480_v19 }
 0x2f2   : > { %v13623_v23 = vadd.f32 %v13514_v36, %v4258_v18 }
 0x2f3   : > { %v15295_v53 = vmax.f32 %v13618_v14, 0.0 }
 0x2f5   : > { %v10941_v42 = vpack.i.bf16 %v15295_v53, %v15294_v27 }
 0x2f6   : > { %v4262_v54 = vpop.f32.mrb[128].mxu0  ;;  %v4343_v5 = vpop.f32.mrb[128].mxu1 }
 0x2f7   : > { %v4462_v33 = vadd.f32 %v4262_v54, %v13483_v44  ;;  %v4464_v20 = vadd.f32 %v4343_v5, %v13459_v57  ;;  %10942 = vrot.lane.b32.xlu1 %v10941_v42, %s11893_s18  ;;  %v4264_v18 = vpop.f32.mrb[129].mxu0  ;;  %v4345_v46 = vpop.f32.mrb[129].mxu1  ;;  %v4487_v57 = vsub.s32 4, %v13480_v19 }
 0x2f8   : > { %v4463_v11 = vadd.f32 %v4264_v18, %v13494_v51  ;;  %v13639_v50 = vadd.f32 %v4345_v46, %v13461_v60  ;;  %v4266_v32 = vpop.f32.mrb[130].mxu0  ;;  %v4347_v27 = vpop.f32.mrb[130].mxu1  ;;  %v13653_v51 = vrot.slane %v13499_v10, %v13632_v43 }
 0x2f9   : > { %v13642_v53 = vadd.f32 %v13506_v49, %v4462_v33  ;;  %v13645_v30 = vadd.f32 %v13510_v37, %v4464_v20  ;;  %v4267_v44 = vpop.f32.mrb[131].mxu0  ;;  %v4348_v5 = vpop.f32.mrb[131].mxu1  ;;  %v13656_v46 = vrot.slane %v13499_v10, %v4487_v57 }
 0x2fa   : > { %v13649_v42 = vadd.f32 %v13514_v36, %v4463_v11  ;;  %v4497_v32 = vadd.f32 %v13653_v51, %v13522_v61  ;;  %v4502_v20 = vadd.f32 %v13653_v51, %v13533_v3 }
 0x2fc   : > { %v4542_v54 = vmax.f32 %v4497_v32, 0.0  ;;  %v4547_v44 = vmax.f32 %v4502_v20, 0.0 }
 0x2fe   : > { %v4384_v60 = vpop.f32.mrb[132].mxu0 }
 0x2ff   : > { %v4426_v49 = vadd.f32 %v4384_v60, %v13463_v7  ;;  %v10499_v37 = vpop.f32.mrb[133].mxu0  ;;  %v4507_v7 = vadd.f32 %v13653_v51, %v13551_v15 }
 0x300   : > { %v4387_v33 = vpop.f32.mrb[134].mxu0 }
 0x301   : > { %v4498_v11 = vadd.f32 %v13656_v46, %v4426_v49  ;;  %v4431_v36 = vadd.f32 %v4387_v33, %v13465_v6  ;;  %v10500_v27 = vpop.f32.mrb[135].mxu0  ;;  %v4512_v6 = vadd.f32 %v13653_v51, %v13562_v24 }
 0x303   : > { %v4543_v18 = vmax.f32 %v4498_v11, 0.0  ;;  %v4503_v10 = vadd.f32 %v13656_v46, %v4431_v36  ;;  %v4552_v11 = vmax.f32 %v4507_v7, 0.0 }
 0x305   : > { %v4548_v57 = vmax.f32 %v4503_v10, 0.0  ;;  %v10946_v5 = vpack.i.bf16 %v4543_v18, %v4542_v54  ;;  %v4517_v10 = vadd.f32 %v13653_v51, %v13580_v26 }
 0x306   : > { %v4392_v61 = vpop.f32.mrb[136].mxu0 }
 0x307   : > { %v4436_v60 = vadd.f32 %v4392_v61, %v13467_v29  ;;  %10947 = vrot.lane.b32.xlu0 %v10946_v5, %s11893_s18  ;;  %v10503_v3 = vpop.f32.mrb[137].mxu0  ;;  %v10951_v49 = vpack.i.bf16 %v4548_v57, %v4547_v44  ;;  %v4557_v29 = vmax.f32 %v4512_v6, 0.0  ;;  %v4522_v5 = vadd.f32 %v13653_v51, %v13591_v34 }
 0x308   : > { %v4395_v37 = vpop.f32.mrb[138].mxu0  ;;  %v4562_v3 = vmax.f32 %v4517_v10, 0.0 }
 0x309   : > { %v4508_v32 = vadd.f32 %v13656_v46, %v4436_v60  ;;  %v4441_v33 = vadd.f32 %v4395_v37, %v13469_v4  ;;  %v10504_v20 = vpop.f32.mrb[139].mxu0 }
 0x30b   : > { %v4553_v36 = vmax.f32 %v4508_v32, 0.0  ;;  %v4513_v27 = vadd.f32 %v13656_v46, %v4441_v33  ;;  %10952 = vrot.lane.b32.xlu0 %v10951_v49, %s11893_s18  ;;  %v4527_v33 = vadd.f32 %v13653_v51, %v13609_v28  ;;  %v4537_v28 = vadd.f32 %v13653_v51, %v13639_v50 }
 0x30d   : > { %v4558_v15 = vmax.f32 %v4513_v27, 0.0  ;;  %v10956_v54 = vpack.i.bf16 %v4553_v36, %v4552_v11  ;;  %v4532_v36 = vadd.f32 %v13653_v51, %v13620_v2  ;;  %v4581_v2 = vmax.f32 %v13645_v30, 0.0 }
 0x30e   : > { %v4400_v18 = vpop.f32.mrb[140].mxu0 }
 0x30f   : > { %v4446_v24 = vadd.f32 %v4400_v18, %v13471_v16  ;;  %10957 = vrot.lane.b32.xlu1 %v10956_v54, %s11893_s18  ;;  %v10507_v44 = vpop.f32.mrb[141].mxu0  ;;  %v10961_v4 = vpack.i.bf16 %v4558_v15, %v4557_v29  ;;  %v4567_v16 = vmax.f32 %v4522_v5, 0.0  ;;  %v4572_v54 = vmax.f32 %v4527_v33, 0.0 }
 0x310   : > { %v4403_v57 = vpop.f32.mrb[142].mxu0  ;;  %v4577_v10 = vmax.f32 %v4532_v36, 0.0 }
 0x311   : > { %v4518_v61 = vadd.f32 %v13656_v46, %v4446_v24  ;;  %v4451_v7 = vadd.f32 %v4403_v57, %v13473_v22  ;;  %10962 = vrot.lane.b32.xlu0 %v10961_v4, %s11893_s18  ;;  %v10508_v60 = vpop.f32.mrb[143].mxu0  ;;  %v4582_v57 = vmax.f32 %v4537_v28, 0.0 }
 0x313   : > { %v4563_v49 = vmax.f32 %v4518_v61, 0.0  ;;  %v4523_v26 = vadd.f32 %v13656_v46, %v4451_v7 }
 0x315   : > { %v4568_v37 = vmax.f32 %v4523_v26, 0.0  ;;  %v10966_v6 = vpack.i.bf16 %v4563_v49, %v4562_v3  ;;  %v10986_v3 = vpack.i.bf16 %v4582_v57, %v4581_v2 }
 0x316   : > { %v4408_v32 = vpop.f32.mrb[144].mxu0 }
 0x317   : > { %v4456_v34 = vadd.f32 %v4408_v32, %v13475_v0  ;;  %10967 = vrot.lane.b32.xlu0 %v10966_v6, %s11893_s18  ;;  %v10511_v20 = vpop.f32.mrb[145].mxu0  ;;  %v10971_v22 = vpack.i.bf16 %v4568_v37, %v4567_v16 }
 0x318   : > { %v4411_v11 = vpop.f32.mrb[146].mxu0 }
 0x319   : > { %v4528_v27 = vadd.f32 %v13656_v46, %v4456_v34  ;;  %v4461_v29 = vadd.f32 %v4411_v11, %v13477_v59  ;;  %10972 = vrot.lane.b32.xlu1 %v10971_v22, %s11893_s18  ;;  %v10512_v15 = vpop.f32.mrb[147].mxu0 }
 0x31a   : > { %v4544_v15 = vmax.f32 %v13528_v13, 0.0 }
 0x31b   : > { %v4573_v0 = vmax.f32 %v4528_v27, 0.0  ;;  %v4533_v18 = vadd.f32 %v13656_v46, %v4461_v29  ;;  %v4539_v27 = vmax.f32 %v13517_v52, 0.0  ;;  %v4540_v29 = vmax.f32 %v13525_v1, 0.0 }
 0x31d   : > { %v4578_v24 = vmax.f32 %v4533_v18, 0.0  ;;  %v10976_v44 = vpack.i.bf16 %v4573_v0, %v4572_v54  ;;  %v4545_v54 = vmax.f32 %v13536_v63, 0.0 }
 0x31e   : > { %v4416_v4 = vpop.f32.mrb[148].mxu0 }
 0x31f   : > { %v4466_v5 = vadd.f32 %v4416_v4, %v13485_v38  ;;  %10977 = vrot.lane.b32.xlu1 %v10976_v44, %s11893_s18  ;;  %v10981_v59 = vpack.i.bf16 %v4578_v24, %v4577_v10  ;;  %v10515_v61 = vpop.f32.mrb[149].mxu0 }
 0x320   : > { %v4419_v7 = vpop.f32.mrb[150].mxu0 }
 0x321   : > { %v4538_v60 = vadd.f32 %v13656_v46, %v4466_v5  ;;  %10982 = vrot.lane.b32.xlu0 %v10981_v59, %s11893_s18  ;;  %v10516_v50 = vpop.f32.mrb[151].mxu0 }
 0x323   : > { %v4583_v51 = vmax.f32 %v4538_v60, 0.0 }
 0x325   : > { %10987 = vrot.lane.b32.xlu0 %v10986_v3, %s11893_s18  ;;  %4663 = vrot.lane.b32.xlu1 %v4583_v51, %s11893_s18  ;;  %v4549_v51 = vmax.f32 %v13545_v39, 0.0  ;;  %v4550_v3 = vmax.f32 %v13554_v12, 0.0 }
 0x351   : > { %v10928_v49 = vpop.permute.xlu1 %10927 }
 0x352   : > { %v10929_v6 = vunpack.i.l.bf16 %v10928_v49  ;;  %v10930_v32 = vunpack.i.h.bf16 %v10928_v49  ;;  %v4554_v49 = vmax.f32 %v13557_v25, 0.0 }
 0x359   : > { %v10933_v26 = vpop.permute.xlu1 %10932 }
 0x35a   : > { %v10934_v57 = vunpack.i.l.bf16 %v10933_v26  ;;  %v10935_v61 = vunpack.i.h.bf16 %v10933_v26 }
 0x361   : > { %v13707_v38 = vpop.permute.xlu0 %10937 }
 0x369   : > { %v13713_v33 = vpop.permute.xlu1 %10942 }
 0x379   : > { %v13709_v16 = vpop.permute.xlu0 %10947 }
 0x37a   : > { %v10950_v37 = vunpack.i.h.bf16 %v13709_v16  ;;  %v10949_v46 = vunpack.i.l.bf16 %v13709_v16 }
 0x37c   : > { %v4666_v20 = vsel %vm4665_vm5, %v10929_v6, %v10949_v46  ;;  %v4667_v22 = vsel %vm4665_vm5, %v10949_v46, %v10950_v37  ;;  %v4555_v46 = vmax.f32 %v13565_v55, 0.0 }
 0x37d   : > { %v13715_v34 = vpop.permute.xlu0 %10952  ;;  %v4711_v18 = vmax.f32 %v4539_v27, %v4666_v20  ;;  %v4712_v44 = vmax.f32 %v4540_v29, %v4667_v22  ;;  %v10939_v29 = vunpack.i.l.bf16 %v13707_v38 }
 0x37e   : > { %v10955_v11 = vunpack.i.h.bf16 %v13715_v34  ;;  %v10954_v36 = vunpack.i.l.bf16 %v13715_v34 }
 0x380   : > { %v4668_v28 = vsel %vm4665_vm5, %v10930_v32, %v10954_v36  ;;  %v4669_v0 = vsel %vm4665_vm5, %v10954_v36, %v10955_v11 }
 0x381   : > { %v4714_v10 = vmax.f32 %v4544_v15, %v4668_v28  ;;  %v13731_v24 = vpop.permute.xlu1 %10957  ;;  %v4715_v4 = vmax.f32 %v4545_v54, %v4669_v0  ;;  %v4755_v28 = vadd.s32 8, %v13480_v19  ;;  %v10940_v0 = vunpack.i.h.bf16 %v13707_v38 }
 0x382   : > { %v10960_v52 = vunpack.i.h.bf16 %v13731_v24  ;;  %v10959_v1 = vunpack.i.l.bf16 %v13731_v24 }
 0x383   : > { %v13735_v13 = vpop.permute.xlu0 %10962  ;;  %v4739_v63 = vpack.c.bf16 %v4715_v4, %v4712_v44  ;;  %v4738_v5 = vpack.c.bf16 %v4714_v10, %v4711_v18  ;;  %v4559_v4 = vmax.f32 %v13574_v45, 0.0  ;;  %v15301_v45 = vlaneseq }
 0x384   : > { %v10965_v59 = vunpack.i.h.bf16 %v13735_v13  ;;  %v4670_v7 = vsel %vm4665_vm5, %v10934_v57, %v10959_v1  ;;  %v4671_v60 = vsel %vm4665_vm5, %v10959_v1, %v10960_v52  ;;  %v10964_v50 = vunpack.i.l.bf16 %v13735_v13 }
 0x385   : > { %4827 = vmatprep.subr.bf16.mxu1 %v4739_v63  ;;  %4953 = vmatprep.subr.bf16.mxu0 %v4739_v63  ;;  %v4717_v32 = vmax.f32 %v4549_v51, %v4670_v7  ;;  %v4718_v22 = vmax.f32 %v4550_v3, %v4671_v60  ;;  %v4560_v1 = vmax.f32 %v13583_v21, 0.0  ;;  %v4564_v57 = vmax.f32 %v13586_v35, 0.0 }
 0x386   : > { %4828 = vmatpush1.bf16.msra.mxu1 %v4738_v5  ;;  %4954 = vmatpush1.bf16.msra.mxu0 %v4738_v5  ;;  %v4672_v26 = vsel %vm4665_vm5, %v10935_v61, %v10964_v50  ;;  %v4673_v6 = vsel %vm4665_vm5, %v10964_v50, %v10965_v59  ;;  %v4565_v63 = vmax.f32 %v13594_v41, 0.0  ;;  %v4761_v61 = vmul.u32 2, %v13480_v19 }
 0x387   : > { %v4720_v20 = vmax.f32 %v4554_v49, %v4672_v26  ;;  %v4721_v36 = vmax.f32 %v4555_v46, %v4673_v6  ;;  %v13778_v21 = vand.u32 127, %v15301_v45  ;;  %v4762_v35 = vmul.u32 2, %v4755_v28 }
 0x388   : > { %v4569_v6 = vmax.f32 %v13603_v47, 0.0  ;;  %v10945_v28 = vunpack.i.h.bf16 %v13713_v33 }
 0x389   : > { %v13751_v27 = vpop.permute.xlu0 %10967  ;;  %v4742_v25 = vpack.c.bf16 %v4721_v36, %v4718_v22  ;;  %v4741_v55 = vpack.c.bf16 %v4720_v20, %v4717_v32  ;;  %v4570_v32 = vmax.f32 %v13612_v31, 0.0  ;;  %v4574_v20 = vmax.f32 %v13615_v8, 0.0 }
 0x38a   : > { %v10970_v39 = vunpack.i.h.bf16 %v13751_v27  ;;  %v10969_v12 = vunpack.i.l.bf16 %v13751_v27  ;;  %v10944_v22 = vunpack.i.l.bf16 %v13713_v33  ;;  %v4785_v8 = vadd.s32 1, %v4762_v35  ;;  %v11302_v27 = vld [vmem:[%s15273_s2 + $0x264] ss:$16 sps:$4 sm:$0xff]  }
 0x38b   : > { %v13756_v15 = vpop.permute.xlu1 %10972  ;;  %4829 = vmatprep.subr.bf16.mxu1 %v4742_v25  ;;  %4955 = vmatprep.subr.bf16.mxu0 %v4742_v25  ;;  %v4579_v25 = vmax.f32 %v13642_v53, 0.0  ;;  %vm13799_vm6 = vcmp.eq.s32.totalorder %v13778_v21, %v4761_v61  ;;  %v4756_v33 = vadd.s32 16, %v13480_v19  ;;  %vm13809_vm7 = vcmp.eq.s32.totalorder %v13778_v21, %v4762_v35 }
 0x38c   : > { %v10975_v54 = vunpack.i.h.bf16 %v13756_v15  ;;  %v4674_v18 = vsel %vm4665_vm5, %v10939_v29, %v10969_v12  ;;  %v4675_v10 = vsel %vm4665_vm5, %v10969_v12, %v10970_v39  ;;  %v10974_v44 = vunpack.i.l.bf16 %v13756_v15  ;;  %4830 = vmatpush1.bf16.msra.mxu1 %v4741_v55  ;;  %4956 = vmatpush1.bf16.msra.mxu0 %v4741_v55 }
 0x38d   : > { %v4723_v7 = vmax.f32 %v4559_v4, %v4674_v18  ;;  %v4724_v50 = vmax.f32 %v4560_v1, %v4675_v10  ;;  %v4575_v12 = vmax.f32 %v13623_v23, 0.0  ;;  %v4784_v29 = vadd.s32 1, %v4761_v61  ;;  %v11290_v23 = vld [vmem:[%s15273_s2 + $0x224] ss:$16 sps:$4 sm:$0xff]  }
 0x38e   : > { %v4676_v38 = vsel %vm4665_vm5, %v10940_v0, %v10974_v44  ;;  %v4677_v5 = vsel %vm4665_vm5, %v10974_v44, %v10975_v54  ;;  %v4580_v0 = vmax.f32 %v13649_v42, 0.0  ;;  %v4757_v4 = vadd.s32 24, %v13480_v19 }
 0x38f   : > { %v4726_v60 = vmax.f32 %v4564_v57, %v4676_v38  ;;  %v4727_v51 = vmax.f32 %v4565_v63, %v4677_v5  ;;  %vm4789_vm8 = vcmp.eq.s32.totalorder %v13778_v21, %v4784_v29  ;;  %vm4790_vm9 = vcmp.eq.s32.totalorder %v13778_v21, %v4785_v8 }
 0x390   : > { %v4763_v45 = vmul.u32 2, %v4756_v33  ;;  %v15307_v29 = vmax.f32 %v13531_v56, 0.0  ;;  %v15314_v15 = vmax.f32 %v13618_v14, 0.0  ;;  %v11300_v14 = vld [vmem:[%s15273_s2 + $0x260] ss:$16 sps:$4 sm:$0xff]  }
 0x391   : > { %v13775_v3 = vpop.permute.xlu1 %10977  ;;  %v4745_v46 = vpack.c.bf16 %v4727_v51, %v4724_v50  ;;  %v4744_v26 = vpack.c.bf16 %v4726_v60, %v4723_v7 }
 0x392   : > { %v10980_v41 = vunpack.i.h.bf16 %v13775_v3  ;;  %v10979_v49 = vunpack.i.l.bf16 %v13775_v3  ;;  %v4716_v8 = vmax.f32 %v15307_v29, %v10955_v11  ;;  %vm4768_vm12 = vcmp.eq.s32.totalorder %v13778_v21, %v4763_v45  ;;  %v11296_v11 = vld [vmem:[%s15273_s2 + $0x244] ss:$16 sps:$4 sm:$0xff]   ;;  %v11297_v29 = vld [vmem:[%s15273_s2 + $0x248] ss:$16 sps:$4 sm:$0xff]  }
 0x393   : > { %v13786_v36 = vpop.permute.xlu0 %10982  ;;  %4831 = vmatprep.subr.bf16.mxu1 %v4745_v46  ;;  %4957 = vmatprep.subr.bf16.mxu0 %v4745_v46 }
 0x394   : > { %v10985_v55 = vunpack.i.h.bf16 %v13786_v36  ;;  %v4678_v47 = vsel %vm4665_vm5, %v10944_v22, %v10979_v49  ;;  %v10984_v31 = vunpack.i.l.bf16 %v13786_v36  ;;  %4832 = vmatpush1.bf16.msra.mxu1 %v4744_v26  ;;  %4958 = vmatpush1.bf16.msra.mxu0 %v4744_v26  ;;  %v4679_v53 = vsel %vm4665_vm5, %v10979_v49, %v10980_v41  ;;  %v11308_v36 = vld [vmem:[%s15273_s2 + $0x284] ss:$16 sps:$4 sm:$0xff]  }
 0x395   : > { %v4729_v1 = vmax.f32 %v4569_v6, %v4678_v47  ;;  %v4730_v61 = vmax.f32 %v4570_v32, %v4679_v53  ;;  %v4764_v26 = vmul.u32 2, %v4757_v4  ;;  %v4758_v53 = vadd.s32 32, %v13480_v19 }
 0x396   : > { %v4680_v18 = vsel %vm4665_vm5, %v10945_v28, %v10984_v31  ;;  %v4681_v10 = vsel %vm4665_vm5, %v10984_v31, %v10985_v55  ;;  %v4786_v31 = vadd.s32 1, %v4763_v45  ;;  %v11312_v45 = vld [vmem:[%s15273_s2 + $0x2a0] ss:$16 sps:$4 sm:$0xff]  }
 0x397   : > { %v10988_v44 = vpop.permute.xlu0 %10987  ;;  %v4732_v57 = vmax.f32 %v4574_v20, %v4680_v18  ;;  %v13814_v5 = vpop.permute.xlu1 %4663  ;;  %v4733_v7 = vmax.f32 %v4575_v12, %v4681_v10  ;;  %v15306_v20 = vmov 0.0   ;;  %v15308_v10 = vmax.f32 %v13520_v58, 0.0 }
 0x398   : > { %v10990_v63 = vunpack.i.h.bf16 %v10988_v44  ;;  %v10989_v38 = vunpack.i.l.bf16 %v10988_v44  ;;  %v9432_v22 = vsel %vm13799_vm6, 1.0, %v15306_v20  ;;  %v9433_v12 = vsel %vm13809_vm7, 1.0, %v15306_v20 }
 0x399   : > { %v4747_v51 = vpack.c.bf16 %v4732_v57, %v4729_v1  ;;  %v4748_v49 = vpack.c.bf16 %v4733_v7, %v4730_v61  ;;  %v9438_v28 = vsel %vm4790_vm9, 1.0, %v15306_v20  ;;  %v13844_v33 = vpack.c.bf16 %v9433_v12, %v9432_v22  ;;  %v11338_v22 = vld [vmem:[%s15273_s2 + $0x324] ss:$16 sps:$4 sm:$0xff]   ;;  %v11336_v12 = vld [vmem:[%s15273_s2 + $0x320] ss:$16 sps:$4 sm:$0xff]  }
 0x39a   : > { %v4682_v60 = vsel %vm4665_vm5, %v10989_v38, %v10990_v63  ;;  %v4683_v50 = vsel %vm4665_vm5, %v10990_v63, %v13814_v5  ;;  %v4713_v44 = vmax.f32 %v15308_v10, %v10950_v37  ;;  %vm4769_vm13 = vcmp.eq.s32.totalorder %v13778_v21, %v4764_v26  ;;  %v11288_v37 = vld [vmem:[%s15273_s2 + $0x220] ss:$16 sps:$4 sm:$0xff]   ;;  %v11303_v10 = vld [vmem:[%s15273_s2 + $0x268] ss:$16 sps:$4 sm:$0xff]  }
 0x39b   : > { %v4736_v35 = vmax.f32 %v4580_v0, %v4683_v50  ;;  %v4735_v46 = vmax.f32 %v4579_v25, %v4682_v60  ;;  %4833 = vmatprep.subr.bf16.mxu1 %v4748_v49  ;;  %4959 = vmatprep.subr.bf16.mxu0 %v4748_v49  ;;  %v9437_v25 = vsel %vm4789_vm8, 1.0, %v15306_v20  ;;  %v4787_v0 = vadd.s32 1, %v4764_v26  ;;  %v11314_v50 = vld [vmem:[%s15273_s2 + $0x2a4] ss:$16 sps:$4 sm:$0xff]   ;;  %v11318_v49 = vld [vmem:[%s15273_s2 + $0x2c0] ss:$16 sps:$4 sm:$0xff]  }
 0x39c   : > { %4834 = vmatpush1.bf16.msra.mxu1 %v4747_v51  ;;  %4960 = vmatpush1.bf16.msra.mxu0 %v4747_v51  ;;  %v13846_v18 = vpack.c.bf16 %v9438_v28, %v9437_v25  ;;  %vm4791_vm14 = vcmp.eq.s32.totalorder %v13778_v21, %v4786_v31  ;;  %v4765_v19 = vmul.u32 2, %v4758_v53  ;;  %v13857_v56 = vpack.c.bf16 %v4716_v8, %v4713_v44  ;;  %v11324_v26 = vld [vmem:[%s15273_s2 + $0x2e0] ss:$16 sps:$4 sm:$0xff]   ;;  %v11344_v25 = vld [vmem:[%s15273_s2 + $0x344] ss:$16 sps:$4 sm:$0xff]  }
 0x39d   : > { %v4751_v6 = vpack.c.bf16 %v4736_v35, %v4736_v35  ;;  %v4750_v32 = vpack.c.bf16 %v4735_v46, %v4735_v46  ;;  %vm4792_vm15 = vcmp.eq.s32.totalorder %v13778_v21, %v4787_v0  ;;  %v15309_v58 = vmax.f32 %v13560_v17, 0.0  ;;  %v11320_v35 = vld [vmem:[%s15273_s2 + $0x2c4] ss:$16 sps:$4 sm:$0xff]   ;;  %v11293_v28 = vld [vmem:[%s15273_s2 + $0x22c] ss:$16 sps:$4 sm:$0xff]  }
 0x39e   : > { %v9434_v34 = vsel %vm4768_vm12, 1.0, %v15306_v20  ;;  %v15310_v17 = vmax.f32 %v13548_v62, 0.0  ;;  %v9435_v42 = vsel %vm4769_vm13, 1.0, %v15306_v20  ;;  %v9439_v4 = vsel %vm4791_vm14, 1.0, %v15306_v20  ;;  %v11326_v46 = vld [vmem:[%s15273_s2 + $0x2e4] ss:$16 sps:$4 sm:$0xff]  }
 0x39f   : > { %9442 = vmatprep.subr.msk.bf16.mxu1 %vm4817_vm10, %v4751_v6  ;;  %9449 = vmatprep.subr.msk.bf16.mxu0 %vm4817_vm10, %v4751_v6  ;;  %v4819_v47 = vsel %vm4817_vm10, %v4750_v32, 0  ;;  %v4722_v16 = vmax.f32 %v15309_v58, %v10965_v59  ;;  %v15311_v59 = vmov 0   ;;  %v9440_v1 = vsel %vm4792_vm15, 1.0, %v15306_v20  ;;  %v11332_v6 = vld [vmem:[%s15273_s2 + $0x304] ss:$16 sps:$4 sm:$0xff]  }
 0x3a0   : > { %4836 = vmatpush1.bf16.msra.mxu1 %v4819_v47  ;;  %4962 = vmatpush1.bf16.msra.mxu0 %v4819_v47  ;;  %v4719_v13 = vmax.f32 %v15310_v17, %v10960_v52  ;;  %v4788_v57 = vadd.s32 1, %v4765_v19  ;;  %v15312_v62 = vmax.f32 %v13589_v9, 0.0  ;;  %v11294_v52 = vld [vmem:[%s15273_s2 + $0x240] ss:$16 sps:$4 sm:$0xff]   ;;  %v13892_v38 = vpack.c.bf16 %v9435_v42, %v9434_v34  ;;  %v11350_v31 = vld [vmem:[%s15273_s2 + $0x364] ss:$16 sps:$4 sm:$0xff]  }
 0x3a1   : > { %10517 = vmatprep.subr.bf16.mxu1 %v15306_v20  ;;  %5642 = vmatprep.subr.bf16.mxu0 %v11290_v23  ;;  %v13894_v61 = vpack.c.bf16 %v9440_v1, %v9439_v4  ;;  %v15313_v7 = vmax.f32 %v13577_v48, 0.0  ;;  %vm4770_vm2 = vcmp.eq.s32.totalorder %v13778_v21, %v4765_v19  ;;  %v4737_v48 = vmax.f32 %v4581_v2, %v13814_v5  ;;  %v11306_v5 = vld [vmem:[%s15273_s2 + $0x280] ss:$16 sps:$4 sm:$0xff]   ;;  %v11291_v53 = vld [vmem:[%s15273_s2 + $0x228] ss:$16 sps:$4 sm:$0xff]  }
 0x3a2   : > { %v4743_v63 = vpack.c.bf16 %v4722_v16, %v4719_v13  ;;  %v4728_v24 = vmax.f32 %v15312_v62, %v10975_v54  ;;  %vm4793_vm5 = vcmp.eq.s32.totalorder %v13778_v21, %v4788_v57  ;;  %v4734_v54 = vmax.f32 %v15314_v15, %v10985_v55  ;;  %v11330_v32 = vld [vmem:[%s15273_s2 + $0x300] ss:$16 sps:$4 sm:$0xff]   ;;  %v11299_v23 = vld [vmem:[%s15273_s2 + $0x24c] ss:$16 sps:$4 sm:$0xff]   ;;  %v11309_v19 = vld [vmem:[%s15273_s2 + $0x288] ss:$16 sps:$4 sm:$0xff]  }
 0x3a3   : > { %9443 = vmatmul.mubr.msk.bf16.vlgmr.msra.gmra.mrb[132].mxu1 %vm4807_vm11, %v13844_v33  ;;  %9450 = vmatmul.mubr.msk.bf16.vlgmr.msra.gmra.mrb[152].mxu0 %vm4807_vm11, %v13846_v18  ;;  %v4725_v60 = vmax.f32 %v15313_v7, %v10970_v39  ;;  %v15315_v39 = vmax.f32 %v13606_v40, 0.0  ;;  %v9436_v30 = vsel %vm4770_vm2, 1.0, %v15306_v20  ;;  %v9441_v2 = vsel %vm4793_vm5, 1.0, %v15306_v20  ;;  %v11342_v47 = vld [vmem:[%s15273_s2 + $0x340] ss:$16 sps:$4 sm:$0xff]  }
 0x3a4   : > { %10518 = vmatpush3.bf16.msra.mxu1 %v13857_v56  ;;  %4869 = vmatprep.mubr.bf16.mxu1 %v15311_v59  ;;  %v4752_v3 = vpack.c.bf16 %v4737_v48, %v4737_v48  ;;  %v4783_v40 = vpack.c.bf16 %v9436_v30, %v9436_v30  ;;  %v11348_v0 = vld [vmem:[%s15273_s2 + $0x360] ss:$16 sps:$4 sm:$0xff]   ;;  %v11305_v8 = vld [vmem:[%s15273_s2 + $0x26c] ss:$16 sps:$4 sm:$0xff]   ;;  %v11315_v58 = vld [vmem:[%s15273_s2 + $0x2a8] ss:$16 sps:$4 sm:$0xff]  }
 0x3a5   : > { %10519 = vmatprep.subr.bf16.mxu1 %v15306_v20  ;;  %4995 = vmatprep.mubr.bf16.mxu0 %v15311_v59  ;;  %v4746_v9 = vpack.c.bf16 %v4728_v24, %v4725_v60  ;;  %v4731_v21 = vmax.f32 %v15315_v39, %v10980_v41  ;;  %v13932_v41 = vpack.c.bf16 %v9441_v2, %v9441_v2  ;;  %v11311_v44 = vld [vmem:[%s15273_s2 + $0x28c] ss:$16 sps:$4 sm:$0xff]   ;;  %v11321_v16 = vld [vmem:[%s15273_s2 + $0x2c8] ss:$16 sps:$4 sm:$0xff]   ;;  %v11354_v24 = vld [vmem:[%s15273_s2 + $0x380] ss:$16 sps:$4 sm:$0xff]  }
 0x3a6   : > { %5643 = vmatpush1.bf16.msra.mxu0 %v11288_v37  ;;  %v4825_v51 = vsel %vm4817_vm10, %v4752_v3, 0  ;;  %v11329_v37 = vld [vmem:[%s15273_s2 + $0x2ec] ss:$16 sps:$4 sm:$0xff]   ;;  %v11327_v34 = vld [vmem:[%s15273_s2 + $0x2e8] ss:$16 sps:$4 sm:$0xff]   ;;  %vm8750_vm6 = vcmask 523268  }
 0x3a7   : > { %5644 = vmatprep.subr.bf16.mxu0 %v11296_v11  ;;  %v4749_v55 = vpack.c.bf16 %v4734_v54, %v4731_v21  ;;  %v11335_v11 = vld [vmem:[%s15273_s2 + $0x30c] ss:$16 sps:$4 sm:$0xff]   ;;  %v11333_v17 = vld [vmem:[%s15273_s2 + $0x308] ss:$16 sps:$4 sm:$0xff]   ;;  %v11360_v7 = vld [vmem:[%s15273_s2 + $0x3a0] ss:$16 sps:$4 sm:$0xff]  }
 0x3a8   : > { %10520 = vmatpush3.bf16.msra.mxu1 %v4743_v63  ;;  %v11341_v13 = vld [vmem:[%s15273_s2 + $0x32c] ss:$16 sps:$4 sm:$0xff]   ;;  %v11339_v42 = vld [vmem:[%s15273_s2 + $0x328] ss:$16 sps:$4 sm:$0xff]   ;;  %v11366_v54 = vld [vmem:[%s15273_s2 + $0x3c0] ss:$16 sps:$4 sm:$0xff]  }
 0x3a9   : > { %10521 = vmatprep.subr.bf16.mxu1 %v15306_v20  ;;  %v11347_v4 = vld [vmem:[%s15273_s2 + $0x34c] ss:$16 sps:$4 sm:$0xff]   ;;  %v11345_v1 = vld [vmem:[%s15273_s2 + $0x348] ss:$16 sps:$4 sm:$0xff]   ;;  %v11374_v48 = vld [vmem:[%s15273_s2 + $0x3e4] ss:$16 sps:$4 sm:$0xff]  }
 0x3aa   : > { %5645 = vmatpush1.bf16.msra.mxu0 %v11294_v52  ;;  %v11353_v57 = vld [vmem:[%s15273_s2 + $0x36c] ss:$16 sps:$4 sm:$0xff]   ;;  %v11351_v62 = vld [vmem:[%s15273_s2 + $0x368] ss:$16 sps:$4 sm:$0xff]   ;;  %v11372_v39 = vld [vmem:[%s15273_s2 + $0x3e0] ss:$16 sps:$4 sm:$0xff]  }
 0x3ab   : > { %9444 = vmatmul.mubr.msk.bf16.gmra.mrb[136].mxu1 %vm4807_vm11, %v13892_v38  ;;  %9451 = vmatmul.mubr.msk.bf16.gmra.mrb[156].mxu0 %vm4807_vm11, %v13894_v61  ;;  %v11359_v52 = vld [vmem:[%s15273_s2 + $0x38c] ss:$16 sps:$4 sm:$0xff]   ;;  %v11363_v15 = vld [vmem:[%s15273_s2 + $0x3a8] ss:$16 sps:$4 sm:$0xff]   ;;  %v11380_v30 = vld [vmem:[%s15273_s2 + $0x404] ss:$16 sps:$4 sm:$0xff]  }
 0x3ac   : > { %10522 = vmatpush3.bf16.msra.mxu1 %v4746_v9  ;;  %4879 = vmatprep.mubr.bf16.mxu1 %v15311_v59  ;;  %v11365_v60 = vld [vmem:[%s15273_s2 + $0x3ac] ss:$16 sps:$4 sm:$0xff]   ;;  %v11375_v2 = vld [vmem:[%s15273_s2 + $0x3e8] ss:$16 sps:$4 sm:$0xff]   ;;  %vm8754_vm7 = vcmask 522244  }
 0x3ad   : > { %10523 = vmatprep.subr.bf16.mxu1 %v15306_v20  ;;  %5005 = vmatprep.mubr.bf16.mxu0 %v15311_v59  ;;  %v11377_v21 = vld [vmem:[%s15273_s2 + $0x3ec] ss:$16 sps:$4 sm:$0xff]   ;;  %v11381_v3 = vld [vmem:[%s15273_s2 + $0x408] ss:$16 sps:$4 sm:$0xff]   ;;  %vm8755_vm9 = vmor %vm8754_vm7, %vm522_vm0 }
 0x3ae   : > { %5646 = vmatprep.subr.bf16.mxu0 %v11302_v27  ;;  %v11371_v27 = vld [vmem:[%s15273_s2 + $0x3cc] ss:$16 sps:$4 sm:$0xff]  }
 0x3af   : > { %5647 = vmatpush1.bf16.msra.mxu0 %v11300_v14  ;;  %v11369_v14 = vld [vmem:[%s15273_s2 + $0x3c8] ss:$16 sps:$4 sm:$0xff]  }
 0x3b0   : > { %10524 = vmatpush3.bf16.msra.mxu1 %v4749_v55  ;;  %5648 = vmatprep.subr.bf16.mxu0 %v11308_v36  ;;  %v11378_v36 = vld [vmem:[%s15273_s2 + $0x400] ss:$16 sps:$4 sm:$0xff]  }
 0x3b1   : > { %10525 = vmatprep.subr.bf16.mxu1 %v15306_v20 }
 0x3b3   : > { %9445 = vmatmul.mubr.msk.bf16.gmra.mrb[140].mxu1 %vm4807_vm11, %v4783_v40  ;;  %9452 = vmatmul.mubr.msk.bf16.gmra.mrb[160].mxu0 %vm4807_vm11, %v13932_v41 }
 0x3b4   : > { %10526 = vmatpush3.bf16.msra.mxu1 %v4825_v51  ;;  %10527 = vmatprep.mubr.msk.bf16.mxu1 %vm11892_vm3, %v15306_v20 }
 0x3b5   : > { %10539 = vmatprep.subr.bf16.mxu1 %v15306_v20  ;;  %5649 = vmatpush1.bf16.msra.mxu0 %v11306_v5 }
 0x3b6   : > { %5650 = vmatprep.subr.bf16.mxu0 %v11314_v50 }
 0x3b9   : > { %5651 = vmatpush1.bf16.msra.mxu0 %v11312_v45 }
 0x3ba   : > { %5652 = vmatprep.subr.bf16.mxu0 %v11320_v35 }
 0x3bb   : > { %10528 = vmatmul.mubr.msk.bf16.vlgmr.msra.gmra.mrb[144].mxu1 %vm4807_vm11, %v13844_v33 }
 0x3bc   : > { %10540 = vmatpush3.bf16.msra.mxu1 %v13857_v56  ;;  %10531 = vmatprep.mubr.msk.bf16.mxu1 %vm11892_vm3, %v15306_v20  ;;  %v11317_v56 = vld [vmem:[%s15273_s2 + $0x2ac] ss:$16 sps:$4 sm:$0xff]  }
 0x3bd   : > { %10541 = vmatprep.subr.bf16.mxu1 %v15306_v20  ;;  %5653 = vmatpush1.bf16.msra.mxu0 %v11318_v49 }
 0x3be   : > { %5654 = vmatprep.subr.bf16.mxu0 %v11326_v46 }
 0x3c0   : > { %10542 = vmatpush3.bf16.msra.mxu1 %v4743_v63  ;;  %v11356_v63 = vld [vmem:[%s15273_s2 + $0x384] ss:$16 sps:$4 sm:$0xff]  }
 0x3c1   : > { %10543 = vmatprep.subr.bf16.mxu1 %v15306_v20  ;;  %5655 = vmatpush1.bf16.msra.mxu0 %v11324_v26 }
 0x3c2   : > { %5656 = vmatprep.subr.bf16.mxu0 %v11332_v6 }
 0x3c3   : > { %10532 = vmatmul.mubr.msk.bf16.gmra.mrb[148].mxu1 %vm4807_vm11, %v13892_v38  ;;  %v11362_v38 = vld [vmem:[%s15273_s2 + $0x3a4] ss:$16 sps:$4 sm:$0xff]  }
 0x3c4   : > { %10544 = vmatpush3.bf16.msra.mxu1 %v4746_v9  ;;  %10535 = vmatprep.mubr.msk.bf16.mxu1 %vm11892_vm3, %v15306_v20  ;;  %v11368_v9 = vld [vmem:[%s15273_s2 + $0x3c4] ss:$16 sps:$4 sm:$0xff]  }
 0x3c5   : > { %10545 = vmatprep.subr.bf16.mxu1 %v15306_v20  ;;  %5657 = vmatpush1.bf16.msra.mxu0 %v11330_v32 }
 0x3c6   : > { %5658 = vmatprep.subr.bf16.mxu0 %v11338_v22 }
 0x3c8   : > { %10546 = vmatpush3.bf16.msra.mxu1 %v4749_v55  ;;  %v11383_v55 = vld [vmem:[%s15273_s2 + $0x40c] ss:$16 sps:$4 sm:$0xff]  }
 0x3c9   : > { %10547 = vmatprep.subr.bf16.mxu1 %v15306_v20  ;;  %5659 = vmatpush1.bf16.msra.mxu0 %v11336_v12 }
 0x3ca   : > { %5660 = vmatprep.subr.bf16.mxu0 %v11344_v25 }
 0x3cb   : > { %10536 = vmatmul.mubr.msk.bf16.gmra.mrb[152].mxu1 %vm4807_vm11, %v4783_v40  ;;  %v11386_v40 = vld [vmem:[%s15273_s2 + $0x424] ss:$16 sps:$4 sm:$0xff]  }
 0x3cc   : > { %10548 = vmatpush3.bf16.msra.mxu1 %v4825_v51  ;;  %10549 = vmatprep.mubr.msk.bf16.mxu1 %vm11892_vm3, %v15306_v20 }
 0x3cd   : > { %5748 = vmatprep.subr.bf16.mxu1 %v11293_v28  ;;  %5661 = vmatpush1.bf16.msra.mxu0 %v11342_v47 }
 0x3ce   : > { %5662 = vmatprep.subr.bf16.mxu0 %v11350_v31 }
 0x3d1   : > { %5663 = vmatpush1.bf16.msra.mxu0 %v11348_v0 }
 0x3d2   : > { %5664 = vmatprep.subr.bf16.mxu0 %v11356_v63 }
 0x3d3   : > { %10550 = vmatmul.mubr.msk.bf16.vlgmr.msra.gmra.mrb[156].mxu1 %vm4807_vm11, %v13846_v18 }
 0x3d4   : > { %10553 = vmatprep.mubr.msk.bf16.mxu1 %vm11892_vm3, %v15306_v20  ;;  %5749 = vmatpush1.bf16.msra.mxu1 %v11291_v53 }
 0x3d5   : > { %5750 = vmatprep.subr.bf16.mxu1 %v11299_v23  ;;  %5665 = vmatpush1.bf16.msra.mxu0 %v11354_v24 }
 0x3d6   : > { %5666 = vmatprep.subr.bf16.mxu0 %v11362_v38 }
 0x3d8   : > { %5751 = vmatpush1.bf16.msra.mxu1 %v11297_v29 }
 0x3d9   : > { %5752 = vmatprep.subr.bf16.mxu1 %v11305_v8  ;;  %5667 = vmatpush1.bf16.msra.mxu0 %v11360_v7 }
 0x3da   : > { %5668 = vmatprep.subr.bf16.mxu0 %v11368_v9 }
 0x3db   : > { %10554 = vmatmul.mubr.msk.bf16.gmra.mrb[160].mxu1 %vm4807_vm11, %v13894_v61  ;;  %v11357_v61 = vld [vmem:[%s15273_s2 + $0x388] ss:$16 sps:$4 sm:$0xff]  }
 0x3dc   : > { %10557 = vmatprep.mubr.msk.bf16.mxu1 %vm11892_vm3, %v15306_v20  ;;  %5753 = vmatpush1.bf16.msra.mxu1 %v11303_v10  ;;  %v11323_v20 = vld [vmem:[%s15273_s2 + $0x2cc] ss:$16 sps:$4 sm:$0xff]   ;;  %vm5635_vm3 = vcmask 130048  }
 0x3dd   : > { %5754 = vmatprep.subr.bf16.mxu1 %v11311_v44  ;;  %5669 = vmatpush1.bf16.msra.mxu0 %v11366_v54 }
 0x3de   : > { %5670 = vmatprep.subr.bf16.mxu0 %v11374_v48 }
 0x3e0   : > { %5755 = vmatpush1.bf16.msra.mxu1 %v11309_v19 }
 0x3e1   : > { %5756 = vmatprep.subr.bf16.mxu1 %v11317_v56  ;;  %5671 = vmatpush1.bf16.msra.mxu0 %v11372_v39  ;;  %v11384_v39 = vld [vmem:[%s15273_s2 + $0x420] ss:$16 sps:$4 sm:$0xff]  }
 0x3e2   : > { %5672 = vmatprep.subr.bf16.mxu0 %v11380_v30 }
 0x3e3   : > { %10558 = vmatmul.mubr.msk.bf16.gmra.mrb[164].mxu1 %vm4807_vm11, %v13932_v41  ;;  %v11389_v41 = vld [vmem:[%s15273_s2 + $0x42c] ss:$16 sps:$4 sm:$0xff]  }
 0x3e4   : > { %5757 = vmatpush1.bf16.msra.mxu1 %v11315_v58 }
 0x3e5   : > { %5758 = vmatprep.subr.bf16.mxu1 %v11323_v20  ;;  %5673 = vmatpush1.bf16.msra.mxu0 %v11378_v36  ;;  %v11392_v36 = vld [vmem:[%s15273_s2 + $0x4] ss:$16 sps:$4 sm:$0xff]  }
 0x3e6   : > { %5695 = vmatprep.subr.bf16.mxu0 %v11386_v40 }
 0x3e8   : > { %5759 = vmatpush1.bf16.msra.mxu1 %v11321_v16 }
 0x3e9   : > { %5760 = vmatprep.subr.bf16.mxu1 %v11329_v37 }
 0x3ec   : > { %5761 = vmatpush1.bf16.msra.mxu1 %v11327_v34 }
 0x3ed   : > { %5762 = vmatprep.subr.bf16.mxu1 %v11335_v11 }
 0x3f0   : > { %5763 = vmatpush1.bf16.msra.mxu1 %v11333_v17 }
 0x3f1   : > { %5764 = vmatprep.subr.bf16.mxu1 %v11341_v13 }
 0x3f4   : > { %5765 = vmatpush1.bf16.msra.mxu1 %v11339_v42 }
 0x3f5   : > { %5766 = vmatprep.subr.bf16.mxu1 %v11347_v4 }
 0x3f8   : > { %5767 = vmatpush1.bf16.msra.mxu1 %v11345_v1 }
 0x3f9   : > { %5768 = vmatprep.subr.bf16.mxu1 %v11353_v57 }
 0x3fc   : > { %5769 = vmatpush1.bf16.msra.mxu1 %v11351_v62 }
 0x3fd   : > { %5770 = vmatprep.subr.bf16.mxu1 %v11359_v52 }
 0x400   : > { %5771 = vmatpush1.bf16.msra.mxu1 %v11357_v61 }
 0x401   : > { %5772 = vmatprep.subr.bf16.mxu1 %v11365_v60 }
 0x404   : > { %5773 = vmatpush1.bf16.msra.mxu1 %v11363_v15 }
 0x405   : > { %5774 = vmatprep.subr.bf16.mxu1 %v11371_v27 }
 0x408   : > { %5775 = vmatpush1.bf16.msra.mxu1 %v11369_v14 }
 0x409   : > { %5776 = vmatprep.subr.bf16.mxu1 %v11377_v21  ;;  %v11387_v21 = vld [vmem:[%s15273_s2 + $0x428] ss:$16 sps:$4 sm:$0xff]  }
 0x40c   : > { %5777 = vmatpush1.bf16.msra.mxu1 %v11375_v2 }
 0x40d   : > { %5778 = vmatprep.subr.bf16.mxu1 %v11383_v55  ;;  %v11395_v55 = vld [vmem:[%s15273_s2 + $0xc] ss:$16 sps:$4 sm:$0xff]  }
 0x410   : > { %5779 = vmatpush1.bf16.msra.mxu1 %v11381_v3 }
 0x411   : > { %5801 = vmatprep.subr.bf16.mxu1 %v11389_v41 }
 0x476   : > { %v4861_v5 = vpop.f32.mrb[132].mxu1  ;;  %v4987_v50 = vpop.f32.mrb[152].mxu0 }
 0x477   : > { %v5070_v51 = vmax.f32 %v4861_v5, %v4987_v50  ;;  %v4863_v45 = vpop.f32.mrb[133].mxu1  ;;  %v4989_v35 = vpop.f32.mrb[153].mxu0 }
 0x478   : > { %v5071_v49 = vmax.f32 %v4863_v45, %v4989_v35  ;;  %v4865_v46 = vpop.f32.mrb[134].mxu1  ;;  %v4991_v26 = vpop.f32.mrb[154].mxu0 }
 0x479   : > { %v5073_v6 = vmax.f32 %v4865_v46, %v4991_v26  ;;  %v4867_v32 = vpop.f32.mrb[135].mxu1  ;;  %v4993_v22 = vpop.f32.mrb[155].mxu0 }
 0x47a   : > { %v5074_v12 = vmax.f32 %v4867_v32, %v4993_v22 }
 0x47b   : > { %v14145_v25 = vpack.c.bf16 %v5073_v6, %v5070_v51 }
 0x47c   : > { %v14147_v28 = vpack.c.bf16 %v5074_v12, %v5071_v49 }
 0x47d   : > { %v5234_v20 = vshll.u32 %v14145_v25, 16  ;;  %v5232_v52 = vshrl.u32 %v14145_v25, 16 }
 0x47e   : > { %v4871_v47 = vpop.f32.mrb[136].mxu1  ;;  %v4997_v31 = vpop.f32.mrb[156].mxu0  ;;  %v5246_v44 = vshll.u32 %v14147_v28, 16  ;;  %v5244_v1 = vshrl.u32 %v14147_v28, 16 }
 0x47f   : > { %v5076_v0 = vmax.f32 %v4871_v47, %v4997_v31  ;;  %v4873_v53 = vpop.f32.mrb[137].mxu1  ;;  %v4999_v23 = vpop.f32.mrb[157].mxu0  ;;  %v5236_v17 = vrot.slane %v5234_v20, 1 }
 0x480   : > { %v5077_v29 = vmax.f32 %v4873_v53, %v4999_v23  ;;  %v4875_v8 = vpop.f32.mrb[138].mxu1  ;;  %v5001_v10 = vpop.f32.mrb[158].mxu0  ;;  %v5248_v11 = vrot.slane %v5246_v44, 1 }
 0x481   : > { %v5079_v19 = vmax.f32 %v4875_v8, %v5001_v10  ;;  %v4877_v56 = vpop.f32.mrb[139].mxu1  ;;  %v5003_v58 = vpop.f32.mrb[159].mxu0  ;;  %v5237_v48 = vor.u32 %v5236_v17, %v5232_v52 }
 0x482   : > { %v5080_v16 = vmax.f32 %v4877_v56, %v5003_v58  ;;  %v5249_v60 = vor.u32 %v5248_v11, %v5244_v1 }
 0x483   : > { %v14151_v37 = vpack.c.bf16 %v5079_v19, %v5076_v0 }
 0x484   : > { %v14153_v34 = vpack.c.bf16 %v5080_v16, %v5077_v29 }
 0x485   : > { %v5239_v13 = vshll.u32 %v14151_v37, 16  ;;  %v5267_v46 = vshrl.u32 %v14151_v37, 16 }
 0x486   : > { %v4881_v42 = vpop.f32.mrb[140].mxu1  ;;  %v5007_v4 = vpop.f32.mrb[160].mxu0  ;;  %v5251_v57 = vshll.u32 %v14153_v34, 16  ;;  %v5275_v5 = vshrl.u32 %v14153_v34, 16 }
 0x487   : > { %v5082_v63 = vmax.f32 %v4881_v42, %v5007_v4  ;;  %v4883_v62 = vpop.f32.mrb[141].mxu1  ;;  %v5009_v24 = vpop.f32.mrb[161].mxu0  ;;  %v5241_v38 = vrot.slane %v5239_v13, 1 }
 0x488   : > { %v5083_v61 = vmax.f32 %v4883_v62, %v5009_v24  ;;  %v4885_v7 = vpop.f32.mrb[142].mxu1  ;;  %v5253_v9 = vrot.slane %v5251_v57, 1  ;;  %v5011_v15 = vpop.f32.mrb[162].mxu0 }
 0x489   : > { %v14159_v54 = vpack.c.bf16 %v5082_v63, %v5082_v63  ;;  %v4886_v27 = vpop.f32.mrb[143].mxu1  ;;  %v5012_v14 = vpop.f32.mrb[163].mxu0  ;;  %v5242_v40 = vsel %vm349_vm1, %v5237_v48, %v5241_v38  ;;  %v5269_v22 = vor.u32 %v5267_v46, %v5241_v38  ;;  %v11390_v7 = vld [vmem:[%s15273_s2] ss:$16 sps:$4 sm:$0xff]  }
 0x48a   : > { %v14167_v30 = vpack.c.bf16 %v5083_v61, %v5083_v61  ;;  %v5254_v2 = vsel %vm349_vm1, %v5249_v60, %v5253_v9  ;;  %v5277_v45 = vor.u32 %v5275_v5, %v5253_v9  ;;  %v11393_v9 = vld [vmem:[%s15273_s2 + $0x8] ss:$16 sps:$4 sm:$0xff]   ;;  %v11398_v14 = vld [vmem:[%s15273_s2 + $0x24] ss:$16 sps:$4 sm:$0xff]  }
 0x48b   : > { %v5271_v3 = vshll.u32 %v14159_v54, 16  ;;  %5674 = vmatprep.mubr.bf16.mxu0 %v5254_v2  ;;  %5780 = vmatprep.mubr.bf16.mxu1 %v5254_v2  ;;  %v11404_v5 = vld [vmem:[%s15273_s2 + $0x44] ss:$16 sps:$4 sm:$0xff]  }
 0x48c   : > { %v5279_v41 = vshll.u32 %v14167_v30, 16  ;;  %5675 = vmatmul.mubr.bf16.vlgmr.msra.gmra.mrb[164].mxu0 %v5242_v40  ;;  %5781 = vmatmul.mubr.bf16.vlgmr.msra.gmra.mrb[168].mxu1 %v5242_v40  ;;  %v11396_v40 = vld [vmem:[%s15273_s2 + $0x20] ss:$16 sps:$4 sm:$0xff]  }
 0x48d   : > { %5696 = vmatpush1.bf16.msra.mxu0 %v11384_v39  ;;  %5802 = vmatpush1.bf16.msra.mxu1 %v11387_v21  ;;  %v5273_v35 = vrot.slane %v5271_v3, 1  ;;  %v11401_v39 = vld [vmem:[%s15273_s2 + $0x2c] ss:$16 sps:$4 sm:$0xff]  }
 0x48e   : > { %v5281_v50 = vrot.slane %v5279_v41, 1  ;;  %v4922_v51 = vpop.f32.mrb[144].mxu1  ;;  %6198 = vmatprep.subr.bf16.mxu0 %v11392_v36  ;;  %6304 = vmatprep.subr.bf16.mxu1 %v11395_v55  ;;  %v11399_v41 = vld [vmem:[%s15273_s2 + $0x28] ss:$16 sps:$4 sm:$0xff]  }
 0x48f   : > { %v10529_v49 = vpop.f32.mrb[145].mxu1  ;;  %v5274_v12 = vsel %vm349_vm1, %v5269_v22, %v5273_v35  ;;  %v11402_v35 = vld [vmem:[%s15273_s2 + $0x40] ss:$16 sps:$4 sm:$0xff]  }
 0x490   : > { %v5282_v26 = vsel %vm349_vm1, %v5277_v45, %v5281_v50  ;;  %v4925_v6 = vpop.f32.mrb[146].mxu1  ;;  %v11407_v50 = vld [vmem:[%s15273_s2 + $0x4c] ss:$16 sps:$4 sm:$0xff]   ;;  %v11405_v49 = vld [vmem:[%s15273_s2 + $0x48] ss:$16 sps:$4 sm:$0xff]  }
 0x491   : > { %5684 = vmatprep.mubr.bf16.mxu0 %v5282_v26  ;;  %5790 = vmatprep.mubr.bf16.mxu1 %v5282_v26  ;;  %v10530_v32 = vpop.f32.mrb[147].mxu1  ;;  %v11408_v22 = vld [vmem:[%s15273_s2 + $0x60] ss:$16 sps:$4 sm:$0xff]  }
 0x492   : > { %v11413_v32 = vld [vmem:[%s15273_s2 + $0x6c] ss:$16 sps:$4 sm:$0xff]  }
 0x494   : > { %5685 = vmatmul.mubr.bf16.gmra.mrb[168].mxu0 %v5274_v12  ;;  %5791 = vmatmul.mubr.bf16.gmra.mrb[172].mxu1 %v5274_v12  ;;  %v11411_v12 = vld [vmem:[%s15273_s2 + $0x68] ss:$16 sps:$4 sm:$0xff]  }
 0x495   : > { %5727 = vmatprep.mubr.bf16.mxu0 %v15311_v59  ;;  %5833 = vmatprep.mubr.bf16.mxu1 %v15311_v59 }
 0x496   : > { %v4930_v47 = vpop.f32.mrb[148].mxu1 }
 0x497   : > { %v10533_v31 = vpop.f32.mrb[149].mxu1 }
 0x498   : > { %v4933_v0 = vpop.f32.mrb[150].mxu1  ;;  %v11419_v31 = vld [vmem:[%s15273_s2 + $0x8c] ss:$16 sps:$4 sm:$0xff]  }
 0x499   : > { %v10534_v53 = vpop.f32.mrb[151].mxu1 }
 0x49a   : > { %v11417_v53 = vld [vmem:[%s15273_s2 + $0x88] ss:$16 sps:$4 sm:$0xff]  }
 0x49e   : > { %v4938_v23 = vpop.f32.mrb[152].mxu1 }
 0x49f   : > { %v10537_v29 = vpop.f32.mrb[153].mxu1 }
 0x4a0   : > { %v4941_v8 = vpop.f32.mrb[154].mxu1  ;;  %v11425_v29 = vld [vmem:[%s15273_s2 + $0xac] ss:$16 sps:$4 sm:$0xff]  }
 0x4a1   : > { %v10538_v10 = vpop.f32.mrb[155].mxu1  ;;  %v11420_v8 = vld [vmem:[%s15273_s2 + $0xa0] ss:$16 sps:$4 sm:$0xff]  }
 0x4a2   : > { %v11423_v10 = vld [vmem:[%s15273_s2 + $0xa8] ss:$16 sps:$4 sm:$0xff]  }
 0x4a6   : > { %v5048_v44 = vpop.f32.mrb[156].mxu1 }
 0x4a7   : > { %v5072_v19 = vmax.f32 %v4922_v51, %v5048_v44  ;;  %v10551_v56 = vpop.f32.mrb[157].mxu1  ;;  %v11428_v44 = vld [vmem:[%s15273_s2 + $0xc4] ss:$16 sps:$4 sm:$0xff]  }
 0x4a8   : > { %v5051_v58 = vpop.f32.mrb[158].mxu1  ;;  %v11426_v56 = vld [vmem:[%s15273_s2 + $0xc0] ss:$16 sps:$4 sm:$0xff]  }
 0x4a9   : > { %v5075_v20 = vmax.f32 %v4925_v6, %v5051_v58  ;;  %v10552_v16 = vpop.f32.mrb[159].mxu1  ;;  %v11410_v6 = vld [vmem:[%s15273_s2 + $0x64] ss:$16 sps:$4 sm:$0xff]   ;;  %v11429_v58 = vld [vmem:[%s15273_s2 + $0xc8] ss:$16 sps:$4 sm:$0xff]  }
 0x4aa   : > { %v11437_v16 = vld [vmem:[%s15273_s2 + $0xec] ss:$16 sps:$4 sm:$0xff]  }
 0x4ab   : > { %v14185_v11 = vpack.c.bf16 %v5075_v20, %v5072_v19  ;;  %v11431_v19 = vld [vmem:[%s15273_s2 + $0xcc] ss:$16 sps:$4 sm:$0xff]   ;;  %v11434_v20 = vld [vmem:[%s15273_s2 + $0xe4] ss:$16 sps:$4 sm:$0xff]  }
 0x4ad   : > { %v5258_v13 = vshll.u32 %v14185_v11, 16  ;;  %v5256_v52 = vshrl.u32 %v14185_v11, 16 }
 0x4ae   : > { %v5056_v17 = vpop.f32.mrb[160].mxu1 }
 0x4af   : > { %v5078_v42 = vmax.f32 %v4930_v47, %v5056_v17  ;;  %v10555_v4 = vpop.f32.mrb[161].mxu1  ;;  %v5260_v24 = vrot.slane %v5258_v13, 1  ;;  %v11416_v47 = vld [vmem:[%s15273_s2 + $0x84] ss:$16 sps:$4 sm:$0xff]   ;;  %v11432_v17 = vld [vmem:[%s15273_s2 + $0xe0] ss:$16 sps:$4 sm:$0xff]  }
 0x4b0   : > { %v5059_v1 = vpop.f32.mrb[162].mxu1  ;;  %v11435_v13 = vld [vmem:[%s15273_s2 + $0xe8] ss:$16 sps:$4 sm:$0xff]   ;;  %v11443_v4 = vld [vmem:[%s15273_s2 + $0x10c] ss:$16 sps:$4 sm:$0xff]  }
 0x4b1   : > { %v5081_v57 = vmax.f32 %v4933_v0, %v5059_v1  ;;  %v10556_v63 = vpop.f32.mrb[163].mxu1  ;;  %v5261_v15 = vor.u32 %v5260_v24, %v5256_v52  ;;  %v11414_v0 = vld [vmem:[%s15273_s2 + $0x80] ss:$16 sps:$4 sm:$0xff]   ;;  %v11449_v24 = vld [vmem:[%s15273_s2 + $0x12c] ss:$16 sps:$4 sm:$0xff]  }
 0x4b2   : > { %v11438_v1 = vld [vmem:[%s15273_s2 + $0x100] ss:$16 sps:$4 sm:$0xff]   ;;  %v11446_v63 = vld [vmem:[%s15273_s2 + $0x124] ss:$16 sps:$4 sm:$0xff]  }
 0x4b3   : > { %v14188_v62 = vpack.c.bf16 %v5081_v57, %v5078_v42  ;;  %v11440_v42 = vld [vmem:[%s15273_s2 + $0x104] ss:$16 sps:$4 sm:$0xff]   ;;  %v11441_v57 = vld [vmem:[%s15273_s2 + $0x108] ss:$16 sps:$4 sm:$0xff]   ;;  %v11444_v52 = vld [vmem:[%s15273_s2 + $0x120] ss:$16 sps:$4 sm:$0xff]  }
 0x4b5   : > { %v5263_v38 = vshll.u32 %v14188_v62, 16  ;;  %v5283_v45 = vshrl.u32 %v14188_v62, 16 }
 0x4b6   : > { %v5064_v61 = vpop.f32.mrb[164].mxu1 }
 0x4b7   : > { %v5084_v60 = vmax.f32 %v4938_v23, %v5064_v61  ;;  %v5265_v27 = vrot.slane %v5263_v38, 1  ;;  %v10559_v48 = vpop.f32.mrb[165].mxu1  ;;  %v11422_v23 = vld [vmem:[%s15273_s2 + $0xa4] ss:$16 sps:$4 sm:$0xff]   ;;  %v11447_v38 = vld [vmem:[%s15273_s2 + $0x128] ss:$16 sps:$4 sm:$0xff]  }
 0x4b8   : > { %v5067_v21 = vpop.f32.mrb[166].mxu1  ;;  %v11452_v61 = vld [vmem:[%s15273_s2 + $0x144] ss:$16 sps:$4 sm:$0xff]   ;;  %v11456_v48 = vld [vmem:[%s15273_s2 + $0x160] ss:$16 sps:$4 sm:$0xff]  }
 0x4b9   : > { %v14204_v2 = vpack.c.bf16 %v5084_v60, %v5084_v60  ;;  %v5266_v36 = vsel %vm349_vm1, %v5261_v15, %v5265_v27  ;;  %v10560_v55 = vpop.f32.mrb[167].mxu1  ;;  %v5285_v46 = vor.u32 %v5283_v45, %v5265_v27  ;;  %v11450_v60 = vld [vmem:[%s15273_s2 + $0x140] ss:$16 sps:$4 sm:$0xff]   ;;  %v11458_v15 = vld [vmem:[%s15273_s2 + $0x164] ss:$16 sps:$4 sm:$0xff]  }
 0x4ba   : > { %9592 = vmatmul.mubr.msk.bf16.vlgmr.msra.gmra.mrb[164].mxu0 %vm5635_vm3, %v5266_v36  ;;  %9594 = vmatmul.mubr.msk.bf16.vlgmr.msra.gmra.mrb[168].mxu1 %vm5635_vm3, %v5266_v36  ;;  %v11461_v27 = vld [vmem:[%s15273_s2 + $0x16c] ss:$16 sps:$4 sm:$0xff]   ;;  %v11462_v36 = vld [vmem:[%s15273_s2 + $0x180] ss:$16 sps:$4 sm:$0xff]   ;;  %v11465_v55 = vld [vmem:[%s15273_s2 + $0x188] ss:$16 sps:$4 sm:$0xff]  }
 0x4bb   : > { %v5287_v3 = vshll.u32 %v14204_v2, 16  ;;  %6199 = vmatpush1.bf16.msra.mxu0 %v11390_v7  ;;  %6305 = vmatpush1.bf16.msra.mxu1 %v11393_v9  ;;  %v11455_v7 = vld [vmem:[%s15273_s2 + $0x14c] ss:$16 sps:$4 sm:$0xff]   ;;  %v11453_v9 = vld [vmem:[%s15273_s2 + $0x148] ss:$16 sps:$4 sm:$0xff]  }
 0x4bc   : > { %6200 = vmatprep.subr.bf16.mxu0 %v11398_v14  ;;  %6306 = vmatprep.subr.bf16.mxu1 %v11401_v39  ;;  %v11459_v14 = vld [vmem:[%s15273_s2 + $0x168] ss:$16 sps:$4 sm:$0xff]   ;;  %v11464_v39 = vld [vmem:[%s15273_s2 + $0x184] ss:$16 sps:$4 sm:$0xff]   ;;  %v11467_v21 = vld [vmem:[%s15273_s2 + $0x18c] ss:$16 sps:$4 sm:$0xff]  }
 0x4bd   : > { %v5289_v51 = vrot.slane %v5287_v3, 1  ;;  %5737 = vmatprep.mubr.bf16.mxu0 %v15311_v59  ;;  %5843 = vmatprep.mubr.bf16.mxu1 %v15311_v59  ;;  %v11470_v3 = vld [vmem:[%s15273_s2 + $0x1a4] ss:$16 sps:$4 sm:$0xff]   ;;  %v11474_v45 = vld [vmem:[%s15273_s2 + $0x1c0] ss:$16 sps:$4 sm:$0xff]  }
 0x4bf   : > { %6201 = vmatpush1.bf16.msra.mxu0 %v11396_v40  ;;  %6307 = vmatpush1.bf16.msra.mxu1 %v11399_v41  ;;  %v5290_v26 = vsel %vm349_vm1, %v5285_v46, %v5289_v51  ;;  %v11473_v40 = vld [vmem:[%s15273_s2 + $0x1ac] ss:$16 sps:$4 sm:$0xff]   ;;  %v11468_v41 = vld [vmem:[%s15273_s2 + $0x1a0] ss:$16 sps:$4 sm:$0xff]   ;;  %vm7147_vm1 = vcmask 261120  }
 0x4c0   : > { %6202 = vmatprep.subr.bf16.mxu0 %v11404_v5  ;;  %6308 = vmatprep.subr.bf16.mxu1 %v11407_v50  ;;  %v11471_v5 = vld [vmem:[%s15273_s2 + $0x1a8] ss:$16 sps:$4 sm:$0xff]   ;;  %v11476_v50 = vld [vmem:[%s15273_s2 + $0x1c4] ss:$16 sps:$4 sm:$0xff]   ;;  %v11479_v51 = vld [vmem:[%s15273_s2 + $0x1cc] ss:$16 sps:$4 sm:$0xff]  }
 0x4c1   : > { %v11485_v46 = vld [vmem:[%s15273_s2 + $0x1ec] ss:$16 sps:$4 sm:$0xff]  }
 0x4c2   : > { %9593 = vmatmul.mubr.msk.bf16.gmra.mrb[168].mxu0 %vm5635_vm3, %v5290_v26  ;;  %9595 = vmatmul.mubr.msk.bf16.gmra.mrb[172].mxu1 %vm5635_vm3, %v5290_v26  ;;  %v11480_v26 = vld [vmem:[%s15273_s2 + $0x1e0] ss:$16 sps:$4 sm:$0xff]  }
 0x4c3   : > { %6203 = vmatpush1.bf16.msra.mxu0 %v11402_v35  ;;  %6309 = vmatpush1.bf16.msra.mxu1 %v11405_v49  ;;  %v11477_v35 = vld [vmem:[%s15273_s2 + $0x1c8] ss:$16 sps:$4 sm:$0xff]   ;;  %v11482_v49 = vld [vmem:[%s15273_s2 + $0x1e4] ss:$16 sps:$4 sm:$0xff]  }
 0x4c4   : > { %6230 = vmatprep.mubr.bf16.mxu0 %v14147_v28  ;;  %6336 = vmatprep.mubr.bf16.mxu1 %v14147_v28 }
 0x4c5   : > { %6204 = vmatprep.subr.bf16.mxu0 %v11410_v6  ;;  %6310 = vmatprep.subr.bf16.mxu1 %v11413_v32  ;;  %v11483_v6 = vld [vmem:[%s15273_s2 + $0x1e8] ss:$16 sps:$4 sm:$0xff]   ;;  %v11488_v32 = vld [vmem:[%s15273_s2 + $0x204] ss:$16 sps:$4 sm:$0xff]  }
 0x4c7   : > { %6205 = vmatpush1.bf16.msra.mxu0 %v11408_v22  ;;  %6311 = vmatpush1.bf16.msra.mxu1 %v11411_v12  ;;  %v11491_v22 = vld [vmem:[%s15273_s2 + $0x20c] ss:$16 sps:$4 sm:$0xff]   ;;  %v11486_v12 = vld [vmem:[%s15273_s2 + $0x200] ss:$16 sps:$4 sm:$0xff]  }
 0x4c8   : > { %6206 = vmatprep.subr.bf16.mxu0 %v11416_v47  ;;  %6312 = vmatprep.subr.bf16.mxu1 %v11419_v31  ;;  %v11489_v47 = vld [vmem:[%s15273_s2 + $0x208] ss:$16 sps:$4 sm:$0xff]   ;;  %v11494_v31 = vld [vmem:[%s15273_s2 + $0x444] ss:$16 sps:$4 sm:$0xff]  }
 0x4cb   : > { %6207 = vmatpush1.bf16.msra.mxu0 %v11414_v0  ;;  %6313 = vmatpush1.bf16.msra.mxu1 %v11417_v53  ;;  %v11497_v0 = vld [vmem:[%s15273_s2 + $0x44c] ss:$16 sps:$4 sm:$0xff]   ;;  %v11492_v53 = vld [vmem:[%s15273_s2 + $0x440] ss:$16 sps:$4 sm:$0xff]  }
 0x4cc   : > { %6208 = vmatprep.subr.bf16.mxu0 %v11422_v23  ;;  %6314 = vmatprep.subr.bf16.mxu1 %v11425_v29  ;;  %v11495_v23 = vld [vmem:[%s15273_s2 + $0x448] ss:$16 sps:$4 sm:$0xff]   ;;  %v11500_v29 = vld [vmem:[%s15273_s2 + $0x464] ss:$16 sps:$4 sm:$0xff]  }
 0x4cf   : > { %6209 = vmatpush1.bf16.msra.mxu0 %v11420_v8  ;;  %6315 = vmatpush1.bf16.msra.mxu1 %v11423_v10  ;;  %v11503_v8 = vld [vmem:[%s15273_s2 + $0x46c] ss:$16 sps:$4 sm:$0xff]   ;;  %v11498_v10 = vld [vmem:[%s15273_s2 + $0x460] ss:$16 sps:$4 sm:$0xff]  }
 0x4d0   : > { %6210 = vmatprep.subr.bf16.mxu0 %v11428_v44  ;;  %6316 = vmatprep.subr.bf16.mxu1 %v11431_v19  ;;  %v11501_v44 = vld [vmem:[%s15273_s2 + $0x468] ss:$16 sps:$4 sm:$0xff]   ;;  %v11506_v19 = vld [vmem:[%s15273_s2 + $0x484] ss:$16 sps:$4 sm:$0xff]  }
 0x4d3   : > { %6211 = vmatpush1.bf16.msra.mxu0 %v11426_v56  ;;  %6317 = vmatpush1.bf16.msra.mxu1 %v11429_v58  ;;  %v11509_v56 = vld [vmem:[%s15273_s2 + $0x48c] ss:$16 sps:$4 sm:$0xff]   ;;  %v11504_v58 = vld [vmem:[%s15273_s2 + $0x480] ss:$16 sps:$4 sm:$0xff]  }
 0x4d4   : > { %6212 = vmatprep.subr.bf16.mxu0 %v11434_v20  ;;  %6318 = vmatprep.subr.bf16.mxu1 %v11437_v16  ;;  %v11507_v20 = vld [vmem:[%s15273_s2 + $0x488] ss:$16 sps:$4 sm:$0xff]   ;;  %v6492_v16 = vrot.slane %v14153_v34, 1 }
 0x4d7   : > { %6213 = vmatpush1.bf16.msra.mxu0 %v11432_v17  ;;  %6319 = vmatpush1.bf16.msra.mxu1 %v11435_v13  ;;  %v6491_v17 = vrot.slane %v14147_v28, 1  ;;  %v11512_v13 = vld [vmem:[%s15273_s2 + $0x4a4] ss:$16 sps:$4 sm:$0xff]  }
 0x4d8   : > { %6214 = vmatprep.subr.bf16.mxu0 %v11440_v42  ;;  %6320 = vmatprep.subr.bf16.mxu1 %v11443_v4  ;;  %v11515_v42 = vld [vmem:[%s15273_s2 + $0x4ac] ss:$16 sps:$4 sm:$0xff]   ;;  %v11510_v4 = vld [vmem:[%s15273_s2 + $0x4a0] ss:$16 sps:$4 sm:$0xff]  }
 0x4d9   : > { %v6493_v28 = vsel %vm1181_vm4, %v6491_v17, %v6492_v16  ;;  %v11587_v17 = vld [vmem:[%s15273_s2 + $0x62c] ss:$16 sps:$4 sm:$0xff]  }
 0x4db   : > { %6215 = vmatpush1.bf16.msra.mxu0 %v11438_v1  ;;  %6321 = vmatpush1.bf16.msra.mxu1 %v11441_v57  ;;  %v11513_v1 = vld [vmem:[%s15273_s2 + $0x4a8] ss:$16 sps:$4 sm:$0xff]   ;;  %v11518_v57 = vld [vmem:[%s15273_s2 + $0x4c4] ss:$16 sps:$4 sm:$0xff]  }
 0x4dc   : > { %6216 = vmatprep.subr.bf16.mxu0 %v11446_v63  ;;  %6322 = vmatprep.subr.bf16.mxu1 %v11449_v24  ;;  %v11521_v63 = vld [vmem:[%s15273_s2 + $0x4cc] ss:$16 sps:$4 sm:$0xff]   ;;  %v11516_v24 = vld [vmem:[%s15273_s2 + $0x4c0] ss:$16 sps:$4 sm:$0xff]  }
 0x4df   : > { %6217 = vmatpush1.bf16.msra.mxu0 %v11444_v52  ;;  %6323 = vmatpush1.bf16.msra.mxu1 %v11447_v38  ;;  %v11519_v52 = vld [vmem:[%s15273_s2 + $0x4c8] ss:$16 sps:$4 sm:$0xff]   ;;  %v11524_v38 = vld [vmem:[%s15273_s2 + $0x4e4] ss:$16 sps:$4 sm:$0xff]  }
 0x4e0   : > { %6218 = vmatprep.subr.bf16.mxu0 %v11452_v61  ;;  %6324 = vmatprep.subr.bf16.mxu1 %v11455_v7  ;;  %v11527_v61 = vld [vmem:[%s15273_s2 + $0x4ec] ss:$16 sps:$4 sm:$0xff]   ;;  %v11522_v7 = vld [vmem:[%s15273_s2 + $0x4e0] ss:$16 sps:$4 sm:$0xff]  }
 0x4e3   : > { %6219 = vmatpush1.bf16.msra.mxu0 %v11450_v60  ;;  %6325 = vmatpush1.bf16.msra.mxu1 %v11453_v9  ;;  %v11525_v60 = vld [vmem:[%s15273_s2 + $0x4e8] ss:$16 sps:$4 sm:$0xff]   ;;  %v11530_v9 = vld [vmem:[%s15273_s2 + $0x504] ss:$16 sps:$4 sm:$0xff]  }
 0x4e4   : > { %6220 = vmatprep.subr.bf16.mxu0 %v11458_v15  ;;  %6326 = vmatprep.subr.bf16.mxu1 %v11461_v27  ;;  %v11533_v15 = vld [vmem:[%s15273_s2 + $0x50c] ss:$16 sps:$4 sm:$0xff]   ;;  %v11528_v27 = vld [vmem:[%s15273_s2 + $0x500] ss:$16 sps:$4 sm:$0xff]  }
 0x4e7   : > { %6221 = vmatpush1.bf16.msra.mxu0 %v11456_v48  ;;  %6327 = vmatpush1.bf16.msra.mxu1 %v11459_v14  ;;  %v11531_v48 = vld [vmem:[%s15273_s2 + $0x508] ss:$16 sps:$4 sm:$0xff]   ;;  %v11536_v14 = vld [vmem:[%s15273_s2 + $0x524] ss:$16 sps:$4 sm:$0xff]  }
 0x4e8   : > { %6222 = vmatprep.subr.bf16.mxu0 %v11464_v39  ;;  %6328 = vmatprep.subr.bf16.mxu1 %v11467_v21  ;;  %v11539_v39 = vld [vmem:[%s15273_s2 + $0x52c] ss:$16 sps:$4 sm:$0xff]   ;;  %v11534_v21 = vld [vmem:[%s15273_s2 + $0x520] ss:$16 sps:$4 sm:$0xff]  }
 0x4eb   : > { %6223 = vmatpush1.bf16.msra.mxu0 %v11462_v36  ;;  %6329 = vmatpush1.bf16.msra.mxu1 %v11465_v55  ;;  %v11537_v36 = vld [vmem:[%s15273_s2 + $0x528] ss:$16 sps:$4 sm:$0xff]   ;;  %v11542_v55 = vld [vmem:[%s15273_s2 + $0x544] ss:$16 sps:$4 sm:$0xff]  }
 0x4ec   : > { %6224 = vmatprep.subr.bf16.mxu0 %v11470_v3  ;;  %6330 = vmatprep.subr.bf16.mxu1 %v11473_v40  ;;  %v11545_v3 = vld [vmem:[%s15273_s2 + $0x54c] ss:$16 sps:$4 sm:$0xff]   ;;  %v11540_v40 = vld [vmem:[%s15273_s2 + $0x540] ss:$16 sps:$4 sm:$0xff]  }
 0x4ef   : > { %6225 = vmatpush1.bf16.msra.mxu0 %v11468_v41  ;;  %6331 = vmatpush1.bf16.msra.mxu1 %v11471_v5  ;;  %v11543_v41 = vld [vmem:[%s15273_s2 + $0x548] ss:$16 sps:$4 sm:$0xff]   ;;  %v11548_v5 = vld [vmem:[%s15273_s2 + $0x564] ss:$16 sps:$4 sm:$0xff]  }
 0x4f0   : > { %6226 = vmatprep.subr.bf16.mxu0 %v11476_v50  ;;  %6332 = vmatprep.subr.bf16.mxu1 %v11479_v51  ;;  %v11551_v50 = vld [vmem:[%s15273_s2 + $0x56c] ss:$16 sps:$4 sm:$0xff]   ;;  %v11546_v51 = vld [vmem:[%s15273_s2 + $0x560] ss:$16 sps:$4 sm:$0xff]  }
 0x4f3   : > { %6227 = vmatpush1.bf16.msra.mxu0 %v11474_v45  ;;  %6333 = vmatpush1.bf16.msra.mxu1 %v11477_v35  ;;  %v11549_v45 = vld [vmem:[%s15273_s2 + $0x568] ss:$16 sps:$4 sm:$0xff]   ;;  %v11554_v35 = vld [vmem:[%s15273_s2 + $0x584] ss:$16 sps:$4 sm:$0xff]  }
 0x4f4   : > { %6228 = vmatprep.subr.bf16.mxu0 %v11482_v49  ;;  %6334 = vmatprep.subr.bf16.mxu1 %v11485_v46  ;;  %v11557_v49 = vld [vmem:[%s15273_s2 + $0x58c] ss:$16 sps:$4 sm:$0xff]   ;;  %v11552_v46 = vld [vmem:[%s15273_s2 + $0x580] ss:$16 sps:$4 sm:$0xff]  }
 0x4f7   : > { %6229 = vmatpush1.bf16.msra.mxu0 %v11480_v26  ;;  %6335 = vmatpush1.bf16.msra.mxu1 %v11483_v6  ;;  %v11555_v26 = vld [vmem:[%s15273_s2 + $0x588] ss:$16 sps:$4 sm:$0xff]   ;;  %v11560_v6 = vld [vmem:[%s15273_s2 + $0x5a4] ss:$16 sps:$4 sm:$0xff]  }
 0x4f8   : > { %6251 = vmatprep.subr.bf16.mxu0 %v11488_v32  ;;  %6357 = vmatprep.subr.bf16.mxu1 %v11491_v22  ;;  %v11563_v32 = vld [vmem:[%s15273_s2 + $0x5ac] ss:$16 sps:$4 sm:$0xff]   ;;  %v11558_v22 = vld [vmem:[%s15273_s2 + $0x5a0] ss:$16 sps:$4 sm:$0xff]  }
 0x4fa   : > { %6231 = vmatmul.mubr.bf16.vlgmr.msra.gmra.mrb[164].mxu0 %v14145_v25  ;;  %6337 = vmatmul.mubr.bf16.vlgmr.msra.gmra.mrb[168].mxu1 %v14145_v25 }
 0x4fb   : > { %6240 = vmatprep.mubr.bf16.mxu0 %v14153_v34  ;;  %6346 = vmatprep.mubr.bf16.mxu1 %v14153_v34  ;;  %v6494_v34 = vrot.slane %v14185_v11, 1 }
 0x4fc   : > { %6252 = vmatpush1.bf16.msra.mxu0 %v11486_v12  ;;  %6358 = vmatpush1.bf16.msra.mxu1 %v11489_v47  ;;  %v11561_v12 = vld [vmem:[%s15273_s2 + $0x5a8] ss:$16 sps:$4 sm:$0xff]   ;;  %v11566_v47 = vld [vmem:[%s15273_s2 + $0x5c4] ss:$16 sps:$4 sm:$0xff]  }
 0x4fd   : > { %6853 = vmatprep.subr.bf16.mxu0 %v11494_v31  ;;  %6959 = vmatprep.subr.bf16.mxu1 %v11497_v0  ;;  %v11569_v31 = vld [vmem:[%s15273_s2 + $0x5cc] ss:$16 sps:$4 sm:$0xff]   ;;  %v11564_v0 = vld [vmem:[%s15273_s2 + $0x5c0] ss:$16 sps:$4 sm:$0xff]  }
 0x502   : > { %6241 = vmatmul.mubr.bf16.gmra.mrb[168].mxu0 %v14151_v37  ;;  %6347 = vmatmul.mubr.bf16.gmra.mrb[172].mxu1 %v14151_v37 }
 0x503   : > { %6283 = vmatprep.mubr.bf16.mxu0 %v15311_v59  ;;  %6389 = vmatprep.mubr.bf16.mxu1 %v15311_v59 }
 0x50a   : > { %9664 = vmatmul.mubr.msk.bf16.vlgmr.msra.gmra.mrb[164].mxu0 %vm5635_vm3, %v14185_v11  ;;  %9666 = vmatmul.mubr.msk.bf16.vlgmr.msra.gmra.mrb[168].mxu1 %vm5635_vm3, %v14185_v11  ;;  %v11594_v11 = vld [vmem:[%s15274_s3 + $0x200] ss:$16 sps:$4 sm:$0xff]  }
 0x50b   : > { %6854 = vmatpush1.bf16.msra.mxu0 %v11492_v53  ;;  %6960 = vmatpush1.bf16.msra.mxu1 %v11495_v23  ;;  %v11567_v53 = vld [vmem:[%s15273_s2 + $0x5c8] ss:$16 sps:$4 sm:$0xff]   ;;  %v11572_v23 = vld [vmem:[%s15273_s2 + $0x5e4] ss:$16 sps:$4 sm:$0xff]  }
 0x50c   : > { %6855 = vmatprep.subr.bf16.mxu0 %v11500_v29  ;;  %6961 = vmatprep.subr.bf16.mxu1 %v11503_v8  ;;  %v11575_v29 = vld [vmem:[%s15273_s2 + $0x5ec] ss:$16 sps:$4 sm:$0xff]   ;;  %v11570_v8 = vld [vmem:[%s15273_s2 + $0x5e0] ss:$16 sps:$4 sm:$0xff]  }
 0x50d   : > { %6293 = vmatprep.mubr.bf16.mxu0 %v15311_v59  ;;  %6399 = vmatprep.mubr.bf16.mxu1 %v15311_v59 }
 0x50f   : > { %6856 = vmatpush1.bf16.msra.mxu0 %v11498_v10  ;;  %6962 = vmatpush1.bf16.msra.mxu1 %v11501_v44  ;;  %v11573_v10 = vld [vmem:[%s15273_s2 + $0x5e8] ss:$16 sps:$4 sm:$0xff]   ;;  %v11578_v44 = vld [vmem:[%s15273_s2 + $0x604] ss:$16 sps:$4 sm:$0xff]  }
 0x510   : > { %6857 = vmatprep.subr.bf16.mxu0 %v11506_v19  ;;  %6963 = vmatprep.subr.bf16.mxu1 %v11509_v56  ;;  %v11581_v19 = vld [vmem:[%s15273_s2 + $0x60c] ss:$16 sps:$4 sm:$0xff]   ;;  %v11576_v56 = vld [vmem:[%s15273_s2 + $0x600] ss:$16 sps:$4 sm:$0xff]  }
 0x512   : > { %9665 = vmatmul.mubr.msk.bf16.gmra.mrb[168].mxu0 %vm5635_vm3, %v14188_v62  ;;  %9667 = vmatmul.mubr.msk.bf16.gmra.mrb[172].mxu1 %vm5635_vm3, %v14188_v62 }
 0x513   : > { %6858 = vmatpush1.bf16.msra.mxu0 %v11504_v58  ;;  %6964 = vmatpush1.bf16.msra.mxu1 %v11507_v20  ;;  %v11579_v58 = vld [vmem:[%s15273_s2 + $0x608] ss:$16 sps:$4 sm:$0xff]   ;;  %v11584_v20 = vld [vmem:[%s15273_s2 + $0x624] ss:$16 sps:$4 sm:$0xff]  }
 0x514   : > { %6885 = vmatprep.mubr.bf16.mxu0 %v6493_v28  ;;  %6991 = vmatprep.mubr.bf16.mxu1 %v6493_v28  ;;  %v11590_v28 = vld [vmem:[%s15273_s2 + $0x644] ss:$16 sps:$4 sm:$0xff]  }
 0x515   : > { %6859 = vmatprep.subr.bf16.mxu0 %v11512_v13  ;;  %6965 = vmatprep.subr.bf16.mxu1 %v11515_v42  ;;  %v11582_v13 = vld [vmem:[%s15273_s2 + $0x620] ss:$16 sps:$4 sm:$0xff]   ;;  %v11585_v42 = vld [vmem:[%s15273_s2 + $0x628] ss:$16 sps:$4 sm:$0xff]  }
 0x517   : > { %6860 = vmatpush1.bf16.msra.mxu0 %v11510_v4  ;;  %6966 = vmatpush1.bf16.msra.mxu1 %v11513_v1  ;;  %v11593_v4 = vld [vmem:[%s15273_s2 + $0x64c] ss:$16 sps:$4 sm:$0xff]   ;;  %v6489_v1 = vrot.slane %v14151_v37, 1 }
 0x518   : > { %6861 = vmatprep.subr.bf16.mxu0 %v11518_v57  ;;  %6967 = vmatprep.subr.bf16.mxu1 %v11521_v63  ;;  %v6499_v57 = vrot.slane %v14167_v30, 1  ;;  %v6488_v63 = vrot.slane %v14145_v25, 1  ;;  %v6497_v25 = vrot.slane %v14159_v54, 1  ;;  %v6501_v54 = vrot.slane %v14204_v2, 1  ;;  %v11602_v2 = vld [vmem:[%s15274_s3 + $0x224] ss:$16 sps:$4 sm:$0xff]  }
 0x51a   : > { %v6500_v37 = vsel %vm1181_vm4, %v6492_v16, %v6499_v57  ;;  %v6498_v30 = vsel %vm1181_vm4, %v6489_v1, %v6497_v25 }
 0x51b   : > { %6862 = vmatpush1.bf16.msra.mxu0 %v11516_v24  ;;  %6968 = vmatpush1.bf16.msra.mxu1 %v11519_v52  ;;  %v11588_v24 = vld [vmem:[%s15273_s2 + $0x640] ss:$16 sps:$4 sm:$0xff]   ;;  %v11591_v52 = vld [vmem:[%s15273_s2 + $0x648] ss:$16 sps:$4 sm:$0xff]  }
 0x51c   : > { %6863 = vmatprep.subr.bf16.mxu0 %v11524_v38  ;;  %6969 = vmatprep.subr.bf16.mxu1 %v11527_v61  ;;  %v6490_v38 = vsel %vm1181_vm4, %v6488_v63, %v6489_v1  ;;  %v6495_v61 = vrot.slane %v14188_v62, 1  ;;  %v11596_v62 = vld [vmem:[%s15274_s3 + $0x204] ss:$16 sps:$4 sm:$0xff]  }
 0x51e   : > { %v6496_v16 = vsel %vm1181_vm4, %v6494_v34, %v6495_v61 }
 0x51f   : > { %6864 = vmatpush1.bf16.msra.mxu0 %v11522_v7  ;;  %6970 = vmatpush1.bf16.msra.mxu1 %v11525_v60  ;;  %v6502_v7 = vsel %vm1181_vm4, %v6495_v61, %v6501_v54  ;;  %v11600_v60 = vld [vmem:[%s15274_s3 + $0x220] ss:$16 sps:$4 sm:$0xff]   ;;  %vm8749_vm4 = vcmask 1043456  }
 0x520   : > { %6865 = vmatprep.subr.bf16.mxu0 %v11530_v9  ;;  %6971 = vmatprep.subr.bf16.mxu1 %v11533_v15  ;;  %v11608_v9 = vld [vmem:[%s15274_s3 + $0x244] ss:$16 sps:$4 sm:$0xff]   ;;  %v11606_v15 = vld [vmem:[%s15274_s3 + $0x240] ss:$16 sps:$4 sm:$0xff]   ;;  %vm8751_vm8 = vmor %vm8750_vm6, %vm8749_vm4 }
 0x523   : > { %6866 = vmatpush1.bf16.msra.mxu0 %v11528_v27  ;;  %6972 = vmatpush1.bf16.msra.mxu1 %v11531_v48  ;;  %v11614_v27 = vld [vmem:[%s15274_s3 + $0x264] ss:$16 sps:$4 sm:$0xff]   ;;  %v11612_v48 = vld [vmem:[%s15274_s3 + $0x260] ss:$16 sps:$4 sm:$0xff]  }
 0x524   : > { %6867 = vmatprep.subr.bf16.mxu0 %v11536_v14  ;;  %6973 = vmatprep.subr.bf16.mxu1 %v11539_v39  ;;  %v11620_v14 = vld [vmem:[%s15274_s3 + $0x284] ss:$16 sps:$4 sm:$0xff]   ;;  %v11618_v39 = vld [vmem:[%s15274_s3 + $0x280] ss:$16 sps:$4 sm:$0xff]  }
 0x527   : > { %6868 = vmatpush1.bf16.msra.mxu0 %v11534_v21  ;;  %6974 = vmatpush1.bf16.msra.mxu1 %v11537_v36  ;;  %v11626_v21 = vld [vmem:[%s15274_s3 + $0x2a4] ss:$16 sps:$4 sm:$0xff]   ;;  %v11624_v36 = vld [vmem:[%s15274_s3 + $0x2a0] ss:$16 sps:$4 sm:$0xff]  }
 0x528   : > { %6869 = vmatprep.subr.bf16.mxu0 %v11542_v55  ;;  %6975 = vmatprep.subr.bf16.mxu1 %v11545_v3  ;;  %v11632_v55 = vld [vmem:[%s15274_s3 + $0x2c4] ss:$16 sps:$4 sm:$0xff]   ;;  %v11630_v3 = vld [vmem:[%s15274_s3 + $0x2c0] ss:$16 sps:$4 sm:$0xff]  }
 0x52b   : > { %6870 = vmatpush1.bf16.msra.mxu0 %v11540_v40  ;;  %6976 = vmatpush1.bf16.msra.mxu1 %v11543_v41  ;;  %v11638_v40 = vld [vmem:[%s15274_s3 + $0x2e4] ss:$16 sps:$4 sm:$0xff]   ;;  %v11636_v41 = vld [vmem:[%s15274_s3 + $0x2e0] ss:$16 sps:$4 sm:$0xff]  }
 0x52c   : > { %6871 = vmatprep.subr.bf16.mxu0 %v11548_v5  ;;  %6977 = vmatprep.subr.bf16.mxu1 %v11551_v50  ;;  %v11644_v5 = vld [vmem:[%s15274_s3 + $0x304] ss:$16 sps:$4 sm:$0xff]   ;;  %v11642_v50 = vld [vmem:[%s15274_s3 + $0x300] ss:$16 sps:$4 sm:$0xff]  }
 0x52f   : > { %6872 = vmatpush1.bf16.msra.mxu0 %v11546_v51  ;;  %6978 = vmatpush1.bf16.msra.mxu1 %v11549_v45  ;;  %v11650_v51 = vld [vmem:[%s15274_s3 + $0x324] ss:$16 sps:$4 sm:$0xff]   ;;  %v11648_v45 = vld [vmem:[%s15274_s3 + $0x320] ss:$16 sps:$4 sm:$0xff]  }
 0x530   : > { %6873 = vmatprep.subr.bf16.mxu0 %v11554_v35  ;;  %6979 = vmatprep.subr.bf16.mxu1 %v11557_v49  ;;  %v11656_v35 = vld [vmem:[%s15274_s3 + $0x344] ss:$16 sps:$4 sm:$0xff]   ;;  %v11654_v49 = vld [vmem:[%s15274_s3 + $0x340] ss:$16 sps:$4 sm:$0xff]  }
 0x533   : > { %6874 = vmatpush1.bf16.msra.mxu0 %v11552_v46  ;;  %6980 = vmatpush1.bf16.msra.mxu1 %v11555_v26  ;;  %v11662_v46 = vld [vmem:[%s15274_s3 + $0x364] ss:$16 sps:$4 sm:$0xff]   ;;  %v11660_v26 = vld [vmem:[%s15274_s3 + $0x360] ss:$16 sps:$4 sm:$0xff]  }
 0x534   : > { %6875 = vmatprep.subr.bf16.mxu0 %v11560_v6  ;;  %6981 = vmatprep.subr.bf16.mxu1 %v11563_v32  ;;  %v7081_v6 = vld [vmem:[%s15276_s5] sm:$0xf] }
 0x535   : > { %v15316_v32 = vld [vmem:[#allocation2_spill] sm:$0xff] }
 0x537   : > { %6876 = vmatpush1.bf16.msra.mxu0 %v11558_v22  ;;  %6982 = vmatpush1.bf16.msra.mxu1 %v11561_v12  ;;  %v7086_v22 = vrot.slane %v7081_v6, %v15316_v32  ;;  %v15317_v12 = vld [vmem:[#allocation3_spill] sm:$0xff] }
 0x538   : > { %6877 = vmatprep.subr.bf16.mxu0 %v11566_v47  ;;  %6983 = vmatprep.subr.bf16.mxu1 %v11569_v31  ;;  %v7094_v47 = vrot.slane %v7081_v6, %v15317_v12  ;;  %v15318_v31 = vld [vmem:[#allocation4_spill] sm:$0xff] }
 0x53b   : > { %6878 = vmatpush1.bf16.msra.mxu0 %v11564_v0  ;;  %6984 = vmatpush1.bf16.msra.mxu1 %v11567_v53  ;;  %v7090_v0 = vrot.slane %v7081_v6, %v15318_v31  ;;  %v7098_v53 = vrot.slane %v7081_v6, %v13632_v43 }
 0x53c   : > { %6879 = vmatprep.subr.bf16.mxu0 %v11572_v23  ;;  %6985 = vmatprep.subr.bf16.mxu1 %v11575_v29 }
 0x53f   : > { %6880 = vmatpush1.bf16.msra.mxu0 %v11570_v8  ;;  %6986 = vmatpush1.bf16.msra.mxu1 %v11573_v10 }
 0x540   : > { %6881 = vmatprep.subr.bf16.mxu0 %v11578_v44  ;;  %6987 = vmatprep.subr.bf16.mxu1 %v11581_v19 }
 0x543   : > { %6882 = vmatpush1.bf16.msra.mxu0 %v11576_v56  ;;  %6988 = vmatpush1.bf16.msra.mxu1 %v11579_v58 }
 0x544   : > { %6883 = vmatprep.subr.bf16.mxu0 %v11584_v20  ;;  %6989 = vmatprep.subr.bf16.mxu1 %v11587_v17 }
 0x547   : > { %6884 = vmatpush1.bf16.msra.mxu0 %v11582_v13  ;;  %6990 = vmatpush1.bf16.msra.mxu1 %v11585_v42 }
 0x548   : > { %6906 = vmatprep.subr.bf16.mxu0 %v11590_v28  ;;  %7012 = vmatprep.subr.bf16.mxu1 %v11593_v4 }
 0x54a   : > { %6886 = vmatmul.mubr.bf16.vlgmr.msra.gmra.mrb[164].mxu0 %v6490_v38  ;;  %6992 = vmatmul.mubr.bf16.vlgmr.msra.gmra.mrb[168].mxu1 %v6490_v38 }
 0x54b   : > { %6895 = vmatprep.mubr.bf16.mxu0 %v6500_v37  ;;  %7001 = vmatprep.mubr.bf16.mxu1 %v6500_v37 }
 0x54c   : > { %6907 = vmatpush1.bf16.msra.mxu0 %v11588_v24  ;;  %7013 = vmatpush1.bf16.msra.mxu1 %v11591_v52 }
 0x54d   : > { %7709 = vmatprep.subr.bf16.mxu1 %v11596_v62 }
 0x552   : > { %6896 = vmatmul.mubr.bf16.gmra.mrb[168].mxu0 %v6498_v30  ;;  %7002 = vmatmul.mubr.bf16.gmra.mrb[172].mxu1 %v6498_v30 }
 0x553   : > { %6938 = vmatprep.mubr.bf16.mxu0 %v15311_v59  ;;  %7044 = vmatprep.mubr.bf16.mxu1 %v15311_v59 }
 0x55a   : > { %9804 = vmatmul.mubr.msk.bf16.vlgmr.msra.gmra.mrb[164].mxu0 %vm5635_vm3, %v6496_v16  ;;  %9806 = vmatmul.mubr.msk.bf16.vlgmr.msra.gmra.mrb[168].mxu1 %vm5635_vm3, %v6496_v16 }
 0x55b   : > { %6948 = vmatprep.mubr.bf16.mxu0 %v15311_v59  ;;  %7054 = vmatprep.mubr.bf16.mxu1 %v15311_v59 }
 0x55c   : > { %7710 = vmatpush1.bf16.msra.mxu1 %v11594_v11 }
 0x55d   : > { %7711 = vmatprep.subr.bf16.mxu1 %v11602_v2 }
 0x560   : > { %7712 = vmatpush1.bf16.msra.mxu1 %v11600_v60 }
 0x561   : > { %7713 = vmatprep.subr.bf16.mxu1 %v11608_v9 }
 0x562   : > { %9805 = vmatmul.mubr.msk.bf16.gmra.mrb[168].mxu0 %vm5635_vm3, %v6502_v7  ;;  %9807 = vmatmul.mubr.msk.bf16.gmra.mrb[172].mxu1 %vm5635_vm3, %v6502_v7 }
 0x563   : > { %7182 = vmatprep.mubr.bf16.mxu0 %v15311_v59 }
 0x564   : > { %7714 = vmatpush1.bf16.msra.mxu1 %v11606_v15 }
 0x565   : > { %7715 = vmatprep.subr.bf16.mxu1 %v11614_v27 }
 0x568   : > { %7716 = vmatpush1.bf16.msra.mxu1 %v11612_v48 }
 0x569   : > { %7717 = vmatprep.subr.bf16.mxu1 %v11620_v14 }
 0x56c   : > { %7718 = vmatpush1.bf16.msra.mxu1 %v11618_v39 }
 0x56d   : > { %7719 = vmatprep.subr.bf16.mxu1 %v11626_v21 }
 0x570   : > { %7720 = vmatpush1.bf16.msra.mxu1 %v11624_v36 }
 0x571   : > { %7721 = vmatprep.subr.bf16.mxu1 %v11632_v55 }
 0x574   : > { %7722 = vmatpush1.bf16.msra.mxu1 %v11630_v3 }
 0x575   : > { %7723 = vmatprep.subr.bf16.mxu1 %v11638_v40 }
 0x578   : > { %7724 = vmatpush1.bf16.msra.mxu1 %v11636_v41 }
 0x579   : > { %7725 = vmatprep.subr.bf16.mxu1 %v11644_v5 }
 0x57c   : > { %7726 = vmatpush1.bf16.msra.mxu1 %v11642_v50 }
 0x57d   : > { %7727 = vmatprep.subr.bf16.mxu1 %v11650_v51 }
 0x580   : > { %7728 = vmatpush1.bf16.msra.mxu1 %v11648_v45 }
 0x581   : > { %7729 = vmatprep.subr.bf16.mxu1 %v11656_v35 }
 0x584   : > { %7730 = vmatpush1.bf16.msra.mxu1 %v11654_v49 }
 0x585   : > { %7731 = vmatprep.subr.bf16.mxu1 %v11662_v46 }
 0x588   : > { %7732 = vmatpush1.bf16.msra.mxu1 %v11660_v26 }
 0x62d   : > { %v6940_v23 = vpop.f32.mrb[164].mxu0  ;;  %v7046_v29 = vpop.f32.mrb[168].mxu1 }
 0x62e   : > { %v7103_v8 = vadd.f32 %v7086_v22, %v6940_v23  ;;  %v7105_v10 = vadd.f32 %v7094_v47, %v7046_v29  ;;  %v6942_v44 = vpop.f32.mrb[165].mxu0  ;;  %v7048_v19 = vpop.f32.mrb[169].mxu1 }
 0x62f   : > { %v7104_v56 = vadd.f32 %v7090_v0, %v6942_v44  ;;  %v7106_v58 = vadd.f32 %v7098_v53, %v7048_v19  ;;  %v6944_v20 = vpop.f32.mrb[166].mxu0  ;;  %v7050_v17 = vpop.f32.mrb[170].mxu1 }
 0x630   : > { %v7119_v13 = vmax.f32 %v7103_v8, 0.0  ;;  %v7121_v42 = vmax.f32 %v7105_v10, 0.0  ;;  %v7107_v28 = vadd.f32 %v7086_v22, %v6944_v20  ;;  %v7109_v4 = vadd.f32 %v7094_v47, %v7050_v17  ;;  %v6946_v1 = vpop.f32.mrb[167].mxu0  ;;  %v7052_v57 = vpop.f32.mrb[171].mxu1  ;;  %v11623_v20 = vld [vmem:[%s15274_s3 + $0x28c] ss:$16 sps:$4 sm:$0xff]  }
 0x631   : > { %v7120_v63 = vmax.f32 %v7104_v56, 0.0  ;;  %v7122_v24 = vmax.f32 %v7106_v58, 0.0  ;;  %v7108_v52 = vadd.f32 %v7090_v0, %v6946_v1  ;;  %v7110_v38 = vadd.f32 %v7098_v53, %v7052_v57  ;;  %v11615_v58 = vld [vmem:[%s15274_s3 + $0x268] ss:$16 sps:$4 sm:$0xff]   ;;  %v11641_v1 = vld [vmem:[%s15274_s3 + $0x2ec] ss:$16 sps:$4 sm:$0xff]  }
 0x632   : > { %v7135_v37 = vmax.f32 %v7119_v13, %v7121_v42  ;;  %v7123_v25 = vmax.f32 %v7107_v28, 0.0  ;;  %v7125_v30 = vmax.f32 %v7109_v4, 0.0  ;;  %v11621_v17 = vld [vmem:[%s15274_s3 + $0x288] ss:$16 sps:$4 sm:$0xff]   ;;  %v11629_v13 = vld [vmem:[%s15274_s3 + $0x2ac] ss:$16 sps:$4 sm:$0xff]  }
 0x633   : > { %v7136_v61 = vmax.f32 %v7120_v63, %v7122_v24  ;;  %v7124_v34 = vmax.f32 %v7108_v52, 0.0  ;;  %v7126_v16 = vmax.f32 %v7110_v38, 0.0  ;;  %v11627_v42 = vld [vmem:[%s15274_s3 + $0x2a8] ss:$16 sps:$4 sm:$0xff]   ;;  %v11635_v28 = vld [vmem:[%s15274_s3 + $0x2cc] ss:$16 sps:$4 sm:$0xff]  }
 0x634   : > { %v7137_v54 = vmax.f32 %v7123_v25, %v7125_v30  ;;  %v11633_v4 = vld [vmem:[%s15274_s3 + $0x2c8] ss:$16 sps:$4 sm:$0xff]   ;;  %v11647_v63 = vld [vmem:[%s15274_s3 + $0x30c] ss:$16 sps:$4 sm:$0xff]  }
 0x635   : > { %v7138_v7 = vmax.f32 %v7124_v34, %v7126_v16  ;;  %v6950_v11 = vpop.f32.mrb[168].mxu0  ;;  %v7056_v62 = vpop.f32.mrb[172].mxu1  ;;  %v11639_v57 = vld [vmem:[%s15274_s3 + $0x2e8] ss:$16 sps:$4 sm:$0xff]   ;;  %v11653_v52 = vld [vmem:[%s15274_s3 + $0x32c] ss:$16 sps:$4 sm:$0xff]  }
 0x636   : > { %v7143_v2 = vpack.c.bf16 %v7137_v54, %v7135_v37  ;;  %v7111_v60 = vadd.f32 %v7086_v22, %v6950_v11  ;;  %v7113_v9 = vadd.f32 %v7094_v47, %v7056_v62  ;;  %v6952_v15 = vpop.f32.mrb[169].mxu0  ;;  %v7058_v27 = vpop.f32.mrb[173].mxu1  ;;  %v11645_v24 = vld [vmem:[%s15274_s3 + $0x308] ss:$16 sps:$4 sm:$0xff]   ;;  %v11659_v37 = vld [vmem:[%s15274_s3 + $0x34c] ss:$16 sps:$4 sm:$0xff]  }
 0x637   : > { %v7112_v48 = vadd.f32 %v7090_v0, %v6952_v15  ;;  %v7114_v14 = vadd.f32 %v7098_v53, %v7058_v27  ;;  %v6954_v39 = vpop.f32.mrb[170].mxu0  ;;  %v7060_v21 = vpop.f32.mrb[174].mxu1  ;;  %v7144_v36 = vpack.c.bf16 %v7138_v7, %v7136_v61  ;;  %v11651_v38 = vld [vmem:[%s15274_s3 + $0x328] ss:$16 sps:$4 sm:$0xff]   ;;  %v11665_v30 = vld [vmem:[%s15274_s3 + $0x36c] ss:$16 sps:$4 sm:$0xff]  }
 0x638   : > { %v7127_v55 = vmax.f32 %v7111_v60, 0.0  ;;  %v7129_v3 = vmax.f32 %v7113_v9, 0.0  ;;  %v7115_v40 = vadd.f32 %v7086_v22, %v6954_v39  ;;  %v7117_v41 = vadd.f32 %v7094_v47, %v7060_v21  ;;  %v6956_v5 = vpop.f32.mrb[171].mxu0  ;;  %v7062_v50 = vpop.f32.mrb[175].mxu1  ;;  %v11599_v22 = vld [vmem:[%s15274_s3 + $0x20c] ss:$16 sps:$4 sm:$0xff]  }
 0x639   : > { %v7128_v51 = vmax.f32 %v7112_v48, 0.0  ;;  %v7130_v45 = vmax.f32 %v7114_v14, 0.0  ;;  %v7116_v35 = vadd.f32 %v7090_v0, %v6956_v5  ;;  %v7118_v49 = vadd.f32 %v7098_v53, %v7062_v50  ;;  %7150 = vmatprep.subr.bf16.mxu0 %v7144_v36  ;;  %v11597_v47 = vld [vmem:[%s15274_s3 + $0x208] ss:$16 sps:$4 sm:$0xff]   ;;  %v11605_v0 = vld [vmem:[%s15274_s3 + $0x22c] ss:$16 sps:$4 sm:$0xff]  }
 0x63a   : > { %v7139_v46 = vmax.f32 %v7127_v55, %v7129_v3  ;;  %v7131_v26 = vmax.f32 %v7115_v40, 0.0  ;;  %v7133_v6 = vmax.f32 %v7117_v41, 0.0  ;;  %7151 = vmatpush1.bf16.msra.mxu0 %v7143_v2  ;;  %v11609_v53 = vld [vmem:[%s15274_s3 + $0x248] ss:$16 sps:$4 sm:$0xff]   ;;  %v11666_v34 = vld [vmem:[%s15274_s3 + $0x380] ss:$16 sps:$4 sm:$0xff]  }
 0x63b   : > { %v7140_v23 = vmax.f32 %v7128_v51, %v7130_v45  ;;  %v7132_v29 = vmax.f32 %v7116_v35, 0.0  ;;  %v7134_v8 = vmax.f32 %v7118_v49, 0.0  ;;  %v11657_v25 = vld [vmem:[%s15274_s3 + $0x348] ss:$16 sps:$4 sm:$0xff]   ;;  %v11668_v16 = vld [vmem:[%s15274_s3 + $0x384] ss:$16 sps:$4 sm:$0xff]  }
 0x63c   : > { %v7141_v10 = vmax.f32 %v7131_v26, %v7133_v6  ;;  %v11663_v61 = vld [vmem:[%s15274_s3 + $0x368] ss:$16 sps:$4 sm:$0xff]   ;;  %v11671_v7 = vld [vmem:[%s15274_s3 + $0x38c] ss:$16 sps:$4 sm:$0xff]   ;;  %7733 = vmatprep.subr.bf16.mxu1 %v11668_v16  ;;  %v11674_v11 = vld [vmem:[%s15274_s3 + $0x3a4] ss:$16 sps:$4 sm:$0xff]  }
 0x63d   : > { %v7142_v44 = vmax.f32 %v7132_v29, %v7134_v8  ;;  %v11669_v54 = vld [vmem:[%s15274_s3 + $0x388] ss:$16 sps:$4 sm:$0xff]   ;;  %7734 = vmatpush1.bf16.msra.mxu1 %v11666_v34  ;;  %v11677_v62 = vld [vmem:[%s15274_s3 + $0x3ac] ss:$16 sps:$4 sm:$0xff]   ;;  %v11680_v9 = vld [vmem:[%s15274_s3 + $0x3c4] ss:$16 sps:$4 sm:$0xff]  }
 0x63e   : > { %v7145_v19 = vpack.c.bf16 %v7141_v10, %v7139_v46  ;;  %v11675_v60 = vld [vmem:[%s15274_s3 + $0x3a8] ss:$16 sps:$4 sm:$0xff]   ;;  %7735 = vmatprep.subr.bf16.mxu1 %v11674_v11  ;;  %v11683_v15 = vld [vmem:[%s15274_s3 + $0x3cc] ss:$16 sps:$4 sm:$0xff]   ;;  %v11678_v27 = vld [vmem:[%s15274_s3 + $0x3c0] ss:$16 sps:$4 sm:$0xff]  }
 0x63f   : > { %v7146_v56 = vpack.c.bf16 %v7142_v44, %v7140_v23  ;;  %v11681_v48 = vld [vmem:[%s15274_s3 + $0x3c8] ss:$16 sps:$4 sm:$0xff]   ;;  %v11686_v14 = vld [vmem:[%s15274_s3 + $0x3e4] ss:$16 sps:$4 sm:$0xff]   ;;  %v11684_v39 = vld [vmem:[%s15274_s3 + $0x3e0] ss:$16 sps:$4 sm:$0xff]  }
 0x640   : > { %v11687_v21 = vld [vmem:[%s15274_s3 + $0x3e8] ss:$16 sps:$4 sm:$0xff]   ;;  %v11692_v55 = vld [vmem:[%s15274_s3 + $0x4] ss:$16 sps:$4 sm:$0xff]   ;;  %v11695_v3 = vld [vmem:[%s15274_s3 + $0xc] ss:$16 sps:$4 sm:$0xff]  }
 0x641   : > { %7152 = vmatprep.subr.bf16.mxu0 %v7146_v56  ;;  %v11720_v34 = vld [vmem:[%s15274_s3 + $0xa0] ss:$16 sps:$4 sm:$0xff]   ;;  %v11723_v16 = vld [vmem:[%s15274_s3 + $0xa8] ss:$16 sps:$4 sm:$0xff]  }
 0x642   : > { %7153 = vmatpush1.bf16.msra.mxu0 %v7145_v19  ;;  %v11726_v11 = vld [vmem:[%s15274_s3 + $0xc0] ss:$16 sps:$4 sm:$0xff]  }
 0x643   : > { %7195 = vmatprep.subr.bf16.mxu0 %v7144_v36  ;;  %v11689_v36 = vld [vmem:[%s15274_s3 + $0x3ec] ss:$16 sps:$4 sm:$0xff]  }
 0x645   : > { %9808 = vmatmul.mubr.msk.bf16.vlgmr.msra.gmra.mrb[172].mxu0 %vm7147_vm1, %v13844_v33  ;;  %v11603_v33 = vld [vmem:[%s15274_s3 + $0x228] ss:$16 sps:$4 sm:$0xff]  }
 0x646   : > { %7196 = vmatpush1.bf16.msra.mxu0 %v7143_v2  ;;  %7227 = vmatprep.mubr.bf16.mxu0 %v15311_v59  ;;  %v11611_v59 = vld [vmem:[%s15274_s3 + $0x24c] ss:$16 sps:$4 sm:$0xff]   ;;  %v11672_v2 = vld [vmem:[%s15274_s3 + $0x3a0] ss:$16 sps:$4 sm:$0xff]  }
 0x647   : > { %7197 = vmatprep.subr.bf16.mxu0 %v7146_v56  ;;  %7736 = vmatpush1.bf16.msra.mxu1 %v11672_v2  ;;  %v11734_v2 = vld [vmem:[%s15274_s3 + $0xe4] ss:$16 sps:$4 sm:$0xff]  }
 0x648   : > { %7737 = vmatprep.subr.bf16.mxu1 %v11680_v9  ;;  %v11732_v9 = vld [vmem:[%s15274_s3 + $0xe0] ss:$16 sps:$4 sm:$0xff]  }
 0x64a   : > { %7198 = vmatpush1.bf16.msra.mxu0 %v7145_v19 }
 0x64b   : > { %7752 = vmatprep.subr.bf16.mxu0 %v11599_v22  ;;  %7738 = vmatpush1.bf16.msra.mxu1 %v11678_v27  ;;  %v11740_v27 = vld [vmem:[%s15274_s3 + $0x104] ss:$16 sps:$4 sm:$0xff]  }
 0x64c   : > { %7739 = vmatprep.subr.bf16.mxu1 %v11686_v14  ;;  %v11738_v14 = vld [vmem:[%s15274_s3 + $0x100] ss:$16 sps:$4 sm:$0xff]  }
 0x64d   : > { %9809 = vmatmul.mubr.msk.bf16.vlgmr.msra.gmra.mrb[176].mxu0 %vm7147_vm1, %v13846_v18  ;;  %v11617_v18 = vld [vmem:[%s15274_s3 + $0x26c] ss:$16 sps:$4 sm:$0xff]  }
 0x64e   : > { %7753 = vmatpush1.bf16.msra.mxu0 %v11597_v47 }
 0x64f   : > { %7754 = vmatprep.subr.bf16.mxu0 %v11605_v0  ;;  %7740 = vmatpush1.bf16.msra.mxu1 %v11684_v39  ;;  %v11741_v39 = vld [vmem:[%s15274_s3 + $0x108] ss:$16 sps:$4 sm:$0xff]  }
 0x650   : > { %8115 = vmatprep.subr.bf16.mxu1 %v11692_v55  ;;  %v11744_v55 = vld [vmem:[%s15274_s3 + $0x120] ss:$16 sps:$4 sm:$0xff]  }
 0x652   : > { %7755 = vmatpush1.bf16.msra.mxu0 %v11603_v33  ;;  %v11690_v33 = vld [vmem:[%s15274_s3] ss:$16 sps:$4 sm:$0xff]  }
 0x653   : > { %7756 = vmatprep.subr.bf16.mxu0 %v11611_v59  ;;  %v11693_v59 = vld [vmem:[%s15274_s3 + $0x8] ss:$16 sps:$4 sm:$0xff]  }
 0x656   : > { %7757 = vmatpush1.bf16.msra.mxu0 %v11609_v53 }
 0x657   : > { %7758 = vmatprep.subr.bf16.mxu0 %v11617_v18  ;;  %v11698_v18 = vld [vmem:[%s15274_s3 + $0x24] ss:$16 sps:$4 sm:$0xff]  }
 0x65a   : > { %7759 = vmatpush1.bf16.msra.mxu0 %v11615_v58  ;;  %v11701_v58 = vld [vmem:[%s15274_s3 + $0x2c] ss:$16 sps:$4 sm:$0xff]  }
 0x65b   : > { %7760 = vmatprep.subr.bf16.mxu0 %v11623_v20  ;;  %v11696_v20 = vld [vmem:[%s15274_s3 + $0x20] ss:$16 sps:$4 sm:$0xff]  }
 0x65e   : > { %7761 = vmatpush1.bf16.msra.mxu0 %v11621_v17  ;;  %v11699_v17 = vld [vmem:[%s15274_s3 + $0x28] ss:$16 sps:$4 sm:$0xff]  }
 0x65f   : > { %7762 = vmatprep.subr.bf16.mxu0 %v11629_v13  ;;  %v11704_v13 = vld [vmem:[%s15274_s3 + $0x44] ss:$16 sps:$4 sm:$0xff]  }
 0x662   : > { %7763 = vmatpush1.bf16.msra.mxu0 %v11627_v42  ;;  %v11707_v42 = vld [vmem:[%s15274_s3 + $0x4c] ss:$16 sps:$4 sm:$0xff]  }
 0x663   : > { %7764 = vmatprep.subr.bf16.mxu0 %v11635_v28  ;;  %v11702_v28 = vld [vmem:[%s15274_s3 + $0x40] ss:$16 sps:$4 sm:$0xff]  }
 0x666   : > { %7765 = vmatpush1.bf16.msra.mxu0 %v11633_v4  ;;  %v11705_v4 = vld [vmem:[%s15274_s3 + $0x48] ss:$16 sps:$4 sm:$0xff]  }
 0x667   : > { %7766 = vmatprep.subr.bf16.mxu0 %v11641_v1  ;;  %v11710_v1 = vld [vmem:[%s15274_s3 + $0x64] ss:$16 sps:$4 sm:$0xff]  }
 0x66a   : > { %7767 = vmatpush1.bf16.msra.mxu0 %v11639_v57  ;;  %v11713_v57 = vld [vmem:[%s15274_s3 + $0x6c] ss:$16 sps:$4 sm:$0xff]  }
 0x66b   : > { %7768 = vmatprep.subr.bf16.mxu0 %v11647_v63  ;;  %v11708_v63 = vld [vmem:[%s15274_s3 + $0x60] ss:$16 sps:$4 sm:$0xff]  }
 0x66e   : > { %7769 = vmatpush1.bf16.msra.mxu0 %v11645_v24  ;;  %v11711_v24 = vld [vmem:[%s15274_s3 + $0x68] ss:$16 sps:$4 sm:$0xff]  }
 0x66f   : > { %7770 = vmatprep.subr.bf16.mxu0 %v11653_v52  ;;  %v11716_v52 = vld [vmem:[%s15274_s3 + $0x84] ss:$16 sps:$4 sm:$0xff]  }
 0x672   : > { %7771 = vmatpush1.bf16.msra.mxu0 %v11651_v38  ;;  %v11719_v38 = vld [vmem:[%s15274_s3 + $0x8c] ss:$16 sps:$4 sm:$0xff]  }
 0x673   : > { %7772 = vmatprep.subr.bf16.mxu0 %v11659_v37  ;;  %v11714_v37 = vld [vmem:[%s15274_s3 + $0x80] ss:$16 sps:$4 sm:$0xff]  }
 0x676   : > { %7773 = vmatpush1.bf16.msra.mxu0 %v11657_v25  ;;  %v11717_v25 = vld [vmem:[%s15274_s3 + $0x88] ss:$16 sps:$4 sm:$0xff]  }
 0x677   : > { %7774 = vmatprep.subr.bf16.mxu0 %v11665_v30  ;;  %v11722_v30 = vld [vmem:[%s15274_s3 + $0xa4] ss:$16 sps:$4 sm:$0xff]  }
 0x67a   : > { %7775 = vmatpush1.bf16.msra.mxu0 %v11663_v61  ;;  %v11725_v61 = vld [vmem:[%s15274_s3 + $0xac] ss:$16 sps:$4 sm:$0xff]  }
 0x67b   : > { %7776 = vmatprep.subr.bf16.mxu0 %v11671_v7  ;;  %v11731_v7 = vld [vmem:[%s15274_s3 + $0xcc] ss:$16 sps:$4 sm:$0xff]  }
 0x67e   : > { %7777 = vmatpush1.bf16.msra.mxu0 %v11669_v54  ;;  %v11728_v54 = vld [vmem:[%s15274_s3 + $0xc4] ss:$16 sps:$4 sm:$0xff]  }
 0x67f   : > { %7778 = vmatprep.subr.bf16.mxu0 %v11677_v62  ;;  %v11729_v62 = vld [vmem:[%s15274_s3 + $0xc8] ss:$16 sps:$4 sm:$0xff]  }
 0x682   : > { %7779 = vmatpush1.bf16.msra.mxu0 %v11675_v60  ;;  %v11737_v60 = vld [vmem:[%s15274_s3 + $0xec] ss:$16 sps:$4 sm:$0xff]  }
 0x683   : > { %7780 = vmatprep.subr.bf16.mxu0 %v11683_v15  ;;  %v11735_v15 = vld [vmem:[%s15274_s3 + $0xe8] ss:$16 sps:$4 sm:$0xff]  }
 0x686   : > { %7781 = vmatpush1.bf16.msra.mxu0 %v11681_v48  ;;  %v11743_v48 = vld [vmem:[%s15274_s3 + $0x10c] ss:$16 sps:$4 sm:$0xff]  }
 0x687   : > { %7782 = vmatprep.subr.bf16.mxu0 %v11689_v36  ;;  %v11749_v36 = vld [vmem:[%s15274_s3 + $0x12c] ss:$16 sps:$4 sm:$0xff]  }
 0x68a   : > { %7783 = vmatpush1.bf16.msra.mxu0 %v11687_v21  ;;  %v11746_v21 = vld [vmem:[%s15274_s3 + $0x124] ss:$16 sps:$4 sm:$0xff]  }
 0x68b   : > { %8158 = vmatprep.subr.bf16.mxu0 %v11695_v3  ;;  %v11747_v3 = vld [vmem:[%s15274_s3 + $0x128] ss:$16 sps:$4 sm:$0xff]  }
 0x718   : > { %v7184_v40 = vpop.f32.mrb[172].mxu0 }
 0x719   : > { %v7186_v41 = vpop.f32.mrb[173].mxu0 }
 0x71a   : > { %v7188_v5 = vpop.f32.mrb[174].mxu0 }
 0x71b   : > { %v7190_v50 = vpop.f32.mrb[175].mxu0 }
 0x720   : > { %v7229_v51 = vpop.f32.mrb[176].mxu0 }
 0x721   : > { %v7238_v45 = vmax.f32 %v7184_v40, %v7229_v51  ;;  %v7231_v35 = vpop.f32.mrb[177].mxu0  ;;  %v11752_v40 = vld [vmem:[%s15274_s3 + $0x144] ss:$16 sps:$4 sm:$0xff]  }
 0x722   : > { %v7239_v49 = vmax.f32 %v7186_v41, %v7231_v35  ;;  %v7233_v46 = vpop.f32.mrb[178].mxu0  ;;  %v11755_v41 = vld [vmem:[%s15274_s3 + $0x14c] ss:$16 sps:$4 sm:$0xff]   ;;  %v11758_v51 = vld [vmem:[%s15274_s3 + $0x164] ss:$16 sps:$4 sm:$0xff]  }
 0x723   : > { %v7240_v26 = vmax.f32 %v7188_v5, %v7233_v46  ;;  %v7235_v6 = vpop.f32.mrb[179].mxu0  ;;  %v11750_v5 = vld [vmem:[%s15274_s3 + $0x140] ss:$16 sps:$4 sm:$0xff]   ;;  %v11764_v46 = vld [vmem:[%s15274_s3 + $0x184] ss:$16 sps:$4 sm:$0xff]  }
 0x724   : > { %v7241_v23 = vmax.f32 %v7190_v50, %v7235_v6  ;;  %v11753_v50 = vld [vmem:[%s15274_s3 + $0x148] ss:$16 sps:$4 sm:$0xff]   ;;  %v11756_v35 = vld [vmem:[%s15274_s3 + $0x160] ss:$16 sps:$4 sm:$0xff]  }
 0x725   : > { %v14862_v29 = vpack.c.bf16 %v7240_v26, %v7238_v45  ;;  %v11761_v45 = vld [vmem:[%s15274_s3 + $0x16c] ss:$16 sps:$4 sm:$0xff]   ;;  %v11762_v6 = vld [vmem:[%s15274_s3 + $0x180] ss:$16 sps:$4 sm:$0xff]  }
 0x726   : > { %v14864_v8 = vpack.c.bf16 %v7241_v23, %v7239_v49  ;;  %v11759_v49 = vld [vmem:[%s15274_s3 + $0x168] ss:$16 sps:$4 sm:$0xff]   ;;  %v11767_v26 = vld [vmem:[%s15274_s3 + $0x18c] ss:$16 sps:$4 sm:$0xff]  }
 0x727   : > { %v7376_v10 = vshll.u32 %v14862_v29, 16  ;;  %v7374_v47 = vshrl.u32 %v14862_v29, 16  ;;  %v11765_v23 = vld [vmem:[%s15274_s3 + $0x188] ss:$16 sps:$4 sm:$0xff]  }
 0x728   : > { %v7383_v44 = vshll.u32 %v14864_v8, 16  ;;  %v7381_v56 = vshrl.u32 %v14864_v8, 16 }
 0x729   : > { %v7378_v19 = vrot.slane %v7376_v10, 1  ;;  %v11770_v10 = vld [vmem:[%s15274_s3 + $0x1a4] ss:$16 sps:$4 sm:$0xff]  }
 0x72a   : > { %v7385_v22 = vrot.slane %v7383_v44, 1  ;;  %v11773_v44 = vld [vmem:[%s15274_s3 + $0x1ac] ss:$16 sps:$4 sm:$0xff]  }
 0x72b   : > { %v7379_v53 = vor.u32 %v7378_v19, %v7374_v47  ;;  %v11768_v19 = vld [vmem:[%s15274_s3 + $0x1a0] ss:$16 sps:$4 sm:$0xff]   ;;  %v11779_v47 = vld [vmem:[%s15274_s3 + $0x1cc] ss:$16 sps:$4 sm:$0xff]  }
 0x72c   : > { %v7386_v0 = vor.u32 %v7385_v22, %v7381_v56  ;;  %v11771_v56 = vld [vmem:[%s15274_s3 + $0x1a8] ss:$16 sps:$4 sm:$0xff]   ;;  %v11776_v22 = vld [vmem:[%s15274_s3 + $0x1c4] ss:$16 sps:$4 sm:$0xff]  }
 0x72e   : > { %7741 = vmatprep.mubr.bf16.mxu1 %v7386_v0  ;;  %7784 = vmatprep.mubr.bf16.mxu0 %v7386_v0  ;;  %v11774_v0 = vld [vmem:[%s15274_s3 + $0x1c0] ss:$16 sps:$4 sm:$0xff]  }
 0x72f   : > { %7742 = vmatmul.mubr.bf16.vlgmr.msra.gmra.mrb[176].mxu1 %v7379_v53  ;;  %7785 = vmatmul.mubr.bf16.vlgmr.msra.gmra.mrb[180].mxu0 %v7379_v53  ;;  %v11785_v53 = vld [vmem:[%s15274_s3 + $0x1ec] ss:$16 sps:$4 sm:$0xff]  }
 0x730   : > { %8116 = vmatpush1.bf16.msra.mxu1 %v11690_v33  ;;  %8159 = vmatpush1.bf16.msra.mxu0 %v11693_v59  ;;  %v11777_v33 = vld [vmem:[%s15274_s3 + $0x1c8] ss:$16 sps:$4 sm:$0xff]   ;;  %v11782_v59 = vld [vmem:[%s15274_s3 + $0x1e4] ss:$16 sps:$4 sm:$0xff]  }
 0x731   : > { %8147 = vmatprep.mubr.bf16.mxu1 %v14864_v8  ;;  %8190 = vmatprep.mubr.bf16.mxu0 %v14864_v8 }
 0x732   : > { %8117 = vmatprep.subr.bf16.mxu1 %v11698_v18  ;;  %8160 = vmatprep.subr.bf16.mxu0 %v11701_v58  ;;  %v11780_v18 = vld [vmem:[%s15274_s3 + $0x1e0] ss:$16 sps:$4 sm:$0xff]   ;;  %v11783_v58 = vld [vmem:[%s15274_s3 + $0x1e8] ss:$16 sps:$4 sm:$0xff]  }
 0x734   : > { %8118 = vmatpush1.bf16.msra.mxu1 %v11696_v20  ;;  %8161 = vmatpush1.bf16.msra.mxu0 %v11699_v17  ;;  %v11788_v20 = vld [vmem:[%s15274_s3 + $0x404] ss:$16 sps:$4 sm:$0xff]   ;;  %v11791_v17 = vld [vmem:[%s15274_s3 + $0x40c] ss:$16 sps:$4 sm:$0xff]  }
 0x735   : > { %8119 = vmatprep.subr.bf16.mxu1 %v11704_v13  ;;  %8162 = vmatprep.subr.bf16.mxu0 %v11707_v42  ;;  %v11786_v13 = vld [vmem:[%s15274_s3 + $0x400] ss:$16 sps:$4 sm:$0xff]   ;;  %v11789_v42 = vld [vmem:[%s15274_s3 + $0x408] ss:$16 sps:$4 sm:$0xff]  }
 0x738   : > { %8120 = vmatpush1.bf16.msra.mxu1 %v11702_v28  ;;  %8163 = vmatpush1.bf16.msra.mxu0 %v11705_v4  ;;  %v8269_v28 = vrot.slane %v14864_v8, 1  ;;  %v11794_v4 = vld [vmem:[%s15274_s3 + $0x424] ss:$16 sps:$4 sm:$0xff]   ;;  %v11795_v8 = vld [vmem:[%s15274_s3 + $0x428] ss:$16 sps:$4 sm:$0xff]  }
 0x739   : > { %8121 = vmatprep.subr.bf16.mxu1 %v11710_v1  ;;  %8164 = vmatprep.subr.bf16.mxu0 %v11713_v57  ;;  %v11797_v1 = vld [vmem:[%s15274_s3 + $0x42c] ss:$16 sps:$4 sm:$0xff]   ;;  %v11792_v57 = vld [vmem:[%s15274_s3 + $0x420] ss:$16 sps:$4 sm:$0xff]  }
 0x73c   : > { %8122 = vmatpush1.bf16.msra.mxu1 %v11708_v63  ;;  %8165 = vmatpush1.bf16.msra.mxu0 %v11711_v24  ;;  %v11800_v63 = vld [vmem:[%s15274_s3 + $0x444] ss:$16 sps:$4 sm:$0xff]   ;;  %v11803_v24 = vld [vmem:[%s15274_s3 + $0x44c] ss:$16 sps:$4 sm:$0xff]  }
 0x73d   : > { %8123 = vmatprep.subr.bf16.mxu1 %v11716_v52  ;;  %8166 = vmatprep.subr.bf16.mxu0 %v11719_v38  ;;  %v11798_v52 = vld [vmem:[%s15274_s3 + $0x440] ss:$16 sps:$4 sm:$0xff]   ;;  %v11801_v38 = vld [vmem:[%s15274_s3 + $0x448] ss:$16 sps:$4 sm:$0xff]  }
 0x740   : > { %8124 = vmatpush1.bf16.msra.mxu1 %v11714_v37  ;;  %8167 = vmatpush1.bf16.msra.mxu0 %v11717_v25  ;;  %v11806_v37 = vld [vmem:[%s15274_s3 + $0x464] ss:$16 sps:$4 sm:$0xff]   ;;  %v11809_v25 = vld [vmem:[%s15274_s3 + $0x46c] ss:$16 sps:$4 sm:$0xff]  }
 0x741   : > { %8125 = vmatprep.subr.bf16.mxu1 %v11722_v30  ;;  %8168 = vmatprep.subr.bf16.mxu0 %v11725_v61  ;;  %v11804_v30 = vld [vmem:[%s15274_s3 + $0x460] ss:$16 sps:$4 sm:$0xff]   ;;  %v11807_v61 = vld [vmem:[%s15274_s3 + $0x468] ss:$16 sps:$4 sm:$0xff]  }
 0x744   : > { %8126 = vmatpush1.bf16.msra.mxu1 %v11720_v34  ;;  %8169 = vmatpush1.bf16.msra.mxu0 %v11723_v16  ;;  %v11812_v34 = vld [vmem:[%s15274_s3 + $0x484] ss:$16 sps:$4 sm:$0xff]   ;;  %v11815_v16 = vld [vmem:[%s15274_s3 + $0x48c] ss:$16 sps:$4 sm:$0xff]  }
 0x745   : > { %8127 = vmatprep.subr.bf16.mxu1 %v11728_v54  ;;  %8170 = vmatprep.subr.bf16.mxu0 %v11731_v7  ;;  %v11810_v54 = vld [vmem:[%s15274_s3 + $0x480] ss:$16 sps:$4 sm:$0xff]   ;;  %v11813_v7 = vld [vmem:[%s15274_s3 + $0x488] ss:$16 sps:$4 sm:$0xff]  }
 0x748   : > { %8128 = vmatpush1.bf16.msra.mxu1 %v11726_v11  ;;  %8171 = vmatpush1.bf16.msra.mxu0 %v11729_v62  ;;  %v11818_v11 = vld [vmem:[%s15274_s3 + $0x4a4] ss:$16 sps:$4 sm:$0xff]   ;;  %v11821_v62 = vld [vmem:[%s15274_s3 + $0x4ac] ss:$16 sps:$4 sm:$0xff]  }
 0x749   : > { %8129 = vmatprep.subr.bf16.mxu1 %v11734_v2  ;;  %8172 = vmatprep.subr.bf16.mxu0 %v11737_v60  ;;  %v11816_v2 = vld [vmem:[%s15274_s3 + $0x4a0] ss:$16 sps:$4 sm:$0xff]   ;;  %v11819_v60 = vld [vmem:[%s15274_s3 + $0x4a8] ss:$16 sps:$4 sm:$0xff]  }
 0x74c   : > { %8130 = vmatpush1.bf16.msra.mxu1 %v11732_v9  ;;  %8173 = vmatpush1.bf16.msra.mxu0 %v11735_v15  ;;  %v11824_v9 = vld [vmem:[%s15274_s3 + $0x4c4] ss:$16 sps:$4 sm:$0xff]   ;;  %v11827_v15 = vld [vmem:[%s15274_s3 + $0x4cc] ss:$16 sps:$4 sm:$0xff]  }
 0x74d   : > { %8131 = vmatprep.subr.bf16.mxu1 %v11740_v27  ;;  %8174 = vmatprep.subr.bf16.mxu0 %v11743_v48  ;;  %v11822_v27 = vld [vmem:[%s15274_s3 + $0x4c0] ss:$16 sps:$4 sm:$0xff]   ;;  %v11825_v48 = vld [vmem:[%s15274_s3 + $0x4c8] ss:$16 sps:$4 sm:$0xff]  }
 0x750   : > { %8132 = vmatpush1.bf16.msra.mxu1 %v11738_v14  ;;  %8175 = vmatpush1.bf16.msra.mxu0 %v11741_v39  ;;  %v11830_v14 = vld [vmem:[%s15274_s3 + $0x4e4] ss:$16 sps:$4 sm:$0xff]   ;;  %v11833_v39 = vld [vmem:[%s15274_s3 + $0x4ec] ss:$16 sps:$4 sm:$0xff]  }
 0x751   : > { %8133 = vmatprep.subr.bf16.mxu1 %v11746_v21  ;;  %8176 = vmatprep.subr.bf16.mxu0 %v11749_v36  ;;  %v11828_v21 = vld [vmem:[%s15274_s3 + $0x4e0] ss:$16 sps:$4 sm:$0xff]   ;;  %v11831_v36 = vld [vmem:[%s15274_s3 + $0x4e8] ss:$16 sps:$4 sm:$0xff]  }
 0x754   : > { %8134 = vmatpush1.bf16.msra.mxu1 %v11744_v55  ;;  %8177 = vmatpush1.bf16.msra.mxu0 %v11747_v3  ;;  %v11836_v55 = vld [vmem:[%s15274_s3 + $0x504] ss:$16 sps:$4 sm:$0xff]   ;;  %v11839_v3 = vld [vmem:[%s15274_s3 + $0x50c] ss:$16 sps:$4 sm:$0xff]  }
 0x755   : > { %8135 = vmatprep.subr.bf16.mxu1 %v11752_v40  ;;  %8178 = vmatprep.subr.bf16.mxu0 %v11755_v41  ;;  %v11834_v40 = vld [vmem:[%s15274_s3 + $0x500] ss:$16 sps:$4 sm:$0xff]   ;;  %v11837_v41 = vld [vmem:[%s15274_s3 + $0x508] ss:$16 sps:$4 sm:$0xff]  }
 0x758   : > { %8136 = vmatpush1.bf16.msra.mxu1 %v11750_v5  ;;  %8179 = vmatpush1.bf16.msra.mxu0 %v11753_v50  ;;  %v11842_v5 = vld [vmem:[%s15274_s3 + $0x524] ss:$16 sps:$4 sm:$0xff]   ;;  %v11845_v50 = vld [vmem:[%s15274_s3 + $0x52c] ss:$16 sps:$4 sm:$0xff]  }
 0x759   : > { %8137 = vmatprep.subr.bf16.mxu1 %v11758_v51  ;;  %8180 = vmatprep.subr.bf16.mxu0 %v11761_v45  ;;  %v11840_v51 = vld [vmem:[%s15274_s3 + $0x520] ss:$16 sps:$4 sm:$0xff]   ;;  %v11843_v45 = vld [vmem:[%s15274_s3 + $0x528] ss:$16 sps:$4 sm:$0xff]  }
 0x75c   : > { %8138 = vmatpush1.bf16.msra.mxu1 %v11756_v35  ;;  %8181 = vmatpush1.bf16.msra.mxu0 %v11759_v49  ;;  %v11848_v35 = vld [vmem:[%s15274_s3 + $0x544] ss:$16 sps:$4 sm:$0xff]   ;;  %v11851_v49 = vld [vmem:[%s15274_s3 + $0x54c] ss:$16 sps:$4 sm:$0xff]  }
 0x75d   : > { %8139 = vmatprep.subr.bf16.mxu1 %v11764_v46  ;;  %8182 = vmatprep.subr.bf16.mxu0 %v11767_v26  ;;  %v11846_v46 = vld [vmem:[%s15274_s3 + $0x540] ss:$16 sps:$4 sm:$0xff]   ;;  %v11849_v26 = vld [vmem:[%s15274_s3 + $0x548] ss:$16 sps:$4 sm:$0xff]  }
 0x760   : > { %8140 = vmatpush1.bf16.msra.mxu1 %v11762_v6  ;;  %8183 = vmatpush1.bf16.msra.mxu0 %v11765_v23  ;;  %v11854_v6 = vld [vmem:[%s15274_s3 + $0x564] ss:$16 sps:$4 sm:$0xff]   ;;  %v11857_v23 = vld [vmem:[%s15274_s3 + $0x56c] ss:$16 sps:$4 sm:$0xff]  }
 0x761   : > { %8141 = vmatprep.subr.bf16.mxu1 %v11770_v10  ;;  %8184 = vmatprep.subr.bf16.mxu0 %v11773_v44  ;;  %v11852_v10 = vld [vmem:[%s15274_s3 + $0x560] ss:$16 sps:$4 sm:$0xff]   ;;  %v11855_v44 = vld [vmem:[%s15274_s3 + $0x568] ss:$16 sps:$4 sm:$0xff]  }
 0x764   : > { %8142 = vmatpush1.bf16.msra.mxu1 %v11768_v19  ;;  %8185 = vmatpush1.bf16.msra.mxu0 %v11771_v56  ;;  %v11860_v19 = vld [vmem:[%s15274_s3 + $0x584] ss:$16 sps:$4 sm:$0xff]   ;;  %v11863_v56 = vld [vmem:[%s15274_s3 + $0x58c] ss:$16 sps:$4 sm:$0xff]  }
 0x765   : > { %8143 = vmatprep.subr.bf16.mxu1 %v11776_v22  ;;  %8186 = vmatprep.subr.bf16.mxu0 %v11779_v47  ;;  %v11858_v22 = vld [vmem:[%s15274_s3 + $0x580] ss:$16 sps:$4 sm:$0xff]   ;;  %v11861_v47 = vld [vmem:[%s15274_s3 + $0x588] ss:$16 sps:$4 sm:$0xff]  }
 0x768   : > { %8144 = vmatpush1.bf16.msra.mxu1 %v11774_v0  ;;  %8187 = vmatpush1.bf16.msra.mxu0 %v11777_v33  ;;  %v11866_v0 = vld [vmem:[%s15274_s3 + $0x5a4] ss:$16 sps:$4 sm:$0xff]   ;;  %v11869_v33 = vld [vmem:[%s15274_s3 + $0x5ac] ss:$16 sps:$4 sm:$0xff]  }
 0x769   : > { %8145 = vmatprep.subr.bf16.mxu1 %v11782_v59  ;;  %8188 = vmatprep.subr.bf16.mxu0 %v11785_v53  ;;  %v11864_v59 = vld [vmem:[%s15274_s3 + $0x5a0] ss:$16 sps:$4 sm:$0xff]   ;;  %v11867_v53 = vld [vmem:[%s15274_s3 + $0x5a8] ss:$16 sps:$4 sm:$0xff]  }
 0x76c   : > { %8146 = vmatpush1.bf16.msra.mxu1 %v11780_v18  ;;  %8189 = vmatpush1.bf16.msra.mxu0 %v11783_v58  ;;  %v11872_v18 = vld [vmem:[%s15274_s3 + $0x5c4] ss:$16 sps:$4 sm:$0xff]   ;;  %v11875_v58 = vld [vmem:[%s15274_s3 + $0x5cc] ss:$16 sps:$4 sm:$0xff]  }
 0x76d   : > { %8592 = vmatprep.subr.bf16.mxu1 %v11788_v20  ;;  %8635 = vmatprep.subr.bf16.mxu0 %v11791_v17  ;;  %v11870_v20 = vld [vmem:[%s15274_s3 + $0x5c0] ss:$16 sps:$4 sm:$0xff]   ;;  %v11873_v17 = vld [vmem:[%s15274_s3 + $0x5c8] ss:$16 sps:$4 sm:$0xff]  }
 0x76f   : > { %8148 = vmatmul.mubr.bf16.vlgmr.msra.gmra.mrb[176].mxu1 %v14862_v29  ;;  %8191 = vmatmul.mubr.bf16.vlgmr.msra.gmra.mrb[180].mxu0 %v14862_v29 }
 0x770   : > { %8593 = vmatpush1.bf16.msra.mxu1 %v11786_v13  ;;  %8624 = vmatprep.mubr.bf16.mxu1 %v8269_v28  ;;  %v11878_v13 = vld [vmem:[%s15274_s3 + $0x5e4] ss:$16 sps:$4 sm:$0xff]  }
 0x771   : > { %8636 = vmatpush1.bf16.msra.mxu0 %v11789_v42  ;;  %8667 = vmatprep.mubr.bf16.mxu0 %v8269_v28  ;;  %v11881_v42 = vld [vmem:[%s15274_s3 + $0x5ec] ss:$16 sps:$4 sm:$0xff]   ;;  %v11876_v28 = vld [vmem:[%s15274_s3 + $0x5e0] ss:$16 sps:$4 sm:$0xff]  }
 0x772   : > { %8594 = vmatprep.subr.bf16.mxu1 %v11794_v4  ;;  %8637 = vmatprep.subr.bf16.mxu0 %v11797_v1  ;;  %v11879_v4 = vld [vmem:[%s15274_s3 + $0x5e8] ss:$16 sps:$4 sm:$0xff]   ;;  %v8268_v1 = vrot.slane %v14862_v29, 1 }
 0x774   : > { %8595 = vmatpush1.bf16.msra.mxu1 %v11792_v57  ;;  %v8686_v57 = vld [vmem:[%s15277_s6] sm:$0xf] }
 0x775   : > { %8638 = vmatpush1.bf16.msra.mxu0 %v11795_v8  ;;  %8596 = vmatprep.subr.bf16.mxu1 %v11800_v63  ;;  %v8691_v8 = vrot.slane %v8686_v57, %v15316_v32  ;;  %v8699_v63 = vrot.slane %v8686_v57, %v15317_v12 }
 0x776   : > { %8639 = vmatprep.subr.bf16.mxu0 %v11803_v24  ;;  %v8695_v24 = vrot.slane %v8686_v57, %v15318_v31 }
 0x778   : > { %8597 = vmatpush1.bf16.msra.mxu1 %v11798_v52  ;;  %v8703_v52 = vrot.slane %v8686_v57, %v13632_v43 }
 0x779   : > { %8640 = vmatpush1.bf16.msra.mxu0 %v11801_v38  ;;  %8598 = vmatprep.subr.bf16.mxu1 %v11806_v37 }
 0x77a   : > { %8641 = vmatprep.subr.bf16.mxu0 %v11809_v25 }
 0x77c   : > { %8599 = vmatpush1.bf16.msra.mxu1 %v11804_v30 }
 0x77d   : > { %8642 = vmatpush1.bf16.msra.mxu0 %v11807_v61  ;;  %8600 = vmatprep.subr.bf16.mxu1 %v11812_v34 }
 0x77e   : > { %8643 = vmatprep.subr.bf16.mxu0 %v11815_v16 }
 0x780   : > { %8601 = vmatpush1.bf16.msra.mxu1 %v11810_v54 }
 0x781   : > { %8644 = vmatpush1.bf16.msra.mxu0 %v11813_v7  ;;  %8602 = vmatprep.subr.bf16.mxu1 %v11818_v11 }
 0x782   : > { %8645 = vmatprep.subr.bf16.mxu0 %v11821_v62 }
 0x784   : > { %8603 = vmatpush1.bf16.msra.mxu1 %v11816_v2 }
 0x785   : > { %8646 = vmatpush1.bf16.msra.mxu0 %v11819_v60  ;;  %8604 = vmatprep.subr.bf16.mxu1 %v11824_v9 }
 0x786   : > { %8647 = vmatprep.subr.bf16.mxu0 %v11827_v15 }
 0x788   : > { %8605 = vmatpush1.bf16.msra.mxu1 %v11822_v27 }
 0x789   : > { %8648 = vmatpush1.bf16.msra.mxu0 %v11825_v48  ;;  %8606 = vmatprep.subr.bf16.mxu1 %v11830_v14 }
 0x78a   : > { %8649 = vmatprep.subr.bf16.mxu0 %v11833_v39 }
 0x78c   : > { %8607 = vmatpush1.bf16.msra.mxu1 %v11828_v21 }
 0x78d   : > { %8650 = vmatpush1.bf16.msra.mxu0 %v11831_v36  ;;  %8608 = vmatprep.subr.bf16.mxu1 %v11836_v55 }
 0x78e   : > { %8651 = vmatprep.subr.bf16.mxu0 %v11839_v3 }
 0x790   : > { %8609 = vmatpush1.bf16.msra.mxu1 %v11834_v40 }
 0x791   : > { %8652 = vmatpush1.bf16.msra.mxu0 %v11837_v41  ;;  %8610 = vmatprep.subr.bf16.mxu1 %v11842_v5 }
 0x792   : > { %8653 = vmatprep.subr.bf16.mxu0 %v11845_v50 }
 0x794   : > { %8611 = vmatpush1.bf16.msra.mxu1 %v11840_v51 }
 0x795   : > { %8654 = vmatpush1.bf16.msra.mxu0 %v11843_v45  ;;  %8612 = vmatprep.subr.bf16.mxu1 %v11848_v35 }
 0x796   : > { %8655 = vmatprep.subr.bf16.mxu0 %v11851_v49 }
 0x798   : > { %8613 = vmatpush1.bf16.msra.mxu1 %v11846_v46 }
 0x799   : > { %8656 = vmatpush1.bf16.msra.mxu0 %v11849_v26  ;;  %8614 = vmatprep.subr.bf16.mxu1 %v11854_v6 }
 0x79a   : > { %8657 = vmatprep.subr.bf16.mxu0 %v11857_v23 }
 0x79c   : > { %8615 = vmatpush1.bf16.msra.mxu1 %v11852_v10 }
 0x79d   : > { %8658 = vmatpush1.bf16.msra.mxu0 %v11855_v44  ;;  %8616 = vmatprep.subr.bf16.mxu1 %v11860_v19 }
 0x79e   : > { %8659 = vmatprep.subr.bf16.mxu0 %v11863_v56 }
 0x7a0   : > { %8617 = vmatpush1.bf16.msra.mxu1 %v11858_v22 }
 0x7a1   : > { %8660 = vmatpush1.bf16.msra.mxu0 %v11861_v47  ;;  %8618 = vmatprep.subr.bf16.mxu1 %v11866_v0 }
 0x7a2   : > { %8661 = vmatprep.subr.bf16.mxu0 %v11869_v33 }
 0x7a4   : > { %8619 = vmatpush1.bf16.msra.mxu1 %v11864_v59 }
 0x7a5   : > { %8662 = vmatpush1.bf16.msra.mxu0 %v11867_v53  ;;  %8620 = vmatprep.subr.bf16.mxu1 %v11872_v18 }
 0x7a6   : > { %8663 = vmatprep.subr.bf16.mxu0 %v11875_v58 }
 0x7a8   : > { %8621 = vmatpush1.bf16.msra.mxu1 %v11870_v20 }
 0x7a9   : > { %8664 = vmatpush1.bf16.msra.mxu0 %v11873_v17  ;;  %8622 = vmatprep.subr.bf16.mxu1 %v11878_v13 }
 0x7aa   : > { %8665 = vmatprep.subr.bf16.mxu0 %v11881_v42 }
 0x7ac   : > { %8623 = vmatpush1.bf16.msra.mxu1 %v11876_v28 }
 0x7ad   : > { %8666 = vmatpush1.bf16.msra.mxu0 %v11879_v4 }
 0x7af   : > { %8625 = vmatmul.mubr.bf16.vlgmr.msra.gmra.mrb[176].mxu1 %v8268_v1 }
 0x7b0   : > { %8668 = vmatmul.mubr.bf16.vlgmr.msra.gmra.mrb[180].mxu0 %v8268_v1 }
 0x882   : > { %v8626_v38 = vpop.f32.mrb[176].mxu1 }
 0x883   : > { %v8708_v37 = vadd.f32 %v8691_v8, %v8626_v38  ;;  %v8669_v25 = vpop.f32.mrb[180].mxu0  ;;  %v8628_v30 = vpop.f32.mrb[177].mxu1 }
 0x884   : > { %v8710_v61 = vadd.f32 %v8699_v63, %v8669_v25  ;;  %v8709_v29 = vadd.f32 %v8695_v24, %v8628_v30  ;;  %v8671_v34 = vpop.f32.mrb[181].mxu0  ;;  %v8630_v16 = vpop.f32.mrb[178].mxu1 }
 0x885   : > { %v8716_v54 = vmax.f32 %v8708_v37, 0.0  ;;  %v8711_v7 = vadd.f32 %v8703_v52, %v8671_v34  ;;  %v8712_v32 = vadd.f32 %v8691_v8, %v8630_v16  ;;  %v8673_v11 = vpop.f32.mrb[182].mxu0  ;;  %v8632_v12 = vpop.f32.mrb[179].mxu1 }
 0x886   : > { %v8718_v62 = vmax.f32 %v8710_v61, 0.0  ;;  %v8717_v31 = vmax.f32 %v8709_v29, 0.0  ;;  %v8714_v2 = vadd.f32 %v8699_v63, %v8673_v11  ;;  %v8713_v43 = vadd.f32 %v8695_v24, %v8632_v12  ;;  %v8675_v60 = vpop.f32.mrb[183].mxu0 }
 0x887   : > { %v8719_v9 = vmax.f32 %v8711_v7, 0.0  ;;  %v8720_v15 = vmax.f32 %v8712_v32, 0.0  ;;  %v8715_v27 = vadd.f32 %v8703_v52, %v8675_v60 }
 0x888   : > { %v10137_v48 = vpack.c.bf16 %v8717_v31, %v8716_v54  ;;  %v8722_v14 = vmax.f32 %v8714_v2, 0.0  ;;  %v8721_v39 = vmax.f32 %v8713_v43, 0.0 }
 0x889   : > { %v10138_v21 = vpack.c.bf16 %v8719_v9, %v8718_v62  ;;  %v8723_v36 = vmax.f32 %v8715_v27, 0.0 }
 0x88a   : > { %8748 = vst [vmem:[%s278_s20] sm:$0xff] %v10137_v48  ;;  %v10139_v55 = vpack.c.bf16 %v8721_v39, %v8720_v15 }
 0x88b   : > { %8752 = vst.msk [vmem:[%s278_s20 + $0x8] sm:$0xff] %vm8751_vm8, %v10138_v21  ;;  %v10140_v3 = vpack.c.bf16 %v8723_v36, %v8722_v14 }
 0x88c   : > { %8753 = vst [vmem:[%s278_s20 + $0x10] sm:$0x77] %v10139_v55 }
 0x88d   : > { %8756 = vst.msk [vmem:[%s278_s20 + $0x18] sm:$0x77] %vm8755_vm9, %v10140_v3 }
 0x88e PF: > { %s17_s24 = sadd.s32 1, %s11888_s24  }
 0x88f   : > { %p14_p4 = scmp.ge.s32.totalorder %s17_s24, 4  }
 0x891   :  { %16 = sbr.rel (!%p14_p4) target bundleno = 1 (0x1), region = 92 }

</bundles_post_ra>
